<compile_context>
chip_gen: v5e
topology: v5e:2x2
jax: 0.10.0
libtpu: 0.0.40
codegen_flags: <defaults>
</compile_context>

<pallas_src>
import jax
import jax.numpy as jnp
import numpy as np
from jax import lax
from jax.experimental import pallas as pl
from jax.experimental.pallas import tpu as pltpu

# ---- model hyper-parameters (from CNN1D_VNL.__init__) ----
CIN = 4              # input channels
K1 = 30              # depthwise conv kernel size
CMID = 4 * 16        # depthwise out channels (groups=4, 16 per group)
C2 = 32              # pointwise (1x1) conv out channels
POOL_K, POOL_S = 20, 5   # var_pool_func defaults (max, ceil_mode=True)
K3 = 10              # conv2 kernel size
C3 = 64              # conv2 out channels
BIN = 8              # pyramid pooling bin (custom, replaces default [200])
H1 = 250             # Linear1 out features
NEG_SLOPE = 0.01     # nn.LeakyReLU default

KP = 128             # lane-padded im2col feature width (K1*CIN = 120 -> 128)
B_TILE = 8           # samples per grid step (sublane-aligned output block)

assert POOL_K % POOL_S == 0, "block-max pooling trick assumes kernel % stride == 0"


def _round_up(x, m):
    return (x + m - 1) // m * m


def _derive(L):
    L1 = L - K1 + 1                                   # after fused conv1
    L2 = -(-(L1 - POOL_K) // POOL_S) + 1              # max_pool1d, ceil_mode=True
    # PyTorch's ceil_mode rule (last window must start inside the input) is
    # automatically satisfied here: POOL_S*(L2-1) < L1 - (POOL_K - POOL_S).
    L3 = L2 - K3 + 1                                  # after conv2
    st = L3 // BIN                                    # pyramid pool stride
    ks = L3 - (BIN - 1) * st                          # pyramid pool kernel
    NB = L2 + POOL_K // POOL_S - 1                    # 5-row blocks needed
    L1P = _round_up(max(L1, POOL_S * NB), 8)          # padded conv1 length
    L3P = _round_up(L3, 8)                            # padded conv2 length
    L2REQ = max(L2, L3P + K3 - 1)                     # rows needed by conv2 im2col
    return L1, L1P, L2, NB, L2REQ, L3, L3P, st, ks


def _make_kernel(dims):
    L1, L1P, L2, NB, L2REQ, L3, L3P, st, ks = dims

    def kernel(xp_ref, wf_ref, bf_ref, w3f_ref, b3_ref, w1r_ref, b1_ref,
               wl2_ref, bl2_ref, out_ref):
        # --- fused conv1 (depthwise + 1x1) as one im2col matmul, K = 128 ---
        h = jnp.dot(xp_ref[...], wf_ref[...],
                    preferred_element_type=jnp.float32)     # (B_TILE*L1P, C2)
        h = h + bf_ref[...]
        h = jnp.where(h > 0, h, NEG_SLOPE * h)               # LeakyReLU
        h3 = h.reshape(B_TILE, L1P, C2)                      # aligned: L1P % 8 == 0

        # mask padded rows (t >= L1) so they never win a pooling max
        row = lax.broadcasted_iota(jnp.int32, (1, L1P, 1), 1)
        h3 = jnp.where(row < L1, h3, -jnp.inf)

        # --- max_pool1d(kernel=20, stride=5, ceil_mode=True) ---
        # 5-row block maxima; each output row = max of 4 consecutive blocks.
        bm = jnp.concatenate(
            [jnp.max(h3[:, POOL_S * j:POOL_S * (j + 1), :], axis=1, keepdims=True)
             for j in range(NB)], axis=1)                    # (B_TILE, NB, C2)
        h2 = jnp.maximum(jnp.maximum(bm[:, 0:L2], bm[:, 1:L2 + 1]),
                         jnp.maximum(bm[:, 2:L2 + 2], bm[:, 3:L2 + 3]))
        if L2REQ > L2:   # zero-pad so conv2's im2col slices stay in bounds
            h2 = jnp.concatenate(
                [h2, jnp.zeros((B_TILE, L2REQ - L2, C2), jnp.float32)], axis=1)

        # --- conv2 (32 -> 64, kernel 10) as one K = 320 im2col matmul ---
        h2c = jnp.concatenate([h2[:, k:k + L3P, :] for k in range(K3)], axis=-1)
        g = jnp.dot(h2c.reshape(B_TILE * L3P, K3 * C2).astype(jnp.bfloat16),
                    w3f_ref[...], preferred_element_type=jnp.float32)
        g = g + b3_ref[...]
        g = jnp.where(g > 0, g, NEG_SLOPE * g)               # LeakyReLU
        g = g.reshape(B_TILE, L3P, C3)

        # --- pyramid pooling (single bin) + flatten + Linear1: one K=512 dot ---
        # pooled rows are concatenated bin-major along lanes; w1 was re-ordered
        # wrapper-side to match PyTorch's channel-major flatten.
        zin = jnp.concatenate(
            [jnp.max(g[:, i * st:i * st + ks, :], axis=1) for i in range(BIN)],
            axis=-1)                                         # (B_TILE, BIN*C3)
        z = jnp.dot(zin.astype(jnp.bfloat16), w1r_ref[...],
                    preferred_element_type=jnp.float32)
        z = jnp.tanh(z + b1_ref[...])                        # (B_TILE, H1)

        # --- Linear2 + sigmoid ---
        y = jnp.dot(z.astype(jnp.bfloat16), wl2_ref[...],
                    preferred_element_type=jnp.float32) + bl2_ref[...]
        out_ref[...] = 1.0 / (1.0 + jnp.exp(-y))             # (B_TILE, 1)

    return kernel


@jax.jit
def cnn1d_vnl_forward(x_ncl, wf, bf, w3f, b3, w1r, b1, wl2, bl2):
    """x_ncl: (B, CIN, L) float32 (PyTorch NCL). Returns (B, 1) float32."""
    B, _, L = x_ncl.shape
    dims = _derive(L)
    L1, L1P = dims[0], dims[1]
    B_pad = _round_up(B, B_TILE)

    # im2col patches for the fused conv1: feature index = k*CIN + channel,
    # zero-padded to a lane-dense width of 128 and to L1P rows / B_pad samples.
    x_cl = jnp.transpose(x_ncl, (0, 2, 1))                           # (B, L, CIN)
    patches = jnp.concatenate([x_cl[:, k:k + L1, :] for k in range(K1)], axis=-1)
    patches = jnp.pad(patches,
                      ((0, B_pad - B), (0, L1P - L1), (0, KP - K1 * CIN)))
    xp = patches.reshape(B_pad * L1P, KP).astype(jnp.bfloat16)

    kernel = _make_kernel(dims)
    out = pl.pallas_call(
        kernel,
        out_shape=jax.ShapeDtypeStruct((B_pad, 1), jnp.float32),
        grid=(B_pad // B_TILE,),
        in_specs=[
            pl.BlockSpec((B_TILE * L1P, KP), lambda b: (b, 0)),
            pl.BlockSpec((KP, C2), lambda b: (0, 0)),
            pl.BlockSpec((1, C2), lambda b: (0, 0)),
            pl.BlockSpec((K3 * C2, C3), lambda b: (0, 0)),
            pl.BlockSpec((1, C3), lambda b: (0, 0)),
            pl.BlockSpec((BIN * C3, H1), lambda b: (0, 0)),
            pl.BlockSpec((1, H1), lambda b: (0, 0)),
            pl.BlockSpec((H1, 1), lambda b: (0, 0)),
            pl.BlockSpec((1, 1), lambda b: (0, 0)),
        ],
        out_specs=pl.BlockSpec((B_TILE, 1), lambda b: (b, 0)),
        compiler_params=pltpu.CompilerParams(
            dimension_semantics=("parallel",)),
    )(xp, wf, bf, w3f, b3, w1r, b1, wl2, bl2)
    return out[:B]


# ------------------------- parameter construction -------------------------
def init_params(key):
    ks = jax.random.split(key, 10)

    def u(k, shape, fan_in):
        b = 1.0 / np.sqrt(fan_in)
        return jax.random.uniform(k, shape, jnp.float32, -b, b)

    return {
        "wd_pt": u(ks[0], (CMID, 1, K1), 1 * K1),        # Conv1d(4,64,30,groups=4)
        "bd": u(ks[1], (CMID,), 1 * K1),
        "w2_pt": u(ks[2], (C2, CMID, 1), CMID),          # Conv1d(64,32,1)
        "b2": u(ks[3], (C2,), CMID),
        "w3_pt": u(ks[4], (C3, C2, K3), C2 * K3),        # Conv1d(32,64,10)
        "b3": u(ks[5], (C3,), C2 * K3),
        "w1_pt": u(ks[6], (H1, C3 * BIN), C3 * BIN),     # Linear(64*bins, 250)
        "b1": u(ks[7], (H1,), C3 * BIN),
        "wl2_pt": u(ks[8], (1, H1), H1),                 # Linear(250, 1)
        "bl2": u(ks[9], (1,), H1),
    }


def params_to_kernel_layout(p):
    # Fuse depthwise conv (groups=4) with the 1x1 pointwise conv:
    #   Wf[k*CIN+g, c2] = sum_{o in group g} wd[o, k] * w2[c2, o]
    #   bf[c2]          = sum_o w2[c2, o] * bd[o] + b2[c2]
    dw = p["wd_pt"][:, 0, :].astype(jnp.float32)                    # (CMID, K1)
    w2m = p["w2_pt"][:, :, 0].astype(jnp.float32)                   # (C2, CMID)
    grp = jnp.arange(CMID) // (CMID // CIN)
    oh = (jnp.arange(CIN)[:, None] == grp[None, :]).astype(jnp.float32)
    wf3 = jnp.einsum("ok,go,co->kgc", dw, oh, w2m)                  # (K1,CIN,C2)
    wf = wf3.reshape(K1 * CIN, C2)
    wf = jnp.pad(wf, ((0, KP - K1 * CIN), (0, 0))).astype(jnp.bfloat16)
    bf = (w2m @ p["bd"] + p["b2"]).reshape(1, C2).astype(jnp.float32)

    # conv2 im2col weight: row index = k*C2 + c
    w3f = jnp.transpose(p["w3_pt"], (2, 1, 0)).reshape(K3 * C2, C3)
    w3f = w3f.astype(jnp.bfloat16)
    b3 = p["b3"].reshape(1, C3).astype(jnp.float32)

    # Linear1: PyTorch flattens (B, C3, BIN) channel-major (index c*BIN + i);
    # re-order rows to bin-major (index i*C3 + c) to match the kernel's concat.
    w1r = jnp.transpose(p["w1_pt"].T.reshape(C3, BIN, H1), (1, 0, 2))
    w1r = w1r.reshape(BIN * C3, H1).astype(jnp.bfloat16)
    b1 = p["b1"].reshape(1, H1).astype(jnp.float32)

    wl2 = p["wl2_pt"].T.astype(jnp.bfloat16)                        # (H1, 1)
    bl2 = p["bl2"].reshape(1, 1).astype(jnp.float32)
    return wf, bf, w3f, b3, w1r, b1, wl2, bl2


# ------------------- pure-JAX reference (PyTorch semantics, f32) ----------
def reference_forward(x_ncl, p):
    dn = ("NCH", "OIH", "NCH")

    def leaky(v):
        return jnp.where(v > 0, v, NEG_SLOPE * v)

    h = lax.conv_general_dilated(x_ncl, p["wd_pt"], (1,), "VALID",
                                 dimension_numbers=dn, feature_group_count=CIN)
    h = h + p["bd"][None, :, None]
    h = lax.conv_general_dilated(h, p["w2_pt"], (1,), "VALID",
                                 dimension_numbers=dn)
    h = leaky(h + p["b2"][None, :, None])

    L1 = h.shape[2]
    L2 = -(-(L1 - POOL_K) // POOL_S) + 1
    h = jnp.stack([jnp.max(h[:, :, POOL_S * i:min(POOL_S * i + POOL_K, L1)],
                           axis=2) for i in range(L2)], axis=2)

    h = lax.conv_general_dilated(h, p["w3_pt"], (1,), "VALID",
                                 dimension_numbers=dn)
    h = leaky(h + p["b3"][None, :, None])

    L3 = h.shape[2]
    st = L3 // BIN
    ks = L3 - (BIN - 1) * st
    h = jnp.stack([jnp.max(h[:, :, i * st:i * st + ks], axis=2)
                   for i in range(BIN)], axis=2)                    # (B, C3, BIN)

    f = h.reshape(h.shape[0], -1)
    z = jnp.tanh(f @ p["w1_pt"].T + p["b1"])
    y = z @ p["wl2_pt"].T + p["bl2"]
    return jax.nn.sigmoid(y)


if __name__ == "__main__":
    B, L = 12, 160   # L long enough for conv(30) -> pool(20,5,ceil) -> conv(10) -> bins=8
    key = jax.random.PRNGKey(0)
    kx, kp = jax.random.split(key)
    x = jax.random.normal(kx, (B, CIN, L), jnp.float32)   # PyTorch NCL input

    params_pt = init_params(kp)
    kernel_params = params_to_kernel_layout(params_pt)

    y_pallas = jax.block_until_ready(cnn1d_vnl_forward(x, *kernel_params))
    y_ref = jax.block_until_ready(reference_forward(x, params_pt))

    err = float(jnp.max(jnp.abs(y_pallas - y_ref)))
    assert y_pallas.shape == (B, 1), y_pallas.shape
    # bf16 matmul operands with f32 accumulation: typical error ~1e-3 on the
    # (0, 1) sigmoid output; 1e-2 gives a comfortable margin.
    assert err < 1e-2, f"mismatch vs f32 reference: max abs err {err}"
    print("KERNEL_OK")
</pallas_src>

<mosaic_0001>
module attributes {stable_mosaic.version = 11 : i64} {
  func.func @kernel(%arg0: i32, %arg1: memref<1088x128xbf16, #tpu.memory_space<vmem>>, %arg2: memref<128x32xbf16, #tpu.memory_space<vmem>>, %arg3: memref<1x32xf32, #tpu.memory_space<vmem>>, %arg4: memref<320x64xbf16, #tpu.memory_space<vmem>>, %arg5: memref<1x64xf32, #tpu.memory_space<vmem>>, %arg6: memref<512x250xbf16, #tpu.memory_space<vmem>>, %arg7: memref<1x250xf32, #tpu.memory_space<vmem>>, %arg8: memref<250x1xbf16, #tpu.memory_space<vmem>>, %arg9: memref<1x1xf32, #tpu.memory_space<vmem>>, %arg10: memref<8x1xf32, #tpu.memory_space<vmem>>) attributes {dimension_semantics = [#tpu.dimension_semantics<parallel>], iteration_bounds = array<i64: 2>, scalar_prefetch = 0 : i64, scratch_operands = 0 : i64, tpu.core_type = #tpu.core_type<tc>, window_params = [{transform_indices = @transform_0, window_bounds = array<i64: 1088, 128>}, {pipeline_mode = #tpu.pipeline_mode<synchronous>, transform_indices = @transform_1, window_bounds = array<i64: 128, 32>}, {pipeline_mode = #tpu.pipeline_mode<synchronous>, transform_indices = @transform_2, window_bounds = array<i64: 1, 32>}, {pipeline_mode = #tpu.pipeline_mode<synchronous>, transform_indices = @transform_3, window_bounds = array<i64: 320, 64>}, {pipeline_mode = #tpu.pipeline_mode<synchronous>, transform_indices = @transform_4, window_bounds = array<i64: 1, 64>}, {pipeline_mode = #tpu.pipeline_mode<synchronous>, transform_indices = @transform_5, window_bounds = array<i64: 512, 250>}, {pipeline_mode = #tpu.pipeline_mode<synchronous>, transform_indices = @transform_6, window_bounds = array<i64: 1, 250>}, {pipeline_mode = #tpu.pipeline_mode<synchronous>, transform_indices = @transform_7, window_bounds = array<i64: 250, 1>}, {pipeline_mode = #tpu.pipeline_mode<synchronous>, transform_indices = @transform_8, window_bounds = array<i64: 1, 1>}, {transform_indices = @transform_9, window_bounds = array<i64: 8, 1>}]} {
    %c0 = arith.constant 0 : index
    %c0_0 = arith.constant 0 : index
    %0 = vector.load %arg1[%c0, %c0_0] : memref<1088x128xbf16, #tpu.memory_space<vmem>>, vector<1088x128xbf16>
    %c0_1 = arith.constant 0 : index
    %c0_2 = arith.constant 0 : index
    %1 = vector.load %arg2[%c0_1, %c0_2] : memref<128x32xbf16, #tpu.memory_space<vmem>>, vector<128x32xbf16>
    %cst = arith.constant dense<0.000000e+00> : vector<1088x32xf32>
    %2 = tpu.matmul %0, %1, %cst {dimension_numbers = #tpu.dot_dimension_numbers<[1], [0], [0], [1], [0, 0, 1, 1], [], []>} : vector<1088x128xbf16>, vector<128x32xbf16>, vector<1088x32xf32> -> vector<1088x32xf32>
    %c0_3 = arith.constant 0 : index
    %c0_4 = arith.constant 0 : index
    %3 = vector.load %arg3[%c0_3, %c0_4] : memref<1x32xf32, #tpu.memory_space<vmem>>, vector<1x32xf32>
    %4 = vector.broadcast %3 : vector<1x32xf32> to vector<1088x32xf32>
    %5 = arith.addf %2, %4 : vector<1088x32xf32>
    %cst_5 = arith.constant 0.000000e+00 : f32
    %6 = vector.broadcast %cst_5 : f32 to vector<1088x32xf32>
    %7 = arith.cmpf ogt, %5, %6 : vector<1088x32xf32>
    %cst_6 = arith.constant 0.00999999977 : f32
    %8 = vector.broadcast %cst_6 : f32 to vector<1088x32xf32>
    %9 = arith.mulf %8, %5 : vector<1088x32xf32>
    %10 = arith.select %7, %5, %9 : vector<1088x32xi1>, vector<1088x32xf32>
    %11 = vector.shape_cast %10 : vector<1088x32xf32> to vector<8x136x32xf32>
    %12 = tpu.iota {dimensions = array<i32: 1>} : vector<1x136x1xi32>
    %c131_i32 = arith.constant 131 : i32
    %13 = vector.broadcast %c131_i32 : i32 to vector<1x136x1xi32>
    %14 = arith.cmpi slt, %12, %13 : vector<1x136x1xi32>
    %cst_7 = arith.constant 0xFF800000 : f32
    %15 = vector.shape_cast %14 : vector<1x136x1xi1> to vector<1x136x1xi1>
    %16 = vector.broadcast %15 : vector<1x136x1xi1> to vector<8x136x32xi1>
    %17 = vector.broadcast %cst_7 : f32 to vector<8x136x32xf32>
    %18 = arith.select %16, %11, %17 : vector<8x136x32xi1>, vector<8x136x32xf32>
    %19 = vector.extract_strided_slice %18 {offsets = [0, 0, 0], sizes = [8, 5, 32], strides = [1, 1, 1]} : vector<8x136x32xf32> to vector<8x5x32xf32>
    %cst_8 = arith.constant dense<0xFF800000> : vector<8x32xf32>
    %20 = vector.multi_reduction <maximumf>, %19, %cst_8 [1] : vector<8x5x32xf32> to vector<8x32xf32>
    %21 = vector.shape_cast %20 : vector<8x32xf32> to vector<8x1x32xf32>
    %22 = vector.extract_strided_slice %18 {offsets = [0, 5, 0], sizes = [8, 5, 32], strides = [1, 1, 1]} : vector<8x136x32xf32> to vector<8x5x32xf32>
    %cst_9 = arith.constant dense<0xFF800000> : vector<8x32xf32>
    %23 = vector.multi_reduction <maximumf>, %22, %cst_9 [1] : vector<8x5x32xf32> to vector<8x32xf32>
    %24 = vector.shape_cast %23 : vector<8x32xf32> to vector<8x1x32xf32>
    %25 = vector.extract_strided_slice %18 {offsets = [0, 10, 0], sizes = [8, 5, 32], strides = [1, 1, 1]} : vector<8x136x32xf32> to vector<8x5x32xf32>
    %cst_10 = arith.constant dense<0xFF800000> : vector<8x32xf32>
    %26 = vector.multi_reduction <maximumf>, %25, %cst_10 [1] : vector<8x5x32xf32> to vector<8x32xf32>
    %27 = vector.shape_cast %26 : vector<8x32xf32> to vector<8x1x32xf32>
    %28 = vector.extract_strided_slice %18 {offsets = [0, 15, 0], sizes = [8, 5, 32], strides = [1, 1, 1]} : vector<8x136x32xf32> to vector<8x5x32xf32>
    %cst_11 = arith.constant dense<0xFF800000> : vector<8x32xf32>
    %29 = vector.multi_reduction <maximumf>, %28, %cst_11 [1] : vector<8x5x32xf32> to vector<8x32xf32>
    %30 = vector.shape_cast %29 : vector<8x32xf32> to vector<8x1x32xf32>
    %31 = vector.extract_strided_slice %18 {offsets = [0, 20, 0], sizes = [8, 5, 32], strides = [1, 1, 1]} : vector<8x136x32xf32> to vector<8x5x32xf32>
    %cst_12 = arith.constant dense<0xFF800000> : vector<8x32xf32>
    %32 = vector.multi_reduction <maximumf>, %31, %cst_12 [1] : vector<8x5x32xf32> to vector<8x32xf32>
    %33 = vector.shape_cast %32 : vector<8x32xf32> to vector<8x1x32xf32>
    %34 = vector.extract_strided_slice %18 {offsets = [0, 25, 0], sizes = [8, 5, 32], strides = [1, 1, 1]} : vector<8x136x32xf32> to vector<8x5x32xf32>
    %cst_13 = arith.constant dense<0xFF800000> : vector<8x32xf32>
    %35 = vector.multi_reduction <maximumf>, %34, %cst_13 [1] : vector<8x5x32xf32> to vector<8x32xf32>
    %36 = vector.shape_cast %35 : vector<8x32xf32> to vector<8x1x32xf32>
    %37 = vector.extract_strided_slice %18 {offsets = [0, 30, 0], sizes = [8, 5, 32], strides = [1, 1, 1]} : vector<8x136x32xf32> to vector<8x5x32xf32>
    %cst_14 = arith.constant dense<0xFF800000> : vector<8x32xf32>
    %38 = vector.multi_reduction <maximumf>, %37, %cst_14 [1] : vector<8x5x32xf32> to vector<8x32xf32>
    %39 = vector.shape_cast %38 : vector<8x32xf32> to vector<8x1x32xf32>
    %40 = vector.extract_strided_slice %18 {offsets = [0, 35, 0], sizes = [8, 5, 32], strides = [1, 1, 1]} : vector<8x136x32xf32> to vector<8x5x32xf32>
    %cst_15 = arith.constant dense<0xFF800000> : vector<8x32xf32>
    %41 = vector.multi_reduction <maximumf>, %40, %cst_15 [1] : vector<8x5x32xf32> to vector<8x32xf32>
    %42 = vector.shape_cast %41 : vector<8x32xf32> to vector<8x1x32xf32>
    %43 = vector.extract_strided_slice %18 {offsets = [0, 40, 0], sizes = [8, 5, 32], strides = [1, 1, 1]} : vector<8x136x32xf32> to vector<8x5x32xf32>
    %cst_16 = arith.constant dense<0xFF800000> : vector<8x32xf32>
    %44 = vector.multi_reduction <maximumf>, %43, %cst_16 [1] : vector<8x5x32xf32> to vector<8x32xf32>
    %45 = vector.shape_cast %44 : vector<8x32xf32> to vector<8x1x32xf32>
    %46 = vector.extract_strided_slice %18 {offsets = [0, 45, 0], sizes = [8, 5, 32], strides = [1, 1, 1]} : vector<8x136x32xf32> to vector<8x5x32xf32>
    %cst_17 = arith.constant dense<0xFF800000> : vector<8x32xf32>
    %47 = vector.multi_reduction <maximumf>, %46, %cst_17 [1] : vector<8x5x32xf32> to vector<8x32xf32>
    %48 = vector.shape_cast %47 : vector<8x32xf32> to vector<8x1x32xf32>
    %49 = vector.extract_strided_slice %18 {offsets = [0, 50, 0], sizes = [8, 5, 32], strides = [1, 1, 1]} : vector<8x136x32xf32> to vector<8x5x32xf32>
    %cst_18 = arith.constant dense<0xFF800000> : vector<8x32xf32>
    %50 = vector.multi_reduction <maximumf>, %49, %cst_18 [1] : vector<8x5x32xf32> to vector<8x32xf32>
    %51 = vector.shape_cast %50 : vector<8x32xf32> to vector<8x1x32xf32>
    %52 = vector.extract_strided_slice %18 {offsets = [0, 55, 0], sizes = [8, 5, 32], strides = [1, 1, 1]} : vector<8x136x32xf32> to vector<8x5x32xf32>
    %cst_19 = arith.constant dense<0xFF800000> : vector<8x32xf32>
    %53 = vector.multi_reduction <maximumf>, %52, %cst_19 [1] : vector<8x5x32xf32> to vector<8x32xf32>
    %54 = vector.shape_cast %53 : vector<8x32xf32> to vector<8x1x32xf32>
    %55 = vector.extract_strided_slice %18 {offsets = [0, 60, 0], sizes = [8, 5, 32], strides = [1, 1, 1]} : vector<8x136x32xf32> to vector<8x5x32xf32>
    %cst_20 = arith.constant dense<0xFF800000> : vector<8x32xf32>
    %56 = vector.multi_reduction <maximumf>, %55, %cst_20 [1] : vector<8x5x32xf32> to vector<8x32xf32>
    %57 = vector.shape_cast %56 : vector<8x32xf32> to vector<8x1x32xf32>
    %58 = vector.extract_strided_slice %18 {offsets = [0, 65, 0], sizes = [8, 5, 32], strides = [1, 1, 1]} : vector<8x136x32xf32> to vector<8x5x32xf32>
    %cst_21 = arith.constant dense<0xFF800000> : vector<8x32xf32>
    %59 = vector.multi_reduction <maximumf>, %58, %cst_21 [1] : vector<8x5x32xf32> to vector<8x32xf32>
    %60 = vector.shape_cast %59 : vector<8x32xf32> to vector<8x1x32xf32>
    %61 = vector.extract_strided_slice %18 {offsets = [0, 70, 0], sizes = [8, 5, 32], strides = [1, 1, 1]} : vector<8x136x32xf32> to vector<8x5x32xf32>
    %cst_22 = arith.constant dense<0xFF800000> : vector<8x32xf32>
    %62 = vector.multi_reduction <maximumf>, %61, %cst_22 [1] : vector<8x5x32xf32> to vector<8x32xf32>
    %63 = vector.shape_cast %62 : vector<8x32xf32> to vector<8x1x32xf32>
    %64 = vector.extract_strided_slice %18 {offsets = [0, 75, 0], sizes = [8, 5, 32], strides = [1, 1, 1]} : vector<8x136x32xf32> to vector<8x5x32xf32>
    %cst_23 = arith.constant dense<0xFF800000> : vector<8x32xf32>
    %65 = vector.multi_reduction <maximumf>, %64, %cst_23 [1] : vector<8x5x32xf32> to vector<8x32xf32>
    %66 = vector.shape_cast %65 : vector<8x32xf32> to vector<8x1x32xf32>
    %67 = vector.extract_strided_slice %18 {offsets = [0, 80, 0], sizes = [8, 5, 32], strides = [1, 1, 1]} : vector<8x136x32xf32> to vector<8x5x32xf32>
    %cst_24 = arith.constant dense<0xFF800000> : vector<8x32xf32>
    %68 = vector.multi_reduction <maximumf>, %67, %cst_24 [1] : vector<8x5x32xf32> to vector<8x32xf32>
    %69 = vector.shape_cast %68 : vector<8x32xf32> to vector<8x1x32xf32>
    %70 = vector.extract_strided_slice %18 {offsets = [0, 85, 0], sizes = [8, 5, 32], strides = [1, 1, 1]} : vector<8x136x32xf32> to vector<8x5x32xf32>
    %cst_25 = arith.constant dense<0xFF800000> : vector<8x32xf32>
    %71 = vector.multi_reduction <maximumf>, %70, %cst_25 [1] : vector<8x5x32xf32> to vector<8x32xf32>
    %72 = vector.shape_cast %71 : vector<8x32xf32> to vector<8x1x32xf32>
    %73 = vector.extract_strided_slice %18 {offsets = [0, 90, 0], sizes = [8, 5, 32], strides = [1, 1, 1]} : vector<8x136x32xf32> to vector<8x5x32xf32>
    %cst_26 = arith.constant dense<0xFF800000> : vector<8x32xf32>
    %74 = vector.multi_reduction <maximumf>, %73, %cst_26 [1] : vector<8x5x32xf32> to vector<8x32xf32>
    %75 = vector.shape_cast %74 : vector<8x32xf32> to vector<8x1x32xf32>
    %76 = vector.extract_strided_slice %18 {offsets = [0, 95, 0], sizes = [8, 5, 32], strides = [1, 1, 1]} : vector<8x136x32xf32> to vector<8x5x32xf32>
    %cst_27 = arith.constant dense<0xFF800000> : vector<8x32xf32>
    %77 = vector.multi_reduction <maximumf>, %76, %cst_27 [1] : vector<8x5x32xf32> to vector<8x32xf32>
    %78 = vector.shape_cast %77 : vector<8x32xf32> to vector<8x1x32xf32>
    %79 = vector.extract_strided_slice %18 {offsets = [0, 100, 0], sizes = [8, 5, 32], strides = [1, 1, 1]} : vector<8x136x32xf32> to vector<8x5x32xf32>
    %cst_28 = arith.constant dense<0xFF800000> : vector<8x32xf32>
    %80 = vector.multi_reduction <maximumf>, %79, %cst_28 [1] : vector<8x5x32xf32> to vector<8x32xf32>
    %81 = vector.shape_cast %80 : vector<8x32xf32> to vector<8x1x32xf32>
    %82 = vector.extract_strided_slice %18 {offsets = [0, 105, 0], sizes = [8, 5, 32], strides = [1, 1, 1]} : vector<8x136x32xf32> to vector<8x5x32xf32>
    %cst_29 = arith.constant dense<0xFF800000> : vector<8x32xf32>
    %83 = vector.multi_reduction <maximumf>, %82, %cst_29 [1] : vector<8x5x32xf32> to vector<8x32xf32>
    %84 = vector.shape_cast %83 : vector<8x32xf32> to vector<8x1x32xf32>
    %85 = vector.extract_strided_slice %18 {offsets = [0, 110, 0], sizes = [8, 5, 32], strides = [1, 1, 1]} : vector<8x136x32xf32> to vector<8x5x32xf32>
    %cst_30 = arith.constant dense<0xFF800000> : vector<8x32xf32>
    %86 = vector.multi_reduction <maximumf>, %85, %cst_30 [1] : vector<8x5x32xf32> to vector<8x32xf32>
    %87 = vector.shape_cast %86 : vector<8x32xf32> to vector<8x1x32xf32>
    %88 = vector.extract_strided_slice %18 {offsets = [0, 115, 0], sizes = [8, 5, 32], strides = [1, 1, 1]} : vector<8x136x32xf32> to vector<8x5x32xf32>
    %cst_31 = arith.constant dense<0xFF800000> : vector<8x32xf32>
    %89 = vector.multi_reduction <maximumf>, %88, %cst_31 [1] : vector<8x5x32xf32> to vector<8x32xf32>
    %90 = vector.shape_cast %89 : vector<8x32xf32> to vector<8x1x32xf32>
    %91 = vector.extract_strided_slice %18 {offsets = [0, 120, 0], sizes = [8, 5, 32], strides = [1, 1, 1]} : vector<8x136x32xf32> to vector<8x5x32xf32>
    %cst_32 = arith.constant dense<0xFF800000> : vector<8x32xf32>
    %92 = vector.multi_reduction <maximumf>, %91, %cst_32 [1] : vector<8x5x32xf32> to vector<8x32xf32>
    %93 = vector.shape_cast %92 : vector<8x32xf32> to vector<8x1x32xf32>
    %94 = vector.extract_strided_slice %18 {offsets = [0, 125, 0], sizes = [8, 5, 32], strides = [1, 1, 1]} : vector<8x136x32xf32> to vector<8x5x32xf32>
    %cst_33 = arith.constant dense<0xFF800000> : vector<8x32xf32>
    %95 = vector.multi_reduction <maximumf>, %94, %cst_33 [1] : vector<8x5x32xf32> to vector<8x32xf32>
    %96 = vector.shape_cast %95 : vector<8x32xf32> to vector<8x1x32xf32>
    %97 = vector.extract_strided_slice %18 {offsets = [0, 130, 0], sizes = [8, 5, 32], strides = [1, 1, 1]} : vector<8x136x32xf32> to vector<8x5x32xf32>
    %cst_34 = arith.constant dense<0xFF800000> : vector<8x32xf32>
    %98 = vector.multi_reduction <maximumf>, %97, %cst_34 [1] : vector<8x5x32xf32> to vector<8x32xf32>
    %99 = vector.shape_cast %98 : vector<8x32xf32> to vector<8x1x32xf32>
    %100 = tpu.concatenate %21, %24, %27, %30, %33, %36, %39, %42, %45, %48, %51, %54, %57, %60, %63, %66 in 1 : vector<8x1x32xf32>, vector<8x1x32xf32>, vector<8x1x32xf32>, vector<8x1x32xf32>, vector<8x1x32xf32>, vector<8x1x32xf32>, vector<8x1x32xf32>, vector<8x1x32xf32>, vector<8x1x32xf32>, vector<8x1x32xf32>, vector<8x1x32xf32>, vector<8x1x32xf32>, vector<8x1x32xf32>, vector<8x1x32xf32>, vector<8x1x32xf32>, vector<8x1x32xf32> -> vector<8x16x32xf32>
    %101 = tpu.concatenate %69, %72, %75, %78, %81, %84, %87, %90, %93, %96, %99 in 1 : vector<8x1x32xf32>, vector<8x1x32xf32>, vector<8x1x32xf32>, vector<8x1x32xf32>, vector<8x1x32xf32>, vector<8x1x32xf32>, vector<8x1x32xf32>, vector<8x1x32xf32>, vector<8x1x32xf32>, vector<8x1x32xf32>, vector<8x1x32xf32> -> vector<8x11x32xf32>
    %102 = tpu.concatenate %100, %101 in 1 : vector<8x16x32xf32>, vector<8x11x32xf32> -> vector<8x27x32xf32>
    %103 = vector.extract_strided_slice %102 {offsets = [0, 0, 0], sizes = [8, 24, 32], strides = [1, 1, 1]} : vector<8x27x32xf32> to vector<8x24x32xf32>
    %104 = vector.extract_strided_slice %102 {offsets = [0, 1, 0], sizes = [8, 24, 32], strides = [1, 1, 1]} : vector<8x27x32xf32> to vector<8x24x32xf32>
    %105 = arith.maximumf %103, %104 : vector<8x24x32xf32>
    %106 = vector.extract_strided_slice %102 {offsets = [0, 2, 0], sizes = [8, 24, 32], strides = [1, 1, 1]} : vector<8x27x32xf32> to vector<8x24x32xf32>
    %107 = vector.extract_strided_slice %102 {offsets = [0, 3, 0], sizes = [8, 24, 32], strides = [1, 1, 1]} : vector<8x27x32xf32> to vector<8x24x32xf32>
    %108 = arith.maximumf %106, %107 : vector<8x24x32xf32>
    %109 = arith.maximumf %105, %108 : vector<8x24x32xf32>
    %cst_35 = arith.constant 0.000000e+00 : f32
    %110 = vector.broadcast %cst_35 : f32 to vector<8x1x32xf32>
    %111 = tpu.concatenate %109, %110 in 1 : vector<8x24x32xf32>, vector<8x1x32xf32> -> vector<8x25x32xf32>
    %112 = vector.extract_strided_slice %111 {offsets = [0, 0, 0], sizes = [8, 16, 32], strides = [1, 1, 1]} : vector<8x25x32xf32> to vector<8x16x32xf32>
    %113 = vector.extract_strided_slice %111 {offsets = [0, 1, 0], sizes = [8, 16, 32], strides = [1, 1, 1]} : vector<8x25x32xf32> to vector<8x16x32xf32>
    %114 = vector.extract_strided_slice %111 {offsets = [0, 2, 0], sizes = [8, 16, 32], strides = [1, 1, 1]} : vector<8x25x32xf32> to vector<8x16x32xf32>
    %115 = vector.extract_strided_slice %111 {offsets = [0, 3, 0], sizes = [8, 16, 32], strides = [1, 1, 1]} : vector<8x25x32xf32> to vector<8x16x32xf32>
    %116 = vector.extract_strided_slice %111 {offsets = [0, 4, 0], sizes = [8, 16, 32], strides = [1, 1, 1]} : vector<8x25x32xf32> to vector<8x16x32xf32>
    %117 = vector.extract_strided_slice %111 {offsets = [0, 5, 0], sizes = [8, 16, 32], strides = [1, 1, 1]} : vector<8x25x32xf32> to vector<8x16x32xf32>
    %118 = vector.extract_strided_slice %111 {offsets = [0, 6, 0], sizes = [8, 16, 32], strides = [1, 1, 1]} : vector<8x25x32xf32> to vector<8x16x32xf32>
    %119 = vector.extract_strided_slice %111 {offsets = [0, 7, 0], sizes = [8, 16, 32], strides = [1, 1, 1]} : vector<8x25x32xf32> to vector<8x16x32xf32>
    %120 = vector.extract_strided_slice %111 {offsets = [0, 8, 0], sizes = [8, 16, 32], strides = [1, 1, 1]} : vector<8x25x32xf32> to vector<8x16x32xf32>
    %121 = vector.extract_strided_slice %111 {offsets = [0, 9, 0], sizes = [8, 16, 32], strides = [1, 1, 1]} : vector<8x25x32xf32> to vector<8x16x32xf32>
    %122 = tpu.concatenate %112, %113, %114, %115, %116, %117, %118, %119, %120, %121 in 2 : vector<8x16x32xf32>, vector<8x16x32xf32>, vector<8x16x32xf32>, vector<8x16x32xf32>, vector<8x16x32xf32>, vector<8x16x32xf32>, vector<8x16x32xf32>, vector<8x16x32xf32>, vector<8x16x32xf32>, vector<8x16x32xf32> -> vector<8x16x320xf32>
    %123 = vector.shape_cast %122 : vector<8x16x320xf32> to vector<128x320xf32>
    %124 = arith.truncf %123 : vector<128x320xf32> to vector<128x320xbf16>
    %c0_36 = arith.constant 0 : index
    %c0_37 = arith.constant 0 : index
    %125 = vector.load %arg4[%c0_36, %c0_37] : memref<320x64xbf16, #tpu.memory_space<vmem>>, vector<320x64xbf16>
    %cst_38 = arith.constant dense<0.000000e+00> : vector<128x64xf32>
    %126 = tpu.matmul %124, %125, %cst_38 {dimension_numbers = #tpu.dot_dimension_numbers<[1], [0], [0], [1], [0, 0, 1, 1], [], []>} : vector<128x320xbf16>, vector<320x64xbf16>, vector<128x64xf32> -> vector<128x64xf32>
    %c0_39 = arith.constant 0 : index
    %c0_40 = arith.constant 0 : index
    %127 = vector.load %arg5[%c0_39, %c0_40] : memref<1x64xf32, #tpu.memory_space<vmem>>, vector<1x64xf32>
    %128 = vector.broadcast %127 : vector<1x64xf32> to vector<128x64xf32>
    %129 = arith.addf %126, %128 : vector<128x64xf32>
    %cst_41 = arith.constant 0.000000e+00 : f32
    %130 = vector.broadcast %cst_41 : f32 to vector<128x64xf32>
    %131 = arith.cmpf ogt, %129, %130 : vector<128x64xf32>
    %cst_42 = arith.constant 0.00999999977 : f32
    %132 = vector.broadcast %cst_42 : f32 to vector<128x64xf32>
    %133 = arith.mulf %132, %129 : vector<128x64xf32>
    %134 = arith.select %131, %129, %133 : vector<128x64xi1>, vector<128x64xf32>
    %135 = vector.shape_cast %134 : vector<128x64xf32> to vector<8x16x64xf32>
    %136 = vector.extract_strided_slice %135 {offsets = [0, 0, 0], sizes = [8, 8, 64], strides = [1, 1, 1]} : vector<8x16x64xf32> to vector<8x8x64xf32>
    %cst_43 = arith.constant dense<0xFF800000> : vector<8x64xf32>
    %137 = vector.multi_reduction <maximumf>, %136, %cst_43 [1] : vector<8x8x64xf32> to vector<8x64xf32>
    %138 = vector.extract_strided_slice %135 {offsets = [0, 1, 0], sizes = [8, 8, 64], strides = [1, 1, 1]} : vector<8x16x64xf32> to vector<8x8x64xf32>
    %cst_44 = arith.constant dense<0xFF800000> : vector<8x64xf32>
    %139 = vector.multi_reduction <maximumf>, %138, %cst_44 [1] : vector<8x8x64xf32> to vector<8x64xf32>
    %140 = vector.extract_strided_slice %135 {offsets = [0, 2, 0], sizes = [8, 8, 64], strides = [1, 1, 1]} : vector<8x16x64xf32> to vector<8x8x64xf32>
    %cst_45 = arith.constant dense<0xFF800000> : vector<8x64xf32>
    %141 = vector.multi_reduction <maximumf>, %140, %cst_45 [1] : vector<8x8x64xf32> to vector<8x64xf32>
    %142 = vector.extract_strided_slice %135 {offsets = [0, 3, 0], sizes = [8, 8, 64], strides = [1, 1, 1]} : vector<8x16x64xf32> to vector<8x8x64xf32>
    %cst_46 = arith.constant dense<0xFF800000> : vector<8x64xf32>
    %143 = vector.multi_reduction <maximumf>, %142, %cst_46 [1] : vector<8x8x64xf32> to vector<8x64xf32>
    %144 = vector.extract_strided_slice %135 {offsets = [0, 4, 0], sizes = [8, 8, 64], strides = [1, 1, 1]} : vector<8x16x64xf32> to vector<8x8x64xf32>
    %cst_47 = arith.constant dense<0xFF800000> : vector<8x64xf32>
    %145 = vector.multi_reduction <maximumf>, %144, %cst_47 [1] : vector<8x8x64xf32> to vector<8x64xf32>
    %146 = vector.extract_strided_slice %135 {offsets = [0, 5, 0], sizes = [8, 8, 64], strides = [1, 1, 1]} : vector<8x16x64xf32> to vector<8x8x64xf32>
    %cst_48 = arith.constant dense<0xFF800000> : vector<8x64xf32>
    %147 = vector.multi_reduction <maximumf>, %146, %cst_48 [1] : vector<8x8x64xf32> to vector<8x64xf32>
    %148 = vector.extract_strided_slice %135 {offsets = [0, 6, 0], sizes = [8, 8, 64], strides = [1, 1, 1]} : vector<8x16x64xf32> to vector<8x8x64xf32>
    %cst_49 = arith.constant dense<0xFF800000> : vector<8x64xf32>
    %149 = vector.multi_reduction <maximumf>, %148, %cst_49 [1] : vector<8x8x64xf32> to vector<8x64xf32>
    %150 = vector.extract_strided_slice %135 {offsets = [0, 7, 0], sizes = [8, 8, 64], strides = [1, 1, 1]} : vector<8x16x64xf32> to vector<8x8x64xf32>
    %cst_50 = arith.constant dense<0xFF800000> : vector<8x64xf32>
    %151 = vector.multi_reduction <maximumf>, %150, %cst_50 [1] : vector<8x8x64xf32> to vector<8x64xf32>
    %152 = tpu.concatenate %137, %139, %141, %143, %145, %147, %149, %151 in 1 : vector<8x64xf32>, vector<8x64xf32>, vector<8x64xf32>, vector<8x64xf32>, vector<8x64xf32>, vector<8x64xf32>, vector<8x64xf32>, vector<8x64xf32> -> vector<8x512xf32>
    %153 = arith.truncf %152 : vector<8x512xf32> to vector<8x512xbf16>
    %c0_51 = arith.constant 0 : index
    %c0_52 = arith.constant 0 : index
    %154 = vector.load %arg6[%c0_51, %c0_52] : memref<512x250xbf16, #tpu.memory_space<vmem>>, vector<512x250xbf16>
    %cst_53 = arith.constant dense<0.000000e+00> : vector<8x250xf32>
    %155 = tpu.matmul %153, %154, %cst_53 {dimension_numbers = #tpu.dot_dimension_numbers<[1], [0], [0], [1], [0, 0, 1, 1], [], []>} : vector<8x512xbf16>, vector<512x250xbf16>, vector<8x250xf32> -> vector<8x250xf32>
    %c0_54 = arith.constant 0 : index
    %c0_55 = arith.constant 0 : index
    %156 = vector.load %arg7[%c0_54, %c0_55] : memref<1x250xf32, #tpu.memory_space<vmem>>, vector<1x250xf32>
    %157 = vector.broadcast %156 : vector<1x250xf32> to vector<8x250xf32>
    %158 = arith.addf %155, %157 : vector<8x250xf32>
    %159 = math.tanh %158 : vector<8x250xf32>
    %160 = arith.truncf %159 : vector<8x250xf32> to vector<8x250xbf16>
    %c0_56 = arith.constant 0 : index
    %c0_57 = arith.constant 0 : index
    %161 = vector.load %arg8[%c0_56, %c0_57] : memref<250x1xbf16, #tpu.memory_space<vmem>>, vector<250x1xbf16>
    %cst_58 = arith.constant dense<0.000000e+00> : vector<8x1xf32>
    %162 = tpu.matmul %160, %161, %cst_58 {dimension_numbers = #tpu.dot_dimension_numbers<[1], [0], [0], [1], [0, 0, 1, 1], [], []>} : vector<8x250xbf16>, vector<250x1xbf16>, vector<8x1xf32> -> vector<8x1xf32>
    %c0_59 = arith.constant 0 : index
    %c0_60 = arith.constant 0 : index
    %163 = vector.load %arg9[%c0_59, %c0_60] : memref<1x1xf32, #tpu.memory_space<vmem>>, vector<1x1xf32>
    %164 = vector.broadcast %163 : vector<1x1xf32> to vector<8x1xf32>
    %165 = arith.addf %162, %164 : vector<8x1xf32>
    %cst_61 = arith.constant 0.000000e+00 : f32
    %166 = vector.broadcast %cst_61 : f32 to vector<8x1xf32>
    %167 = arith.subf %166, %165 : vector<8x1xf32>
    %168 = math.exp %167 : vector<8x1xf32>
    %cst_62 = arith.constant 1.000000e+00 : f32
    %169 = vector.broadcast %cst_62 : f32 to vector<8x1xf32>
    %170 = arith.addf %169, %168 : vector<8x1xf32>
    %cst_63 = arith.constant 1.000000e+00 : f32
    %171 = vector.broadcast %cst_63 : f32 to vector<8x1xf32>
    %172 = arith.divf %171, %170 : vector<8x1xf32>
    %c0_64 = arith.constant 0 : index
    %c0_65 = arith.constant 0 : index
    %173 = vector.load %arg10[%c0_64, %c0_65] : memref<8x1xf32, #tpu.memory_space<vmem>>, vector<8x1xf32>
    tpu.vector_store %arg10[%c0_64, %c0_65], %172 {strides = array<i32>} : memref<8x1xf32, #tpu.memory_space<vmem>>, vector<8x1xf32>,
    return
  }
  func.func @transform_0(%arg0: i32) -> (i32, i32) {
    %c0_i32 = arith.constant 0 : i32
    %c0_i32_0 = arith.constant 0 : i32
    return %arg0, %c0_i32 : i32, i32
  }
  func.func @transform_1(%arg0: i32) -> (i32, i32) {
    %c0_i32 = arith.constant 0 : i32
    %c0_i32_0 = arith.constant 0 : i32
    %c0_i32_1 = arith.constant 0 : i32
    return %c0_i32, %c0_i32_0 : i32, i32
  }
  func.func @transform_2(%arg0: i32) -> (i32, i32) {
    %c0_i32 = arith.constant 0 : i32
    %c0_i32_0 = arith.constant 0 : i32
    %c0_i32_1 = arith.constant 0 : i32
    return %c0_i32, %c0_i32_0 : i32, i32
  }
  func.func @transform_3(%arg0: i32) -> (i32, i32) {
    %c0_i32 = arith.constant 0 : i32
    %c0_i32_0 = arith.constant 0 : i32
    %c0_i32_1 = arith.constant 0 : i32
    return %c0_i32, %c0_i32_0 : i32, i32
  }
  func.func @transform_4(%arg0: i32) -> (i32, i32) {
    %c0_i32 = arith.constant 0 : i32
    %c0_i32_0 = arith.constant 0 : i32
    %c0_i32_1 = arith.constant 0 : i32
    return %c0_i32, %c0_i32_0 : i32, i32
  }
  func.func @transform_5(%arg0: i32) -> (i32, i32) {
    %c0_i32 = arith.constant 0 : i32
    %c0_i32_0 = arith.constant 0 : i32
    %c0_i32_1 = arith.constant 0 : i32
    return %c0_i32, %c0_i32_0 : i32, i32
  }
  func.func @transform_6(%arg0: i32) -> (i32, i32) {
    %c0_i32 = arith.constant 0 : i32
    %c0_i32_0 = arith.constant 0 : i32
    %c0_i32_1 = arith.constant 0 : i32
    return %c0_i32, %c0_i32_0 : i32, i32
  }
  func.func @transform_7(%arg0: i32) -> (i32, i32) {
    %c0_i32 = arith.constant 0 : i32
    %c0_i32_0 = arith.constant 0 : i32
    %c0_i32_1 = arith.constant 0 : i32
    return %c0_i32, %c0_i32_0 : i32, i32
  }
  func.func @transform_8(%arg0: i32) -> (i32, i32) {
    %c0_i32 = arith.constant 0 : i32
    %c0_i32_0 = arith.constant 0 : i32
    %c0_i32_1 = arith.constant 0 : i32
    return %c0_i32, %c0_i32_0 : i32, i32
  }
  func.func @transform_9(%arg0: i32) -> (i32, i32) {
    %c0_i32 = arith.constant 0 : i32
    %c0_i32_0 = arith.constant 0 : i32
    return %arg0, %c0_i32 : i32, i32
  }
}

</mosaic_0001>

<bundles_post_ra>
// kernel: cnn1d_vnl_forward.1
= control target key start
LH: loop header
LB: loop body
LE: loop exit
PB: predicated region body
PF: predicated region fallthrough
CT: control target
= control target key end

     0   :  { %s8019_s11 = smov 0   ;;  %s11299_s0 = inlined_call_operand.vmem [shape: bf16[2176,128], index: 0, kind: input, shape index: {}]   ;;  %s11300_s1 = inlined_call_operand.vmem [shape: bf16[128,32], index: 1, kind: input, shape index: {}]   ;;  %s11301_s2 = inlined_call_operand.vmem [shape: f32[1,32], index: 2, kind: input, shape index: {}]   ;;  %s11302_s3 = inlined_call_operand.vmem [shape: bf16[320,64], index: 3, kind: input, shape index: {}]   ;;  %s11303_s4 = inlined_call_operand.vmem [shape: f32[1,64], index: 4, kind: input, shape index: {}]   ;;  %s11304_s5 = inlined_call_operand.vmem [shape: bf16[512,250], index: 5, kind: input, shape index: {}]   ;;  %s11305_s6 = inlined_call_operand.vmem [shape: f32[1,250], index: 6, kind: input, shape index: {}]   ;;  %s11306_s7 = inlined_call_operand.vmem [shape: bf16[250,1], index: 7, kind: input, shape index: {}]   ;;  %s11307_s8 = inlined_call_operand.<no memory space> [shape: f32[1,1], index: 8, kind: input, shape index: {}]   ;;  %s11308_s9 = inlined_call_operand.vmem [shape: f32[16,1], index: 9, kind: output, shape index: {}]  }
   0x1   :  { %v14_v0 = vstv %s11307_s8 }
   0x2   :  { %15 = vst [vmem:[#allocation2] sm:$0x1] %v14_v0 }
   0x3 LB: > { %s8025_s12 = sadd.s32 4294967295, %s7960_s11   ;;  %p6742_p0 = scmp.ge.s32.totalorder %s7960_s11, 1  ;;  %s7960_s11 = sphi %s8019_s11, %s21_s11  }
   0x4   : > { %p290_p1 = scmp.lt.s32.totalorder %s7960_s11, 3 }
   0x6   : > { %p291_p2 = pnand %p6742_p0, %p290_p1 }
   0x8   : > { %294 = sbr.rel (%p291_p2) target bundleno = 1779 (0x6f3), region = 56 }
   0xd   : > { %v7535_v1 = vld [vmem:[%s11300_s1 + $0x38] sm:$0xff]  ;;  %v7534_v2 = vld [vmem:[%s11300_s1 + $0x30] sm:$0xff]  ;;  %v7533_v3 = vld [vmem:[%s11300_s1 + $0x28] sm:$0xff]  ;;  %s325_s20 = smul.u32 136, %s8025_s12  ;;  %vm11313_vm1 = vcmask 258048   ;;  %vm11317_vm3 = vcmask 261125  }
   0xe   : > { %948 = vmatpush.bf16.msra.mxu0 %v7535_v1  ;;  %7636 = vmatpush.bf16.msra.mxu1 %v7535_v1  ;;  %v7532_v4 = vld [vmem:[%s11300_s1 + $0x20] sm:$0xff]  ;;  %v7531_v5 = vld [vmem:[%s11300_s1 + $0x18] sm:$0xff]  ;;  %v7530_v6 = vld [vmem:[%s11300_s1 + $0x10] sm:$0xff]  ;;  %vm1969_vm4 = vcmask 254976   ;;  %vm2041_vm5 = vcmask 260098   ;;  %vm2303_vm8 = vcmask 261126  }
   0xf   : > { %7637 = vmatpush.bf16.msra.mxu2 %v7535_v1  ;;  %7638 = vmatpush.bf16.msra.mxu3 %v7535_v1  ;;  %p326_p3 = scmp.lt.s32.totalorder %s325_s20, 271  ;;  %v7529_v7 = vld [vmem:[%s11300_s1 + $0x8] sm:$0xff]  ;;  %v7528_v8 = vld [vmem:[%s11300_s1] sm:$0xff]  ;;  %vm2305_vm9 = vcmask 256000   ;;  %vm2098_vm11 = vcmask 261127   ;;  %vm11318_vm12 = vcmask 257024  }
  0x10   : > { %v8089_v36 = vld [vmem:[%s11301_s2] ss:$0 sm:$0xff]  ;;  %vm11311_vm14 = vcmask 261124   ;;  %vm3642_vm15 = vcmask 1040384   ;;  %s7962_s19 = smov 96   ;;  %s7964_s21 = smov 64  }
  0x11   : > { %s11856_s20 = smov (!%p326_p3, %s325_s20), 271  ;;  %p331_p4 = scmp.lt.s32.totalorder %s8025_s12, 1 }
  0x12   : > { %949 = vmatpush.bf16.msra.mxu0 %v7534_v2  ;;  %7639 = vmatpush.bf16.msra.mxu1 %v7534_v2  ;;  %s6743_s27 = sshll.u32 %s11856_s20, 2  ;;  %s7963_s20 = smov 32  }
  0x13   : > { %7640 = vmatpush.bf16.msra.mxu2 %v7534_v2  ;;  %7641 = vmatpush.bf16.msra.mxu3 %v7534_v2  ;;  %s8057_s13 = scalar_lea.vmem %s11299_s0, %s6743_s27  ;;  %s11858_s12 = smov (!%p331_p4, %s8025_s12), 1 }
  0x14   : > { %v7460_v9 = vld [vmem:[%s8057_s13] sm:$0xff]  ;;  %v7487_v10 = vld [vmem:[%s8057_s13 + $0xd8] sm:$0xff]  ;;  %v7461_v11 = vld [vmem:[%s8057_s13 + $0x8] sm:$0xff]  ;;  %s6744_s15 = sshll.u32 %s11858_s12, 3 }
  0x15   : > { %v7488_v12 = vld [vmem:[%s8057_s13 + $0xe0] sm:$0xff]  ;;  %v7501_v13 = vld [vmem:[%s8057_s13 + $0x148] sm:$0xff]  ;;  %v7462_v14 = vld [vmem:[%s8057_s13 + $0x10] sm:$0xff] }
  0x16   : > { %950 = vmatpush.bf16.msra.mxu0 %v7533_v3  ;;  %7642 = vmatpush.bf16.msra.mxu1 %v7533_v3  ;;  %v7489_v15 = vld [vmem:[%s8057_s13 + $0xe8] sm:$0xff]  ;;  %v7502_v16 = vld [vmem:[%s8057_s13 + $0x150] sm:$0xff]  ;;  %v7463_v17 = vld [vmem:[%s8057_s13 + $0x18] sm:$0xff] }
  0x17   : > { %7643 = vmatpush.bf16.msra.mxu2 %v7533_v3  ;;  %7644 = vmatpush.bf16.msra.mxu3 %v7533_v3  ;;  %v7490_v18 = vld [vmem:[%s8057_s13 + $0xf0] sm:$0xff]  ;;  %v7503_v19 = vld [vmem:[%s8057_s13 + $0x158] sm:$0xff]  ;;  %v7464_v20 = vld [vmem:[%s8057_s13 + $0x20] sm:$0xff] }
  0x18   : > { %v7491_v21 = vld [vmem:[%s8057_s13 + $0xf8] sm:$0xff]  ;;  %v7516_v22 = vld [vmem:[%s8057_s13 + $0x1c0] sm:$0xff]  ;;  %v7465_v24 = vld [vmem:[%s8057_s13 + $0x28] sm:$0xff] }
  0x19   : > { %v7504_v23 = vld [vmem:[%s8057_s13 + $0x160] sm:$0xff]  ;;  %v7517_v26 = vld [vmem:[%s8057_s13 + $0x1c8] sm:$0xff]  ;;  %v7466_v28 = vld [vmem:[%s8057_s13 + $0x30] sm:$0xff] }
  0x1a   : > { %951 = vmatpush.bf16.msra.mxu0 %v7532_v4  ;;  %7645 = vmatpush.bf16.msra.mxu1 %v7532_v4  ;;  %v7492_v25 = vld [vmem:[%s8057_s13 + $0x100] sm:$0xff]  ;;  %v7505_v27 = vld [vmem:[%s8057_s13 + $0x168] sm:$0xff]  ;;  %v7518_v30 = vld [vmem:[%s8057_s13 + $0x1d0] sm:$0xff] }
  0x1b   : > { %7646 = vmatpush.bf16.msra.mxu2 %v7532_v4  ;;  %7647 = vmatpush.bf16.msra.mxu3 %v7532_v4  ;;  %v7493_v29 = vld [vmem:[%s8057_s13 + $0x108] sm:$0xff]  ;;  %v7506_v31 = vld [vmem:[%s8057_s13 + $0x170] sm:$0xff]  ;;  %v7467_v32 = vld [vmem:[%s8057_s13 + $0x38] sm:$0xff] }
  0x1c   : > { %v7494_v33 = vld [vmem:[%s8057_s13 + $0x110] sm:$0xff]  ;;  %v7519_v34 = vld [vmem:[%s8057_s13 + $0x1d8] sm:$0xff]  ;;  %v7468_v37 = vld [vmem:[%s8057_s13 + $0x40] sm:$0xff] }
  0x1d   : > { %v7507_v35 = vld [vmem:[%s8057_s13 + $0x178] sm:$0xff]  ;;  %v7520_v50 = vld [vmem:[%s8057_s13 + $0x1e0] sm:$0xff]  ;;  %v7469_v3 = vld [vmem:[%s8057_s13 + $0x48] sm:$0xff] }
  0x1e   : > { %952 = vmatpush.bf16.msra.mxu0 %v7531_v5  ;;  %7648 = vmatpush.bf16.msra.mxu1 %v7531_v5  ;;  %v7495_v38 = vld [vmem:[%s8057_s13 + $0x118] sm:$0xff]  ;;  %v7508_v53 = vld [vmem:[%s8057_s13 + $0x180] sm:$0xff] }
  0x1f   : > { %7649 = vmatpush.bf16.msra.mxu2 %v7531_v5  ;;  %7650 = vmatpush.bf16.msra.mxu3 %v7531_v5  ;;  %v7496_v4 = vld [vmem:[%s8057_s13 + $0x120] sm:$0xff] }
  0x22   : > { %953 = vmatpush.bf16.msra.mxu0 %v7530_v6  ;;  %7651 = vmatpush.bf16.msra.mxu1 %v7530_v6 }
  0x23   : > { %7652 = vmatpush.bf16.msra.mxu2 %v7530_v6  ;;  %7653 = vmatpush.bf16.msra.mxu3 %v7530_v6 }
  0x26   : > { %954 = vmatpush.bf16.msra.mxu0 %v7529_v7  ;;  %7654 = vmatpush.bf16.msra.mxu1 %v7529_v7 }
  0x27   : > { %7655 = vmatpush.bf16.msra.mxu2 %v7529_v7  ;;  %7656 = vmatpush.bf16.msra.mxu3 %v7529_v7 }
  0x2a   : > { %955 = vmatpush.bf16.msra.mxu0 %v7528_v8  ;;  %7657 = vmatpush.bf16.msra.mxu1 %v7528_v8 }
  0x2b   : > { %7658 = vmatpush.bf16.msra.mxu2 %v7528_v8  ;;  %7659 = vmatpush.bf16.msra.mxu3 %v7528_v8 }
  0x2d   : > { %956 = vmatmul.bf16.vlgmr.msra.gmra.mxu0 %v7460_v9  ;;  %1091 = vmatmul.bf16.vlgmr.msra.gmra.mxu1 %v7487_v10 }
  0x2e   : > { %1161 = vmatmul.bf16.vlgmr.msra.gmra.mxu2 %v7501_v13  ;;  %1236 = vmatmul.bf16.vlgmr.msra.gmra.mxu3 %v7516_v22 }
  0x3d   : > { %961 = vmatmul.bf16.gmra.mxu0 %v7461_v11  ;;  %1096 = vmatmul.bf16.gmra.mxu1 %v7488_v12 }
  0x3e   : > { %1166 = vmatmul.bf16.gmra.mxu2 %v7502_v16  ;;  %1241 = vmatmul.bf16.gmra.mxu3 %v7517_v26 }
  0x4d   : > { %966 = vmatmul.bf16.gmra.mxu0 %v7462_v14  ;;  %1101 = vmatmul.bf16.gmra.mxu1 %v7489_v15 }
  0x4e   : > { %1171 = vmatmul.bf16.gmra.mxu2 %v7503_v19  ;;  %1246 = vmatmul.bf16.gmra.mxu3 %v7518_v30 }
  0x5d   : > { %971 = vmatmul.bf16.gmra.mxu0 %v7463_v17  ;;  %1106 = vmatmul.bf16.gmra.mxu1 %v7490_v18 }
  0x5e   : > { %1176 = vmatmul.bf16.gmra.mxu2 %v7504_v23  ;;  %1251 = vmatmul.bf16.gmra.mxu3 %v7519_v34 }
  0x6d   : > { %976 = vmatmul.bf16.gmra.mxu0 %v7464_v20  ;;  %1111 = vmatmul.bf16.gmra.mxu1 %v7491_v21 }
  0x6e   : > { %1181 = vmatmul.bf16.gmra.mxu2 %v7505_v27  ;;  %1256 = vmatmul.bf16.gmra.mxu3 %v7520_v50 }
  0x7d   : > { %981 = vmatmul.bf16.gmra.mxu0 %v7465_v24  ;;  %1116 = vmatmul.bf16.gmra.mxu1 %v7492_v25 }
  0x7e   : > { %1186 = vmatmul.bf16.gmra.mxu2 %v7506_v31 }
  0x8d   : > { %986 = vmatmul.bf16.gmra.mxu0 %v7466_v28  ;;  %1121 = vmatmul.bf16.gmra.mxu1 %v7493_v29 }
  0x8e   : > { %1191 = vmatmul.bf16.gmra.mxu2 %v7507_v35  ;;  %v7521_v35 = vld [vmem:[%s8057_s13 + $0x1e8] sm:$0xff] }
  0x8f   : > { %1261 = vmatmul.bf16.gmra.mxu3 %v7521_v35 }
  0x9d   : > { %991 = vmatmul.bf16.gmra.mxu0 %v7467_v32  ;;  %1126 = vmatmul.bf16.gmra.mxu1 %v7494_v33 }
  0x9e   : > { %1196 = vmatmul.bf16.gmra.mxu2 %v7508_v53 }
  0xaa   : > { %v957_v39 = vpop.f32.mrf.mxu0  ;;  %v1092_v40 = vpop.f32.mrf.mxu1 }
  0xab   : > { %v958_v41 = vadd.f32 %v8089_v36, %v957_v39  ;;  %v1093_v43 = vadd.f32 %v8089_v36, %v1092_v40  ;;  %v7509_v40 = vld [vmem:[%s8057_s13 + $0x188] sm:$0xff] }
  0xad   : > { %vm1297_vm0 = vcmp.gt.f32.partialorder %v958_v41, 0.0  ;;  %v1433_v42 = vmul.f32 0.01, %v958_v41  ;;  %996 = vmatmul.bf16.gmra.mxu0 %v7468_v37  ;;  %1131 = vmatmul.bf16.gmra.mxu1 %v7495_v38  ;;  %v1487_v47 = vmul.f32 0.01, %v1093_v43  ;;  %vm1351_vm2 = vcmp.gt.f32.partialorder %v1093_v43, 0.0 }
  0xae   : > { %1201 = vmatmul.bf16.gmra.mxu2 %v7509_v40 }
  0xaf   : > { %v1569_v44 = vsel %vm1297_vm0, %v958_v41, %v1433_v42  ;;  %v8100_v56 = vsel %vm1351_vm2, %v1093_v43, %v1487_v47  ;;  %vm3651_vm0 = vcmask 1041408   ;;  %vm11310_vm2 = vcmask 253952  }
  0xb0   : > { %v1911_v45 = vsel %vm11313_vm1, %v1569_v44, -inf  ;;  %v1968_v58 = vsel %vm11317_vm3, %v1569_v44, -inf  ;;  %v2332_v62 = vsel %vm2303_vm8, %v8100_v56, -inf }
  0xb1   : > { %v1912_v46 = vrot.slane %v1911_v45, 4 }
  0xb2   : > { %v959_v48 = vpop.f32.mrf.mxu0  ;;  %v1094_v49 = vpop.f32.mrf.mxu1 }
  0xb3   : > { %v960_v51 = vadd.f32 %v8089_v36, %v959_v48  ;;  %v1095_v52 = vadd.f32 %v8089_v36, %v1094_v49  ;;  %v1913_v54 = vmax.f32 %v1911_v45, %v1912_v46 }
  0xb5   : > { %vm1298_vm6 = vcmp.gt.f32.partialorder %v960_v51, 0.0  ;;  %v1434_v55 = vmul.f32 0.01, %v960_v51  ;;  %vm1352_vm7 = vcmp.gt.f32.partialorder %v1095_v52, 0.0  ;;  %v1488_v57 = vmul.f32 0.01, %v1095_v52 }
  0xb6   : > { %v1914_v0 = vrot.slane %v1913_v54, 2 }
  0xb7   : > { %v1570_v59 = vsel %vm1298_vm6, %v960_v51, %v1434_v55  ;;  %v8107_v63 = vsel %vm1352_vm7, %v1095_v52, %v1488_v57  ;;  %vm11309_vm6 = vcmask 259073   ;;  %v7470_v55 = vld [vmem:[%s8057_s13 + $0x50] sm:$0xff]  ;;  %v7497_v57 = vld [vmem:[%s8057_s13 + $0x128] sm:$0xff] }
  0xb8   : > { %v1970_v60 = vsel %vm1969_vm4, %v1570_v59, -inf  ;;  %v2042_v61 = vsel %vm2041_vm5, %v1570_v59, -inf  ;;  %v2333_v6 = vsel %vm2305_vm9, %v8107_v63, -inf  ;;  %v1915_v13 = vmax.f32 %v1913_v54, %v1914_v0 }
  0xb9   : > { %v1971_v1 = vmax.f32 %v1968_v58, %v1970_v60  ;;  %v2043_v2 = vrot.slane %v2042_v61, 4  ;;  %v8114_v11 = vmax.f32 %v2332_v62, %v2333_v6  ;;  %v2099_v23 = vsel %vm2098_vm11, %v1570_v59, -inf }
  0xba   : > { %v962_v5 = vpop.f32.mrf.mxu0  ;;  %v1097_v7 = vpop.f32.mrf.mxu1  ;;  %v1916_v21 = vrot.slane %v1915_v13, 1 }
  0xbb   : > { %v1972_v8 = vrot.slane %v1971_v1, 4  ;;  %v2044_v9 = vmax.f32 %v2042_v61, %v2043_v2  ;;  %v963_v10 = vadd.f32 %v8089_v36, %v962_v5  ;;  %v1098_v12 = vadd.f32 %v8089_v36, %v1097_v7 }
  0xbc   : > { %v1917_v37 = vmax.f32 %v1915_v13, %v1916_v21 }
  0xbd   : > { %v1973_v14 = vmax.f32 %v1971_v1, %v1972_v8  ;;  %v2045_v15 = vrot.slane %v2044_v9, 2  ;;  %1001 = vmatmul.bf16.gmra.mxu0 %v7469_v3  ;;  %1136 = vmatmul.bf16.gmra.mxu1 %v7496_v4  ;;  %vm1299_vm10 = vcmp.gt.f32.partialorder %v963_v10, 0.0  ;;  %v1435_v16 = vmul.f32 0.01, %v963_v10 }
  0xbe   : > { %vm1353_vm13 = vcmp.gt.f32.partialorder %v1098_v12, 0.0  ;;  %v1489_v19 = vmul.f32 0.01, %v1098_v12 }
  0xbf   : > { %v1974_v17 = vrot.slane %v1973_v14, 2  ;;  %v2046_v18 = vmax.f32 %v2044_v9, %v2045_v15  ;;  %v1571_v20 = vsel %vm1299_vm10, %v963_v10, %v1435_v16  ;;  %vm3660_vm10 = vcmask 1042432  }
  0xc0   : > { %v2101_v24 = vsel %vm11318_vm12, %v1571_v20, -inf  ;;  %v1625_v28 = vsel %vm1353_vm13, %v1098_v12, %v1489_v19  ;;  %vm2377_vm13 = vcmask 261123   ;;  %v2173_v49 = vsel %vm11311_vm14, %v1571_v20, -inf }
  0xc1   : > { %v1975_v22 = vmax.f32 %v1973_v14, %v1974_v17  ;;  %v2047_v25 = vrot.slane %v2046_v18, 1  ;;  %v2102_v26 = vmax.f32 %v2099_v23, %v2101_v24  ;;  %v2455_v32 = vsel %vm11313_vm1, %v1625_v28, -inf }
  0xc2   : > { %v964_v27 = vpop.f32.mrf.mxu0  ;;  %v1099_v29 = vpop.f32.mrf.mxu1  ;;  %v2456_v34 = vrot.slane %v2455_v32, 4  ;;  %v2517_v54 = vsel %vm11317_vm3, %v1625_v28, -inf }
  0xc3   : > { %v1976_v30 = vrot.slane %v1975_v22, 1  ;;  %v965_v31 = vadd.f32 %v8089_v36, %v964_v27  ;;  %v2103_v33 = vrot.slane %v2102_v26, 4  ;;  %v2048_v41 = vmax.f32 %v2046_v18, %v2047_v25 }
  0xc4   : > { %v2457_v43 = vmax.f32 %v2455_v32, %v2456_v34  ;;  %v1100_v46 = vadd.f32 %v8089_v36, %v1099_v29 }
  0xc5   : > { %v1977_v38 = vmax.f32 %v1975_v22, %v1976_v30  ;;  %vm1300_vm7 = vcmp.gt.f32.partialorder %v965_v31, 0.0  ;;  %v1436_v39 = vmul.f32 0.01, %v965_v31  ;;  %v2104_v42 = vmax.f32 %v2102_v26, %v2103_v33 }
  0xc6   : > { %v2458_v53 = vrot.slane %v2457_v43, 2  ;;  %v1490_v61 = vmul.f32 0.01, %v1100_v46 }
  0xc7   : > { %v3643_v44 = vsel %vm3642_vm15, %v1917_v37, %v1977_v38  ;;  %v1572_v45 = vsel %vm1300_vm7, %v965_v31, %v1436_v39  ;;  %v2105_v48 = vrot.slane %v2104_v42, 2  ;;  %vm1354_vm7 = vcmp.gt.f32.partialorder %v1100_v46, 0.0 }
  0xc8   : > { %v3652_v47 = vsel %vm3651_vm0, %v3643_v44, %v2048_v41  ;;  %v2175_v50 = vsel %vm11310_vm2, %v1572_v45, -inf  ;;  %v2247_v52 = vsel %vm11309_vm6, %v1572_v45, -inf  ;;  %v2459_v1 = vmax.f32 %v2457_v43, %v2458_v53 }
  0xc9   : > { %v2176_v51 = vmax.f32 %v2173_v49, %v2175_v50  ;;  %v2106_v58 = vmax.f32 %v2104_v42, %v2105_v48  ;;  %v2248_v59 = vrot.slane %v2247_v52, 4  ;;  %v2304_v3 = vsel %vm2303_vm8, %v1572_v45, -inf }
  0xca   : > { %v967_v60 = vpop.f32.mrf.mxu0  ;;  %v1102_v62 = vpop.f32.mrf.mxu1  ;;  %vm11314_vm6 = vcmask 1043456   ;;  %v1626_v6 = vsel %vm1354_vm7, %v1100_v46, %v1490_v61  ;;  %vm11312_vm2 = vcmask 1044480   ;;  %v2460_v9 = vrot.slane %v2459_v1, 1 }
  0xcb   : > { %v2177_v0 = vrot.slane %v2176_v51, 4  ;;  %v968_v2 = vadd.f32 %v8089_v36, %v967_v60  ;;  %v2107_v4 = vrot.slane %v2106_v58, 1  ;;  %v2249_v5 = vmax.f32 %v2247_v52, %v2248_v59 }
  0xcc   : > { %v1103_v7 = vadd.f32 %v8089_v36, %v1102_v62  ;;  %v2518_v14 = vsel %vm1969_vm4, %v1626_v6, -inf  ;;  %v2583_v15 = vsel %vm2041_vm5, %v1626_v6, -inf  ;;  %v8137_v17 = vmax.f32 %v2459_v1, %v2460_v9  ;;  %v7471_v62 = vld [vmem:[%s8057_s13 + $0x58] sm:$0xff] }
  0xcd   : > { %v2178_v8 = vmax.f32 %v2176_v51, %v2177_v0  ;;  %vm1301_vm14 = vcmp.gt.f32.partialorder %v968_v2, 0.0  ;;  %v1437_v10 = vmul.f32 0.01, %v968_v2  ;;  %1006 = vmatmul.bf16.gmra.mxu0 %v7470_v55  ;;  %1141 = vmatmul.bf16.gmra.mxu1 %v7497_v57  ;;  %v2108_v12 = vmax.f32 %v2106_v58, %v2107_v4  ;;  %v7522_v0 = vld [vmem:[%s8057_s13 + $0x1f0] sm:$0xff] }
  0xce   : > { %v2250_v13 = vrot.slane %v2249_v5, 2  ;;  %v2519_v19 = vmax.f32 %v2517_v54, %v2518_v14  ;;  %v2584_v29 = vrot.slane %v2583_v15, 4  ;;  %vm1355_vm7 = vcmp.gt.f32.partialorder %v1103_v7, 0.0  ;;  %1266 = vmatmul.bf16.gmra.mxu3 %v7522_v0 }
  0xcf   : > { %v2179_v16 = vrot.slane %v2178_v8, 2  ;;  %v1573_v18 = vsel %vm1301_vm14, %v968_v2, %v1437_v10  ;;  %v3661_v20 = vsel %vm3660_vm10, %v3652_v47, %v2108_v12  ;;  %v1491_v31 = vmul.f32 0.01, %v1103_v7 }
  0xd0   : > { %v2251_v21 = vmax.f32 %v2249_v5, %v2250_v13  ;;  %v2306_v22 = vsel %vm2305_vm9, %v1573_v18, -inf  ;;  %v2378_v23 = vsel %vm2377_vm13, %v1573_v18, -inf  ;;  %v2520_v27 = vrot.slane %v2519_v19, 4  ;;  %v7498_v5 = vld [vmem:[%s8057_s13 + $0x130] sm:$0xff] }
  0xd1   : > { %v2180_v24 = vmax.f32 %v2178_v8, %v2179_v16  ;;  %v2307_v25 = vmax.f32 %v2304_v3, %v2306_v22  ;;  %v2379_v26 = vrot.slane %v2378_v23, 4  ;;  %v2585_v39 = vmax.f32 %v2583_v15, %v2584_v29 }
  0xd2   : > { %v2252_v28 = vrot.slane %v2251_v21, 1  ;;  %v969_v30 = vpop.f32.mrf.mxu0  ;;  %v1104_v32 = vpop.f32.mrf.mxu1  ;;  %v2521_v37 = vmax.f32 %v2519_v19, %v2520_v27  ;;  %v1627_v41 = vsel %vm1355_vm7, %v1103_v7, %v1491_v31  ;;  %v2645_v48 = vsel %vm2098_vm11, %v1626_v6, -inf  ;;  %v7510_v6 = vld [vmem:[%s8057_s13 + $0x190] sm:$0xff] }
  0xd3   : > { %v2181_v33 = vrot.slane %v2180_v24, 1  ;;  %v2308_v34 = vrot.slane %v2307_v25, 4  ;;  %v2380_v35 = vmax.f32 %v2378_v23, %v2379_v26  ;;  %v970_v40 = vadd.f32 %v8089_v36, %v969_v30  ;;  %1206 = vmatmul.bf16.gmra.mxu2 %v7510_v6 }
  0xd4   : > { %v2253_v38 = vmax.f32 %v2251_v21, %v2252_v28  ;;  %v2522_v45 = vrot.slane %v2521_v37, 2  ;;  %v2586_v46 = vrot.slane %v2585_v39, 2  ;;  %v2646_v57 = vsel %vm11318_vm12, %v1627_v41, -inf }
  0xd5   : > { %v2182_v42 = vmax.f32 %v2180_v24, %v2181_v33  ;;  %v2309_v43 = vmax.f32 %v2307_v25, %v2308_v34  ;;  %v2381_v44 = vrot.slane %v2380_v35, 2  ;;  %vm1302_vm14 = vcmp.gt.f32.partialorder %v970_v40, 0.0 }
  0xd6   : > { %v1438_v47 = vmul.f32 0.01, %v970_v40  ;;  %v2523_v52 = vmax.f32 %v2521_v37, %v2522_v45  ;;  %v2587_v54 = vmax.f32 %v2585_v39, %v2586_v46  ;;  %vm11315_vm7 = vcmask 1045504  }
  0xd7   : > { %v3670_v49 = vsel %vm11314_vm6, %v3661_v20, %v2182_v42  ;;  %v2310_v50 = vrot.slane %v2309_v43, 2  ;;  %v2382_v51 = vmax.f32 %v2380_v35, %v2381_v44  ;;  %v2647_v3 = vmax.f32 %v2645_v48, %v2646_v57 }
  0xd8   : > { %v3679_v53 = vsel %vm11312_vm2, %v3670_v49, %v2253_v38  ;;  %v1574_v55 = vsel %vm1302_vm14, %v970_v40, %v1438_v47  ;;  %v2524_v60 = vrot.slane %v2523_v52, 1  ;;  %v2588_v1 = vrot.slane %v2587_v54, 1 }
  0xd9   : > { %v2311_v58 = vmax.f32 %v2309_v43, %v2310_v50  ;;  %v2383_v59 = vrot.slane %v2382_v51, 1  ;;  %v2434_v61 = vsel %vm11313_vm1, %v1574_v55, -inf  ;;  %vm11316_vm2 = vcmask 1046528  }
  0xda   : > { %v2435_v2 = vrot.slane %v2434_v61, 4  ;;  %v972_v4 = vpop.f32.mrf.mxu0  ;;  %v2525_v9 = vmax.f32 %v2523_v52, %v2524_v60  ;;  %v2589_v10 = vmax.f32 %v2587_v54, %v2588_v1  ;;  %v2648_v13 = vrot.slane %v2647_v3, 4  ;;  %v1107_v15 = vpop.f32.mrf.mxu1 }
  0xdb   : > { %v2312_v7 = vrot.slane %v2311_v58, 1  ;;  %v2384_v8 = vmax.f32 %v2382_v51, %v2383_v59  ;;  %v973_v14 = vadd.f32 %v8089_v36, %v972_v4  ;;  %v1105_v19 = vadd.f32 %v8089_v36, %v1104_v32 }
  0xdc   : > { %v2436_v12 = vmax.f32 %v2434_v61, %v2435_v2  ;;  %v3708_v18 = vsel %vm3642_vm15, %v8137_v17, %v2525_v9  ;;  %v1108_v20 = vadd.f32 %v8089_v36, %v1107_v15  ;;  %v2649_v23 = vmax.f32 %v2647_v3, %v2648_v13  ;;  %v7472_v3 = vld [vmem:[%s8057_s13 + $0x60] sm:$0xff] }
  0xdd   : > { %v2313_v16 = vmax.f32 %v2311_v58, %v2312_v7  ;;  %1011 = vmatmul.bf16.gmra.mxu0 %v7471_v62  ;;  %v3716_v21 = vsel %vm3651_vm0, %v3708_v18, %v2589_v10  ;;  %vm1303_vm14 = vcmp.gt.f32.partialorder %v973_v14, 0.0  ;;  %1146 = vmatmul.bf16.gmra.mxu1 %v7498_v5  ;;  %v1439_v25 = vmul.f32 0.01, %v973_v14 }
  0xde   : > { %v2437_v22 = vrot.slane %v2436_v12, 2  ;;  %vm1356_vm1 = vcmp.gt.f32.partialorder %v1105_v19, 0.0  ;;  %v1492_v26 = vmul.f32 0.01, %v1105_v19  ;;  %v2650_v28 = vrot.slane %v2649_v23, 2 }
  0xdf   : > { %v3688_v24 = vsel %vm11315_vm7, %v3679_v53, %v2313_v16  ;;  %v2490_v29 = vsel %vm11317_vm3, %v1574_v55, -inf  ;;  %vm11343_vm6 = vcmask 261124   ;;  %v1575_v31 = vsel %vm1303_vm14, %v973_v14, %v1439_v25 }
  0xe0   : > { %v8160_v27 = vsel %vm11316_vm2, %v3688_v24, %v2384_v8  ;;  %v2438_v17 = vmax.f32 %v2436_v12, %v2437_v22  ;;  %v2717_v30 = vsel %vm11343_vm6, %v1627_v41, -inf  ;;  %v1628_v32 = vsel %vm1356_vm1, %v1105_v19, %v1492_v26  ;;  %v7499_v8 = vld [vmem:[%s8057_s13 + $0x138] sm:$0xff] }
  0xe1   : > { %v2651_v33 = vmax.f32 %v2649_v23, %v2650_v28  ;;  %v2491_v34 = vsel %vm1969_vm4, %v1575_v31, -inf  ;;  %v2562_v35 = vsel %vm2041_vm5, %v1575_v31, -inf  ;;  %v1493_v38 = vmul.f32 0.01, %v1108_v20 }
  0xe2   : > { %v974_v37 = vpop.f32.mrf.mxu0  ;;  %v2492_v39 = vmax.f32 %v2490_v29, %v2491_v34  ;;  %v2563_v40 = vrot.slane %v2562_v35, 4  ;;  %vm11344_vm7 = vcmask 253952   ;;  %vm1357_vm2 = vcmp.gt.f32.partialorder %v1108_v20, 0.0 }
  0xe3   : > { %v2718_v42 = vsel %vm11344_vm7, %v1628_v32, -inf  ;;  %v2439_v43 = vrot.slane %v2438_v17, 1  ;;  %v2652_v44 = vrot.slane %v2651_v33, 1  ;;  %vm11345_vm3 = vcmask 259073  }
  0xe4   : > { %v2719_v45 = vmax.f32 %v2717_v30, %v2718_v42  ;;  %v2783_v46 = vsel %vm11345_vm3, %v1628_v32, -inf  ;;  %v2493_v41 = vrot.slane %v2492_v39, 4  ;;  %v2564_v47 = vmax.f32 %v2562_v35, %v2563_v40 }
  0xe5   : > { %v2784_v48 = vrot.slane %v2783_v46, 4  ;;  %v975_v49 = vadd.f32 %v8089_v36, %v974_v37  ;;  %v2653_v50 = vmax.f32 %v2651_v33, %v2652_v44  ;;  %v1629_v52 = vsel %vm1357_vm2, %v1108_v20, %v1493_v38  ;;  %v1109_v44 = vpop.f32.mrf.mxu1 }
  0xe6   : > { %v2720_v51 = vrot.slane %v2719_v45, 4  ;;  %v2845_v53 = vsel %vm2303_vm8, %v1628_v32, -inf  ;;  %v2494_v54 = vmax.f32 %v2492_v39, %v2493_v41  ;;  %v2565_v55 = vrot.slane %v2564_v47, 2 }
  0xe7   : > { %v2785_v57 = vmax.f32 %v2783_v46, %v2784_v48  ;;  %vm1304_vm1 = vcmp.gt.f32.partialorder %v975_v49, 0.0  ;;  %v3724_v58 = vsel %vm3660_vm10, %v3716_v21, %v2653_v50  ;;  %v1440_v60 = vmul.f32 0.01, %v975_v49 }
  0xe8   : > { %v2721_v59 = vmax.f32 %v2719_v45, %v2720_v51  ;;  %v2846_v61 = vsel %vm2305_vm9, %v1629_v52, -inf  ;;  %v2495_v62 = vrot.slane %v2494_v54, 2  ;;  %v2566_v0 = vmax.f32 %v2564_v47, %v2565_v55  ;;  %v7523_v55 = vld [vmem:[%s8057_s13 + $0x1f8] sm:$0xff] }
  0xe9   : > { %v2786_v1 = vrot.slane %v2785_v57, 2  ;;  %v2847_v2 = vmax.f32 %v2845_v53, %v2846_v61  ;;  %v2618_v4 = vsel %vm2098_vm11, %v1575_v31, -inf  ;;  %v1576_v6 = vsel %vm1304_vm1, %v975_v49, %v1440_v60  ;;  %v7511_v61 = vld [vmem:[%s8057_s13 + $0x198] sm:$0xff]  ;;  %1271 = vmatmul.bf16.gmra.mxu3 %v7523_v55 }
  0xea   : > { %v2722_v5 = vrot.slane %v2721_v59, 2  ;;  %v2911_v7 = vsel %vm2377_vm13, %v1629_v52, -inf  ;;  %v2496_v9 = vmax.f32 %v2494_v54, %v2495_v62  ;;  %v2567_v10 = vrot.slane %v2566_v0, 1  ;;  %v977_v18 = vpop.f32.mrf.mxu0  ;;  %1211 = vmatmul.bf16.gmra.mxu2 %v7511_v61 }
  0xeb   : > { %v2787_v12 = vmax.f32 %v2785_v57, %v2786_v1  ;;  %v2619_v13 = vsel %vm11318_vm12, %v1576_v6, -inf  ;;  %v2848_v16 = vrot.slane %v2847_v2, 4  ;;  %v2912_v21 = vrot.slane %v2911_v7, 4 }
  0xec   : > { %v2723_v14 = vmax.f32 %v2721_v59, %v2722_v5  ;;  %v2620_v15 = vmax.f32 %v2618_v4, %v2619_v13  ;;  %v2497_v19 = vrot.slane %v2496_v9, 1  ;;  %v2440_v25 = vmax.f32 %v2438_v17, %v2439_v43  ;;  %v1162_v43 = vpop.f32.mrf.mxu2 }
  0xed   : > { %v2788_v20 = vrot.slane %v2787_v12, 1  ;;  %1016 = vmatmul.bf16.gmra.mxu0 %v7472_v3  ;;  %v2849_v24 = vmax.f32 %v2847_v2, %v2848_v16  ;;  %1151 = vmatmul.bf16.gmra.mxu1 %v7499_v8  ;;  %v2568_v28 = vmax.f32 %v2566_v0, %v2567_v10  ;;  %v2913_v29 = vmax.f32 %v2911_v7, %v2912_v21  ;;  %v7473_v3 = vld [vmem:[%s8057_s13 + $0x68] sm:$0xff] }
  0xee   : > { %v2724_v22 = vrot.slane %v2723_v14, 1  ;;  %v2621_v23 = vrot.slane %v2620_v15, 4  ;;  %v2498_v26 = vmax.f32 %v2496_v9, %v2497_v19  ;;  %v978_v33 = vadd.f32 %v8089_v36, %v977_v18 }
  0xef   : > { %v2850_v32 = vrot.slane %v2849_v24, 2  ;;  %v2789_v35 = vmax.f32 %v2787_v12, %v2788_v20  ;;  %v2914_v37 = vrot.slane %v2913_v29, 2  ;;  %vm11346_vm3 = vcmask 1043456  }
  0xf0   : > { %v2725_v30 = vmax.f32 %v2723_v14, %v2724_v22  ;;  %v2622_v31 = vmax.f32 %v2620_v15, %v2621_v23  ;;  %v3705_v34 = vsel %vm3642_vm15, %v2440_v25, %v2498_v26  ;;  %vm1305_vm2 = vcmp.gt.f32.partialorder %v978_v33, 0.0  ;;  %v1112_v14 = vpop.f32.mrf.mxu1 }
  0xf1   : > { %v3713_v38 = vsel %vm3651_vm0, %v3705_v34, %v2568_v28  ;;  %v2851_v42 = vmax.f32 %v2849_v24, %v2850_v32  ;;  %v2915_v17 = vmax.f32 %v2913_v29, %v2914_v37  ;;  %vm11347_vm6 = vcmask 1044480  }
  0xf2   : > { %v3732_v39 = vsel %vm11346_vm3, %v3724_v58, %v2725_v30  ;;  %v2623_v40 = vrot.slane %v2622_v31, 2  ;;  %v1441_v48 = vmul.f32 0.01, %v978_v33  ;;  %v979_v51 = vpop.f32.mrf.mxu0  ;;  %vm11348_vm7 = vcmask 261124  }
  0xf3   : > { %v2852_v46 = vrot.slane %v2851_v42, 1  ;;  %v3740_v41 = vsel %vm11347_vm6, %v3732_v39, %v2789_v35  ;;  %v2916_v47 = vrot.slane %v2915_v17, 1  ;;  %v2690_v52 = vsel %vm11348_vm7, %v1576_v6, -inf  ;;  %v7500_v6 = vld [vmem:[%s8057_s13 + $0x140] sm:$0xff] }
  0xf4   : > { %v2624_v45 = vmax.f32 %v2622_v31, %v2623_v40  ;;  %v1577_v54 = vsel %vm1305_vm2, %v978_v33, %v1441_v48  ;;  %vm11349_vm14 = vcmask 1045504   ;;  %vm11350_vm1 = vcmask 253952   ;;  %v1164_v12 = vpop.f32.mrf.mxu2 }
  0xf5   : > { %v2853_v50 = vmax.f32 %v2851_v42, %v2852_v46  ;;  %v2917_v53 = vmax.f32 %v2915_v17, %v2916_v47  ;;  %v2691_v59 = vsel %vm11350_vm1, %v1577_v54, -inf  ;;  %v1110_v60 = vadd.f32 %v8089_v36, %v1109_v44 }
  0xf6   : > { %v2625_v49 = vrot.slane %v2624_v45, 1  ;;  %vm11351_vm3 = vcmask 1046528   ;;  %v2692_v0 = vmax.f32 %v2690_v52, %v2691_v59  ;;  %vm11352_vm6 = vcmask 259073  }
  0xf7   : > { %v3748_v58 = vsel %vm11349_vm14, %v3740_v41, %v2853_v50  ;;  %v2762_v1 = vsel %vm11352_vm6, %v1577_v54, -inf  ;;  %v980_v2 = vadd.f32 %v8089_v36, %v979_v51  ;;  %v1494_v10 = vmul.f32 0.01, %v1110_v60 }
  0xf8   : > { %v2626_v57 = vmax.f32 %v2624_v45, %v2625_v49  ;;  %v8189_v62 = vsel %vm11351_vm3, %v3748_v58, %v2917_v53  ;;  %v2763_v5 = vrot.slane %v2762_v1, 4  ;;  %v2693_v7 = vrot.slane %v2692_v0, 4 }
  0xf9   : > { %vm1306_vm2 = vcmp.gt.f32.partialorder %v980_v2, 0.0  ;;  %v1442_v13 = vmul.f32 0.01, %v980_v2  ;;  %vm1358_vm7 = vcmp.gt.f32.partialorder %v1110_v60, 0.0  ;;  %v1113_v16 = vadd.f32 %v8089_v36, %v1112_v14 }
  0xfa   : > { %v3721_v4 = vsel %vm3660_vm10, %v3713_v38, %v2626_v57  ;;  %v2764_v8 = vmax.f32 %v2762_v1, %v2763_v5  ;;  %v2694_v9 = vmax.f32 %v2692_v0, %v2693_v7  ;;  %v2818_v21 = vsel %vm2303_vm8, %v1577_v54, -inf  ;;  %v982_v53 = vpop.f32.mrf.mxu0  ;;  %v1114_v1 = vpop.f32.mrf.mxu1 }
  0xfb   : > { %v1578_v19 = vsel %vm1306_vm2, %v980_v2, %v1442_v13  ;;  %v1630_v24 = vsel %vm1358_vm7, %v1110_v60, %v1494_v10  ;;  %vm1359_vm14 = vcmp.gt.f32.partialorder %v1113_v16, 0.0  ;;  %v1495_v32 = vmul.f32 0.01, %v1113_v16 }
  0xfc   : > { %v2765_v15 = vrot.slane %v2764_v8, 2  ;;  %v2695_v18 = vrot.slane %v2694_v9, 2  ;;  %v2819_v22 = vsel %vm2305_vm9, %v1578_v19, -inf  ;;  %v2890_v26 = vsel %vm2377_vm13, %v1578_v19, -inf }
  0xfd   : > { %1021 = vmatmul.bf16.gmra.mxu0 %v7473_v3  ;;  %1156 = vmatmul.bf16.gmra.mxu1 %v7500_v6  ;;  %v2820_v25 = vmax.f32 %v2818_v21, %v2819_v22  ;;  %v2891_v29 = vrot.slane %v2890_v26, 4  ;;  %v1163_v33 = vadd.f32 %v8089_v36, %v1162_v43  ;;  %vm11353_vm1 = vcmask 258048   ;;  %v1167_v43 = vpop.f32.mrf.mxu2 }
  0xfe   : > { %v2766_v20 = vmax.f32 %v2764_v8, %v2765_v15  ;;  %v2696_v23 = vmax.f32 %v2694_v9, %v2695_v18  ;;  %v2967_v34 = vsel %vm11353_vm1, %v1630_v24, -inf  ;;  %vm11354_vm3 = vcmask 261125   ;;  %v7474_v18 = vld [vmem:[%s8057_s13 + $0x70] sm:$0xff] }
  0xff   : > { %v2821_v31 = vrot.slane %v2820_v25, 4  ;;  %v3029_v35 = vsel %vm11354_vm3, %v1630_v24, -inf  ;;  %v2892_v37 = vmax.f32 %v2890_v26, %v2891_v29  ;;  %v1165_v39 = vadd.f32 %v8089_v36, %v1164_v12 }
 0x100   : > { %v2767_v28 = vrot.slane %v2766_v20, 1  ;;  %v2697_v30 = vrot.slane %v2696_v23, 1  ;;  %v1631_v42 = vsel %vm1359_vm14, %v1113_v16, %v1495_v32  ;;  %vm11355_vm6 = vcmask 1043456  }
 0x101   : > { %v2822_v40 = vmax.f32 %v2820_v25, %v2821_v31  ;;  %v2893_v44 = vrot.slane %v2892_v37, 2  ;;  %v3030_v45 = vsel %vm1969_vm4, %v1631_v42, -inf  ;;  %v2968_v41 = vrot.slane %v2967_v34, 4 }
 0x102   : > { %v2698_v38 = vmax.f32 %v2696_v23, %v2697_v30  ;;  %v2768_v17 = vmax.f32 %v2766_v20, %v2767_v28  ;;  %v3031_v48 = vmax.f32 %v3029_v35, %v3030_v45  ;;  %v1515_v49 = vmul.f32 0.01, %v1163_v33 }
 0x103   : > { %v2823_v47 = vrot.slane %v2822_v40, 2  ;;  %vm11356_vm2 = vcmask 1044480   ;;  %v2894_v51 = vmax.f32 %v2892_v37, %v2893_v44  ;;  %v3095_v52 = vsel %vm2041_vm5, %v1631_v42, -inf }
 0x104   : > { %v3729_v46 = vsel %vm11355_vm6, %v3721_v4, %v2698_v38  ;;  %vm1379_vm7 = vcmp.gt.f32.partialorder %v1163_v33, 0.0  ;;  %v1516_v54 = vmul.f32 0.01, %v1165_v39  ;;  %vm1380_vm14 = vcmp.gt.f32.partialorder %v1165_v39, 0.0 }
 0x105   : > { %v3737_v50 = vsel %vm11356_vm2, %v3729_v46, %v2768_v17  ;;  %v2824_v55 = vmax.f32 %v2822_v40, %v2823_v47  ;;  %v2895_v57 = vrot.slane %v2894_v51, 1  ;;  %v3032_v58 = vrot.slane %v3031_v48, 4  ;;  %v1169_v26 = vpop.f32.mrf.mxu2  ;;  %v7524_v40 = vld [vmem:[%s8057_s13 + $0x200] sm:$0xff] }
 0x106   : > { %v2969_v59 = vmax.f32 %v2967_v34, %v2968_v41  ;;  %v3096_v61 = vrot.slane %v3095_v52, 4  ;;  %v983_v0 = vadd.f32 %v8089_v36, %v982_v53  ;;  %v3865_v2 = vrot.slane %v8160_v27, 1  ;;  %v984_v41 = vpop.f32.mrf.mxu0  ;;  %v7512_v47 = vld [vmem:[%s8057_s13 + $0x1a0] sm:$0xff]  ;;  %1276 = vmatmul.bf16.gmra.mxu3 %v7524_v40 }
 0x107   : > { %v2825_v60 = vrot.slane %v2824_v55, 1  ;;  %v8210_v3 = vsel %vm1379_vm7, %v1163_v33, %v1515_v49  ;;  %v1115_v4 = vadd.f32 %v8089_v36, %v1114_v1  ;;  %v1652_v5 = vsel %vm1380_vm14, %v1165_v39, %v1516_v54  ;;  %1216 = vmatmul.bf16.gmra.mxu2 %v7512_v47 }
 0x108   : > { %vm1307_vm1 = vcmp.gt.f32.partialorder %v983_v0, 0.0  ;;  %v1443_v7 = vmul.f32 0.01, %v983_v0  ;;  %v3430_v8 = vsel %vm2377_vm13, %v8210_v3, -inf  ;;  %vm11357_vm3 = vcmask 258048  }
 0x109   : > { %v2826_v6 = vmax.f32 %v2824_v55, %v2825_v60  ;;  %v3486_v9 = vsel %vm11357_vm3, %v1652_v5, -inf  ;;  %v2896_v10 = vmax.f32 %v2894_v51, %v2895_v57  ;;  %v3033_v12 = vmax.f32 %v3031_v48, %v3032_v58  ;;  %vm11360_vm7 = vmmov %vm11357_vm3  ;;  %v1117_v55 = vpop.f32.mrf.mxu1 }
 0x10a   : > { %v2970_v13 = vrot.slane %v2969_v59, 2  ;;  %vm11358_vm6 = vcmask 1045504   ;;  %v3097_v15 = vmax.f32 %v3095_v52, %v3096_v61  ;;  %v8217_v16 = vsel %vm1307_vm1, %v983_v0, %v1443_v7 }
 0x10b   : > { %v3745_v14 = vsel %vm11358_vm6, %v3737_v50, %v2826_v6  ;;  %vm11359_vm2 = vcmask 1046528   ;;  %v1705_v20 = vlaneseq  ;;  %v2946_v21 = vsel %vm11360_vm7, %v8217_v16, -inf }
 0x10c   : > { %v8221_v19 = vsel %vm11359_vm2, %v3745_v14, %v2896_v10  ;;  %v1496_v22 = vmul.f32 0.01, %v1115_v4  ;;  %v3431_v23 = vrot.slane %v3430_v8, 4  ;;  %v3487_v24 = vrot.slane %v3486_v9, 4  ;;  %vm11361_vm1 = vmmov %vm11359_vm2 }
 0x10d   : > { %v3866_v25 = vrot.slane %v8221_v19, 1  ;;  %vm1360_vm14 = vcmp.gt.f32.partialorder %v1115_v4, 0.0  ;;  %1026 = vmatmul.bf16.gmra.mxu0 %v7474_v18  ;;  %v3034_v28 = vrot.slane %v3033_v12, 2  ;;  %v1168_v29 = vadd.f32 %v8089_v36, %v1167_v43  ;;  %v1172_v14 = vpop.f32.mrf.mxu2 }
 0x10e   : > { %v1170_v30 = vadd.f32 %v8089_v36, %v1169_v26  ;;  %v2971_v31 = vmax.f32 %v2969_v59, %v2970_v13  ;;  %v3157_v33 = vsel %vm2098_vm11, %v1631_v42, -inf  ;;  %v2947_v34 = vrot.slane %v2946_v21, 4 }
 0x10f   : > { %v3867_v32 = vsel %vm11361_vm1, %v3865_v2, %v3866_v25  ;;  %v3098_v37 = vrot.slane %v3097_v15, 2  ;;  %v1706_v38 = vshrl.u32 %v1705_v20, 7  ;;  %v1632_v39 = vsel %vm1360_vm14, %v1115_v4, %v1496_v22 }
 0x110   : > { %v8233_v35 = vmax.f32 %v8160_v27, %v3867_v32  ;;  %v11320_v17 = vrot.slane %v8189_v62, 1  ;;  %v8237_v44 = vmax.f32 %v3430_v8, %v3431_v23  ;;  %v3488_v45 = vmax.f32 %v3486_v9, %v3487_v24 }
 0x111   : > { %v3158_v46 = vsel %vm11318_vm12, %v1632_v39, -inf  ;;  %v3035_v48 = vmax.f32 %v3033_v12, %v3034_v28  ;;  %v1517_v43 = vmul.f32 0.01, %v1168_v29  ;;  %vm1382_vm3 = vcmp.gt.f32.partialorder %v1170_v30, 0.0 }
 0x112   : > { %v3159_v42 = vmax.f32 %v3157_v33, %v3158_v46  ;;  %v2972_v27 = vrot.slane %v2971_v31, 1  ;;  %vm1381_vm6 = vcmp.gt.f32.partialorder %v1168_v29, 0.0  ;;  %v2948_v49 = vmax.f32 %v2946_v21, %v2947_v34 }
 0x113   : > { %v1518_v50 = vmul.f32 0.01, %v1170_v30  ;;  %v3099_v51 = vmax.f32 %v3097_v15, %v3098_v37  ;;  %v8241_v52 = vadd.s32 128, %v1706_v38  ;;  %v985_v54 = vadd.f32 %v8089_v36, %v984_v41 }
 0x114   : > { %v3160_v53 = vrot.slane %v3159_v42, 4  ;;  %v3489_v57 = vrot.slane %v3488_v45, 2  ;;  %vm11362_vm2 = vcmask 261125   ;;  %v1118_v60 = vadd.f32 %v8089_v36, %v1117_v55 }
 0x115   : > { %v8245_v58 = vsel %vm11362_vm2, %v1652_v5, -inf  ;;  %v1654_v59 = vsel %vm1382_vm3, %v1170_v30, %v1518_v50  ;;  %v3036_v61 = vrot.slane %v3035_v48, 1  ;;  %v1653_v0 = vsel %vm1381_vm6, %v1168_v29, %v1517_v43  ;;  %vm11363_vm6 = vmmov %vm11362_vm2 }
 0x116   : > { %v3161_v1 = vmax.f32 %v3159_v42, %v3160_v53  ;;  %v1946_v2 = vsel %vm11360_vm7, %v1654_v59, -inf  ;;  %v2973_v4 = vmax.f32 %v2971_v31, %v2972_v27  ;;  %v2949_v6 = vrot.slane %v2948_v49, 2 }
 0x117   : > { %v1947_v7 = vrot.slane %v1946_v2, 4  ;;  %vm1308_vm14 = vcmp.gt.f32.partialorder %v985_v54, 0.0  ;;  %v3100_v8 = vrot.slane %v3099_v51, 1  ;;  %vm1739_vm1 = vcmp.lt.s32.totalorder %v8241_v52, 131 }
 0x118   : > { %v3162_v9 = vrot.slane %v3161_v1, 2  ;;  %v1444_v10 = vmul.f32 0.01, %v985_v54  ;;  %v8252_v5 = vsel %vm1739_vm1, %v1653_v0, -inf  ;;  %vm1361_vm3 = vcmp.gt.f32.partialorder %v1118_v60, 0.0 }
 0x119   : > { %v1948_v12 = vmax.f32 %v1946_v2, %v1947_v7  ;;  %v1497_v13 = vmul.f32 0.01, %v1118_v60  ;;  %v3037_v15 = vmax.f32 %v3035_v48, %v3036_v61  ;;  %v3002_v18 = vsel %vm11363_vm6, %v8217_v16, -inf  ;;  %v987_v48 = vpop.f32.mrf.mxu0 }
 0x11a   : > { %v8256_v20 = vsel %vm1308_vm14, %v985_v54, %v1444_v10  ;;  %v1173_v21 = vadd.f32 %v8089_v36, %v1172_v14  ;;  %v2950_v22 = vmax.f32 %v2948_v49, %v2949_v6  ;;  %vm11364_vm2 = vcmask 261124  }
 0x11b   : > { %v3229_v23 = vsel %vm11364_vm2, %v1632_v39, -inf  ;;  %v3003_v24 = vsel %vm1969_vm4, %v8256_v20, -inf  ;;  %v3074_v26 = vsel %vm2041_vm5, %v8256_v20, -inf  ;;  %v3163_v28 = vmax.f32 %v3161_v1, %v3162_v9 }
 0x11c   : > { %v3004_v29 = vmax.f32 %v3002_v18, %v3003_v24  ;;  %v3075_v30 = vrot.slane %v3074_v26, 4  ;;  %v1633_v31 = vsel %vm1361_vm3, %v1118_v60, %v1497_v13  ;;  %v8264_v32 = vmax.f32 %v3488_v45, %v3489_v57 }
 0x11d   : > { %v1949_v16 = vrot.slane %v1948_v12, 2  ;;  %vm11365_vm7 = vcmask 253952   ;;  %vm11366_vm14 = vcmask 259073   ;;  %v3101_v37 = vmax.f32 %v3099_v51, %v3100_v8 }
 0x11e   : > { %v3230_v33 = vsel %vm11365_vm7, %v1633_v31, -inf  ;;  %v3295_v34 = vsel %vm11366_vm14, %v1633_v31, -inf  ;;  %v3005_v38 = vrot.slane %v3004_v29, 4  ;;  %v3076_v39 = vmax.f32 %v3074_v26, %v3075_v30 }
 0x11f   : > { %v1519_v40 = vmul.f32 0.01, %v1173_v21  ;;  %v8270_v46 = vsel %vm1969_vm4, %v8252_v5, -inf  ;;  %v3231_v41 = vmax.f32 %v3229_v23, %v3230_v33  ;;  %v3296_v47 = vrot.slane %v3295_v34, 4 }
 0x120   : > { %vm1383_vm6 = vcmp.gt.f32.partialorder %v1173_v21, 0.0  ;;  %v3764_v45 = vsel %vm3642_vm15, %v2973_v4, %v3037_v15  ;;  %v2951_v43 = vrot.slane %v2950_v22, 1  ;;  %v3164_v42 = vrot.slane %v3163_v28, 1  ;;  %v1119_v15 = vpop.f32.mrf.mxu1 }
 0x121   : > { %v3006_v27 = vmax.f32 %v3004_v29, %v3005_v38  ;;  %v1950_v49 = vmax.f32 %v1948_v12, %v1949_v16  ;;  %vm11367_vm3 = vcmask 261125   ;;  %v3232_v51 = vrot.slane %v3231_v41, 4  ;;  %v8287_v29 = vld [vmem:[%s11301_s2] ss:$0 sm:$0xff] }
 0x122   : > { %v2014_v50 = vsel %vm11367_vm3, %v1654_v59, -inf  ;;  %v3297_v53 = vmax.f32 %v3295_v34, %v3296_v47  ;;  %v3077_v55 = vrot.slane %v3076_v39, 2  ;;  %v1655_v57 = vsel %vm1383_vm6, %v1173_v21, %v1519_v40  ;;  %v7475_v47 = vld [vmem:[%s8057_s13 + $0x78] sm:$0xff] }
 0x123   : > { %v3007_v54 = vrot.slane %v3006_v27, 2  ;;  %v988_v60 = vadd.f32 %v8089_v36, %v987_v48  ;;  %v3772_v61 = vsel %vm3651_vm0, %v3764_v45, %v3101_v37  ;;  %v3233_v0 = vmax.f32 %v3231_v41, %v3232_v51  ;;  %1031 = vmatmul.bf16.gmra.mxu0 %v7475_v47  ;;  %v1237_v47 = vpop.f32.mrf.mxu3 }
 0x124   : > { %v3298_v1 = vrot.slane %v3297_v53, 2  ;;  %v2015_v2 = vsel %vm1969_vm4, %v1655_v57, -inf  ;;  %v8277_v4 = vmax.f32 %v2950_v22, %v2951_v43  ;;  %v3165_v6 = vmax.f32 %v3163_v28, %v3164_v42 }
 0x125   : > { %v2016_v7 = vmax.f32 %v2014_v50, %v2015_v2  ;;  %v2077_v8 = vsel %vm2041_vm5, %v1655_v57, -inf  ;;  %v3008_v59 = vmax.f32 %v3006_v27, %v3007_v54  ;;  %v3234_v9 = vrot.slane %v3233_v0, 2  ;;  %v1174_v27 = vpop.f32.mrf.mxu2 }
 0x126   : > { %v3299_v10 = vmax.f32 %v3297_v53, %v3298_v1  ;;  %v2078_v12 = vrot.slane %v2077_v8, 4  ;;  %v1951_v13 = vrot.slane %v1950_v49, 1  ;;  %v8280_v14 = vmax.f32 %v3076_v39, %v3077_v55 }
 0x127   : > { %v2017_v36 = vrot.slane %v2016_v7, 4  ;;  %vm1309_vm2 = vcmp.gt.f32.partialorder %v988_v60, 0.0  ;;  %v3235_v18 = vmax.f32 %v3233_v0, %v3234_v9  ;;  %v1445_v22 = vmul.f32 0.01, %v988_v60 }
 0x128   : > { %v3300_v21 = vrot.slane %v3299_v10, 1  ;;  %v2079_v23 = vmax.f32 %v2077_v8, %v2078_v12  ;;  %v3780_v24 = vsel %vm3660_vm10, %v3772_v61, %v3165_v6  ;;  %v3357_v26 = vsel %vm2303_vm8, %v1633_v31, -inf  ;;  %v989_v31 = vpop.f32.mrf.mxu0  ;;  %v1122_v12 = vpop.f32.mrf.mxu1 }
 0x129   : > { %v2018_v28 = vmax.f32 %v2016_v7, %v2017_v36  ;;  %v1120_v30 = vadd.f32 %v8287_v29, %v1119_v15  ;;  %v3009_v16 = vrot.slane %v3008_v59, 1  ;;  %v3236_v33 = vrot.slane %v3235_v18, 1 }
 0x12a   : > { %v1581_v34 = vsel %vm1309_vm2, %v988_v60, %v1445_v22  ;;  %v3130_v37 = vsel %vm2098_vm11, %v8256_v20, -inf  ;;  %v3301_v38 = vmax.f32 %v3299_v10, %v3300_v21  ;;  %v2080_v40 = vrot.slane %v2079_v23, 2 }
 0x12b   : > { %v2019_v39 = vrot.slane %v2018_v28, 2  ;;  %v3131_v41 = vsel %vm11318_vm12, %v1581_v34, -inf  ;;  %v1952_v48 = vmax.f32 %v1950_v49, %v1951_v13  ;;  %v3079_v45 = vrot.slane %v8280_v14, 1 }
 0x12c   : > { %v3237_v43 = vmax.f32 %v3235_v18, %v3236_v33  ;;  %v3132_v42 = vmax.f32 %v3130_v37, %v3131_v41  ;;  %vm1362_vm7 = vcmp.gt.f32.partialorder %v1120_v30, 0.0  ;;  %v1498_v51 = vmul.f32 0.01, %v1120_v30 }
 0x12d   : > { %v2020_v50 = vmax.f32 %v2018_v28, %v2019_v39  ;;  %v1175_v53 = vadd.f32 %v8287_v29, %v1174_v27  ;;  %v3010_v20 = vmax.f32 %v3008_v59, %v3009_v16  ;;  %vm11368_vm14 = vcmask 1043456  }
 0x12e   : > { %v3788_v54 = vsel %vm11368_vm14, %v3780_v24, %v3237_v43  ;;  %v3133_v55 = vrot.slane %v3132_v42, 4  ;;  %v990_v60 = vadd.f32 %v8287_v29, %v989_v31  ;;  %vm11369_vm6 = vcmask 1044480  }
 0x12f   : > { %v8299_v61 = vsel %vm11369_vm6, %v3788_v54, %v3301_v38  ;;  %v2021_v49 = vrot.slane %v2020_v50, 1  ;;  %v2081_v0 = vmax.f32 %v2079_v23, %v2080_v40  ;;  %v1634_v1 = vsel %vm1362_vm7, %v1120_v30, %v1498_v51 }
 0x130   : > { %v3134_v2 = vmax.f32 %v3132_v42, %v3133_v55  ;;  %v3358_v6 = vsel %vm2305_vm9, %v1634_v1, -inf  ;;  %v3423_v7 = vsel %vm2377_vm13, %v1634_v1, -inf  ;;  %vm1384_vm3 = vcmp.gt.f32.partialorder %v1175_v53, 0.0 }
 0x131   : > { %v2145_v8 = vsel %vm2098_vm11, %v1655_v57, -inf  ;;  %v3359_v59 = vmax.f32 %v3357_v26, %v3358_v6  ;;  %v3424_v9 = vrot.slane %v3423_v7, 4  ;;  %v1520_v10 = vmul.f32 0.01, %v1175_v53 }
 0x132   : > { %v3135_v13 = vrot.slane %v3134_v2, 2  ;;  %vm1310_vm2 = vcmp.gt.f32.partialorder %v990_v60, 0.0  ;;  %v1446_v36 = vmul.f32 0.01, %v990_v60  ;;  %v1123_v15 = vadd.f32 %v8287_v29, %v1122_v12 }
 0x133   : > { %v3761_v18 = vsel %vm3642_vm15, %v8277_v4, %v3010_v20  ;;  %v3360_v21 = vrot.slane %v3359_v59, 4  ;;  %v3425_v23 = vmax.f32 %v3423_v7, %v3424_v9  ;;  %v8307_v22 = vsel %vm1384_vm3, %v1175_v53, %v1520_v10 }
 0x134   : > { %v2022_v24 = vmax.f32 %v2020_v50, %v2021_v49  ;;  %v2082_v28 = vrot.slane %v2081_v0, 1  ;;  %vm11370_vm7 = vcmask 261124   ;;  %v2146_v26 = vsel %vm11318_vm12, %v8307_v22, -inf }
 0x135   : > { %v3202_v57 = vsel %vm11370_vm7, %v1581_v34, -inf  ;;  %v3361_v30 = vmax.f32 %v3359_v59, %v3360_v21  ;;  %v3426_v16 = vrot.slane %v3425_v23, 2  ;;  %v2147_v33 = vmax.f32 %v2145_v8, %v2146_v26 }
 0x136   : > { %v8312_v37 = vsel %vm1310_vm2, %v990_v60, %v1446_v36  ;;  %v3136_v38 = vmax.f32 %v3134_v2, %v3135_v13  ;;  %vm11371_vm14 = vcmask 253952   ;;  %vm11372_vm6 = vcmask 259073   ;;  %v7525_v2 = vld [vmem:[%s8057_s13 + $0x208] sm:$0xff] }
 0x137   : > { %v3203_v4 = vsel %vm11371_vm14, %v8312_v37, -inf  ;;  %v3274_v39 = vsel %vm11372_vm6, %v8312_v37, -inf  ;;  %vm1363_vm3 = vcmp.gt.f32.partialorder %v1123_v15, 0.0  ;;  %v3362_v40 = vrot.slane %v3361_v30, 2  ;;  %1281 = vmatmul.bf16.gmra.mxu3 %v7525_v2 }
 0x138   : > { %v3427_v41 = vmax.f32 %v3425_v23, %v3426_v16  ;;  %v2148_v34 = vrot.slane %v2147_v33, 4  ;;  %v3204_v31 = vmax.f32 %v3202_v57, %v3203_v4  ;;  %v2083_v43 = vmax.f32 %v2081_v0, %v2082_v28  ;;  %v7513_v0 = vld [vmem:[%s8057_s13 + $0x1a8] sm:$0xff]  ;;  %v1177_v23 = vpop.f32.mrf.mxu2  ;;  %v992_v4 = vpop.f32.mrf.mxu0 }
 0x139   : > { %v3275_v42 = vrot.slane %v3274_v39, 4  ;;  %v1499_v27 = vmul.f32 0.01, %v1123_v15  ;;  %v1238_v50 = vadd.f32 %v8287_v29, %v1237_v47  ;;  %v3363_v51 = vmax.f32 %v3361_v30, %v3362_v40  ;;  %1221 = vmatmul.bf16.gmra.mxu2 %v7513_v0 }
 0x13a   : > { %v3428_v53 = vrot.slane %v3427_v41, 1  ;;  %v2149_v20 = vmax.f32 %v2147_v33, %v2148_v34  ;;  %v3205_v54 = vrot.slane %v3204_v31, 4  ;;  %v3648_v55 = vsel %vm3642_vm15, %v1952_v48, %v2022_v24 }
 0x13b   : > { %v3137_v60 = vrot.slane %v3136_v38, 1  ;;  %v3276_v49 = vmax.f32 %v3274_v39, %v3275_v42  ;;  %v1635_v1 = vsel %vm1363_vm3, %v1123_v15, %v1499_v27  ;;  %v3364_v6 = vrot.slane %v3363_v51, 1 }
 0x13c   : > { %v2150_v7 = vrot.slane %v2149_v20, 2  ;;  %v3206_v8 = vmax.f32 %v3204_v31, %v3205_v54  ;;  %vm1409_vm2 = vcmp.gt.f32.partialorder %v1238_v50, 0.0  ;;  %v3429_v59 = vmax.f32 %v3427_v41, %v3428_v53 }
 0x13d   : > { %v3277_v9 = vrot.slane %v3276_v49, 2  ;;  %vm11373_vm7 = vcmask 258048   ;;  %v1545_v12 = vmul.f32 0.01, %v1238_v50  ;;  %v3365_v13 = vmax.f32 %v3363_v51, %v3364_v6 }
 0x13e   : > { %v3479_v10 = vsel %vm11373_vm7, %v1635_v1, -inf  ;;  %v2151_v36 = vmax.f32 %v2149_v20, %v2150_v7  ;;  %v3207_v21 = vrot.slane %v3206_v8, 2  ;;  %v3080_v15 = vmax.f32 %v8280_v14, %v3079_v45  ;;  %vm11376_vm3 = vmmov %vm11373_vm7 }
 0x13f   : > { %v3480_v48 = vrot.slane %v3479_v10, 4  ;;  %v3278_v24 = vmax.f32 %v3276_v49, %v3277_v9  ;;  %v1681_v28 = vsel %vm1409_vm2, %v1238_v50, %v1545_v12  ;;  %v1178_v57 = vadd.f32 %v8287_v29, %v1177_v23 }
 0x140   : > { %vm11374_vm14 = vcmask 1045504   ;;  %v2152_v30 = vrot.slane %v2151_v36, 1  ;;  %v3208_v16 = vmax.f32 %v3206_v8, %v3207_v21  ;;  %v3769_v39 = vsel %vm3651_vm0, %v3761_v18, %v3080_v15  ;;  %v1239_v21 = vpop.f32.mrf.mxu3 }
 0x141   : > { %v3804_v26 = vsel %vm11374_vm14, %v8299_v61, %v3365_v13  ;;  %v3481_v33 = vmax.f32 %v3479_v10, %v3480_v48  ;;  %v3657_v40 = vsel %vm3651_vm0, %v3648_v55, %v2083_v43  ;;  %vm11375_vm6 = vcmask 1046528   ;;  %v1124_v10 = vpop.f32.mrf.mxu1 }
 0x142   : > { %v8333_v41 = vsel %vm11375_vm6, %v3804_v26, %v3429_v59  ;;  %v2988_v14 = vsel %vm11376_vm3, %v1681_v28, -inf  ;;  %v3138_v45 = vmax.f32 %v3136_v38, %v3137_v60  ;;  %v3209_v31 = vrot.slane %v3208_v16, 1  ;;  %vm11377_vm7 = vmmov %vm11375_vm6 }
 0x143   : > { %v3889_v34 = vrot.slane %v8333_v41, 1  ;;  %v3482_v47 = vrot.slane %v3481_v33, 2  ;;  %v3279_v42 = vrot.slane %v3278_v24, 1  ;;  %vm1385_vm2 = vcmp.gt.f32.partialorder %v1178_v57, 0.0 }
 0x144   : > { %v1521_v61 = vmul.f32 0.01, %v1178_v57  ;;  %v993_v27 = vadd.f32 %v8287_v29, %v992_v4  ;;  %v2153_v43 = vmax.f32 %v2151_v36, %v2152_v30  ;;  %vm11378_vm14 = vcmask 261124  }
 0x145   : > { %v3890_v18 = vsel %vm11377_vm7, %v11320_v17, %v3889_v34  ;;  %v2219_v50 = vsel %vm11378_vm14, %v8307_v22, -inf  ;;  %v2989_v38 = vrot.slane %v2988_v14, 4  ;;  %v3210_v53 = vmax.f32 %v3208_v16, %v3209_v31 }
 0x146   : > { %v8346_v51 = vmax.f32 %v8189_v62, %v3890_v18  ;;  %v8348_v20 = vmax.f32 %v3481_v33, %v3482_v47  ;;  %v1657_v54 = vsel %vm1385_vm2, %v1178_v57, %v1521_v61  ;;  %v3777_v55 = vsel %vm3660_vm10, %v3769_v39, %v3138_v45 }
 0x147   : > { %vm11379_vm6 = vcmask 261125   ;;  %vm11380_vm3 = vcmask 253952   ;;  %vm11381_vm12 = vcmask 259073   ;;  %v8354_v6 = vmax.f32 %v3278_v24, %v3279_v42 }
 0x148   : > { %v3541_v60 = vsel %vm11379_vm6, %v1635_v1, -inf  ;;  %v2220_v49 = vsel %vm11380_vm3, %v1657_v54, -inf  ;;  %v2282_v2 = vsel %vm11381_vm12, %v1657_v54, -inf  ;;  %vm11382_vm7 = vmmov %vm11379_vm6  ;;  %vm1311_vm14 = vcmp.gt.f32.partialorder %v993_v27, 0.0 }
 0x149   : > { %v3056_v22 = vsel %vm11382_vm7, %v1681_v28, -inf  ;;  %v2221_v7 = vmax.f32 %v2219_v50, %v2220_v49  ;;  %v3666_v8 = vsel %vm3660_vm10, %v3657_v40, %v2153_v43  ;;  %v8358_v0 = vmax.f32 %v2988_v14, %v2989_v38  ;;  %v1179_v28 = vpop.f32.mrf.mxu2 }
 0x14a   : > { %v2283_v59 = vrot.slane %v2282_v2, 4  ;;  %v1447_v9 = vmul.f32 0.01, %v993_v27  ;;  %vm11383_vm2 = vcmask 1043456   ;;  %v3484_v1 = vrot.slane %v8348_v20, 1 }
 0x14b   : > { %v3785_v12 = vsel %vm11383_vm2, %v3777_v55, %v3210_v53  ;;  %v2222_v13 = vrot.slane %v2221_v7, 4  ;;  %v1125_v36 = vadd.f32 %v8287_v29, %v1124_v10  ;;  %v3330_v15 = vsel %vm2303_vm8, %v8312_v37, -inf  ;;  %v7476_v37 = vld [vmem:[%s8057_s13 + $0x80] sm:$0xff]  ;;  %vm11384_vm7 = vmmov %vm11383_vm2 }
 0x14c   : > { %v2284_v48 = vmax.f32 %v2282_v2, %v2283_v59  ;;  %v1583_v23 = vsel %vm1311_vm14, %v993_v27, %v1447_v9  ;;  %v1240_v24 = vadd.f32 %v8287_v29, %v1239_v21  ;;  %v1180_v16 = vadd.f32 %v8287_v29, %v1179_v28  ;;  %1036 = vmatmul.bf16.gmra.mxu0 %v7476_v37 }
 0x14d   : > { %v2223_v57 = vmax.f32 %v2221_v7, %v2222_v13  ;;  %v3331_v26 = vsel %vm2305_vm9, %v1583_v23, -inf  ;;  %v3402_v30 = vsel %vm2377_vm13, %v1583_v23, -inf  ;;  %vm1364_vm12 = vcmp.gt.f32.partialorder %v1125_v36, 0.0 }
 0x14e   : > { %v2285_v33 = vrot.slane %v2284_v48, 2  ;;  %v3332_v4 = vmax.f32 %v3330_v15, %v3331_v26  ;;  %v3403_v39 = vrot.slane %v3402_v30, 4  ;;  %v2350_v14 = vsel %vm2303_vm8, %v1657_v54, -inf }
 0x14f   : > { %v2224_v40 = vrot.slane %v2223_v57, 2  ;;  %v1500_v45 = vmul.f32 0.01, %v1125_v36  ;;  %vm1410_vm6 = vcmp.gt.f32.partialorder %v1240_v24, 0.0  ;;  %v1546_v61 = vmul.f32 0.01, %v1240_v24 }
 0x150   : > { %v2286_v31 = vmax.f32 %v2284_v48, %v2285_v33  ;;  %v3333_v47 = vrot.slane %v3332_v4, 4  ;;  %v3404_v42 = vmax.f32 %v3402_v30, %v3403_v39  ;;  %vm1386_vm3 = vcmp.gt.f32.partialorder %v1180_v16, 0.0 }
 0x151   : > { %v2225_v27 = vmax.f32 %v2223_v57, %v2224_v40  ;;  %v1636_v18 = vsel %vm1364_vm12, %v1125_v36, %v1500_v45  ;;  %v1522_v43 = vmul.f32 0.01, %v1180_v16  ;;  %v8376_v7 = vsel %vm1410_vm6, %v1240_v24, %v1546_v61 }
 0x152   : > { %v2287_v50 = vrot.slane %v2286_v31, 1  ;;  %v3334_v38 = vmax.f32 %v3332_v4, %v3333_v47  ;;  %v3405_v53 = vrot.slane %v3404_v42, 2  ;;  %v1841_v55 = vsel %vm1739_vm1, %v1636_v18, -inf }
 0x153   : > { %v2226_v49 = vrot.slane %v2225_v27, 1  ;;  %v3542_v54 = vsel %vm1969_vm4, %v1841_v55, -inf  ;;  %v3607_v2 = vsel %vm2041_vm5, %v1841_v55, -inf  ;;  %v3057_v48 = vsel %vm1969_vm4, %v8376_v7, -inf }
 0x154   : > { %v2288_v59 = vmax.f32 %v2286_v31, %v2287_v50  ;;  %v3335_v9 = vrot.slane %v3334_v38, 2  ;;  %v3406_v10 = vmax.f32 %v3404_v42, %v3405_v53  ;;  %v3543_v13 = vmax.f32 %v3541_v60, %v3542_v54 }
 0x155   : > { %v2227_v36 = vmax.f32 %v2225_v27, %v2226_v49  ;;  %v3608_v21 = vrot.slane %v3607_v2, 4  ;;  %v3116_v23 = vsel %vm2041_vm5, %v8376_v7, -inf  ;;  %v3058_v26 = vmax.f32 %v3056_v22, %v3057_v48  ;;  %v994_v22 = vpop.f32.mrf.mxu0 }
 0x156   : > { %v3336_v15 = vmax.f32 %v3334_v38, %v3335_v9  ;;  %v3407_v28 = vrot.slane %v3406_v10, 1  ;;  %v3544_v57 = vrot.slane %v3543_v13, 4  ;;  %v3117_v33 = vrot.slane %v3116_v23, 4 }
 0x157   : > { %v3675_v30 = vsel %vm11384_vm7, %v3666_v8, %v2227_v36  ;;  %v3609_v24 = vmax.f32 %v3607_v2, %v3608_v21  ;;  %v1658_v4 = vsel %vm1386_vm3, %v1180_v16, %v1522_v43  ;;  %vm11385_vm14 = vcmask 1044480  }
 0x158   : > { %v3793_v60 = vsel %vm11385_vm14, %v3785_v12, %v8354_v6  ;;  %vm11386_vm2 = vmmov %vm11385_vm14  ;;  %v3337_v40 = vrot.slane %v3336_v15, 1  ;;  %v3545_v45 = vmax.f32 %v3543_v13, %v3544_v57  ;;  %v3059_v31 = vrot.slane %v3058_v26, 4 }
 0x159   : > { %v8387_v39 = vsel %vm11386_vm2, %v3675_v30, %v2288_v59  ;;  %v3610_v37 = vrot.slane %v3609_v24, 2  ;;  %v3118_v47 = vmax.f32 %v3116_v23, %v3117_v33  ;;  %v2351_v42 = vsel %vm2305_vm9, %v1658_v4, -inf }
 0x15a   : > { %v3338_v61 = vmax.f32 %v3336_v15, %v3337_v40  ;;  %v3546_v8 = vrot.slane %v3545_v45, 2  ;;  %v2352_v27 = vmax.f32 %v2350_v14, %v2351_v42  ;;  %v2413_v18 = vsel %vm2377_vm13, %v1658_v4, -inf }
 0x15b   : > { %v3408_v16 = vmax.f32 %v3406_v10, %v3407_v28  ;;  %v3611_v43 = vmax.f32 %v3609_v24, %v3610_v37  ;;  %v3060_v50 = vmax.f32 %v3058_v26, %v3059_v31  ;;  %v2414_v6 = vrot.slane %v2413_v18, 4  ;;  %v1127_v37 = vpop.f32.mrf.mxu1  ;;  %v7526_v31 = vld [vmem:[%s8057_s13 + $0x210] sm:$0xff] }
 0x15c   : > { %vm11387_vm12 = vcmask 1045504   ;;  %v3547_v38 = vmax.f32 %v3545_v45, %v3546_v8  ;;  %v2353_v53 = vrot.slane %v2352_v27, 4  ;;  %v995_v55 = vadd.f32 %v8287_v29, %v994_v22  ;;  %1286 = vmatmul.bf16.gmra.mxu3 %v7526_v31 }
 0x15d   : > { %v3801_v12 = vsel %vm11387_vm12, %v3793_v60, %v3338_v61  ;;  %v3485_v49 = vmax.f32 %v8348_v20, %v3484_v1  ;;  %v2991_v54 = vrot.slane %v8358_v0, 2  ;;  %vm11388_vm6 = vcmask 1046528   ;;  %v7514_v61 = vld [vmem:[%s8057_s13 + $0x1b0] sm:$0xff]  ;;  %vm11391_vm2 = vmmov %vm11387_vm12 }
 0x15e   : > { %v8398_v14 = vsel %vm11388_vm6, %v3801_v12, %v3408_v16  ;;  %v3612_v2 = vrot.slane %v3611_v43, 1  ;;  %v3548_v9 = vrot.slane %v3547_v38, 1  ;;  %v3119_v10 = vrot.slane %v3118_v47, 2  ;;  %vm11389_vm3 = vmmov %vm11388_vm6  ;;  %1226 = vmatmul.bf16.gmra.mxu2 %v7514_v61 }
 0x15f   : > { %v3868_v59 = vrot.slane %v8398_v14, 1  ;;  %v2354_v13 = vmax.f32 %v2352_v27, %v2353_v53  ;;  %v8403_v36 = vsel %vm2041_vm5, %v8252_v5, -inf  ;;  %v3061_v48 = vrot.slane %v3060_v50, 2  ;;  %vm11392_vm12 = vmmov %vm11389_vm3 }
 0x160   : > { %v3613_v21 = vmax.f32 %v3611_v43, %v3612_v2  ;;  %v2415_v23 = vmax.f32 %v2413_v18, %v2414_v6  ;;  %v3549_v1 = vmax.f32 %v3547_v38, %v3548_v9  ;;  %vm1312_vm7 = vcmp.gt.f32.partialorder %v995_v55, 0.0  ;;  %vm11393_vm6 = vmmov %vm11391_vm2 }
 0x161   : > { %v3869_v20 = vsel %vm11389_vm3, %v3866_v25, %v3868_v59  ;;  %v2355_v15 = vrot.slane %v2354_v13, 2  ;;  %v4017_v28 = vrot.slane %v8233_v35, 2  ;;  %v2992_v57 = vmax.f32 %v8358_v0, %v2991_v54 }
 0x162   : > { %v8413_v5 = vmax.f32 %v8221_v19, %v3869_v20  ;;  %v1448_v26 = vmul.f32 0.01, %v995_v55  ;;  %v11319_v30 = vrot.slane %v8346_v51, 2  ;;  %v3820_v24 = vsel %vm3642_vm15, %v3485_v49, %v3549_v1  ;;  %v1242_v49 = vpop.f32.mrf.mxu3  ;;  %v997_v1 = vpop.f32.mrf.mxu0 }
 0x163   : > { %v3120_v33 = vmax.f32 %v3118_v47, %v3119_v10  ;;  %v2356_v4 = vmax.f32 %v2354_v13, %v2355_v15  ;;  %v3828_v60 = vsel %vm3651_vm0, %v3820_v24, %v3613_v21  ;;  %v3062_v40 = vmax.f32 %v3060_v50, %v3061_v48  ;;  %v1129_v31 = vpop.f32.mrf.mxu1 }
 0x164   : > { %v4018_v25 = vrot.slane %v8413_v5, 2  ;;  %v1584_v45 = vsel %vm1312_vm7, %v995_v55, %v1448_v26  ;;  %v3891_v0 = vrot.slane %v3828_v60, 1  ;;  %v2416_v19 = vrot.slane %v2415_v23, 2  ;;  %v1182_v26 = vpop.f32.mrf.mxu2 }
 0x165   : > { %v2357_v42 = vrot.slane %v2356_v4, 1  ;;  %vm11390_vm14 = vcmask 258048   ;;  %v2993_v8 = vrot.slane %v2992_v57, 1  ;;  %v1128_v18 = vadd.f32 %v8287_v29, %v1127_v37 }
 0x166   : > { %v3458_v22 = vsel %vm11390_vm14, %v1584_v45, -inf  ;;  %v4019_v47 = vsel %vm11391_vm2, %v4017_v28, %v4018_v25  ;;  %v3892_v43 = vsel %vm11392_vm12, %v3889_v34, %v3891_v0  ;;  %v3980_v50 = vmax.f32 %v3828_v60, %v3891_v0  ;;  %vm11394_vm14 = vmmov %vm11391_vm2 }
 0x167   : > { %v3459_v27 = vrot.slane %v3458_v22, 4  ;;  %v8427_v16 = vmax.f32 %v8233_v35, %v4019_v47  ;;  %v3121_v6 = vrot.slane %v3120_v33, 1  ;;  %v3956_v12 = vmax.f32 %v8333_v41, %v3892_v43 }
 0x168   : > { %v3063_v38 = vrot.slane %v3062_v40, 1  ;;  %v2358_v53 = vmax.f32 %v2356_v4, %v2357_v42  ;;  %v8435_v54 = vmax.f32 %v8245_v58, %v8270_v46  ;;  %v4043_v2 = vrot.slane %v3980_v50, 2 }
 0x169   : > { %v3460_v55 = vmax.f32 %v3458_v22, %v3459_v27  ;;  %v2417_v35 = vmax.f32 %v2415_v23, %v2416_v19  ;;  %v1243_v9 = vadd.f32 %v8287_v29, %v1242_v49  ;;  %v4041_v10 = vrot.slane %v3956_v12, 2 }
 0x16a   : > { %v8440_v34 = vsel %vm11393_vm6, %v8387_v39, %v2358_v53  ;;  %v1501_v21 = vmul.f32 0.01, %v1128_v18  ;;  %v2994_v41 = vmax.f32 %v2992_v57, %v2993_v8  ;;  %vm1365_vm3 = vcmp.gt.f32.partialorder %v1128_v18, 0.0 }
 0x16b   : > { %v3461_v13 = vrot.slane %v3460_v55, 2  ;;  %vm1411_vm7 = vcmp.gt.f32.partialorder %v1243_v9, 0.0  ;;  %v1547_v48 = vmul.f32 0.01, %v1243_v9  ;;  %v4042_v58 = vsel %vm11394_vm14, %v11319_v30, %v4041_v10 }
 0x16c   : > { %v4044_v46 = vsel %vm11391_vm2, %v4041_v10, %v4043_v2  ;;  %v3064_v23 = vmax.f32 %v3062_v40, %v3063_v38  ;;  %v3122_v20 = vmax.f32 %v3120_v33, %v3121_v6  ;;  %v8447_v15 = vmax.f32 %v8346_v51, %v4042_v58  ;;  %v1244_v2 = vpop.f32.mrf.mxu3 }
 0x16d   : > { %v8449_v39 = vmax.f32 %v3956_v12, %v4044_v46  ;;  %v3462_v28 = vmax.f32 %v3460_v55, %v3461_v13  ;;  %v3184_v57 = vsel %vm2098_vm11, %v8376_v7, -inf  ;;  %v2418_v24 = vrot.slane %v2417_v35, 1 }
 0x16e   : > { %v1637_v4 = vsel %vm1365_vm3, %v1128_v18, %v1501_v21  ;;  %v1683_v60 = vsel %vm1411_vm7, %v1243_v9, %v1547_v48  ;;  %v1183_v37 = vadd.f32 %v8287_v29, %v1182_v26  ;;  %vm11396_vm12 = vcmask 258048   ;;  %v7477_v21 = vld [vmem:[%s8057_s13 + $0x88] sm:$0xff] }
 0x16f   : > { %11395 = vst [vmem:[#allocation3_spill] sm:$0xff] %v8449_v39  ;;  %v1939_v40 = vsel %vm11396_vm12, %v1637_v4, -inf  ;;  %vm11397_vm6 = vcmask 257024   ;;  %v998_v0 = vadd.f32 %v8287_v29, %v997_v1  ;;  %v1130_v42 = vadd.f32 %v8287_v29, %v1129_v31  ;;  %1041 = vmatmul.bf16.gmra.mxu0 %v7477_v21 }
 0x170   : > { %v3185_v33 = vsel %vm11397_vm6, %v1683_v60, -inf  ;;  %v3767_v19 = vsel %vm3642_vm15, %v2994_v41, %v3064_v23  ;;  %vm11398_vm14 = vcmask 261125   ;;  %vm1387_vm2 = vcmp.gt.f32.partialorder %v1183_v37, 0.0 }
 0x171   : > { %v3514_v22 = vsel %vm11398_vm14, %v1584_v45, -inf  ;;  %v3186_v7 = vmax.f32 %v3184_v57, %v3185_v33  ;;  %v3463_v61 = vrot.slane %v3462_v28, 1  ;;  %v1523_v8 = vmul.f32 0.01, %v1183_v37  ;;  %vm11399_vm12 = vmmov %vm11398_vm14  ;;  %v1184_v57 = vpop.f32.mrf.mxu2 }
 0x172   : > { %vm1313_vm3 = vcmp.gt.f32.partialorder %v998_v0, 0.0  ;;  %v1449_v47 = vmul.f32 0.01, %v998_v0  ;;  %v1940_v27 = vrot.slane %v1939_v40, 4  ;;  %vm1366_vm7 = vcmp.gt.f32.partialorder %v1130_v42, 0.0 }
 0x173   : > { %v3187_v18 = vrot.slane %v3186_v7, 4  ;;  %v1502_v43 = vmul.f32 0.01, %v1130_v42  ;;  %v3775_v50 = vsel %vm3651_vm0, %v3767_v19, %v3122_v20  ;;  %v8461_v6 = vmax.f32 %v2417_v35, %v2418_v24 }
 0x174   : > { %v1659_v12 = vsel %vm1387_vm2, %v1183_v37, %v1523_v8  ;;  %v1585_v38 = vsel %vm1313_vm3, %v998_v0, %v1449_v47  ;;  %v2005_v53 = vsel %vm11399_vm12, %v1637_v4, -inf  ;;  %vm11400_vm6 = vcmask 261124  }
 0x175   : > { %v3188_v45 = vmax.f32 %v3186_v7, %v3187_v18  ;;  %v3256_v55 = vsel %vm11400_vm6, %v1683_v60, -inf  ;;  %vm11401_vm14 = vcmask 258048   ;;  %v8466_v9 = vmax.f32 %v3462_v28, %v3463_v61 }
 0x176   : > { %v2469_v49 = vsel %vm11401_vm14, %v1659_v12, -inf  ;;  %v1790_v10 = vsel %vm1739_vm1, %v1585_v38, -inf  ;;  %v8470_v13 = vsel %vm1366_vm7, %v1130_v42, %v1502_v43  ;;  %v1245_v35 = vadd.f32 %v8287_v29, %v1244_v2 }
 0x177   : > { %v1941_v41 = vmax.f32 %v1939_v40, %v1940_v27  ;;  %v3189_v48 = vrot.slane %v3188_v45, 2  ;;  %v3515_v58 = vsel %vm1969_vm4, %v1790_v10, -inf  ;;  %v3586_v46 = vsel %vm2041_vm5, %v1790_v10, -inf }
 0x178   : > { %v2470_v23 = vrot.slane %v2469_v49, 4  ;;  %v3516_v20 = vmax.f32 %v3514_v22, %v3515_v58  ;;  %v3587_v1 = vrot.slane %v3586_v46, 4  ;;  %v2006_v28 = vsel %vm1969_vm4, %v8470_v13, -inf }
 0x179   : > { %v3190_v26 = vmax.f32 %v3188_v45, %v3189_v48  ;;  %v2007_v24 = vmax.f32 %v2005_v53, %v2006_v28  ;;  %v2070_v4 = vsel %vm2041_vm5, %v8470_v13, -inf  ;;  %v1185_v60 = vadd.f32 %v8287_v29, %v1184_v57  ;;  %v999_v48 = vpop.f32.mrf.mxu0 }
 0x17a   : > { %v3517_v37 = vrot.slane %v3516_v20, 4  ;;  %v3588_v31 = vmax.f32 %v3586_v46, %v3587_v1  ;;  %v2071_v40 = vrot.slane %v2070_v4, 4  ;;  %vm1412_vm2 = vcmp.gt.f32.partialorder %v1245_v35, 0.0 }
 0x17b   : > { %v1942_v33 = vrot.slane %v1941_v41, 2  ;;  %v3191_v0 = vrot.slane %v3190_v26, 1  ;;  %v2008_v42 = vrot.slane %v2007_v24, 4  ;;  %v1548_v19 = vmul.f32 0.01, %v1245_v35 }
 0x17c   : > { %v2471_v22 = vmax.f32 %v2469_v49, %v2470_v23  ;;  %v3518_v7 = vmax.f32 %v3516_v20, %v3517_v37  ;;  %v3589_v61 = vrot.slane %v3588_v31, 2  ;;  %v2072_v8 = vmax.f32 %v2070_v4, %v2071_v40 }
 0x17d   : > { %v3192_v47 = vmax.f32 %v3190_v26, %v3191_v0  ;;  %v2009_v27 = vmax.f32 %v2007_v24, %v2008_v42  ;;  %v8481_v18 = vsel %vm1412_vm2, %v1245_v35, %v1548_v19  ;;  %v1524_v43 = vmul.f32 0.01, %v1185_v60 }
 0x17e   : > { %v3519_v38 = vrot.slane %v3518_v7, 2  ;;  %v3590_v53 = vmax.f32 %v3588_v31, %v3589_v61  ;;  %v2073_v45 = vrot.slane %v2072_v8, 2  ;;  %vm1388_vm3 = vcmp.gt.f32.partialorder %v1185_v60, 0.0 }
 0x17f   : > { %v8484_v2 = vsel %vm3660_vm10, %v3775_v50, %v3192_v47  ;;  %v2010_v10 = vrot.slane %v2009_v27, 2  ;;  %vm11402_vm7 = vcmask 253952   ;;  %vm11403_vm12 = vcmask 259073  }
 0x180   : > { %v3257_v21 = vsel %vm11402_vm7, %v8481_v18, -inf  ;;  %v3316_v49 = vsel %vm11403_vm12, %v8481_v18, -inf  ;;  %v1943_v58 = vmax.f32 %v1941_v41, %v1942_v33  ;;  %vm11404_vm6 = vcmask 261125  }
 0x181   : > { %v2535_v35 = vsel %vm11404_vm6, %v1659_v12, -inf  ;;  %v3520_v46 = vmax.f32 %v3518_v7, %v3519_v38  ;;  %v3591_v23 = vrot.slane %v3590_v53, 1  ;;  %v2011_v20 = vmax.f32 %v2009_v27, %v2010_v10 }
 0x182   : > { %v3258_v1 = vmax.f32 %v3256_v55, %v3257_v21  ;;  %v3317_v28 = vrot.slane %v3316_v49, 4  ;;  %v8491_v57 = vsel %vm1388_vm3, %v1185_v60, %v1524_v43  ;;  %v2472_v50 = vrot.slane %v2471_v22, 2 }
 0x183   : > { %v3521_v26 = vrot.slane %v3520_v46, 1  ;;  %v2536_v24 = vsel %vm1969_vm4, %v8491_v57, -inf  ;;  %v1000_v4 = vadd.f32 %v8287_v29, %v999_v48  ;;  %v2074_v37 = vmax.f32 %v2072_v8, %v2073_v45 }
 0x184   : > { %v3259_v31 = vrot.slane %v3258_v1, 4  ;;  %v3318_v40 = vmax.f32 %v3316_v49, %v3317_v28  ;;  %v2537_v41 = vmax.f32 %v2535_v35, %v2536_v24  ;;  %v1944_v33 = vrot.slane %v1943_v58, 1 }
 0x185   : > { %v3522_v12 = vmax.f32 %v3520_v46, %v3521_v26  ;;  %v3592_v0 = vmax.f32 %v3590_v53, %v3591_v23  ;;  %v2597_v55 = vsel %vm2041_vm5, %v8491_v57, -inf  ;;  %v2012_v42 = vrot.slane %v2011_v20, 1  ;;  %v1132_v53 = vpop.f32.mrf.mxu1  ;;  %v7527_v26 = vld [vmem:[%s8057_s13 + $0x218] sm:$0xff] }
 0x186   : > { %v3260_v60 = vmax.f32 %v3258_v1, %v3259_v31  ;;  %v3319_v19 = vrot.slane %v3318_v40, 2  ;;  %v2538_v7 = vrot.slane %v2537_v41, 4  ;;  %v2598_v47 = vrot.slane %v2597_v55, 4  ;;  %1291 = vmatmul.bf16.gmra.mxu3 %v7527_v26 }
 0x187   : > { %v3817_v61 = vsel %vm3642_vm15, %v8466_v9, %v3522_v12  ;;  %vm1314_vm14 = vcmp.gt.f32.partialorder %v1000_v4, 0.0  ;;  %v1450_v27 = vmul.f32 0.01, %v1000_v4  ;;  %v2473_v8 = vmax.f32 %v2471_v22, %v2472_v50 }
 0x188   : > { %v3825_v43 = vsel %vm3651_vm0, %v3817_v61, %v3592_v0  ;;  %v2075_v38 = vrot.slane %v2074_v37, 1  ;;  %v3261_v45 = vrot.slane %v3260_v60, 2  ;;  %v2539_v21 = vmax.f32 %v2537_v41, %v2538_v7 }
 0x189   : > { %v3870_v10 = vrot.slane %v3825_v43, 1  ;;  %v2599_v49 = vmax.f32 %v2597_v55, %v2598_v47  ;;  %v1133_v48 = vadd.f32 %v8287_v29, %v1132_v53  ;;  %v1945_v35 = vmax.f32 %v1943_v58, %v1944_v33  ;;  %v7515_v58 = vld [vmem:[%s8057_s13 + $0x1b8] sm:$0xff] }
 0x18a   : > { %v3262_v46 = vmax.f32 %v3260_v60, %v3261_v45  ;;  %v3320_v23 = vmax.f32 %v3318_v40, %v3319_v19  ;;  %v1586_v9 = vsel %vm1314_vm14, %v1000_v4, %v1450_v27  ;;  %vm11405_vm2 = vcmask 1046528   ;;  %1231 = vmatmul.bf16.gmra.mxu2 %v7515_v58 }
 0x18b   : > { %v3871_v22 = vsel %vm11405_vm2, %v3868_v59, %v3870_v10  ;;  %v2013_v1 = vmax.f32 %v2011_v20, %v2012_v42  ;;  %v2540_v28 = vrot.slane %v2539_v21, 2  ;;  %v2600_v50 = vrot.slane %v2599_v49, 2  ;;  %vm11407_vm7 = vmmov %vm11405_vm2 }
 0x18c   : > { %v3615_v24 = vrot.slane %v8403_v36, 4  ;;  %v8508_v31 = vmax.f32 %v8398_v14, %v3871_v22  ;;  %v3263_v41 = vrot.slane %v3262_v46, 1  ;;  %vm11406_vm3 = vcmask 258048  }
 0x18d   : > { %v1918_v12 = vsel %vm11406_vm3, %v1586_v9, -inf  ;;  %v8515_v4 = vsel %vm11407_vm7, %v8440_v34, %v8461_v6  ;;  %v2474_v40 = vrot.slane %v2473_v8, 1  ;;  %v2076_v59 = vmax.f32 %v2074_v37, %v2075_v38 }
 0x18e   : > { %vm1367_vm12 = vcmp.gt.f32.partialorder %v1133_v48, 0.0  ;;  %v8517_v20 = vmax.f32 %v3825_v43, %v3870_v10  ;;  %v3264_v33 = vmax.f32 %v3262_v46, %v3263_v41  ;;  %v3321_v0 = vrot.slane %v3320_v23, 1  ;;  %v1247_v10 = vpop.f32.mrf.mxu3 }
 0x18f   : > { %v1503_v55 = vmul.f32 0.01, %v1133_v48  ;;  %v3647_v14 = vsel %vm3642_vm15, %v1945_v35, %v2013_v1  ;;  %v2541_v42 = vmax.f32 %v2539_v21, %v2540_v28  ;;  %v2601_v60 = vmax.f32 %v2599_v49, %v2600_v50  ;;  %v1002_v21 = vpop.f32.mrf.mxu0  ;;  %v1187_v35 = vpop.f32.mrf.mxu2 }
 0x190   : > { %v1919_v19 = vrot.slane %v1918_v12, 4  ;;  %v4020_v7 = vrot.slane %v8508_v31, 2  ;;  %vm11408_vm6 = vcmask 1043456   ;;  %v2136_v37 = vsel %vm2098_vm11, %v8470_v13, -inf }
 0x191   : > { %v3791_v34 = vsel %vm11408_vm6, %v8484_v2, %v3264_v33  ;;  %v8523_v6 = vsel %vm1367_vm12, %v1133_v48, %v1503_v55  ;;  %v3553_v61 = vrot.slane %v8435_v54, 4  ;;  %v8529_v47 = vmax.f32 %v8403_v36, %v3615_v24 }
 0x192   : > { %v3900_v27 = vrot.slane %v8515_v4, 1  ;;  %v2475_v43 = vmax.f32 %v2473_v8, %v2474_v40  ;;  %v4022_v38 = vrot.slane %v8517_v20, 2  ;;  %v8534_v45 = vsel %vm3651_vm0, %v3647_v14, %v2076_v59 }
 0x193   : > { %v3322_v53 = vmax.f32 %v3320_v23, %v3321_v0  ;;  %vm11409_vm14 = vcmask 257024   ;;  %v2542_v13 = vrot.slane %v2541_v42, 1  ;;  %vm11410_vm2 = vcmask 261125  }
 0x194   : > { %v2137_v2 = vsel %vm11409_vm14, %v8523_v6, -inf  ;;  %v1978_v49 = vsel %vm11410_vm2, %v1586_v9, -inf  ;;  %v1248_v36 = vadd.f32 %v8287_v29, %v1247_v10  ;;  %vm11411_vm3 = vcmask 1045504  }
 0x195   : > { %v2138_v48 = vmax.f32 %v2136_v37, %v2137_v2  ;;  %v8545_v8 = vsel %vm11411_vm3, %v4018_v25, %v4020_v7  ;;  %v2602_v46 = vrot.slane %v2601_v60, 1  ;;  %v1920_v23 = vmax.f32 %v1918_v12, %v1919_v19  ;;  %v1134_v12 = vpop.f32.mrf.mxu1 }
 0x196   : > { %v1188_v22 = vadd.f32 %v8287_v29, %v1187_v35  ;;  %vm1413_vm7 = vcmp.gt.f32.partialorder %v1248_v36, 0.0  ;;  %v1549_v28 = vmul.f32 0.01, %v1248_v36  ;;  %v1003_v9 = vadd.f32 %v8287_v29, %v1002_v21 }
 0x197   : > { %v2139_v1 = vrot.slane %v2138_v48, 4  ;;  %v3384_v50 = vsel %vm2303_vm8, %v8481_v18, -inf  ;;  %v2663_v24 = vsel %vm2098_vm11, %v8491_v57, -inf  ;;  %v1135_v0 = vadd.f32 %v8287_v29, %v1134_v12 }
 0x198   : > { %vm1389_vm12 = vcmp.gt.f32.partialorder %v1188_v22, 0.0  ;;  %v1525_v26 = vmul.f32 0.01, %v1188_v22  ;;  %v1685_v25 = vsel %vm1413_vm7, %v1248_v36, %v1549_v28  ;;  %vm1315_vm6 = vcmp.gt.f32.partialorder %v1003_v9, 0.0 }
 0x199   : > { %v2140_v41 = vmax.f32 %v2138_v48, %v2139_v1  ;;  %v1451_v58 = vmul.f32 0.01, %v1003_v9  ;;  %v3385_v40 = vsel %vm2305_vm9, %v1685_v25, -inf  ;;  %v3444_v59 = vsel %vm2377_vm13, %v1685_v25, -inf }
 0x19a   : > { %v8555_v33 = vsel %vm1389_vm12, %v1188_v22, %v1525_v26  ;;  %v3386_v18 = vmax.f32 %v3384_v50, %v3385_v40  ;;  %v3445_v14 = vrot.slane %v3444_v59, 4  ;;  %vm11412_vm2 = vcmask 1044480  }
 0x19b   : > { %v2141_v55 = vrot.slane %v2140_v41, 2  ;;  %v2664_v19 = vsel %vm11409_vm14, %v8555_v33, -inf  ;;  %v3799_v57 = vsel %vm11412_vm2, %v3791_v34, %v3322_v53  ;;  %v2543_v37 = vmax.f32 %v2541_v42, %v2542_v13 }
 0x19c   : > { %v2665_v2 = vmax.f32 %v2663_v24, %v2664_v19  ;;  %v8561_v10 = vsel %vm1315_vm6, %v1003_v9, %v1451_v58  ;;  %v3387_v48 = vrot.slane %v3386_v18, 4  ;;  %v3446_v36 = vmax.f32 %v3444_v59, %v3445_v14  ;;  %v1249_v24 = vpop.f32.mrf.mxu3  ;;  %v7478_v19 = vld [vmem:[%s8057_s13 + $0x90] sm:$0xff] }
 0x19d   : > { %v2142_v21 = vmax.f32 %v2140_v41, %v2141_v55  ;;  %v1979_v35 = vsel %vm1969_vm4, %v8561_v10, -inf  ;;  %v2603_v22 = vmax.f32 %v2601_v60, %v2602_v46  ;;  %vm1368_vm3 = vcmp.gt.f32.partialorder %v1135_v0, 0.0  ;;  %1046 = vmatmul.bf16.gmra.mxu0 %v7478_v19 }
 0x19e   : > { %v2666_v1 = vrot.slane %v2665_v2, 4  ;;  %v1980_v28 = vmax.f32 %v1978_v49, %v1979_v35  ;;  %v3388_v26 = vmax.f32 %v3386_v18, %v3387_v48  ;;  %v3447_v25 = vrot.slane %v3446_v36, 2 }
 0x19f   : > { %v2143_v50 = vrot.slane %v2142_v21, 1  ;;  %v2049_v34 = vsel %vm2041_vm5, %v8561_v10, -inf  ;;  %v3710_v42 = vsel %vm3642_vm15, %v2475_v43, %v2543_v37  ;;  %v1921_v53 = vrot.slane %v1920_v23, 2 }
 0x1a0   : > { %v2667_v13 = vmax.f32 %v2665_v2, %v2666_v1  ;;  %v1504_v9 = vmul.f32 0.01, %v1135_v0  ;;  %v3389_v58 = vrot.slane %v3388_v26, 2  ;;  %v3448_v12 = vmax.f32 %v3446_v36, %v3447_v25 }
 0x1a1   : > { %v2144_v41 = vmax.f32 %v2142_v21, %v2143_v50  ;;  %v1250_v60 = vadd.f32 %v8287_v29, %v1249_v24  ;;  %vm11413_vm7 = vcmask 261124   ;;  %v2050_v40 = vrot.slane %v2049_v34, 4 }
 0x1a2   : > { %v2210_v49 = vsel %vm11413_vm7, %v8523_v6, -inf  ;;  %v2668_v46 = vrot.slane %v2667_v13, 2  ;;  %v8572_v59 = vsel %vm1368_vm3, %v1135_v0, %v1504_v9  ;;  %v3390_v55 = vmax.f32 %v3388_v26, %v3389_v58 }
 0x1a3   : > { %v8576_v43 = vsel %vm3660_vm10, %v8534_v45, %v2144_v41  ;;  %v3449_v18 = vrot.slane %v3448_v12, 1  ;;  %v1981_v14 = vrot.slane %v1980_v28, 4  ;;  %v3718_v37 = vsel %vm3651_vm0, %v3710_v42, %v2603_v22  ;;  %v1189_v42 = vpop.f32.mrf.mxu2 }
 0x1a4   : > { %v2669_v2 = vmax.f32 %v2667_v13, %v2668_v46  ;;  %vm11414_vm12 = vcmask 253952   ;;  %vm11415_vm6 = vcmask 259073   ;;  %v1922_v21 = vmax.f32 %v1920_v23, %v1921_v53  ;;  %v8587_v23 = vld [vmem:[%s11301_s2] ss:$0 sm:$0xff] }
 0x1a5   : > { %v2211_v29 = vsel %vm11414_vm12, %v8572_v59, -inf  ;;  %v2275_v6 = vsel %vm11415_vm6, %v8572_v59, -inf  ;;  %v3391_v0 = vrot.slane %v3390_v55, 1  ;;  %vm1414_vm14 = vcmp.gt.f32.partialorder %v1250_v60, 0.0 }
 0x1a6   : > { %v2212_v48 = vmax.f32 %v2210_v49, %v2211_v29  ;;  %v3450_v45 = vmax.f32 %v3448_v12, %v3449_v18  ;;  %v2670_v36 = vrot.slane %v2669_v2, 1  ;;  %v2276_v35 = vrot.slane %v2275_v6, 4 }
 0x1a7   : > { %v1550_v1 = vmul.f32 0.01, %v1250_v60  ;;  %v3392_v50 = vmax.f32 %v3390_v55, %v3391_v0  ;;  %v1982_v26 = vmax.f32 %v1980_v28, %v1981_v14  ;;  %v2051_v25 = vmax.f32 %v2049_v34, %v2050_v40  ;;  %v1004_v40 = vpop.f32.mrf.mxu0 }
 0x1a8   : > { %v2213_v22 = vrot.slane %v2212_v48, 4  ;;  %v2671_v13 = vmax.f32 %v2669_v2, %v2670_v36  ;;  %v2277_v9 = vmax.f32 %v2275_v6, %v2276_v35  ;;  %v1190_v53 = vadd.f32 %v8587_v23, %v1189_v42  ;;  %v1137_v6 = vpop.f32.mrf.mxu1 }
 0x1a9   : > { %v1686_v24 = vsel %vm1414_vm14, %v1250_v60, %v1550_v1  ;;  %vm11416_vm2 = vcmask 1045504   ;;  %vm11418_vm7 = vcmask 258048   ;;  %v1923_v12 = vrot.slane %v1922_v21, 1 }
 0x1aa   : > { %v4023_v41 = vsel %vm11416_vm2, %v4020_v7, %v4022_v38  ;;  %vm11417_vm3 = vmmov %vm11416_vm2  ;;  %v2214_v34 = vmax.f32 %v2212_v48, %v2213_v22  ;;  %v3500_v58 = vsel %vm11418_vm7, %v1686_v24, -inf  ;;  %vm11419_vm12 = vcmask 1046528  }
 0x1ab   : > { %v3807_v28 = vsel %vm11417_vm3, %v3799_v57, %v3392_v50  ;;  %v8601_v49 = vsel %vm3660_vm10, %v3718_v37, %v2671_v13  ;;  %v2278_v46 = vrot.slane %v2277_v9, 2  ;;  %v8605_v20 = vmax.f32 %v8413_v5, %v8545_v8 }
 0x1ac   : > { %v8598_v60 = vsel %vm11419_vm12, %v3807_v28, %v3450_v45  ;;  %v1983_v55 = vrot.slane %v1982_v26, 2  ;;  %v2215_v7 = vrot.slane %v2214_v34, 2  ;;  %v3501_v38 = vrot.slane %v3500_v58, 4 }
 0x1ad   : > { %vm11420_vm6 = vcmask 261124   ;;  %v2052_v18 = vrot.slane %v2051_v25, 2  ;;  %vm1390_vm14 = vcmp.gt.f32.partialorder %v1190_v53, 0.0  ;;  %v1526_v14 = vmul.f32 0.01, %v1190_v53 }
 0x1ae   : > { %v2735_v57 = vsel %vm11420_vm6, %v8555_v33, -inf  ;;  %v2216_v19 = vmax.f32 %v2214_v34, %v2215_v7  ;;  %v2279_v2 = vmax.f32 %v2277_v9, %v2278_v46  ;;  %v3502_v29 = vmax.f32 %v3500_v58, %v3501_v38 }
 0x1af   : > { %v1005_v37 = vadd.f32 %v8587_v23, %v1004_v40  ;;  %v8611_v0 = vmax.f32 %v8508_v31, %v4023_v41  ;;  %v8613_v5 = vmax.f32 %v1922_v21, %v1923_v12  ;;  %v8615_v8 = vsel %vm1390_vm14, %v1190_v53, %v1526_v14  ;;  %v1252_v41 = vpop.f32.mrf.mxu3 }
 0x1b0   : > { %v1138_v48 = vadd.f32 %v8587_v23, %v1137_v6  ;;  %v8618_v45 = vmax.f32 %v1982_v26, %v1983_v55  ;;  %v2217_v33 = vrot.slane %v2216_v19, 1  ;;  %vm11421_vm2 = vcmask 253952  }
 0x1b1   : > { %v2736_v36 = vsel %vm11421_vm2, %v8615_v8, -inf  ;;  %vm11422_vm3 = vcmask 259073   ;;  %v2109_v1 = vsel %vm2098_vm11, %v8561_v10, -inf  ;;  %v3503_v31 = vrot.slane %v3502_v29, 2 }
 0x1b2   : > { %v2797_v35 = vsel %vm11422_vm3, %v8615_v8, -inf  ;;  %v2737_v50 = vmax.f32 %v2735_v57, %v2736_v36  ;;  %vm1316_vm7 = vcmp.gt.f32.partialorder %v1005_v37, 0.0  ;;  %v8626_v21 = vmax.f32 %v2051_v25, %v2052_v18  ;;  %v1192_v36 = vpop.f32.mrf.mxu2 }
 0x1b3   : > { %v2218_v22 = vmax.f32 %v2216_v19, %v2217_v33  ;;  %v2280_v42 = vrot.slane %v2279_v2, 1  ;;  %v1452_v13 = vmul.f32 0.01, %v1005_v37  ;;  %v2798_v9 = vrot.slane %v2797_v35, 4 }
 0x1b4   : > { %v2738_v26 = vrot.slane %v2737_v50, 4  ;;  %vm1369_vm12 = vcmp.gt.f32.partialorder %v1138_v48, 0.0  ;;  %v1505_v53 = vmul.f32 0.01, %v1138_v48  ;;  %v1985_v28 = vrot.slane %v8618_v45, 1 }
 0x1b5   : > { %vm11423_vm6 = vcmask 1043456   ;;  %v1588_v58 = vsel %vm1316_vm7, %v1005_v37, %v1452_v13  ;;  %v1253_v10 = vadd.f32 %v8587_v23, %v1252_v41  ;;  %v8632_v12 = vmax.f32 %v3502_v29, %v3503_v31  ;;  %v1007_v37 = vpop.f32.mrf.mxu0 }
 0x1b6   : > { %v3674_v34 = vsel %vm11423_vm6, %v8576_v43, %v2218_v22  ;;  %v2739_v25 = vmax.f32 %v2737_v50, %v2738_v26  ;;  %vm11424_vm14 = vcmask 257024   ;;  %v2341_v40 = vsel %vm2303_vm8, %v8572_v59, -inf }
 0x1b7   : > { %v2110_v46 = vsel %vm11424_vm14, %v1588_v58, -inf  ;;  %v2281_v55 = vmax.f32 %v2279_v2, %v2280_v42  ;;  %vm11425_vm2 = vcmask 261125   ;;  %v1641_v57 = vsel %vm1369_vm12, %v1138_v48, %v1505_v53 }
 0x1b8   : > { %v3568_v7 = vsel %vm11425_vm2, %v1686_v24, -inf  ;;  %v2111_v38 = vmax.f32 %v2109_v1, %v2110_v46  ;;  %v2740_v18 = vrot.slane %v2739_v25, 2  ;;  %v2799_v14 = vmax.f32 %v2797_v35, %v2798_v9 }
 0x1b9   : > { %v2342_v43 = vsel %vm2305_vm9, %v1641_v57, -inf  ;;  %v2406_v19 = vsel %vm2377_vm13, %v1641_v57, -inf  ;;  %vm1415_vm3 = vcmp.gt.f32.partialorder %v1253_v10, 0.0  ;;  %v3505_v31 = vrot.slane %v8632_v12, 1 }
 0x1ba   : > { %v2112_v29 = vrot.slane %v2111_v38, 4  ;;  %v2343_v6 = vmax.f32 %v2341_v40, %v2342_v43  ;;  %v2407_v33 = vrot.slane %v2406_v19, 4  ;;  %v2741_v59 = vmax.f32 %v2739_v25, %v2740_v18 }
 0x1bb   : > { %v1551_v2 = vmul.f32 0.01, %v1253_v10  ;;  %v1193_v24 = vadd.f32 %v8587_v23, %v1192_v36  ;;  %vm11426_vm7 = vcmask 1044480   ;;  %v1008_v50 = vadd.f32 %v8587_v23, %v1007_v37 }
 0x1bc   : > { %v3683_v48 = vsel %vm11426_vm7, %v3674_v34, %v2281_v55  ;;  %v2344_v1 = vrot.slane %v2343_v6, 4  ;;  %v2408_v35 = vmax.f32 %v2406_v19, %v2407_v33  ;;  %v2742_v22 = vrot.slane %v2741_v59, 1 }
 0x1bd   : > { %v2800_v42 = vrot.slane %v2799_v14, 2  ;;  %v2113_v13 = vmax.f32 %v2111_v38, %v2112_v29  ;;  %v1687_v26 = vsel %vm1415_vm3, %v1253_v10, %v1551_v2  ;;  %vm1391_vm12 = vcmp.gt.f32.partialorder %v1193_v24, 0.0 }
 0x1be   : > { %v2345_v9 = vmax.f32 %v2343_v6, %v2344_v1  ;;  %v2409_v53 = vrot.slane %v2408_v35, 2  ;;  %v1892_v41 = vsel %vm1739_vm1, %v1687_v26, -inf  ;;  %v2743_v25 = vmax.f32 %v2741_v59, %v2742_v22 }
 0x1bf   : > { %v3569_v46 = vsel %vm1969_vm4, %v1892_v41, -inf  ;;  %v3628_v40 = vsel %vm2041_vm5, %v1892_v41, -inf  ;;  %v1527_v34 = vmul.f32 0.01, %v1193_v24  ;;  %vm11427_vm6 = vcmask 261124  }
 0x1c0   : > { %v2183_v55 = vsel %vm11427_vm6, %v1588_v58, -inf  ;;  %v2346_v57 = vrot.slane %v2345_v9, 2  ;;  %v2410_v18 = vmax.f32 %v2408_v35, %v2409_v53  ;;  %v3570_v43 = vmax.f32 %v3568_v7, %v3569_v46 }
 0x1c1   : > { %vm11428_vm14 = vcmask 1043456   ;;  %v3629_v38 = vrot.slane %v3628_v40, 4  ;;  %v1663_v19 = vsel %vm1391_vm12, %v1193_v24, %v1527_v34  ;;  %v2863_v37 = vsel %vm2303_vm8, %v8615_v8, -inf }
 0x1c2   : > { %v3734_v10 = vsel %vm11428_vm14, %v8601_v49, %v2743_v25  ;;  %v2801_v29 = vmax.f32 %v2799_v14, %v2800_v42  ;;  %v2114_v6 = vrot.slane %v2113_v13, 2  ;;  %v2347_v33 = vmax.f32 %v2345_v9, %v2346_v57 }
 0x1c3   : > { %v2411_v36 = vrot.slane %v2410_v18, 1  ;;  %v3571_v59 = vrot.slane %v3570_v43, 4  ;;  %v3630_v2 = vmax.f32 %v3628_v40, %v3629_v38  ;;  %v2864_v1 = vsel %vm2305_vm9, %v1663_v19, -inf }
 0x1c4   : > { %v2925_v58 = vsel %vm2377_vm13, %v1663_v19, -inf  ;;  %v2348_v35 = vrot.slane %v2347_v33, 1  ;;  %v2865_v22 = vmax.f32 %v2863_v37, %v2864_v1  ;;  %vm1317_vm2 = vcmp.gt.f32.partialorder %v1008_v50, 0.0 }
 0x1c5   : > { %v2412_v7 = vmax.f32 %v2410_v18, %v2411_v36  ;;  %v3572_v49 = vmax.f32 %v3570_v43, %v3571_v59  ;;  %v3631_v26 = vrot.slane %v3630_v2, 2  ;;  %v2926_v24 = vrot.slane %v2925_v58, 4 }
 0x1c6   : > { %v1453_v53 = vmul.f32 0.01, %v1008_v50  ;;  %v2802_v41 = vrot.slane %v2801_v29, 1  ;;  %v2115_v8 = vmax.f32 %v2113_v13, %v2114_v6  ;;  %v2349_v14 = vmax.f32 %v2347_v33, %v2348_v35 }
 0x1c7   : > { %v2866_v42 = vrot.slane %v2865_v22, 4  ;;  %v3573_v9 = vrot.slane %v3572_v49, 2  ;;  %v3632_v25 = vmax.f32 %v3630_v2, %v3631_v26  ;;  %v2927_v46 = vmax.f32 %v2925_v58, %v2926_v24 }
 0x1c8   : > { %v8655_v40 = vsel %vm1317_vm2, %v1008_v50, %v1453_v53  ;;  %vm11429_vm3 = vcmask 1045504   ;;  %vm11430_vm7 = vcmask 253952   ;;  %vm11431_vm12 = vcmask 259073  }
 0x1c9   : > { %v3692_v34 = vsel %vm11429_vm3, %v3683_v48, %v2349_v14  ;;  %v2867_v57 = vmax.f32 %v2865_v22, %v2866_v42  ;;  %v2184_v18 = vsel %vm11430_vm7, %v8655_v40, -inf  ;;  %v2254_v43 = vsel %vm11431_vm12, %v8655_v40, -inf  ;;  %vm11434_vm2 = vmmov %vm11429_vm3 }
 0x1ca   : > { %vm11432_vm6 = vcmask 1046528   ;;  %v3574_v13 = vmax.f32 %v3572_v49, %v3573_v9  ;;  %v3633_v19 = vrot.slane %v3632_v25, 1  ;;  %v2928_v37 = vrot.slane %v2927_v46, 2 }
 0x1cb   : > { %v8663_v38 = vsel %vm11432_vm6, %v3692_v34, %v2412_v7  ;;  %v2054_v6 = vrot.slane %v8626_v21, 1  ;;  %v2868_v33 = vrot.slane %v2867_v57, 2  ;;  %v2185_v50 = vmax.f32 %v2183_v55, %v2184_v18  ;;  %vm11435_vm3 = vmmov %vm11432_vm6 }
 0x1cc   : > { %v2255_v36 = vrot.slane %v2254_v43, 4  ;;  %v3506_v48 = vmax.f32 %v8632_v12, %v3505_v31  ;;  %v2803_v59 = vmax.f32 %v2801_v29, %v2802_v41  ;;  %v3575_v2 = vrot.slane %v3574_v13, 1  ;;  %vm11436_vm7 = vmmov %vm11435_vm3 }
 0x1cd   : > { %v2929_v1 = vmax.f32 %v2927_v46, %v2928_v37  ;;  %v3634_v58 = vmax.f32 %v3632_v25, %v3633_v19  ;;  %v2869_v35 = vmax.f32 %v2867_v57, %v2868_v33  ;;  %v2186_v22 = vrot.slane %v2185_v50, 4  ;;  %v1194_v19 = vpop.f32.mrf.mxu2  ;;  %vm11437_vm6 = vmmov %vm11435_vm3 }
 0x1ce   : > { %v2256_v7 = vmax.f32 %v2254_v43, %v2255_v36  ;;  %v1986_v49 = vmax.f32 %v8618_v45, %v1985_v28  ;;  %v2116_v26 = vrot.slane %v2115_v8, 1  ;;  %v3576_v24 = vmax.f32 %v3574_v13, %v3575_v2  ;;  %v1139_v28 = vpop.f32.mrf.mxu1  ;;  %v1254_v13 = vpop.f32.mrf.mxu3 }
 0x1cf   : > { %v2930_v53 = vrot.slane %v2929_v1, 1  ;;  %v2055_v55 = vmax.f32 %v8626_v21, %v2054_v6  ;;  %v2870_v14 = vrot.slane %v2869_v35, 1  ;;  %v2187_v42 = vmax.f32 %v2185_v50, %v2186_v22 }
 0x1d0   : > { %v2257_v9 = vrot.slane %v2256_v7, 2  ;;  %v11323_v12 = vrot.slane %v8598_v60, 1  ;;  %vm11433_vm14 = vcmask 1044480   ;;  %v3823_v29 = vsel %vm3642_vm15, %v3506_v48, %v3576_v24 }
 0x1d1   : > { %v3742_v31 = vsel %vm11433_vm14, %v3734_v10, %v2803_v59  ;;  %v2931_v41 = vmax.f32 %v2929_v1, %v2930_v53  ;;  %v3831_v25 = vsel %vm3651_vm0, %v3823_v29, %v3634_v58  ;;  %v2871_v46 = vmax.f32 %v2869_v35, %v2870_v14 }
 0x1d2   : > { %v2188_v34 = vrot.slane %v2187_v42, 2  ;;  %v2258_v45 = vmax.f32 %v2256_v7, %v2257_v9  ;;  %v3644_v57 = vsel %vm3642_vm15, %v8613_v5, %v1986_v49  ;;  %v2117_v21 = vmax.f32 %v2115_v8, %v2116_v26 }
 0x1d3   : > { %v3912_v18 = vrot.slane %v3831_v25, 1  ;;  %v1140_v43 = vadd.f32 %v8587_v23, %v1139_v28  ;;  %v3750_v10 = vsel %vm11434_vm2, %v3742_v31, %v2871_v46  ;;  %v1255_v6 = vadd.f32 %v8587_v23, %v1254_v13 }
 0x1d4   : > { %v2189_v37 = vmax.f32 %v2187_v42, %v2188_v34  ;;  %v1195_v33 = vadd.f32 %v8587_v23, %v1194_v19  ;;  %v8687_v5 = vsel %vm11436_vm7, %v3750_v10, %v2931_v41  ;;  %v2259_v8 = vrot.slane %v2258_v45, 1  ;;  %v1009_v19 = vpop.f32.mrf.mxu0 }
 0x1d5   : > { %v3913_v50 = vsel %vm11435_vm3, %v11323_v12, %v3912_v18  ;;  %v3983_v36 = vmax.f32 %v3831_v25, %v3912_v18  ;;  %v3653_v48 = vsel %vm3651_vm0, %v3644_v57, %v2055_v55  ;;  %v11324_v2 = vrot.slane %v8687_v5, 1 }
 0x1d6   : > { %v8691_v59 = vmax.f32 %v8598_v60, %v3913_v50  ;;  %v2190_v1 = vrot.slane %v2189_v37, 1  ;;  %v3662_v58 = vsel %vm3660_vm10, %v3653_v48, %v2117_v21  ;;  %vm1370_vm12 = vcmp.gt.f32.partialorder %v1140_v43, 0.0 }
 0x1d7   : > { %v4064_v35 = vrot.slane %v3983_v36, 2  ;;  %v1506_v22 = vmul.f32 0.01, %v1140_v43  ;;  %v3902_v49 = vsel %vm11437_vm6, %v3900_v27, %v11324_v2  ;;  %v1552_v24 = vmul.f32 0.01, %v1255_v6 }
 0x1d8   : > { %v11322_v7 = vrot.slane %v8691_v59, 2  ;;  %v2191_v26 = vmax.f32 %v2189_v37, %v2190_v1  ;;  %v8702_v53 = vmax.f32 %v8515_v4, %v3902_v49  ;;  %v2260_v55 = vmax.f32 %v2258_v45, %v2259_v8 }
 0x1d9   : > { %vm1416_vm14 = vcmp.gt.f32.partialorder %v1255_v6, 0.0  ;;  %v1528_v14 = vmul.f32 0.01, %v1195_v33  ;;  %v3554_v42 = vmax.f32 %v8435_v54, %v3553_v61  ;;  %vm11438_vm3 = vcmask 1043456  }
 0x1da   : > { %v4065_v9 = vsel %vm11434_vm2, %v11322_v7, %v4064_v35  ;;  %v3671_v31 = vsel %vm11438_vm3, %v3662_v58, %v2191_v26  ;;  %vm1392_vm7 = vcmp.gt.f32.partialorder %v1195_v33, 0.0  ;;  %v3491_v27 = vrot.slane %v8264_v32, 1 }
 0x1db   : > { %v8713_v29 = vmax.f32 %v8691_v59, %v4065_v9  ;;  %vm11440_vm6 = vcmask 1044480   ;;  %v1642_v41 = vsel %vm1370_vm12, %v1140_v43, %v1506_v22  ;;  %v8719_v25 = vsel %vm1416_vm14, %v1255_v6, %v1552_v24 }
 0x1dc   : > { %v8716_v4 = vsel %vm11440_vm6, %v3671_v31, %v2260_v55  ;;  %v4641_v54 = vrot.slane %v8427_v16, 7  ;;  %v4642_v61 = vrot.slane %v8605_v20, 7  ;;  %v4644_v46 = vrot.slane %v8611_v0, 7 }
 0x1dd   : > { %11439 = vst [vmem:[#allocation4_spill] sm:$0xff] %v8713_v29  ;;  %v3617_v34 = vrot.slane %v8529_v47, 2  ;;  %vm11441_vm2 = vcmask 258048   ;;  %v8728_v57 = vsel %vm1392_vm7, %v1195_v33, %v1528_v14  ;;  %v3555_v21 = vrot.slane %v3554_v42, 2  ;;  %v1142_v14 = vpop.f32.mrf.mxu1 }
 0x1de   : > { %v2462_v45 = vsel %vm11441_vm2, %v1642_v41, -inf  ;;  %vm11442_vm3 = vmmov %vm11441_vm2  ;;  %v4643_v43 = vsel %vm3642_vm15, %v4641_v54, %v4642_v61  ;;  %v4645_v13 = vsel %vm3642_vm15, %v4642_v61, %v4644_v46  ;;  %v4465_v37 = vrot.slane %v8427_v16, 5  ;;  %v1257_v61 = vpop.f32.mrf.mxu3 }
 0x1df   : > { %v1960_v28 = vsel %vm11442_vm3, %v8719_v25, -inf  ;;  %vm11443_vm12 = vmmov %vm11441_vm2  ;;  %v7682_v10 = vpack.i.bf16 %v4645_v13, %v4643_v43  ;;  %v4466_v6 = vrot.slane %v8605_v20, 5  ;;  %v4468_v50 = vrot.slane %v8611_v0, 5 }
 0x1e0   : > { %v2981_v18 = vsel %vm11443_vm12, %v8728_v57, -inf  ;;  %v2463_v36 = vrot.slane %v2462_v45, 4  ;;  %v1961_v8 = vrot.slane %v1960_v28, 4  ;;  %v4233_v33 = vrot.slane %v8427_v16, 2 }
 0x1e1   : > { %v4234_v48 = vrot.slane %v8605_v20, 2  ;;  %7683 = vrot.lane.b32.xlu1 %v7682_v10, %s7962_s19  ;;  %v4467_v1 = vsel %vm3660_vm10, %v4465_v37, %v4466_v6  ;;  %v4469_v58 = vsel %vm3660_vm10, %v4466_v6, %v4468_v50  ;;  %v4236_v35 = vrot.slane %v8611_v0, 2  ;;  %v1197_v37 = vpop.f32.mrf.mxu2 }
 0x1e2   : > { %v1010_v22 = vadd.f32 %v8587_v23, %v1009_v19  ;;  %v3618_v49 = vmax.f32 %v8529_v47, %v3617_v34  ;;  %v2982_v26 = vrot.slane %v2981_v18, 4  ;;  %v7672_v24 = vpack.i.bf16 %v4469_v58, %v4467_v1 }
 0x1e3   : > { %vm11444_vm14 = vcmask 1045504   ;;  %v1143_v54 = vadd.f32 %v8587_v23, %v1142_v14  ;;  %v3556_v46 = vmax.f32 %v3554_v42, %v3555_v21  ;;  %v2464_v43 = vmax.f32 %v2462_v45, %v2463_v36 }
 0x1e4   : > { %v4235_v55 = vsel %vm11444_vm14, %v4233_v33, %v4234_v48  ;;  %vm11445_vm7 = vmmov %vm11444_vm14  ;;  %vm1318_vm6 = vcmp.gt.f32.partialorder %v1010_v22, 0.0  ;;  %v1454_v31 = vmul.f32 0.01, %v1010_v22  ;;  %7673 = vrot.lane.b32.xlu0 %v7672_v24, %s7963_s20  ;;  %v1258_v47 = vadd.f32 %v8587_v23, %v1257_v61 }
 0x1e5   : > { %v4237_v9 = vsel %vm11445_vm7, %v4234_v48, %v4236_v35  ;;  %v1962_v34 = vmax.f32 %v1960_v28, %v1961_v8  ;;  %vm1371_vm2 = vcmp.gt.f32.partialorder %v1143_v54, 0.0  ;;  %v1507_v10 = vmul.f32 0.01, %v1143_v54 }
 0x1e6   : > { %v7692_v13 = vpack.i.bf16 %v4237_v9, %v4235_v55  ;;  %v1590_v19 = vsel %vm1318_vm6, %v1010_v22, %v1454_v31  ;;  %v2314_v6 = vsel %vm2303_vm8, %v8655_v40, -inf  ;;  %v2983_v50 = vmax.f32 %v2981_v18, %v2982_v26 }
 0x1e7   : > { %v2315_v42 = vsel %vm2305_vm9, %v1590_v19, -inf  ;;  %v1198_v45 = vadd.f32 %v8587_v23, %v1197_v37  ;;  %v8755_v36 = vsel %vm1371_vm2, %v1143_v54, %v1507_v10  ;;  %vm1417_vm3 = vcmp.gt.f32.partialorder %v1258_v47, 0.0 }
 0x1e8   : > { %7693 = vrot.lane.b32.xlu2 %v7692_v13, %s7964_s21  ;;  %v2316_v21 = vmax.f32 %v2314_v6, %v2315_v42  ;;  %v1553_v28 = vmul.f32 0.01, %v1258_v47  ;;  %v3557_v8 = vrot.slane %v3556_v46, 1  ;;  %v2465_v33 = vrot.slane %v2464_v43, 2 }
 0x1e9   : > { %vm11446_vm12 = vcmask 261125   ;;  %v2527_v40 = vsel %vm1969_vm4, %v8755_v36, -inf  ;;  %v3433_v18 = vrot.slane %v8237_v44, 2  ;;  %v3619_v1 = vrot.slane %v3618_v49, 1 }
 0x1ea   : > { %v2526_v48 = vsel %vm11446_vm12, %v1642_v41, -inf  ;;  %v1963_v58 = vrot.slane %v1962_v34, 2  ;;  %v2317_v35 = vrot.slane %v2316_v21, 4  ;;  %vm11447_vm14 = vmmov %vm11446_vm12  ;;  %v2984_v26 = vrot.slane %v2983_v50, 2 }
 0x1eb   : > { %v2032_v22 = vsel %vm11447_vm14, %v8719_v25, -inf  ;;  %v1689_v24 = vsel %vm1417_vm3, %v1258_v47, %v1553_v28  ;;  %v1529_v55 = vmul.f32 0.01, %v1198_v45  ;;  %v2528_v9 = vmax.f32 %v2526_v48, %v2527_v40  ;;  %vm11448_vm6 = vmmov %vm11446_vm12  ;;  %v7479_v48 = vld [vmem:[%s8057_s13 + $0x98] sm:$0xff] }
 0x1ec   : > { %v2318_v14 = vmax.f32 %v2316_v21, %v2317_v35  ;;  %v2590_v31 = vsel %vm2041_vm5, %v8755_v36, -inf  ;;  %vm1393_vm7 = vcmp.gt.f32.partialorder %v1198_v45, 0.0  ;;  %v3492_v41 = vmax.f32 %v8264_v32, %v3491_v27  ;;  %1051 = vmatmul.bf16.gmra.mxu0 %v7479_v48 }
 0x1ed   : > { %v3558_v54 = vmax.f32 %v3556_v46, %v3557_v8  ;;  %v2466_v61 = vmax.f32 %v2464_v43, %v2465_v33  ;;  %v2033_v13 = vsel %vm1969_vm4, %v1689_v24, -inf  ;;  %v8771_v25 = vsel %vm2305_vm9, %v8210_v3, -inf }
 0x1ee   : > { %v1964_v47 = vmax.f32 %v1962_v34, %v1963_v58  ;;  %v2319_v10 = vrot.slane %v2318_v14, 2  ;;  %v2385_v37 = vsel %vm2377_vm13, %v1590_v19, -inf  ;;  %v8775_v6 = vmax.f32 %v8237_v44, %v3433_v18 }
 0x1ef   : > { %v2591_v42 = vrot.slane %v2590_v31, 4  ;;  %v2034_v21 = vmax.f32 %v2032_v22, %v2033_v13  ;;  %v8777_v28 = vsel %vm1393_vm7, %v1198_v45, %v1529_v55  ;;  %v3620_v32 = vmax.f32 %v3618_v49, %v3619_v1 }
 0x1f0   : > { %v2985_v27 = vmax.f32 %v2983_v50, %v2984_v26  ;;  %v2320_v46 = vmax.f32 %v2318_v14, %v2319_v10  ;;  %v2529_v43 = vrot.slane %v2528_v9, 4  ;;  %v3821_v8 = vsel %vm3642_vm15, %v3492_v41, %v3558_v54 }
 0x1f1   : > { %v2467_v3 = vrot.slane %v2466_v61, 1  ;;  %v3047_v34 = vsel %vm11448_vm6, %v8728_v57, -inf  ;;  %v2386_v33 = vrot.slane %v2385_v37, 4  ;;  %v1965_v19 = vrot.slane %v1964_v47, 1 }
 0x1f2   : > { %v2321_v40 = vrot.slane %v2320_v46, 1  ;;  %v2091_v44 = vsel %vm2041_vm5, %v1689_v24, -inf  ;;  %v3048_v45 = vsel %vm1969_vm4, %v8777_v28, -inf  ;;  %v2592_v50 = vmax.f32 %v2590_v31, %v2591_v42 }
 0x1f3   : > { %v2035_v18 = vrot.slane %v2034_v21, 4  ;;  %v4554_v1 = vrot.slane %v8605_v20, 6  ;;  %v8789_v58 = vsel %vm3651_vm0, %v3821_v8, %v3620_v32  ;;  %v2986_v57 = vrot.slane %v2985_v27, 1  ;;  %v1012_v8 = vpop.f32.mrf.mxu0 }
 0x1f4   : > { %v2322_v35 = vmax.f32 %v2320_v46, %v2321_v40  ;;  %v2530_v22 = vmax.f32 %v2528_v9, %v2529_v43  ;;  %v8791_v26 = vmax.f32 %v2385_v37, %v2386_v33  ;;  %v2092_v55 = vrot.slane %v2091_v44, 4 }
 0x1f5   : > { %v3049_v14 = vmax.f32 %v3047_v34, %v3048_v45  ;;  %v4553_v41 = vrot.slane %v8427_v16, 6  ;;  %v8794_v54 = vmax.f32 %v2466_v61, %v2467_v3  ;;  %v8796_v13 = vmax.f32 %v1964_v47, %v1965_v19 }
 0x1f6   : > { %vm11449_vm2 = vcmask 1045504   ;;  %v4556_v10 = vrot.slane %v8611_v0, 6  ;;  %v2593_v42 = vrot.slane %v2592_v50, 2  ;;  %v2036_v32 = vmax.f32 %v2034_v21, %v2035_v18 }
 0x1f7   : > { %v8800_v31 = vsel %vm11449_vm2, %v8716_v4, %v2322_v35  ;;  %v3109_v9 = vsel %vm2041_vm5, %v8777_v28, -inf  ;;  %v4555_v37 = vsel %vm3651_vm0, %v4553_v41, %v4554_v1  ;;  %v8806_v46 = vmax.f32 %v2985_v27, %v2986_v57  ;;  %v1259_v57 = vpop.f32.mrf.mxu3 }
 0x1f8   : > { %v2531_v43 = vrot.slane %v2530_v22, 2  ;;  %v2654_v61 = vsel %vm2098_vm11, %v8755_v36, -inf  ;;  %v4557_v47 = vsel %vm3651_vm0, %v4554_v1, %v4556_v10  ;;  %v2093_v3 = vmax.f32 %v2091_v44, %v2092_v55  ;;  %v1144_v1 = vpop.f32.mrf.mxu1 }
 0x1f9   : > { %v2163_v34 = vsel %vm2098_vm11, %v1689_v24, -inf  ;;  %v3050_v21 = vrot.slane %v3049_v14, 4  ;;  %v3110_v33 = vrot.slane %v3109_v9, 4  ;;  %v7677_v48 = vpack.i.bf16 %v4557_v47, %v4555_v37 }
 0x1fa   : > { %v4145_v19 = vrot.slane %v8427_v16, 1  ;;  %v4146_v27 = vrot.slane %v8605_v20, 1  ;;  %v2594_v40 = vmax.f32 %v2592_v50, %v2593_v42  ;;  %v2037_v45 = vrot.slane %v2036_v32, 2 }
 0x1fb   : > { %v11321_v18 = vrot.slane %v8611_v0, 1  ;;  %v1013_v36 = vadd.f32 %v8587_v23, %v1012_v8  ;;  %v8817_v35 = vmax.f32 %v2530_v22, %v2531_v43  ;;  %7678 = vrot.lane.b32.xlu0 %v7677_v48, %s7964_s21  ;;  %vm11450_vm3 = vcmask 1046528   ;;  %v1199_v48 = vpop.f32.mrf.mxu2  ;;  %v1014_v30 = vpop.f32.mrf.mxu0 }
 0x1fc   : > { %v4147_v24 = vsel %vm11450_vm3, %v4145_v19, %v4146_v27  ;;  %v1145_v44 = vadd.f32 %v8587_v23, %v1144_v1  ;;  %v1260_v55 = vadd.f32 %v8587_v23, %v1259_v57  ;;  %v2094_v41 = vrot.slane %v2093_v3, 2  ;;  %vm11451_vm12 = vmmov %vm11450_vm3 }
 0x1fd   : > { %v3051_v10 = vmax.f32 %v3049_v14, %v3050_v21  ;;  %v4149_v50 = vsel %vm11451_vm12, %v4146_v27, %v11321_v18  ;;  %vm1319_vm14 = vcmp.gt.f32.partialorder %v1013_v36, 0.0  ;;  %v3111_v42 = vmax.f32 %v3109_v9, %v3110_v33 }
 0x1fe   : > { %v7687_v37 = vpack.i.bf16 %v4149_v50, %v4147_v24  ;;  %v1455_v47 = vmul.f32 0.01, %v1013_v36  ;;  %vm1372_vm7 = vcmp.gt.f32.partialorder %v1145_v44, 0.0  ;;  %v2038_v22 = vmax.f32 %v2036_v32, %v2037_v45 }
 0x1ff   : > { %v1508_v43 = vmul.f32 0.01, %v1145_v44  ;;  %vm1418_vm6 = vcmp.gt.f32.partialorder %v1260_v55, 0.0  ;;  %v1554_v8 = vmul.f32 0.01, %v1260_v55  ;;  %v2533_v19 = vrot.slane %v8817_v35, 1 }
 0x200   : > { %v2595_v1 = vrot.slane %v2594_v40, 1  ;;  %7688 = vrot.lane.b32.xlu1 %v7687_v37, %s7963_s20  ;;  %v1591_v14 = vsel %vm1319_vm14, %v1013_v36, %v1455_v47  ;;  %v1200_v21 = vadd.f32 %v8587_v23, %v1199_v48  ;;  %v3052_v57 = vrot.slane %v3051_v10, 2 }
 0x201   : > { %v3175_v9 = vsel %vm2098_vm11, %v8777_v28, -inf  ;;  %v8831_v33 = vsel %vm1372_vm7, %v1145_v44, %v1508_v43  ;;  %v8833_v27 = vsel %vm1418_vm6, %v1260_v55, %v1554_v8  ;;  %v2095_v32 = vmax.f32 %v2093_v3, %v2094_v41 }
 0x202   : > { %v3112_v45 = vrot.slane %v3111_v42, 2  ;;  %vm11452_vm2 = vcmask 258048   ;;  %vm11453_vm3 = vcmask 257024   ;;  %v2039_v37 = vrot.slane %v2038_v22, 1 }
 0x203   : > { %v2441_v24 = vsel %vm11452_vm2, %v1591_v14, -inf  ;;  %v2164_v50 = vsel %vm11453_vm3, %v8833_v27, -inf  ;;  %vm11454_vm12 = vmmov %vm11453_vm3  ;;  %vm1394_vm14 = vcmp.gt.f32.partialorder %v1200_v21, 0.0  ;;  %v1530_v48 = vmul.f32 0.01, %v1200_v21 }
 0x204   : > { %v2655_v36 = vsel %vm11454_vm12, %v8831_v33, -inf  ;;  %v2165_v47 = vmax.f32 %v2163_v34, %v2164_v50  ;;  %v4321_v28 = vrot.slane %v8427_v16, 3  ;;  %v4322_v44 = vrot.slane %v8605_v20, 3  ;;  %vm11457_vm2 = vmmov %vm11453_vm3 }
 0x205   : > { %v4324_v3 = vrot.slane %v8611_v0, 3  ;;  %v3053_v55 = vmax.f32 %v3051_v10, %v3052_v57  ;;  %v2442_v41 = vrot.slane %v2441_v24, 4  ;;  %v1015_v8 = vadd.f32 %v8587_v23, %v1014_v30 }
 0x206   : > { %v2166_v43 = vrot.slane %v2165_v47, 4  ;;  %v2656_v17 = vmax.f32 %v2654_v61, %v2655_v36  ;;  %v8844_v18 = vsel %vm1394_vm14, %v1200_v21, %v1530_v48  ;;  %vm11455_vm7 = vcmask 1044480   ;;  %v1262_v36 = vpop.f32.mrf.mxu3 }
 0x207   : > { %v4323_v7 = vsel %vm11455_vm7, %v4321_v28, %v4322_v44  ;;  %vm11456_vm6 = vmmov %vm11455_vm7  ;;  %v8848_v50 = vmax.f32 %v2594_v40, %v2595_v1  ;;  %v3113_v12 = vmax.f32 %v3111_v42, %v3112_v45  ;;  %v3176_v49 = vsel %vm11457_vm2, %v8844_v18, -inf  ;;  %v1147_v40 = vpop.f32.mrf.mxu1 }
 0x208   : > { %v4325_v34 = vsel %vm11456_vm6, %v4322_v44, %v4324_v3  ;;  %v2167_v2 = vmax.f32 %v2165_v47, %v2166_v43  ;;  %v2096_v4 = vrot.slane %v2095_v32, 1  ;;  %v3177_v10 = vmax.f32 %v3175_v9, %v3176_v49 }
 0x209   : > { %v7697_v57 = vpack.i.bf16 %v4325_v34, %v4323_v7  ;;  %vm1320_vm3 = vcmp.gt.f32.partialorder %v1015_v8, 0.0  ;;  %v2040_v29 = vmax.f32 %v2038_v22, %v2039_v37  ;;  %v3054_v30 = vrot.slane %v3053_v55, 1 }
 0x20a   : > { %v2443_v61 = vmax.f32 %v2441_v24, %v2442_v41  ;;  %v1456_v21 = vmul.f32 0.01, %v1015_v8  ;;  %v2657_v48 = vrot.slane %v2656_v17, 4  ;;  %v2168_v28 = vrot.slane %v2167_v2, 2 }
 0x20b   : > { %v3178_v39 = vrot.slane %v3177_v10, 4  ;;  %7698 = vrot.lane.b32.xlu0 %v7697_v57, %s7962_s19  ;;  %v1263_v42 = vadd.f32 %v8587_v23, %v1262_v36  ;;  %v2534_v1 = vmax.f32 %v8817_v35, %v2533_v19  ;;  %v3114_v45 = vrot.slane %v3113_v12, 1 }
 0x20c   : > { %v8855_v47 = vsel %vm1320_vm3, %v1015_v8, %v1456_v21  ;;  %v1148_v7 = vadd.f32 %v8587_v23, %v1147_v40  ;;  %vm11458_vm12 = vcmask 261125   ;;  %v2097_v37 = vmax.f32 %v2095_v32, %v2096_v4  ;;  %v7480_v32 = vld [vmem:[%s8057_s13 + $0xa0] sm:$0xff] }
 0x20d   : > { %v2499_v49 = vsel %vm11458_vm12, %v1591_v14, -inf  ;;  %v3179_v22 = vmax.f32 %v3177_v10, %v3178_v39  ;;  %v2500_v9 = vsel %vm1969_vm4, %v8855_v47, -inf  ;;  %v2569_v24 = vsel %vm2041_vm5, %v8855_v47, -inf  ;;  %1056 = vmatmul.bf16.gmra.mxu0 %v7480_v32 }
 0x20e   : > { %v3055_v44 = vmax.f32 %v3053_v55, %v3054_v30  ;;  %v2444_v3 = vrot.slane %v2443_v61, 2  ;;  %v2501_v41 = vmax.f32 %v2499_v49, %v2500_v9  ;;  %v3650_v35 = vsel %vm3642_vm15, %v8796_v13, %v2040_v29  ;;  %v1202_v13 = vpop.f32.mrf.mxu2 }
 0x20f   : > { %v2658_v19 = vmax.f32 %v2656_v17, %v2657_v48  ;;  %v2169_v43 = vmax.f32 %v2167_v2, %v2168_v28  ;;  %v1555_v8 = vmul.f32 0.01, %v1263_v42  ;;  %v8867_v39 = vsel %vm3642_vm15, %v8794_v54, %v2534_v1 }
 0x210   : > { %v2570_v14 = vrot.slane %v2569_v24, 4  ;;  %v1509_v34 = vmul.f32 0.01, %v1148_v7  ;;  %vm1419_vm14 = vcmp.gt.f32.partialorder %v1263_v42, 0.0  ;;  %v3115_v10 = vmax.f32 %v3113_v12, %v3114_v45 }
 0x211   : > { %v3180_v57 = vrot.slane %v3179_v22, 2  ;;  %v2502_v4 = vrot.slane %v2501_v41, 4  ;;  %vm1373_vm7 = vcmp.gt.f32.partialorder %v1148_v7, 0.0  ;;  %v3659_v55 = vsel %vm3651_vm0, %v3650_v35, %v2097_v37 }
 0x212   : > { %v3766_v29 = vsel %vm3642_vm15, %v8806_v46, %v3055_v44  ;;  %v2445_v17 = vmax.f32 %v2443_v61, %v2444_v3  ;;  %vm11459_vm6 = vcmask 261124   ;;  %v2659_v54 = vrot.slane %v2658_v19, 2 }
 0x213   : > { %v2237_v2 = vsel %vm11459_vm6, %v8833_v27, -inf  ;;  %v2170_v30 = vrot.slane %v2169_v43, 1  ;;  %v8875_v21 = vsel %vm1419_vm14, %v1263_v42, %v1555_v8  ;;  %v1203_v12 = vadd.f32 %v8587_v23, %v1202_v13  ;;  %vm11462_vm12 = vmmov %vm11459_vm6 }
 0x214   : > { %v2571_v36 = vmax.f32 %v2569_v24, %v2570_v14  ;;  %v1645_v48 = vsel %vm1373_vm7, %v1148_v7, %v1509_v34  ;;  %vm11460_vm2 = vcmask 253952   ;;  %vm11461_vm3 = vcmask 259073   ;;  %vm11463_vm14 = vmmov %vm11459_vm6 }
 0x215   : > { %v2238_v28 = vsel %vm11460_vm2, %v8875_v21, -inf  ;;  %v2296_v46 = vsel %vm11461_vm3, %v8875_v21, -inf  ;;  %v8883_v61 = vsel %vm3651_vm0, %v3766_v29, %v3115_v10  ;;  %v3181_v27 = vmax.f32 %v3179_v22, %v3180_v57  ;;  %vm11464_vm7 = vmmov %vm11460_vm2 }
 0x216   : > { %v2503_v40 = vmax.f32 %v2501_v41, %v2502_v4  ;;  %v2239_v1 = vmax.f32 %v2237_v2, %v2238_v28  ;;  %v2446_v45 = vrot.slane %v2445_v17, 1  ;;  %v2726_v42 = vsel %vm11462_vm12, %v8831_v33, -inf  ;;  %vm11465_vm6 = vmmov %vm11461_vm3  ;;  %v1017_v41 = vpop.f32.mrf.mxu0 }
 0x217   : > { %v3247_v49 = vsel %vm11463_vm14, %v8844_v18, -inf  ;;  %v2297_v7 = vrot.slane %v2296_v46, 4  ;;  %v8889_v9 = vmax.f32 %v2658_v19, %v2659_v54  ;;  %v2171_v24 = vmax.f32 %v2169_v43, %v2170_v30  ;;  %vm11466_vm3 = vmmov %vm11464_vm7 }
 0x218   : > { %v2727_v37 = vsel %vm11464_vm7, %v1645_v48, -inf  ;;  %v2240_v44 = vrot.slane %v2239_v1, 4  ;;  %v2572_v3 = vrot.slane %v2571_v36, 2  ;;  %v2790_v35 = vsel %vm11465_vm6, %v1645_v48, -inf  ;;  %vm11467_vm12 = vmmov %vm11465_vm6 }
 0x219   : > { %v2298_v22 = vmax.f32 %v2296_v46, %v2297_v7  ;;  %vm1395_vm2 = vcmp.gt.f32.partialorder %v1203_v12, 0.0  ;;  %v3182_v8 = vrot.slane %v3181_v27, 1  ;;  %v2504_v14 = vrot.slane %v2503_v40, 2 }
 0x21a   : > { %v2241_v34 = vmax.f32 %v2239_v1, %v2240_v44  ;;  %v1531_v33 = vmul.f32 0.01, %v1203_v12  ;;  %v8893_v10 = vmax.f32 %v2445_v17, %v2446_v45  ;;  %v8895_v18 = vmax.f32 %v2726_v42, %v2727_v37 }
 0x21b   : > { %v8898_v19 = vsel %vm2303_vm8, %v1645_v48, -inf  ;;  %v2299_v43 = vrot.slane %v2298_v22, 2  ;;  %v2791_v57 = vrot.slane %v2790_v35, 4  ;;  %v1018_v29 = vadd.f32 %v8587_v23, %v1017_v41 }
 0x21c   : > { %v2242_v4 = vrot.slane %v2241_v34, 2  ;;  %v8900_v32 = vsel %vm1395_vm2, %v1203_v12, %v1531_v33  ;;  %v3668_v2 = vsel %vm3660_vm10, %v3659_v55, %v2171_v24  ;;  %v3183_v30 = vmax.f32 %v3181_v27, %v3182_v8  ;;  %v1149_v24 = vpop.f32.mrf.mxu1 }
 0x21d   : > { %v2300_v13 = vmax.f32 %v2298_v22, %v2299_v43  ;;  %v3248_v54 = vsel %vm11466_vm3, %v8900_v32, -inf  ;;  %v3309_v17 = vsel %vm11467_vm12, %v8900_v32, -inf  ;;  %v2505_v28 = vmax.f32 %v2503_v40, %v2504_v14  ;;  %v1264_v40 = vpop.f32.mrf.mxu3 }
 0x21e   : > { %v2573_v48 = vmax.f32 %v2571_v36, %v2572_v3  ;;  %v2243_v46 = vmax.f32 %v2241_v34, %v2242_v4  ;;  %v2729_v1 = vrot.slane %v8895_v18, 4  ;;  %v3249_v12 = vmax.f32 %v3247_v49, %v3248_v54 }
 0x21f   : > { %v2301_v45 = vrot.slane %v2300_v13, 1  ;;  %v3310_v42 = vrot.slane %v3309_v17, 4  ;;  %v8909_v7 = vmax.f32 %v2790_v35, %v2791_v57  ;;  %vm1321_vm14 = vcmp.gt.f32.partialorder %v1018_v29, 0.0 }
 0x220   : > { %v2244_v37 = vrot.slane %v2243_v46, 1  ;;  %v1457_v55 = vmul.f32 0.01, %v1018_v29  ;;  %v3250_v22 = vrot.slane %v3249_v12, 4  ;;  %v1150_v27 = vadd.f32 %v8587_v23, %v1149_v24 }
 0x221   : > { %v2302_v44 = vmax.f32 %v2300_v13, %v2301_v45  ;;  %v3311_v41 = vmax.f32 %v3309_v17, %v3310_v42  ;;  %v2506_v36 = vrot.slane %v2505_v28, 1  ;;  %v1265_v49 = vadd.f32 %v8587_v23, %v1264_v40  ;;  %v7481_v13 = vld [vmem:[%s8057_s13 + $0xa8] sm:$0xff] }
 0x222   : > { %v2245_v3 = vmax.f32 %v2243_v46, %v2244_v37  ;;  %v8912_v8 = vsel %vm1321_vm14, %v1018_v29, %v1457_v55  ;;  %v3251_v14 = vmax.f32 %v3249_v12, %v3250_v22  ;;  %v2627_v34 = vsel %vm2098_vm11, %v8855_v47, -inf  ;;  %v1204_v47 = vpop.f32.mrf.mxu2  ;;  %1061 = vmatmul.bf16.gmra.mxu0 %v7481_v13 }
 0x223   : > { %v3312_v35 = vrot.slane %v3311_v41, 2  ;;  %vm11468_vm7 = vcmask 257024   ;;  %v2574_v43 = vrot.slane %v2573_v48, 1  ;;  %vm11469_vm6 = vcmask 1043456  }
 0x224   : > { %v2628_v33 = vsel %vm11468_vm7, %v8912_v8, -inf  ;;  %v3677_v57 = vsel %vm11469_vm6, %v3668_v2, %v2245_v3  ;;  %vm1374_vm2 = vcmp.gt.f32.partialorder %v1150_v27, 0.0  ;;  %vm11470_vm3 = vcmask 1044480   ;;  %v8927_v2 = vld [vmem:[%s11301_s2] ss:$0 sm:$0xff]  ;;  %vm11471_vm7 = vmmov %vm11469_vm6 }
 0x225   : > { %v2629_v4 = vmax.f32 %v2627_v34, %v2628_v33  ;;  %v8922_v54 = vsel %vm11470_vm3, %v3677_v57, %v2302_v44  ;;  %v3252_v29 = vrot.slane %v3251_v14, 2  ;;  %v3313_v17 = vmax.f32 %v3311_v41, %v3312_v35  ;;  %v1019_v57 = vpop.f32.mrf.mxu0  ;;  %vm11472_vm6 = vmmov %vm11470_vm3 }
 0x226   : > { %v1510_v23 = vmul.f32 0.01, %v1150_v27  ;;  %v2507_v46 = vmax.f32 %v2505_v28, %v2506_v36  ;;  %vm1420_vm12 = vcmp.gt.f32.partialorder %v1265_v49, 0.0  ;;  %v1556_v12 = vmul.f32 0.01, %v1265_v49 }
 0x227   : > { %v2630_v45 = vrot.slane %v2629_v4, 4  ;;  %v3253_v42 = vmax.f32 %v3251_v14, %v3252_v29  ;;  %v3314_v37 = vrot.slane %v3313_v17, 1  ;;  %v1205_v24 = vadd.f32 %v8927_v2, %v1204_v47 }
 0x228   : > { %v1646_v55 = vsel %vm1374_vm2, %v1150_v27, %v1510_v23  ;;  %v2368_v44 = vsel %vm2303_vm8, %v8875_v21, -inf  ;;  %v1692_v41 = vsel %vm1420_vm12, %v1265_v49, %v1556_v12  ;;  %v3782_v40 = vsel %vm3660_vm10, %v8883_v61, %v3183_v30 }
 0x229   : > { %v2631_v22 = vmax.f32 %v2629_v4, %v2630_v45  ;;  %v2855_v28 = vsel %vm2305_vm9, %v1646_v55, -inf  ;;  %v2730_v36 = vmax.f32 %v8895_v18, %v2729_v1  ;;  %v3254_v27 = vrot.slane %v3253_v42, 1 }
 0x22a   : > { %v2856_v3 = vmax.f32 %v8898_v19, %v2855_v28  ;;  %v2575_v14 = vmax.f32 %v2573_v48, %v2574_v43  ;;  %v3315_v35 = vmax.f32 %v3313_v17, %v3314_v37  ;;  %v2369_v33 = vsel %vm2305_vm9, %v1692_v41, -inf }
 0x22b   : > { %v2632_v34 = vrot.slane %v2631_v22, 2  ;;  %v3706_v21 = vsel %vm3642_vm15, %v8893_v10, %v2507_v46  ;;  %v3255_v4 = vmax.f32 %v3253_v42, %v3254_v27  ;;  %v2370_v13 = vmax.f32 %v2368_v44, %v2369_v33 }
 0x22c   : > { %vm1396_vm14 = vcmp.gt.f32.partialorder %v1205_v24, 0.0  ;;  %v3375_v61 = vsel %vm2303_vm8, %v8900_v32, -inf  ;;  %v2918_v18 = vsel %vm2377_vm13, %v1646_v55, -inf  ;;  %v1532_v1 = vmul.f32 0.01, %v1205_v24 }
 0x22d   : > { %v2633_v30 = vmax.f32 %v2631_v22, %v2632_v34  ;;  %v3790_v19 = vsel %vm11471_vm7, %v3782_v40, %v3255_v4  ;;  %v2857_v48 = vrot.slane %v2856_v3, 4  ;;  %v2371_v49 = vrot.slane %v2370_v13, 4 }
 0x22e   : > { %v1020_v43 = vadd.f32 %v8927_v2, %v1019_v57  ;;  %v2731_v29 = vrot.slane %v2730_v36, 2  ;;  %v8946_v17 = vsel %vm11472_vm6, %v3790_v19, %v3315_v35  ;;  %v1668_v23 = vsel %vm1396_vm14, %v1205_v24, %v1532_v1 }
 0x22f   : > { %v2634_v10 = vrot.slane %v2633_v30, 1  ;;  %v2793_v46 = vrot.slane %v8909_v7, 2  ;;  %v2919_v45 = vrot.slane %v2918_v18, 4  ;;  %v2372_v32 = vmax.f32 %v2370_v13, %v2371_v49 }
 0x230   : > { %v3376_v12 = vsel %vm2305_vm9, %v1668_v23, -inf  ;;  %v3714_v47 = vsel %vm3651_vm0, %v3706_v21, %v2575_v14  ;;  %v3437_v55 = vsel %vm2377_vm13, %v1668_v23, -inf  ;;  %v2858_v44 = vmax.f32 %v2856_v3, %v2857_v48 }
 0x231   : > { %v2635_v42 = vmax.f32 %v2633_v30, %v2634_v10  ;;  %v3377_v37 = vmax.f32 %v3375_v61, %v3376_v12  ;;  %v2373_v22 = vrot.slane %v2372_v32, 2  ;;  %v3438_v28 = vrot.slane %v3437_v55, 4 }
 0x232   : > { %vm1322_vm2 = vcmp.gt.f32.partialorder %v1020_v43, 0.0  ;;  %v2732_v40 = vmax.f32 %v2730_v36, %v2731_v29  ;;  %v1458_v35 = vmul.f32 0.01, %v1020_v43  ;;  %v2661_v34 = vrot.slane %v8889_v9, 1 }
 0x233   : > { %v8953_v27 = vsel %vm3660_vm10, %v3714_v47, %v2635_v42  ;;  %v3378_v24 = vrot.slane %v3377_v37, 4  ;;  %v2920_v33 = vmax.f32 %v2918_v18, %v2919_v45  ;;  %v2374_v57 = vmax.f32 %v2372_v32, %v2373_v22 }
 0x234   : > { %v3439_v4 = vmax.f32 %v3437_v55, %v3438_v28  ;;  %vm11473_vm3 = vcmask 261124   ;;  %v2427_v21 = vsel %vm2377_vm13, %v1692_v41, -inf  ;;  %v8959_v13 = vsel %vm1322_vm2, %v1020_v43, %v1458_v35 }
 0x235   : > { %v2699_v14 = vsel %vm11473_vm3, %v8912_v8, -inf  ;;  %v3379_v3 = vmax.f32 %v3377_v37, %v3378_v24  ;;  %v2859_v61 = vrot.slane %v2858_v44, 2  ;;  %v2375_v36 = vrot.slane %v2374_v57, 1 }
 0x236   : > { %v3440_v30 = vrot.slane %v3439_v4, 2  ;;  %vm11474_vm12 = vcmask 253952   ;;  %v2733_v19 = vrot.slane %v2732_v40, 1  ;;  %v2794_v48 = vmax.f32 %v8909_v7, %v2793_v46 }
 0x237   : > { %v2700_v1 = vsel %vm11474_vm12, %v8959_v13, -inf  ;;  %v3380_v18 = vrot.slane %v3379_v3, 2  ;;  %v2921_v29 = vrot.slane %v2920_v33, 2  ;;  %v2376_v10 = vmax.f32 %v2374_v57, %v2375_v36  ;;  %v1152_v57 = vpop.f32.mrf.mxu1 }
 0x238   : > { %v2701_v49 = vmax.f32 %v2699_v14, %v2700_v1  ;;  %v2428_v23 = vrot.slane %v2427_v21, 4  ;;  %v3441_v8 = vmax.f32 %v3439_v4, %v3440_v30  ;;  %v11475_v41 = vrot.slane %v8791_v26, 2 }
 0x239   : > { %v2662_v45 = vmax.f32 %v8889_v9, %v2661_v34  ;;  %v3381_v32 = vmax.f32 %v3379_v3, %v3380_v18  ;;  %v3717_v47 = vsel %vm3651_vm0, %v8867_v39, %v8848_v50  ;;  %v2860_v42 = vmax.f32 %v2858_v44, %v2859_v61 }
 0x23a   : > { %v2389_v43 = vmax.f32 %v8791_v26, %v11475_v41  ;;  %v2702_v12 = vrot.slane %v2701_v49, 4  ;;  %vm11476_vm14 = vcmask 1045504   ;;  %v3442_v46 = vrot.slane %v3441_v8, 1 }
 0x23b   : > { %v8973_v7 = vsel %vm11476_vm14, %v8922_v54, %v2376_v10  ;;  %v2734_v37 = vmax.f32 %v2732_v40, %v2733_v19  ;;  %v2795_v55 = vrot.slane %v2794_v48, 1  ;;  %v3382_v22 = vrot.slane %v3381_v32, 1  ;;  %v1267_v40 = vpop.f32.mrf.mxu3  ;;  %vm11479_vm6 = vmmov %vm11476_vm14 }
 0x23c   : > { %v2703_v28 = vmax.f32 %v2701_v49, %v2702_v12  ;;  %v2922_v24 = vmax.f32 %v2920_v33, %v2921_v29  ;;  %v2429_v26 = vmax.f32 %v2427_v21, %v2428_v23  ;;  %v3443_v35 = vmax.f32 %v3441_v8, %v3442_v46  ;;  %v1207_v29 = vpop.f32.mrf.mxu2 }
 0x23d   : > { %vm11477_vm7 = vcmask 259073   ;;  %v11478_v34 = vrot.slane %v8775_v6, 1  ;;  %v3725_v39 = vsel %vm3660_vm10, %v3717_v47, %v2662_v45  ;;  %v3383_v54 = vmax.f32 %v3381_v32, %v3382_v22 }
 0x23e   : > { %v2769_v9 = vsel %vm11477_vm7, %v8959_v13, -inf  ;;  %v2704_v44 = vrot.slane %v2703_v28, 2  ;;  %v11328_v4 = vrot.slane %v8789_v58, 1  ;;  %v3893_v33 = vrot.slane %v8663_v38, 1 }
 0x23f   : > { %v8980_v50 = vmax.f32 %v8775_v6, %v11478_v34  ;;  %v2390_v14 = vrot.slane %v2389_v43, 1  ;;  %v2861_v21 = vrot.slane %v2860_v42, 1  ;;  %v2796_v3 = vmax.f32 %v2794_v48, %v2795_v55  ;;  %v1022_v6 = vpop.f32.mrf.mxu0 }
 0x240   : > { %v3806_v61 = vsel %vm11479_vm6, %v8946_v17, %v3383_v54  ;;  %v2705_v36 = vmax.f32 %v2703_v28, %v2704_v44  ;;  %v2770_v30 = vrot.slane %v2769_v9, 4  ;;  %vm11480_vm2 = vcmask 1043456  }
 0x241   : > { %v3733_v1 = vsel %vm11480_vm2, %v3725_v39, %v2734_v37  ;;  %v2923_v19 = vrot.slane %v2922_v24, 1  ;;  %v2430_v18 = vrot.slane %v2429_v26, 2  ;;  %vm11481_vm3 = vcmask 1046528   ;;  %vm11485_vm6 = vmmov %vm11480_vm2 }
 0x242   : > { %v8989_v49 = vsel %vm11481_vm3, %v3806_v61, %v3443_v35  ;;  %v2706_v23 = vrot.slane %v2705_v36, 1  ;;  %v1153_v8 = vadd.f32 %v8927_v2, %v1152_v57  ;;  %v1208_v48 = vadd.f32 %v8927_v2, %v1207_v29  ;;  %vm11483_vm12 = vmmov %vm11481_vm3 }
 0x243   : > { %v3903_v10 = vrot.slane %v8989_v49, 1  ;;  %v4052_v17 = vrot.slane %v8702_v53, 2  ;;  %v2391_v41 = vmax.f32 %v2389_v43, %v2390_v14  ;;  %v2862_v45 = vmax.f32 %v2860_v42, %v2861_v21  ;;  %v1269_v14 = vpop.f32.mrf.mxu3 }
 0x244   : > { %v1023_v32 = vadd.f32 %v8927_v2, %v1022_v6  ;;  %v11482_v12 = vrot.slane %v8687_v5, 1  ;;  %v2707_v46 = vmax.f32 %v2705_v36, %v2706_v23  ;;  %v2771_v37 = vmax.f32 %v2769_v9, %v2770_v30 }
 0x245   : > { %v1268_v55 = vadd.f32 %v8927_v2, %v1267_v40  ;;  %vm11484_vm14 = vcmask 1044480   ;;  %v9003_v28 = vmax.f32 %v2429_v26, %v2430_v18  ;;  %vm1397_vm7 = vcmp.gt.f32.partialorder %v1208_v48, 0.0 }
 0x246   : > { %v3904_v47 = vsel %vm11483_vm12, %v11482_v12, %v3903_v10  ;;  %v3741_v22 = vsel %vm11484_vm14, %v3733_v1, %v2796_v3  ;;  %v2924_v43 = vmax.f32 %v2922_v24, %v2923_v19  ;;  %v9010_v42 = vsel %vm11485_vm6, %v8953_v27, %v2707_v46 }
 0x247   : > { %v9006_v35 = vmax.f32 %v8687_v5, %v3904_v47  ;;  %v1511_v34 = vmul.f32 0.01, %v1153_v8  ;;  %v1533_v39 = vmul.f32 0.01, %v1208_v48  ;;  %vm1375_vm2 = vcmp.gt.f32.partialorder %v1153_v8, 0.0  ;;  %v1154_v5 = vpop.f32.mrf.mxu1 }
 0x248   : > { %vm1323_vm3 = vcmp.gt.f32.partialorder %v1023_v32, 0.0  ;;  %v1459_v9 = vmul.f32 0.01, %v1023_v32  ;;  %vm11486_vm12 = vcmask 1045504   ;;  %v2772_v26 = vrot.slane %v2771_v37, 2 }
 0x249   : > { %v4053_v54 = vrot.slane %v9006_v35, 2  ;;  %v3749_v44 = vsel %vm11486_vm12, %v3741_v22, %v2862_v45  ;;  %v1557_v57 = vmul.f32 0.01, %v1268_v55  ;;  %v1669_v40 = vsel %vm1397_vm7, %v1208_v48, %v1533_v39  ;;  %vm11487_vm14 = vmmov %vm11486_vm12 }
 0x24a   : > { %vm11488_vm6 = vcmask 258048   ;;  %v1155_v21 = vadd.f32 %v8927_v2, %v1154_v5  ;;  %v1270_v3 = vadd.f32 %v8927_v2, %v1269_v14  ;;  %v1647_v36 = vsel %vm1375_vm2, %v1153_v8, %v1511_v34  ;;  %v1209_v8 = vpop.f32.mrf.mxu2 }
 0x24b   : > { %v4054_v24 = vsel %vm11487_vm14, %v4052_v17, %v4053_v54  ;;  %v3493_v27 = vsel %vm11488_vm6, %v1669_v40, -inf  ;;  %vm1421_vm12 = vcmp.gt.f32.partialorder %v1268_v55, 0.0  ;;  %v1595_v30 = vsel %vm1323_vm3, %v1023_v32, %v1459_v9  ;;  %vm11489_vm7 = vmmov %vm11488_vm6 }
 0x24c   : > { %v9021_v61 = vmax.f32 %v8702_v53, %v4054_v24  ;;  %v3494_v6 = vrot.slane %v3493_v27, 4  ;;  %v2827_v1 = vsel %vm2303_vm8, %v8959_v13, -inf  ;;  %v2828_v19 = vsel %vm2305_vm9, %v1595_v30, -inf }
 0x24d   : > { %v2897_v18 = vsel %vm2377_vm13, %v1595_v30, -inf  ;;  %v2773_v29 = vmax.f32 %v2771_v37, %v2772_v26  ;;  %v2974_v23 = vsel %vm11489_vm7, %v1647_v36, -inf  ;;  %v2829_v48 = vmax.f32 %v2827_v1, %v2828_v19 }
 0x24e   : > { %v2898_v17 = vrot.slane %v2897_v18, 4  ;;  %v1693_v45 = vsel %vm1421_vm12, %v1268_v55, %v1557_v57  ;;  %v1512_v12 = vmul.f32 0.01, %v1155_v21  ;;  %vm1422_vm14 = vcmp.gt.f32.partialorder %v1270_v3, 0.0 }
 0x24f   : > { %v1558_v53 = vmul.f32 0.01, %v1270_v3  ;;  %v2830_v47 = vrot.slane %v2829_v48, 4  ;;  %vm1376_vm2 = vcmp.gt.f32.partialorder %v1155_v21, 0.0  ;;  %v1210_v13 = vadd.f32 %v8927_v2, %v1209_v8 }
 0x250   : > { %v2899_v32 = vmax.f32 %v2897_v18, %v2898_v17  ;;  %vm11490_vm3 = vcmask 1046528   ;;  %v2975_v37 = vrot.slane %v2974_v23, 4  ;;  %v3495_v22 = vmax.f32 %v3493_v27, %v3494_v6 }
 0x251   : > { %v9031_v46 = vsel %vm11490_vm3, %v8800_v31, %v2391_v41  ;;  %v9033_v34 = vsel %vm1422_vm14, %v1270_v3, %v1558_v53  ;;  %v2774_v39 = vrot.slane %v2773_v29, 1  ;;  %v2483_v55 = vsel %vm11488_vm6, %v1693_v45, -inf  ;;  %vm11491_vm12 = vmmov %vm11490_vm3  ;;  %v7482_v31 = vld [vmem:[%s8057_s13 + $0xb0] sm:$0xff] }
 0x252   : > { %v2831_v9 = vmax.f32 %v2829_v48, %v2830_v47  ;;  %v2900_v26 = vrot.slane %v2899_v32, 2  ;;  %v9037_v57 = vsel %vm11491_vm12, %v3749_v44, %v2924_v43  ;;  %v2432_v5 = vrot.slane %v9003_v28, 1  ;;  %1066 = vmatmul.bf16.gmra.mxu0 %v7482_v31 }
 0x253   : > { %vm11492_vm7 = vcmask 261125   ;;  %v9041_v24 = vsel %vm1376_vm2, %v1155_v21, %v1512_v12  ;;  %v2554_v27 = vsel %vm1969_vm4, %v9033_v34, -inf  ;;  %vm1398_vm14 = vcmp.gt.f32.partialorder %v1210_v13, 0.0 }
 0x254   : > { %v2553_v14 = vsel %vm11492_vm7, %v1693_v45, -inf  ;;  %v2832_v41 = vrot.slane %v2831_v9, 2  ;;  %v2901_v30 = vmax.f32 %v2899_v32, %v2900_v26  ;;  %vm11493_vm3 = vmmov %vm11492_vm7  ;;  %v2484_v6 = vrot.slane %v2483_v55, 4 }
 0x255   : > { %v3038_v3 = vsel %vm11493_vm3, %v1647_v36, -inf  ;;  %v3496_v1 = vrot.slane %v3495_v22, 2  ;;  %v1534_v19 = vmul.f32 0.01, %v1210_v13  ;;  %v2775_v43 = vmax.f32 %v2773_v29, %v2774_v39  ;;  %vm11494_vm6 = vmmov %vm11493_vm3 }
 0x256   : > { %v2976_v44 = vmax.f32 %v2974_v23, %v2975_v37  ;;  %v3559_v18 = vsel %vm11494_vm6, %v1669_v40, -inf  ;;  %v2833_v48 = vmax.f32 %v2831_v9, %v2832_v41  ;;  %v2902_v21 = vrot.slane %v2901_v30, 1 }
 0x257   : > { %v3039_v17 = vsel %vm1969_vm4, %v9041_v24, -inf  ;;  %v2555_v45 = vmax.f32 %v2553_v14, %v2554_v27  ;;  %v1670_v12 = vsel %vm1398_vm14, %v1210_v13, %v1534_v19  ;;  %vm11495_vm2 = vcmask 1044480  }
 0x258   : > { %v3738_v53 = vsel %vm11495_vm2, %v9010_v42, %v2775_v43  ;;  %v2834_v8 = vrot.slane %v2833_v48, 1  ;;  %v3102_v36 = vsel %vm2041_vm5, %v9041_v24, -inf  ;;  %v1875_v29 = vsel %vm1739_vm1, %v1670_v12, -inf }
 0x259   : > { %v2485_v23 = vmax.f32 %v2483_v55, %v2484_v6  ;;  %v3497_v47 = vmax.f32 %v3495_v22, %v3496_v1  ;;  %v2611_v40 = vsel %vm2041_vm5, %v9033_v34, -inf  ;;  %v3560_v32 = vsel %vm1969_vm4, %v1875_v29, -inf }
 0x25a   : > { %v2835_v37 = vmax.f32 %v2833_v48, %v2834_v8  ;;  %v3040_v39 = vmax.f32 %v3038_v3, %v3039_v17  ;;  %v3561_v13 = vmax.f32 %v3559_v18, %v3560_v32  ;;  %v3621_v9 = vsel %vm2041_vm5, %v1875_v29, -inf }
 0x25b   : > { %v2903_v42 = vmax.f32 %v2901_v30, %v2902_v21  ;;  %v3103_v26 = vrot.slane %v3102_v36, 4  ;;  %v2556_v14 = vrot.slane %v2555_v45, 4  ;;  %v3622_v31 = vrot.slane %v3621_v9, 4 }
 0x25c   : > { %v3872_v41 = vrot.slane %v9031_v46, 1  ;;  %vm11496_vm12 = vcmask 1045504   ;;  %v2612_v55 = vrot.slane %v2611_v40, 4  ;;  %v3562_v22 = vrot.slane %v3561_v13, 4 }
 0x25d   : > { %v3746_v27 = vsel %vm11496_vm12, %v3738_v53, %v2835_v37  ;;  %v11329_v6 = vrot.slane %v9037_v57, 1  ;;  %v2433_v1 = vmax.f32 %v9003_v28, %v2432_v5  ;;  %v2977_v19 = vrot.slane %v2976_v44, 2  ;;  %v1157_v5 = vpop.f32.mrf.mxu1 }
 0x25e   : > { %vm11497_vm7 = vcmask 1046528   ;;  %v3041_v30 = vrot.slane %v3040_v39, 4  ;;  %v3563_v18 = vmax.f32 %v3561_v13, %v3562_v22  ;;  %v3623_v48 = vmax.f32 %v3621_v9, %v3622_v31 }
 0x25f   : > { %v9065_v3 = vsel %vm11497_vm7, %v3746_v27, %v2903_v42  ;;  %v2486_v21 = vrot.slane %v2485_v23, 2  ;;  %v3498_v17 = vrot.slane %v3497_v47, 1  ;;  %v3104_v12 = vmax.f32 %v3102_v36, %v3103_v26  ;;  %vm11498_vm14 = vmmov %vm11497_vm7 }
 0x260   : > { %v11327_v43 = vrot.slane %v9065_v3, 1  ;;  %v2557_v8 = vmax.f32 %v2555_v45, %v2556_v14  ;;  %v2613_v29 = vmax.f32 %v2611_v40, %v2612_v55  ;;  %v3564_v32 = vrot.slane %v3563_v18, 2  ;;  %vm11499_vm3 = vmmov %vm11497_vm7  ;;  %v1024_v14 = vpop.f32.mrf.mxu0 }
 0x261   : > { %v3624_v28 = vrot.slane %v3623_v48, 2  ;;  %v9074_v37 = vmax.f32 %v8789_v58, %v11328_v4  ;;  %v9081_v36 = vsel %vm11499_vm3, %v3893_v33, %v11329_v6  ;;  %vm11500_vm6 = vmmov %vm11499_vm3  ;;  %v9090_v13 = vmax.f32 %v2976_v44, %v2977_v19 }
 0x262   : > { %v3874_v53 = vsel %vm11498_vm14, %v3872_v41, %v11327_v43  ;;  %v9085_v45 = vsel %vm11500_vm6, %v8973_v7, %v2433_v1  ;;  %v3042_v9 = vmax.f32 %v3040_v39, %v3041_v30  ;;  %v3565_v42 = vmax.f32 %v3563_v18, %v3564_v32  ;;  %v1272_v7 = vpop.f32.mrf.mxu3 }
 0x263   : > { %v9088_v40 = vmax.f32 %v9031_v46, %v3874_v53  ;;  %v3625_v26 = vmax.f32 %v3623_v48, %v3624_v28  ;;  %v2487_v31 = vmax.f32 %v2485_v23, %v2486_v21  ;;  %v3499_v41 = vmax.f32 %v3497_v47, %v3498_v17 }
 0x264   : > { %v2558_v27 = vrot.slane %v2557_v8, 2  ;;  %v1158_v55 = vadd.f32 %v8927_v2, %v1157_v5  ;;  %v3105_v33 = vrot.slane %v3104_v12, 2  ;;  %v2614_v22 = vrot.slane %v2613_v29, 2 }
 0x265   : > { %v3566_v43 = vrot.slane %v3565_v42, 1  ;;  %v3626_v4 = vrot.slane %v3625_v26, 1  ;;  %v1025_v1 = vadd.f32 %v8927_v2, %v1024_v14  ;;  %v1273_v44 = vadd.f32 %v8927_v2, %v1272_v7 }
 0x266   : > { %vm1377_vm2 = vcmp.gt.f32.partialorder %v1158_v55, 0.0  ;;  %v1513_v46 = vmul.f32 0.01, %v1158_v55  ;;  %v3043_v39 = vrot.slane %v3042_v9, 2  ;;  %v3166_v23 = vsel %vm2098_vm11, %v9041_v24, -inf }
 0x267   : > { %v3567_v19 = vmax.f32 %v3565_v42, %v3566_v43  ;;  %v3627_v30 = vmax.f32 %v3625_v26, %v3626_v4  ;;  %v2559_v47 = vmax.f32 %v2557_v8, %v2558_v27  ;;  %vm1423_vm12 = vcmp.gt.f32.partialorder %v1273_v44, 0.0 }
 0x268   : > { %v1649_v18 = vsel %vm1377_vm2, %v1158_v55, %v1513_v46  ;;  %v1559_v48 = vmul.f32 0.01, %v1273_v44  ;;  %v2615_v21 = vmax.f32 %v2613_v29, %v2614_v22  ;;  %vm11501_vm7 = vcmask 257024   ;;  %v1159_v29 = vpop.f32.mrf.mxu1 }
 0x269   : > { %v3822_v17 = vsel %vm3642_vm15, %v3499_v41, %v3567_v19  ;;  %v3167_v53 = vsel %vm11501_vm7, %v1649_v18, -inf  ;;  %v2681_v32 = vsel %vm2098_vm11, %v9033_v34, -inf  ;;  %v1460_v5 = vmul.f32 0.01, %v1025_v1  ;;  %vm11502_vm3 = vmmov %vm11501_vm7 }
 0x26a   : > { %v3830_v28 = vsel %vm3651_vm0, %v3822_v17, %v3627_v30  ;;  %v3168_v43 = vmax.f32 %v3166_v23, %v3167_v53  ;;  %v9102_v4 = vsel %vm1423_vm12, %v1273_v44, %v1559_v48  ;;  %v2488_v42 = vrot.slane %v2487_v31, 1  ;;  %v1027_v30 = vpop.f32.mrf.mxu0 }
 0x26b   : > { %v3905_v24 = vrot.slane %v3830_v28, 1  ;;  %vm1324_vm14 = vcmp.gt.f32.partialorder %v1025_v1, 0.0  ;;  %v2682_v8 = vsel %vm11502_vm3, %v9102_v4, -inf  ;;  %v3044_v26 = vmax.f32 %v3042_v9, %v3043_v39 }
 0x26c   : > { %v2560_v14 = vrot.slane %v2559_v47, 1  ;;  %v3169_v41 = vrot.slane %v3168_v43, 4  ;;  %v2683_v27 = vmax.f32 %v2681_v32, %v2682_v8  ;;  %v3106_v55 = vmax.f32 %v3104_v12, %v3105_v33 }
 0x26d   : > { %v2616_v22 = vrot.slane %v2615_v21, 1  ;;  %v3906_v34 = vsel %vm11500_vm6, %v3903_v10, %v3905_v24  ;;  %v3982_v7 = vmax.f32 %v3830_v28, %v3905_v24  ;;  %v1596_v44 = vsel %vm1324_vm14, %v1025_v1, %v1460_v5 }
 0x26e   : > { %v3962_v46 = vmax.f32 %v8989_v49, %v3906_v34  ;;  %v2684_v19 = vrot.slane %v2683_v27, 4  ;;  %v1160_v23 = vadd.f32 %v8927_v2, %v1159_v29  ;;  %v2979_v48 = vrot.slane %v9090_v13, 1 }
 0x26f   : > { %v2489_v9 = vmax.f32 %v2487_v31, %v2488_v42  ;;  %v4057_v39 = vrot.slane %v3982_v7, 2  ;;  %v3170_v17 = vmax.f32 %v3168_v43, %v3169_v41  ;;  %v3045_v53 = vrot.slane %v3044_v26, 1  ;;  %v1212_v41 = vpop.f32.mrf.mxu2 }
 0x270   : > { %v2561_v12 = vmax.f32 %v2559_v47, %v2560_v14  ;;  %v4055_v33 = vrot.slane %v3962_v46, 2  ;;  %v2685_v32 = vmax.f32 %v2683_v27, %v2684_v19  ;;  %v3107_v8 = vrot.slane %v3106_v55, 1  ;;  %v1274_v19 = vpop.f32.mrf.mxu3 }
 0x271   : > { %v2617_v6 = vmax.f32 %v2615_v21, %v2616_v22  ;;  %vm11503_vm2 = vcmask 258048   ;;  %v1028_v49 = vadd.f32 %v8927_v2, %v1027_v30  ;;  %vm11504_vm12 = vcmask 1045504  }
 0x272   : > { %v2953_v10 = vsel %vm11503_vm2, %v1596_v44, -inf  ;;  %v4056_v1 = vsel %vm11504_vm12, %v4053_v54, %v4055_v33  ;;  %vm11505_vm7 = vmmov %vm11504_vm12  ;;  %v2686_v5 = vrot.slane %v2685_v32, 2  ;;  %v1514_v31 = vmul.f32 0.01, %v1160_v23 }
 0x273   : > { %v4058_v28 = vsel %vm11505_vm7, %v4055_v33, %v4057_v39  ;;  %v9119_v43 = vmax.f32 %v9006_v35, %v4056_v1  ;;  %v3171_v42 = vrot.slane %v3170_v17, 2  ;;  %vm1378_vm14 = vcmp.gt.f32.partialorder %v1160_v23, 0.0 }
 0x274   : > { %v9121_v47 = vmax.f32 %v3962_v46, %v4058_v28  ;;  %v2980_v21 = vmax.f32 %v9090_v13, %v2979_v48  ;;  %v3046_v24 = vmax.f32 %v3044_v26, %v3045_v53  ;;  %v3712_v29 = vsel %vm3642_vm15, %v2489_v9, %v2561_v12  ;;  %v7483_v9 = vld [vmem:[%s8057_s13 + $0xb8] sm:$0xff] }
 0x275   : > { %11506 = vst [vmem:[#allocation5_spill] sm:$0xff] %v9119_v43  ;;  %v2687_v14 = vmax.f32 %v2685_v32, %v2686_v5  ;;  %v2954_v54 = vrot.slane %v2953_v10, 4  ;;  %vm11508_vm3 = vcmask 261124   ;;  %v1213_v22 = vadd.f32 %v8927_v2, %v1212_v41  ;;  %1071 = vmatmul.bf16.gmra.mxu0 %v7483_v9 }
 0x276   : > { %11507 = vst [vmem:[#allocation6_spill] sm:$0xff] %v9121_v47  ;;  %v3238_v27 = vsel %vm11508_vm3, %v1649_v18, -inf  ;;  %v1461_v34 = vmul.f32 0.01, %v1028_v49  ;;  %v3108_v35 = vmax.f32 %v3106_v55, %v3107_v8  ;;  %vm1325_vm6 = vcmp.gt.f32.partialorder %v1028_v49, 0.0 }
 0x277   : > { %v2688_v7 = vrot.slane %v2687_v14, 1  ;;  %v1650_v46 = vsel %vm1378_vm14, %v1160_v23, %v1514_v31  ;;  %v3720_v30 = vsel %vm3651_vm0, %v3712_v29, %v2617_v6  ;;  %v3172_v13 = vmax.f32 %v3170_v17, %v3171_v42 }
 0x278   : > { %vm11509_vm2 = vcmask 253952   ;;  %v1275_v48 = vadd.f32 %v8927_v2, %v1274_v19  ;;  %v3765_v39 = vsel %vm3642_vm15, %v2980_v21, %v3046_v24  ;;  %vm11510_vm12 = vcmask 259073  }
 0x279   : > { %v3239_v26 = vsel %vm11509_vm2, %v1650_v46, -inf  ;;  %v2689_v53 = vmax.f32 %v2687_v14, %v2688_v7  ;;  %v3302_v12 = vsel %vm11510_vm12, %v1650_v46, -inf  ;;  %v2955_v33 = vmax.f32 %v2953_v10, %v2954_v54 }
 0x27a   : > { %v3240_v18 = vmax.f32 %v3238_v27, %v3239_v26  ;;  %v1535_v55 = vmul.f32 0.01, %v1213_v22  ;;  %v9133_v32 = vsel %vm1325_vm6, %v1028_v49, %v1461_v34  ;;  %v3303_v23 = vrot.slane %v3302_v12, 4 }
 0x27b   : > { %v9136_v6 = vsel %vm3660_vm10, %v3720_v30, %v2689_v53  ;;  %vm1399_vm7 = vcmp.gt.f32.partialorder %v1213_v22, 0.0  ;;  %v3366_v8 = vsel %vm2303_vm8, %v1650_v46, -inf  ;;  %vm11511_vm14 = vcmask 261125  }
 0x27c   : > { %v3241_v17 = vrot.slane %v3240_v18, 4  ;;  %v3011_v1 = vsel %vm11511_vm14, %v1596_v44, -inf  ;;  %v3173_v28 = vrot.slane %v3172_v13, 1  ;;  %v3304_v5 = vmax.f32 %v3302_v12, %v3303_v23  ;;  %v1029_v23 = vpop.f32.mrf.mxu0 }
 0x27d   : > { %vm1424_vm3 = vcmp.gt.f32.partialorder %v1275_v48, 0.0  ;;  %v3012_v10 = vsel %vm1969_vm4, %v9133_v32, -inf  ;;  %v3368_v49 = vmax.f32 %v3366_v8, %v8771_v25  ;;  %v1560_v42 = vmul.f32 0.01, %v1275_v48 }
 0x27e   : > { %v3242_v31 = vmax.f32 %v3240_v18, %v3241_v17  ;;  %v2956_v21 = vrot.slane %v2955_v33, 2  ;;  %vm11512_vm6 = vcmask 261124   ;;  %v1671_v29 = vsel %vm1399_vm7, %v1213_v22, %v1535_v55 }
 0x27f   : > { %v2753_v24 = vsel %vm11512_vm6, %v9102_v4, -inf  ;;  %v3305_v14 = vrot.slane %v3304_v5, 2  ;;  %vm11513_vm2 = vcmask 258048   ;;  %v3369_v44 = vrot.slane %v3368_v49, 4 }
 0x280   : > { %v1953_v41 = vsel %vm11513_vm2, %v1671_v29, -inf  ;;  %v3243_v54 = vrot.slane %v3242_v31, 2  ;;  %v9146_v27 = vsel %vm1424_vm3, %v1275_v48, %v1560_v42  ;;  %v3174_v34 = vmax.f32 %v3172_v13, %v3173_v28 }
 0x281   : > { %v3013_v7 = vmax.f32 %v3011_v1, %v3012_v10  ;;  %v3306_v46 = vmax.f32 %v3304_v5, %v3305_v14  ;;  %vm11514_vm12 = vcmask 253952   ;;  %v3773_v25 = vsel %vm3651_vm0, %v3765_v39, %v3108_v35 }
 0x282   : > { %v2754_v19 = vsel %vm11514_vm12, %v9146_v27, -inf  ;;  %v3244_v30 = vmax.f32 %v3242_v31, %v3243_v54  ;;  %v3370_v26 = vmax.f32 %v3368_v49, %v3369_v44  ;;  %v2957_v4 = vmax.f32 %v2955_v33, %v2956_v21 }
 0x283   : > { %v2755_v9 = vmax.f32 %v2753_v24, %v2754_v19  ;;  %v1954_v22 = vrot.slane %v1953_v41, 4  ;;  %v3307_v53 = vrot.slane %v3306_v46, 1  ;;  %vm11515_vm7 = vcmask 259073  }
 0x284   : > { %v2811_v18 = vsel %vm11515_vm7, %v9146_v27, -inf  ;;  %v9155_v48 = vmax.f32 %v8663_v38, %v9081_v36  ;;  %v3245_v13 = vrot.slane %v3244_v30, 1  ;;  %v3371_v12 = vrot.slane %v3370_v26, 2  ;;  %v1214_v36 = vpop.f32.mrf.mxu2 }
 0x285   : > { %v2756_v55 = vrot.slane %v2755_v9, 4  ;;  %v3781_v17 = vsel %vm3660_vm10, %v3773_v25, %v3174_v34  ;;  %v3014_v35 = vrot.slane %v3013_v7, 4  ;;  %v3081_v39 = vsel %vm2041_vm5, %v9133_v32, -inf }
 0x286   : > { %v3308_v33 = vmax.f32 %v3306_v46, %v3307_v53  ;;  %v3246_v8 = vmax.f32 %v3244_v30, %v3245_v13  ;;  %v3372_v1 = vmax.f32 %v3370_v26, %v3371_v12  ;;  %v2812_v5 = vrot.slane %v2811_v18, 4  ;;  %v1277_v30 = vpop.f32.mrf.mxu3 }
 0x287   : > { %v2757_v28 = vmax.f32 %v2755_v9, %v2756_v55  ;;  %v4050_v10 = vrot.slane %v9074_v37, 2  ;;  %v2958_v31 = vrot.slane %v2957_v4, 1  ;;  %v1955_v38 = vmax.f32 %v1953_v41, %v1954_v22 }
 0x288   : > { %v1030_v49 = vadd.f32 %v8927_v2, %v1029_v23  ;;  %v3082_v42 = vrot.slane %v3081_v39, 4  ;;  %v3373_v21 = vrot.slane %v3372_v1, 1  ;;  %vm11516_vm14 = vcmask 1043456  }
 0x289   : > { %v3789_v24 = vsel %vm11516_vm14, %v3781_v17, %v3246_v8  ;;  %v2758_v14 = vrot.slane %v2757_v28, 2  ;;  %v3914_v54 = vrot.slane %v9085_v45, 1  ;;  %v3015_v44 = vmax.f32 %v3013_v7, %v3014_v35 }
 0x28a   : > { %vm11517_vm3 = vcmask 1044480   ;;  %v1215_v46 = vadd.f32 %v8927_v2, %v1214_v36  ;;  %v4045_v19 = vrot.slane %v9155_v48, 2  ;;  %v3374_v37 = vmax.f32 %v3372_v1, %v3373_v21 }
 0x28b   : > { %v3797_v34 = vsel %vm11517_vm3, %v3789_v24, %v3308_v33  ;;  %v2759_v25 = vmax.f32 %v2757_v28, %v2758_v14  ;;  %v2813_v41 = vmax.f32 %v2811_v18, %v2812_v5  ;;  %v9167_v26 = vmax.f32 %v2957_v4, %v2958_v31 }
 0x28c   : > { %v1956_v9 = vrot.slane %v1955_v38, 2  ;;  %vm11518_vm6 = vcmask 261125   ;;  %v1278_v53 = vadd.f32 %v8927_v2, %v1277_v30  ;;  %v9171_v13 = vmax.f32 %v3081_v39, %v3082_v42  ;;  %v1217_v24 = vpop.f32.mrf.mxu2 }
 0x28d   : > { %v2023_v22 = vsel %vm11518_vm6, %v1671_v29, -inf  ;;  %vm11519_vm2 = vcmask 1045504   ;;  %v2760_v12 = vrot.slane %v2759_v25, 1  ;;  %v1462_v55 = vmul.f32 0.01, %v1030_v49 }
 0x28e   : > { %v3805_v7 = vsel %vm11519_vm2, %v3797_v34, %v3374_v37  ;;  %v3016_v23 = vrot.slane %v3015_v44, 2  ;;  %vm11520_vm12 = vcmask 1046528   ;;  %v1536_v35 = vmul.f32 0.01, %v1215_v46 }
 0x28f   : > { %v3813_v17 = vsel %vm11520_vm12, %v3805_v7, %v8980_v50  ;;  %vm1326_vm7 = vcmp.gt.f32.partialorder %v1030_v49, 0.0  ;;  %v2761_v4 = vmax.f32 %v2759_v25, %v2760_v12  ;;  %v2814_v33 = vrot.slane %v2813_v41, 2  ;;  %vm11522_vm6 = vmmov %vm11520_vm12  ;;  %v1032_v12 = vpop.f32.mrf.mxu0 }
 0x290   : > { %v3896_v18 = vrot.slane %v3813_v17, 1  ;;  %vm1400_vm14 = vcmp.gt.f32.partialorder %v1215_v46, 0.0  ;;  %v9176_v8 = vmax.f32 %v1955_v38, %v1956_v9  ;;  %v3139_v29 = vsel %vm2098_vm11, %v9133_v32, -inf  ;;  %vm11524_vm2 = vmmov %vm11522_vm6 }
 0x291   : > { %vm1425_vm3 = vcmp.gt.f32.partialorder %v1278_v53, 0.0  ;;  %v1561_v39 = vmul.f32 0.01, %v1278_v53  ;;  %v11521_v1 = vrot.slane %v9037_v57, 1  ;;  %v11523_v5 = vrot.slane %v8789_v58, 1 }
 0x292   : > { %vm11525_vm12 = vcmask 1043456   ;;  %v1598_v36 = vsel %vm1326_vm7, %v1030_v49, %v1462_v55  ;;  %v1672_v21 = vsel %vm1400_vm14, %v1215_v46, %v1536_v35  ;;  %v2881_v32 = vsel %vm2303_vm8, %v9146_v27, -inf }
 0x293   : > { %v3897_v28 = vsel %vm11522_vm6, %v11521_v1, %v3896_v18  ;;  %v3899_v50 = vsel %vm11524_vm2, %v3896_v18, %v11523_v5  ;;  %v9188_v31 = vsel %vm11525_vm12, %v9136_v6, %v2761_v4  ;;  %v3017_v14 = vmax.f32 %v3015_v44, %v3016_v23 }
 0x294   : > { %v3958_v38 = vmax.f32 %v9037_v57, %v3897_v28  ;;  %v3959_v42 = vmax.f32 %v3813_v17, %v3899_v50  ;;  %v3084_v34 = vrot.slane %v9171_v13, 2  ;;  %v2815_v37 = vmax.f32 %v2813_v41, %v2814_v33 }
 0x295   : > { %v1697_v58 = vsel %vm1425_vm3, %v1278_v53, %v1561_v39  ;;  %vm11526_vm6 = vcmask 257024   ;;  %v2024_v49 = vsel %vm1969_vm4, %v1672_v21, -inf  ;;  %v1218_v7 = vadd.f32 %v8927_v2, %v1217_v24 }
 0x296   : > { %v4046_v25 = vrot.slane %v3958_v38, 2  ;;  %v4048_v30 = vrot.slane %v3959_v42, 2  ;;  %v3140_v9 = vsel %vm11526_vm6, %v1598_v36, -inf  ;;  %v2882_v6 = vsel %vm2305_vm9, %v1697_v58, -inf }
 0x297   : > { %v2883_v57 = vmax.f32 %v2881_v32, %v2882_v6  ;;  %v2939_v46 = vsel %vm2377_vm13, %v1697_v58, -inf  ;;  %vm11527_vm7 = vcmask 1045504   ;;  %v3141_v35 = vmax.f32 %v3139_v29, %v3140_v9  ;;  %v7484_v9 = vld [vmem:[%s8057_s13 + $0xc0] sm:$0xff] }
 0x298   : > { %v4047_v27 = vsel %vm11527_vm7, %v4045_v19, %v4046_v25  ;;  %vm11528_vm14 = vmmov %vm11527_vm7  ;;  %v2940_v53 = vrot.slane %v2939_v46, 4  ;;  %v2816_v18 = vrot.slane %v2815_v37, 1  ;;  %v2084_v4 = vsel %vm2041_vm5, %v1672_v21, -inf  ;;  %1076 = vmatmul.bf16.gmra.mxu0 %v7484_v9 }
 0x299   : > { %v4049_v44 = vsel %vm11528_vm14, %v4046_v25, %v4048_v30  ;;  %vm11529_vm2 = vmmov %vm11527_vm7  ;;  %v9203_v55 = vmax.f32 %v9155_v48, %v4047_v27  ;;  %v2884_v33 = vrot.slane %v2883_v57, 4  ;;  %v3018_v19 = vrot.slane %v3017_v14, 1 }
 0x29a   : > { %v4051_v41 = vsel %vm11529_vm2, %v4048_v30, %v4050_v10  ;;  %v9205_v23 = vmax.f32 %v3958_v38, %v4049_v44  ;;  %v2941_v39 = vmax.f32 %v2939_v46, %v2940_v53  ;;  %vm1401_vm3 = vcmp.gt.f32.partialorder %v1218_v7, 0.0  ;;  %v1219_v30 = vpop.f32.mrf.mxu2 }
 0x29b   : > { %v9207_v17 = vmax.f32 %v3959_v42, %v4051_v41  ;;  %v1537_v1 = vmul.f32 0.01, %v1218_v7  ;;  %v1033_v10 = vadd.f32 %v8927_v2, %v1032_v12  ;;  %v1958_v28 = vrot.slane %v9176_v8, 1 }
 0x29c   : > { %v2025_v48 = vmax.f32 %v2023_v22, %v2024_v49  ;;  %v2885_v5 = vmax.f32 %v2883_v57, %v2884_v33  ;;  %v2942_v50 = vrot.slane %v2941_v39, 2  ;;  %v2085_v38 = vrot.slane %v2084_v4, 4  ;;  %v1279_v33 = vpop.f32.mrf.mxu3 }
 0x29d   : > { %v3142_v42 = vrot.slane %v3141_v35, 4  ;;  %vm1327_vm12 = vcmp.gt.f32.partialorder %v1033_v10, 0.0  ;;  %v1463_v29 = vmul.f32 0.01, %v1033_v10  ;;  %v2817_v32 = vmax.f32 %v2815_v37, %v2816_v18 }
 0x29e   : > { %v2886_v24 = vrot.slane %v2885_v5, 2  ;;  %v2943_v58 = vmax.f32 %v2941_v39, %v2942_v50  ;;  %v1673_v25 = vsel %vm1401_vm3, %v1218_v7, %v1537_v1  ;;  %v3019_v6 = vmax.f32 %v3017_v14, %v3018_v19  ;;  %v1034_v50 = vpop.f32.mrf.mxu0 }
 0x29f   : > { %v3085_v46 = vmax.f32 %v9171_v13, %v3084_v34  ;;  %v9214_v27 = vsel %vm1327_vm12, %v1033_v10, %v1463_v29  ;;  %v1220_v44 = vadd.f32 %v8927_v2, %v1219_v30  ;;  %vm11530_vm6 = vcmask 261124  }
 0x2a0   : > { %v3211_v22 = vsel %vm11530_vm6, %v1598_v36, -inf  ;;  %v2887_v49 = vmax.f32 %v2885_v5, %v2886_v24  ;;  %v2944_v57 = vrot.slane %v2943_v58, 1  ;;  %vm11531_vm7 = vcmask 253952  }
 0x2a1   : > { %v3212_v41 = vsel %vm11531_vm7, %v9214_v27, -inf  ;;  %v2026_v37 = vrot.slane %v2025_v48, 4  ;;  %v2154_v7 = vsel %vm2098_vm11, %v1672_v21, -inf  ;;  %vm11532_vm14 = vcmask 257024  }
 0x2a2   : > { %v2155_v53 = vsel %vm11532_vm14, %v1673_v25, -inf  ;;  %v3213_v14 = vmax.f32 %v3211_v22, %v3212_v41  ;;  %vm11533_vm2 = vcmask 1044480   ;;  %v2086_v34 = vmax.f32 %v2084_v4, %v2085_v38 }
 0x2a3   : > { %v3744_v13 = vsel %vm11533_vm2, %v9188_v31, %v2817_v32  ;;  %v3143_v12 = vmax.f32 %v3141_v35, %v3142_v42  ;;  %v2888_v18 = vrot.slane %v2887_v49, 1  ;;  %v2945_v36 = vmax.f32 %v2943_v58, %v2944_v57  ;;  %v7551_v31 = vld [vmem:[%s11302_s3 + $0x78] sm:$0xff] }
 0x2a4   : > { %v3214_v39 = vrot.slane %v3213_v14, 4  ;;  %vm11534_vm3 = vcmask 259073   ;;  %vm1402_vm12 = vcmp.gt.f32.partialorder %v1220_v44, 0.0  ;;  %v2156_v10 = vmax.f32 %v2154_v7, %v2155_v53  ;;  %5131 = vmatpush.bf16.msrb.mxu2 %v7551_v31 }
 0x2a5   : > { %v3281_v19 = vsel %vm11534_vm3, %v9214_v27, -inf  ;;  %v2889_v1 = vmax.f32 %v2887_v49, %v2888_v18  ;;  %v1280_v21 = vadd.f32 %v8927_v2, %v1279_v33  ;;  %v1538_v5 = vmul.f32 0.01, %v1220_v44 }
 0x2a6   : > { %v3086_v4 = vrot.slane %v3085_v46, 1  ;;  %v3762_v35 = vsel %vm3642_vm15, %v9167_v26, %v3019_v6  ;;  %v2027_v38 = vmax.f32 %v2025_v48, %v2026_v37  ;;  %v3215_v42 = vmax.f32 %v3213_v14, %v3214_v39  ;;  %v1037_v43 = vpop.f32.mrf.mxu0 }
 0x2a7   : > { %v3144_v29 = vrot.slane %v3143_v12, 2  ;;  %vm11535_vm6 = vcmask 1045504   ;;  %v3282_v24 = vrot.slane %v3281_v19, 4  ;;  %v9233_v58 = vsel %vm1402_vm12, %v1220_v44, %v1538_v5  ;;  %v7550_v44 = vld [vmem:[%s11302_s3 + $0x70] sm:$0xff] }
 0x2a8   : > { %v3752_v32 = vsel %vm11535_vm6, %v3744_v13, %v2889_v1  ;;  %v2087_v30 = vrot.slane %v2086_v34, 2  ;;  %vm11536_vm7 = vcmask 1046528   ;;  %vm11537_vm14 = vcmask 261124   ;;  %5132 = vmatpush.bf16.msrb.mxu2 %v7550_v44 }
 0x2a9   : > { %v9236_v9 = vsel %vm11536_vm7, %v3752_v32, %v2945_v36  ;;  %v2228_v22 = vsel %vm11537_vm14, %v1673_v25, -inf  ;;  %v1035_v49 = vadd.f32 %v8927_v2, %v1034_v50  ;;  %v2157_v26 = vrot.slane %v2156_v10, 4  ;;  %vm11539_vm12 = vmmov %vm11536_vm7  ;;  %v1282_v36 = vpop.f32.mrf.mxu3 }
 0x2aa   : > { %v11330_v57 = vrot.slane %v9236_v9, 1  ;;  %v1562_v48 = vmul.f32 0.01, %v1280_v21  ;;  %vm11538_vm2 = vcmask 253952   ;;  %v9247_v41 = vmax.f32 %v9176_v8, %v1958_v28 }
 0x2ab   : > { %v2229_v6 = vsel %vm11538_vm2, %v9233_v58, -inf  ;;  %v3087_v37 = vmax.f32 %v3085_v46, %v3086_v4  ;;  %v3216_v7 = vrot.slane %v3215_v42, 2  ;;  %vm1426_vm3 = vcmp.gt.f32.partialorder %v1280_v21, 0.0 }
 0x2ac   : > { %v2028_v25 = vrot.slane %v2027_v38, 2  ;;  %v3145_v53 = vmax.f32 %v3143_v12, %v3144_v29  ;;  %v3916_v2 = vsel %vm11539_vm12, %v3914_v54, %v11330_v57  ;;  %v3283_v14 = vmax.f32 %v3281_v19, %v3282_v24  ;;  %v9266_v19 = vld [vmem:[%s11301_s2] ss:$0 sm:$0xff] }
 0x2ad   : > { %v3770_v13 = vsel %vm3651_vm0, %v3762_v35, %v3087_v37  ;;  %v9256_v18 = vmax.f32 %v9085_v45, %v3916_v2  ;;  %v2230_v8 = vmax.f32 %v2228_v22, %v2229_v6  ;;  %vm1328_vm6 = vcmp.gt.f32.partialorder %v1035_v49, 0.0 }
 0x2ae   : > { %v9258_v28 = vmax.f32 %v2086_v34, %v2087_v30  ;;  %v2158_v46 = vmax.f32 %v2156_v10, %v2157_v26  ;;  %v1698_v33 = vsel %vm1426_vm3, %v1280_v21, %v1562_v48  ;;  %v1464_v12 = vmul.f32 0.01, %v1035_v49 }
 0x2af   : > { %v3217_v39 = vmax.f32 %v3215_v42, %v3216_v7  ;;  %vm11540_vm7 = vcmask 258048   ;;  %vm11541_vm14 = vcmask 259073   ;;  %v1283_v45 = vadd.f32 %v9266_v19, %v1282_v36 }
 0x2b0   : > { %v2995_v1 = vsel %vm11540_vm7, %v1698_v33, -inf  ;;  %v2289_v54 = vsel %vm11541_vm14, %v9233_v58, -inf  ;;  %v2029_v5 = vmax.f32 %v2027_v38, %v2028_v25  ;;  %v3146_v34 = vrot.slane %v3145_v53, 1  ;;  %v1222_v38 = vpop.f32.mrf.mxu2 }
 0x2b1   : > { %v3284_v50 = vrot.slane %v3283_v14, 2  ;;  %v1600_v10 = vsel %vm1328_vm6, %v1035_v49, %v1464_v12  ;;  %v3339_v21 = vsel %vm2303_vm8, %v9214_v27, -inf  ;;  %v2231_v31 = vrot.slane %v2230_v8, 4 }
 0x2b2   : > { %v3340_v4 = vsel %vm2305_vm9, %v1600_v10, -inf  ;;  %v3409_v35 = vsel %vm2377_vm13, %v1600_v10, -inf  ;;  %v2996_v42 = vrot.slane %v2995_v1, 4  ;;  %v2290_v29 = vrot.slane %v2289_v54, 4 }
 0x2b3   : > { %v3341_v32 = vmax.f32 %v3339_v21, %v3340_v4  ;;  %vm1427_vm2 = vcmp.gt.f32.partialorder %v1283_v45, 0.0  ;;  %v2159_v24 = vrot.slane %v2158_v46, 2  ;;  %v3218_v30 = vrot.slane %v3217_v39, 1 }
 0x2b4   : > { %v3410_v22 = vrot.slane %v3409_v35, 4  ;;  %v1563_v26 = vmul.f32 0.01, %v1283_v45  ;;  %v2089_v48 = vrot.slane %v9258_v28, 1  ;;  %v3285_v49 = vmax.f32 %v3283_v14, %v3284_v50  ;;  %v7543_v14 = vld [vmem:[%s11302_s3 + $0x38] sm:$0xff] }
 0x2b5   : > { %v3342_v6 = vrot.slane %v3341_v32, 4  ;;  %v1223_v27 = vadd.f32 %v9266_v19, %v1222_v38  ;;  %v2030_v44 = vrot.slane %v2029_v5, 1  ;;  %v2232_v37 = vmax.f32 %v2230_v8, %v2231_v31  ;;  %5082 = vmatpush.bf16.msrb.mxu1 %v7543_v14  ;;  %v7548_v38 = vld [vmem:[%s11302_s3 + $0x60] sm:$0xff] }
 0x2b6   : > { %v3411_v7 = vmax.f32 %v3409_v35, %v3410_v22  ;;  %v9275_v25 = vsel %vm1427_vm2, %v1283_v45, %v1563_v26  ;;  %v3147_v2 = vmax.f32 %v3145_v53, %v3146_v34  ;;  %v2997_v12 = vmax.f32 %v2995_v1, %v2996_v42  ;;  %v7485_v42 = vld [vmem:[%s8057_s13 + $0xc8] sm:$0xff] }
 0x2b7   : > { %v2291_v36 = vmax.f32 %v2289_v54, %v2290_v29  ;;  %v3343_v10 = vmax.f32 %v3341_v32, %v3342_v6  ;;  %v2160_v21 = vmax.f32 %v2158_v46, %v2159_v24  ;;  %v3219_v4 = vmax.f32 %v3217_v39, %v3218_v30  ;;  %v7549_v46 = vld [vmem:[%s11302_s3 + $0x68] sm:$0xff]  ;;  %1081 = vmatmul.bf16.gmra.mxu0 %v7485_v42 }
 0x2b8   : > { %vm11542_vm3 = vcmask 261125   ;;  %v3412_v47 = vrot.slane %v3411_v7, 2  ;;  %v3286_v50 = vrot.slane %v3285_v49, 1  ;;  %v3066_v45 = vsel %vm1969_vm4, %v9275_v25, -inf  ;;  %5133 = vmatpush.bf16.msrb.mxu2 %v7549_v46 }
 0x2b9   : > { %v3065_v57 = vsel %vm11542_vm3, %v1698_v33, -inf  ;;  %v3344_v8 = vrot.slane %v3343_v10, 2  ;;  %v1539_v53 = vmul.f32 0.01, %v1223_v27  ;;  %v2031_v39 = vmax.f32 %v2029_v5, %v2030_v44 }
 0x2ba   : > { %v2233_v1 = vrot.slane %v2232_v37, 2  ;;  %v3413_v33 = vmax.f32 %v3411_v7, %v3412_v47  ;;  %vm1403_vm12 = vcmp.gt.f32.partialorder %v1223_v27, 0.0  ;;  %v3778_v54 = vsel %vm3660_vm10, %v3770_v13, %v3147_v2  ;;  %v7542_v47 = vld [vmem:[%s11302_s3 + $0x30] sm:$0xff] }
 0x2bb   : > { %v2998_v34 = vrot.slane %v2997_v12, 2  ;;  %v2292_v31 = vrot.slane %v2291_v36, 2  ;;  %v3345_v35 = vmax.f32 %v3343_v10, %v3344_v8  ;;  %vm11543_vm6 = vcmask 1043456   ;;  %5083 = vmatpush.bf16.msrb.mxu1 %v7542_v47  ;;  %v1284_v8 = vpop.f32.mrf.mxu3 }
 0x2bc   : > { %v3786_v29 = vsel %vm11543_vm6, %v3778_v54, %v3219_v4  ;;  %v3414_v32 = vrot.slane %v3413_v33, 1  ;;  %v3067_v24 = vmax.f32 %v3065_v57, %v3066_v45  ;;  %v3123_v30 = vsel %vm2041_vm5, %v9275_v25, -inf  ;;  %5134 = vmatpush.bf16.msrb.mxu2 %v7548_v38  ;;  %v1224_v54 = vpop.f32.mrf.mxu2 }
 0x2bd   : > { %v2161_v5 = vrot.slane %v2160_v21, 1  ;;  %v3287_v22 = vmax.f32 %v3285_v49, %v3286_v50  ;;  %v3346_v26 = vrot.slane %v3345_v35, 1  ;;  %v1675_v13 = vsel %vm1403_vm12, %v1223_v27, %v1539_v53 }
 0x2be   : > { %v2090_v6 = vmax.f32 %v9258_v28, %v2089_v48  ;;  %v3649_v57 = vsel %vm3642_vm15, %v9247_v41, %v2031_v39  ;;  %v2234_v44 = vmax.f32 %v2232_v37, %v2233_v1  ;;  %v1038_v7 = vadd.f32 %v9266_v19, %v1037_v43  ;;  %v1039_v39 = vpop.f32.mrf.mxu0 }
 0x2bf   : > { %vm11544_vm7 = vcmask 1044480   ;;  %v2293_v49 = vmax.f32 %v2291_v36, %v2292_v31  ;;  %v3347_v10 = vmax.f32 %v3345_v35, %v3346_v26  ;;  %v3124_v4 = vrot.slane %v3123_v30, 4 }
 0x2c0   : > { %v3794_v2 = vsel %vm11544_vm7, %v3786_v29, %v3287_v22  ;;  %v3415_v27 = vmax.f32 %v3413_v33, %v3414_v32  ;;  %v3068_v14 = vrot.slane %v3067_v24, 4  ;;  %v2359_v50 = vsel %vm2303_vm8, %v9233_v58, -inf }
 0x2c1   : > { %v2360_v28 = vsel %vm2305_vm9, %v1675_v13, -inf  ;;  %v4024_v48 = vrot.slane %v9088_v40, 2  ;;  %v2162_v41 = vmax.f32 %v2160_v21, %v2161_v5  ;;  %v9307_v37 = vmax.f32 %v2997_v12, %v2998_v34 }
 0x2c2   : > { %vm11545_vm14 = vcmask 1045504   ;;  %v3658_v36 = vsel %vm3651_vm0, %v3649_v57, %v2090_v6  ;;  %v2235_v45 = vrot.slane %v2234_v44, 1  ;;  %vm11546_vm2 = vcmask 1046528   ;;  %v7541_v6 = vld [vmem:[%s11302_s3 + $0x28] sm:$0xff] }
 0x2c3   : > { %v3802_v43 = vsel %vm11545_vm14, %v3794_v2, %v3347_v10  ;;  %v1465_v46 = vmul.f32 0.01, %v1038_v7  ;;  %v3125_v1 = vmax.f32 %v3123_v30, %v3124_v4  ;;  %v2361_v33 = vmax.f32 %v2359_v50, %v2360_v28  ;;  %vm11548_vm12 = vmmov %vm11546_vm2  ;;  %5084 = vmatpush.bf16.msrb.mxu1 %v7541_v6 }
 0x2c4   : > { %v9312_v53 = vsel %vm11546_vm2, %v3802_v43, %v3415_v27  ;;  %vm1329_vm3 = vcmp.gt.f32.partialorder %v1038_v7, 0.0  ;;  %v2294_v21 = vrot.slane %v2293_v49, 1  ;;  %v3069_v12 = vmax.f32 %v3067_v24, %v3068_v14 }
 0x2c5   : > { %v3875_v58 = vrot.slane %v9312_v53, 1  ;;  %v2420_v34 = vsel %vm2377_vm13, %v1675_v13, -inf  ;;  %v1285_v31 = vadd.f32 %v9266_v19, %v1284_v8  ;;  %v3667_v35 = vsel %vm3660_vm10, %v3658_v36, %v2162_v41 }
 0x2c6   : > { %v3000_v42 = vrot.slane %v9307_v37, 1  ;;  %v11547_v29 = vrot.slane %v9065_v3, 1  ;;  %v1040_v30 = vadd.f32 %v9266_v19, %v1039_v39  ;;  %v2236_v47 = vmax.f32 %v2234_v44, %v2235_v45  ;;  %v1287_v45 = vpop.f32.mrf.mxu3 }
 0x2c7   : > { %v1601_v24 = vsel %vm1329_vm3, %v1038_v7, %v1465_v46  ;;  %vm1428_vm6 = vcmp.gt.f32.partialorder %v1285_v31, 0.0  ;;  %v3126_v22 = vrot.slane %v3125_v1, 2  ;;  %v2362_v26 = vrot.slane %v2361_v33, 4 }
 0x2c8   : > { %v3876_v32 = vsel %vm11548_vm12, %v11547_v29, %v3875_v58  ;;  %v2421_v13 = vrot.slane %v2420_v34, 4  ;;  %v1564_v38 = vmul.f32 0.01, %v1285_v31  ;;  %v2295_v57 = vmax.f32 %v2293_v49, %v2294_v21 }
 0x2c9   : > { %v9326_v5 = vmax.f32 %v9065_v3, %v3876_v32  ;;  %v3070_v10 = vrot.slane %v3069_v12, 2  ;;  %v1225_v4 = vadd.f32 %v9266_v19, %v1224_v54  ;;  %v7547_v3 = vld [vmem:[%s11302_s3 + $0x58] sm:$0xff]  ;;  %vm11549_vm7 = vcmask 258048  }
 0x2ca   : > { %v3465_v44 = vsel %vm11549_vm7, %v1601_v24, -inf  ;;  %v1700_v7 = vsel %vm1428_vm6, %v1285_v31, %v1564_v38  ;;  %vm1330_vm14 = vcmp.gt.f32.partialorder %v1040_v30, 0.0  ;;  %v1466_v27 = vmul.f32 0.01, %v1040_v30  ;;  %5135 = vmatpush.bf16.msrb.mxu2 %v7547_v3 }
 0x2cb   : > { %v11333_v2 = vrot.slane %v9326_v5, 2  ;;  %vm11550_vm2 = vcmask 1043456   ;;  %vm11551_vm3 = vcmask 1045504   ;;  %v3193_v50 = vsel %vm2098_vm11, %v9275_v25, -inf }
 0x2cc   : > { %v3676_v14 = vsel %vm11550_vm2, %v3667_v35, %v2236_v47  ;;  %vm11552_vm12 = vcmask 257024   ;;  %v9347_v43 = vmax.f32 %v3125_v1, %v3126_v22  ;;  %v2363_v8 = vmax.f32 %v2361_v33, %v2362_v26  ;;  %v1227_v35 = vpop.f32.mrf.mxu2 }
 0x2cd   : > { %v4026_v49 = vsel %vm11551_vm3, %v4024_v48, %v11333_v2  ;;  %v3194_v28 = vsel %vm11552_vm12, %v1700_v7, -inf  ;;  %v2422_v36 = vmax.f32 %v2420_v34, %v2421_v13  ;;  %v3466_v46 = vrot.slane %v3465_v44, 4 }
 0x2ce   : > { %v9345_v41 = vmax.f32 %v9088_v40, %v4026_v49  ;;  %v1540_v39 = vmul.f32 0.01, %v1225_v4  ;;  %v1602_v54 = vsel %vm1330_vm14, %v1040_v30, %v1466_v27  ;;  %v1288_v21 = vadd.f32 %v9266_v19, %v1287_v45 }
 0x2cf   : > { %v3071_v48 = vmax.f32 %v3069_v12, %v3070_v10  ;;  %v3195_v31 = vmax.f32 %v3193_v50, %v3194_v28  ;;  %vm1404_vm6 = vcmp.gt.f32.partialorder %v1225_v4, 0.0  ;;  %v1807_v25 = vsel %vm1739_vm1, %v1602_v54, -inf }
 0x2d0   : > { %vm11553_vm7 = vcmask 261125   ;;  %v3524_v1 = vsel %vm1969_vm4, %v1807_v25, -inf  ;;  %vm1429_vm2 = vcmp.gt.f32.partialorder %v1288_v21, 0.0  ;;  %v1228_v33 = vadd.f32 %v9266_v19, %v1227_v35 }
 0x2d1   : > { %v3523_v40 = vsel %vm11553_vm7, %v1601_v24, -inf  ;;  %v2423_v34 = vrot.slane %v2422_v36, 2  ;;  %v3593_v32 = vsel %vm2041_vm5, %v1807_v25, -inf  ;;  %v1565_v30 = vmul.f32 0.01, %v1288_v21 }
 0x2d2   : > { %v3525_v29 = vmax.f32 %v3523_v40, %v3524_v1  ;;  %v2364_v47 = vrot.slane %v2363_v8, 2  ;;  %v3467_v12 = vmax.f32 %v3465_v44, %v3466_v46  ;;  %vm11554_vm14 = vcmask 261124  }
 0x2d3   : > { %v3265_v22 = vsel %vm11554_vm14, %v1700_v7, -inf  ;;  %v1676_v26 = vsel %vm1404_vm6, %v1225_v4, %v1540_v39  ;;  %v3196_v13 = vrot.slane %v3195_v31, 4  ;;  %vm11555_vm3 = vcmask 258048  }
 0x2d4   : > { %v2476_v38 = vsel %vm11555_vm3, %v1676_v26, -inf  ;;  %v3526_v6 = vrot.slane %v3525_v29, 4  ;;  %v9358_v24 = vsel %vm1429_vm2, %v1288_v21, %v1565_v30  ;;  %v3072_v10 = vrot.slane %v3071_v48, 1  ;;  %v9371_v21 = vpop.permute.xlu2 %7693 }
 0x2d5   : > { %v3594_v3 = vrot.slane %v3593_v32, 4  ;;  %vm11556_vm12 = vcmask 253952   ;;  %v1541_v49 = vmul.f32 0.01, %v1228_v33  ;;  %v2424_v50 = vmax.f32 %v2422_v36, %v2423_v34 }
 0x2d6   : > { %v3266_v27 = vsel %vm11556_vm12, %v9358_v24, -inf  ;;  %v3527_v28 = vmax.f32 %v3525_v29, %v3526_v6  ;;  %vm1405_vm7 = vcmp.gt.f32.partialorder %v1228_v33, 0.0  ;;  %v3468_v7 = vrot.slane %v3467_v12, 2  ;;  %v1042_v29 = vpop.f32.mrf.mxu0 }
 0x2d7   : > { %v3267_v45 = vmax.f32 %v3265_v22, %v3266_v27  ;;  %v2477_v4 = vrot.slane %v2476_v38, 4  ;;  %vm11557_vm6 = vcmask 259073   ;;  %v3001_v39 = vmax.f32 %v9307_v37, %v3000_v42 }
 0x2d8   : > { %v3323_v46 = vsel %vm11557_vm6, %v9358_v24, -inf  ;;  %vm11558_vm2 = vcmask 1044480   ;;  %v3197_v36 = vmax.f32 %v3195_v31, %v3196_v13  ;;  %v3128_v35 = vrot.slane %v9347_v43, 1 }
 0x2d9   : > { %v9369_v54 = vsel %vm11558_vm2, %v3676_v14, %v2295_v57  ;;  %v3268_v25 = vrot.slane %v3267_v45, 4  ;;  %v3528_v40 = vrot.slane %v3527_v28, 2  ;;  %v3595_v1 = vmax.f32 %v3593_v32, %v3594_v3 }
 0x2da   : > { %v9374_v34 = vsel %vm1405_vm7, %v1228_v33, %v1541_v49  ;;  %v3073_v30 = vmax.f32 %v3071_v48, %v3072_v10  ;;  %v2365_v22 = vmax.f32 %v2363_v8, %v2364_v47  ;;  %v2425_v6 = vrot.slane %v2424_v50, 1 }
 0x2db   : > { %v3324_v27 = vrot.slane %v3323_v46, 4  ;;  %v3469_v2 = vmax.f32 %v3467_v12, %v3468_v7  ;;  %v2478_v42 = vmax.f32 %v2476_v38, %v2477_v4  ;;  %vm11559_vm14 = vcmask 261125  }
 0x2dc   : > { %v2544_v57 = vsel %vm11559_vm14, %v1676_v26, -inf  ;;  %v3198_v14 = vrot.slane %v3197_v36, 2  ;;  %v3269_v31 = vmax.f32 %v3267_v45, %v3268_v25  ;;  %v2545_v13 = vsel %vm1969_vm4, %v9374_v34, -inf  ;;  %v1289_v26 = vpop.f32.mrf.mxu3 }
 0x2dd   : > { %v1043_v32 = vadd.f32 %v9266_v19, %v1042_v29  ;;  %v3129_v33 = vmax.f32 %v9347_v43, %v3128_v35  ;;  %v3529_v8 = vmax.f32 %v3527_v28, %v3528_v40  ;;  %v3596_v47 = vrot.slane %v3595_v1, 2  ;;  %v1229_v28 = vpop.f32.mrf.mxu2 }
 0x2de   : > { %v3768_v12 = vsel %vm3642_vm15, %v3001_v39, %v3073_v30  ;;  %v2366_v10 = vrot.slane %v2365_v22, 1  ;;  %v9384_v3 = vmax.f32 %v2424_v50, %v2425_v6  ;;  %v3325_v38 = vmax.f32 %v3323_v46, %v3324_v27 }
 0x2df   : > { %v3470_v49 = vrot.slane %v3469_v2, 1  ;;  %v2546_v45 = vmax.f32 %v2544_v57, %v2545_v13  ;;  %v2604_v7 = vsel %vm2041_vm5, %v9374_v34, -inf  ;;  %v1290_v4 = vadd.f32 %v9266_v19, %v1289_v26 }
 0x2e0   : > { %v3199_v25 = vmax.f32 %v3197_v36, %v3198_v14  ;;  %v2479_v43 = vrot.slane %v2478_v42, 2  ;;  %v3270_v35 = vrot.slane %v3269_v31, 2  ;;  %v1467_v29 = vmul.f32 0.01, %v1043_v32 }
 0x2e1   : > { %v3530_v40 = vrot.slane %v3529_v8, 1  ;;  %v3597_v37 = vmax.f32 %v3595_v1, %v3596_v47  ;;  %vm1331_vm3 = vcmp.gt.f32.partialorder %v1043_v32, 0.0  ;;  %v1230_v50 = vadd.f32 %v9266_v19, %v1229_v28 }
 0x2e2   : > { %v3776_v46 = vsel %vm3651_vm0, %v3768_v12, %v3129_v33  ;;  %v2367_v39 = vmax.f32 %v2365_v22, %v2366_v10  ;;  %v3326_v30 = vrot.slane %v3325_v38, 2  ;;  %v2605_v6 = vrot.slane %v2604_v7, 4 }
 0x2e3   : > { %v3471_v27 = vmax.f32 %v3469_v2, %v3470_v49  ;;  %v2547_v57 = vrot.slane %v2546_v45, 4  ;;  %vm1430_vm12 = vcmp.gt.f32.partialorder %v1290_v4, 0.0  ;;  %v1566_v13 = vmul.f32 0.01, %v1290_v4 }
 0x2e4   : > { %v9391_v26 = vmax.f32 %v2478_v42, %v2479_v43  ;;  %v3271_v36 = vmax.f32 %v3269_v31, %v3270_v35  ;;  %v3393_v14 = vsel %vm2303_vm8, %v9358_v24, -inf  ;;  %v1603_v48 = vsel %vm1331_vm3, %v1043_v32, %v1467_v29 }
 0x2e5   : > { %v3200_v1 = vrot.slane %v3199_v25, 1  ;;  %v3531_v47 = vmax.f32 %v3529_v8, %v3530_v40  ;;  %v3598_v44 = vrot.slane %v3597_v37, 1  ;;  %vm1406_vm7 = vcmp.gt.f32.partialorder %v1230_v50, 0.0 }
 0x2e6   : > { %v3327_v28 = vmax.f32 %v3325_v38, %v3326_v30  ;;  %v2606_v33 = vmax.f32 %v2604_v7, %v2605_v6  ;;  %v1702_v22 = vsel %vm1430_vm12, %v1290_v4, %v1566_v13  ;;  %v1542_v12 = vmul.f32 0.01, %v1230_v50 }
 0x2e7   : > { %v2548_v10 = vmax.f32 %v2546_v45, %v2547_v57  ;;  %vm11560_vm6 = vcmask 258048   ;;  %v3394_v49 = vsel %vm2305_vm9, %v1702_v22, -inf  ;;  %v3451_v42 = vsel %vm2377_vm13, %v1702_v22, -inf  ;;  %v1044_v45 = vpop.f32.mrf.mxu0 }
 0x2e8   : > { %v1925_v2 = vsel %vm11560_vm6, %v1603_v48, -inf  ;;  %v3272_v31 = vrot.slane %v3271_v36, 1  ;;  %v3395_v43 = vmax.f32 %v3393_v14, %v3394_v49  ;;  %v3452_v35 = vrot.slane %v3451_v42, 4 }
 0x2e9   : > { %v9398_v24 = vsel %vm1406_vm7, %v1230_v50, %v1542_v12  ;;  %vm11561_vm2 = vcmask 1045504   ;;  %v3201_v8 = vmax.f32 %v3199_v25, %v3200_v1  ;;  %v3599_v38 = vmax.f32 %v3597_v37, %v3598_v44  ;;  %v7540_v1 = vld [vmem:[%s11302_s3 + $0x20] sm:$0xff] }
 0x2ea   : > { %v9402_v32 = vsel %vm11561_vm2, %v9369_v54, %v2367_v39  ;;  %v3818_v7 = vsel %vm3642_vm15, %v3471_v27, %v3531_v47  ;;  %v2607_v4 = vrot.slane %v2606_v33, 2  ;;  %v2672_v29 = vsel %vm2098_vm11, %v9374_v34, -inf  ;;  %v7546_v47 = vld [vmem:[%s11302_s3 + $0x50] sm:$0xff]  ;;  %5085 = vmatpush.bf16.msrb.mxu1 %v7540_v1 }
 0x2eb   : > { %v1926_v40 = vrot.slane %v1925_v2, 4  ;;  %vm11562_vm14 = vcmask 257024   ;;  %v2481_v50 = vrot.slane %v9391_v26, 1  ;;  %v3328_v6 = vrot.slane %v3327_v28, 1  ;;  %5136 = vmatpush.bf16.msrb.mxu2 %v7546_v47 }
 0x2ec   : > { %v2673_v30 = vsel %vm11562_vm14, %v9398_v24, -inf  ;;  %v3396_v57 = vrot.slane %v3395_v43, 4  ;;  %v3453_v13 = vmax.f32 %v3451_v42, %v3452_v35  ;;  %v3826_v54 = vsel %vm3651_vm0, %v3818_v7, %v3599_v38 }
 0x2ed   : > { %v3273_v25 = vmax.f32 %v3271_v36, %v3272_v31  ;;  %v2549_v44 = vrot.slane %v2548_v10, 2  ;;  %v1045_v37 = vadd.f32 %v9266_v19, %v1044_v45  ;;  %v3784_v39 = vsel %vm3660_vm10, %v3776_v46, %v3201_v8 }
 0x2ee   : > { %v3397_v27 = vmax.f32 %v3395_v43, %v3396_v57  ;;  %v3454_v14 = vrot.slane %v3453_v13, 2  ;;  %v2674_v34 = vmax.f32 %v2672_v29, %v2673_v30  ;;  %v2608_v22 = vmax.f32 %v2606_v33, %v2607_v4  ;;  %v7539_v33 = vld [vmem:[%s11302_s3 + $0x18] sm:$0xff] }
 0x2ef   : > { %v1927_v12 = vmax.f32 %v1925_v2, %v1926_v40  ;;  %vm1332_vm3 = vcmp.gt.f32.partialorder %v1045_v37, 0.0  ;;  %v1468_v36 = vmul.f32 0.01, %v1045_v37  ;;  %v3877_v49 = vrot.slane %v3826_v54, 1  ;;  %v7545_v2 = vld [vmem:[%s11302_s3 + $0x48] sm:$0xff]  ;;  %5086 = vmatpush.bf16.msrb.mxu1 %v7539_v33  ;;  %v1047_v1 = vpop.f32.mrf.mxu0 }
 0x2f0   : > { %v3329_v42 = vmax.f32 %v3327_v28, %v3328_v6  ;;  %v3398_v31 = vrot.slane %v3397_v27, 2  ;;  %v3455_v46 = vmax.f32 %v3453_v13, %v3454_v14  ;;  %vm11563_vm12 = vcmask 1043456   ;;  %v7486_v28 = vld [vmem:[%s8057_s13 + $0xd0] sm:$0xff]  ;;  %5137 = vmatpush.bf16.msrb.mxu2 %v7545_v2  ;;  %v1232_v14 = vpop.f32.mrf.mxu2 }
 0x2f1   : > { %v3792_v43 = vsel %vm11563_vm12, %v3784_v39, %v3273_v25  ;;  %v2550_v35 = vmax.f32 %v2548_v10, %v2549_v44  ;;  %vm11564_vm7 = vcmask 261125   ;;  %v9421_v38 = vsel %vm1332_vm3, %v1045_v37, %v1468_v36  ;;  %1086 = vmatmul.bf16.gmra.mxu0 %v7486_v28 }
 0x2f2   : > { %v1987_v8 = vsel %vm11564_vm7, %v1603_v48, -inf  ;;  %v3399_v7 = vmax.f32 %v3397_v27, %v3398_v31  ;;  %v3456_v45 = vrot.slane %v3455_v46, 1  ;;  %v2675_v4 = vrot.slane %v2674_v34, 4 }
 0x2f3   : > { %v1988_v29 = vsel %vm1969_vm4, %v9421_v38, -inf  ;;  %v2609_v10 = vrot.slane %v2608_v22, 1  ;;  %v1928_v40 = vrot.slane %v1927_v12, 2  ;;  %v2056_v30 = vsel %vm2041_vm5, %v9421_v38, -inf }
 0x2f4   : > { %v1989_v48 = vmax.f32 %v1987_v8, %v1988_v29  ;;  %vm11565_vm6 = vcmask 1046528   ;;  %v9437_v57 = vmax.f32 %v3826_v54, %v3877_v49  ;;  %v3400_v13 = vrot.slane %v3399_v7, 1 }
 0x2f5   : > { %v3878_v6 = vsel %vm11565_vm6, %v3875_v58, %v3877_v49  ;;  %v2057_v25 = vrot.slane %v2056_v30, 4  ;;  %vm11566_vm2 = vcmask 1044480   ;;  %v2551_v37 = vrot.slane %v2550_v35, 1  ;;  %vm11568_vm3 = vmmov %vm11565_vm6 }
 0x2f6   : > { %v3800_v44 = vsel %vm11566_vm2, %v3792_v43, %v3329_v42  ;;  %v3457_v39 = vmax.f32 %v3455_v46, %v3456_v45  ;;  %v1990_v27 = vrot.slane %v1989_v48, 4  ;;  %v3401_v47 = vmax.f32 %v3399_v7, %v3400_v13  ;;  %vm11570_vm7 = vmmov %vm11568_vm3 }
 0x2f7   : > { %v2676_v36 = vmax.f32 %v2674_v34, %v2675_v4  ;;  %v2058_v31 = vmax.f32 %v2056_v30, %v2057_v25  ;;  %v1233_v8 = vadd.f32 %v9266_v19, %v1232_v14  ;;  %v2482_v58 = vmax.f32 %v9391_v26, %v2481_v50 }
 0x2f8   : > { %v9443_v54 = vmax.f32 %v9312_v53, %v3878_v6  ;;  %v1929_v49 = vmax.f32 %v1927_v12, %v1928_v40  ;;  %v1991_v33 = vmax.f32 %v1989_v48, %v1990_v27  ;;  %v2610_v2 = vmax.f32 %v2608_v22, %v2609_v10 }
 0x2f9   : > { %vm11567_vm14 = vcmask 1045504   ;;  %v2059_v43 = vrot.slane %v2058_v31, 2  ;;  %v1048_v46 = vadd.f32 %v9266_v19, %v1047_v1  ;;  %v4029_v28 = vrot.slane %v9437_v57, 2  ;;  %v7674_v1 = vpop.permute.xlu0 %7673 }
 0x2fa   : > { %v3808_v42 = vsel %vm11567_vm14, %v3800_v44, %v3401_v47  ;;  %v2552_v7 = vmax.f32 %v2550_v35, %v2551_v37  ;;  %v1992_v45 = vrot.slane %v1991_v33, 2  ;;  %v2677_v50 = vrot.slane %v2676_v36, 2 }
 0x2fb   : > { %v9449_v34 = vsel %vm11568_vm3, %v3808_v42, %v3457_v39  ;;  %v2060_v53 = vmax.f32 %v2058_v31, %v2059_v43  ;;  %vm1407_vm12 = vcmp.gt.f32.partialorder %v1233_v8, 0.0  ;;  %v4027_v12 = vrot.slane %v9443_v54, 2  ;;  %v9482_v43 = vpop.permute.xlu1 %7683 }
 0x2fc   : > { %v3917_v26 = vrot.slane %v9449_v34, 1  ;;  %v1930_v22 = vrot.slane %v1929_v49, 1  ;;  %v1993_v4 = vmax.f32 %v1991_v33, %v1992_v45  ;;  %v1543_v29 = vmul.f32 0.01, %v1233_v8 }
 0x2fd   : > { %v11569_v10 = vrot.slane %v9236_v9, 1  ;;  %vm11571_vm6 = vcmask 261124   ;;  %v2061_v48 = vrot.slane %v2060_v53, 1  ;;  %v1469_v30 = vmul.f32 0.01, %v1048_v46 }
 0x2fe   : > { %v2744_v40 = vsel %vm11571_vm6, %v9398_v24, -inf  ;;  %v1994_v57 = vrot.slane %v1993_v4, 1  ;;  %v9463_v13 = vsel %vm1407_vm12, %v1233_v8, %v1543_v29  ;;  %vm1333_vm2 = vcmp.gt.f32.partialorder %v1048_v46, 0.0 }
 0x2ff   : > { %v3918_v35 = vsel %vm11570_vm7, %v11569_v10, %v3917_v26  ;;  %v3711_v25 = vsel %vm3642_vm15, %v2482_v58, %v2552_v7  ;;  %v2678_v44 = vmax.f32 %v2676_v36, %v2677_v50  ;;  %vm11572_vm14 = vcmask 253952  }
 0x300   : > { %v9461_v6 = vmax.f32 %v9236_v9, %v3918_v35  ;;  %v2745_v37 = vsel %vm11572_vm14, %v9463_v13, -inf  ;;  %vm11573_vm3 = vcmask 259073   ;;  %v1931_v27 = vmax.f32 %v1929_v49, %v1930_v22 }
 0x301   : > { %v2804_v39 = vsel %vm11573_vm3, %v9463_v13, -inf  ;;  %v1995_v14 = vmax.f32 %v1993_v4, %v1994_v57  ;;  %v2746_v9 = vmax.f32 %v2744_v40, %v2745_v37  ;;  %v2062_v47 = vmax.f32 %v2060_v53, %v2061_v48 }
 0x302   : > { %v11334_v24 = vrot.slane %v9461_v6, 2  ;;  %v4410_v31 = vrot.slane %v8605_v20, 4  ;;  %v2805_v8 = vrot.slane %v2804_v39, 4  ;;  %v9472_v33 = vsel %vm1333_vm2, %v1048_v46, %v1469_v30 }
 0x303   : > { %v11574_v36 = vrot.slane %v9256_v18, 2  ;;  %vm11575_vm12 = vcmask 1045504   ;;  %v2118_v49 = vsel %vm2098_vm11, %v9421_v38, -inf  ;;  %v3645_v42 = vsel %vm3642_vm15, %v1931_v27, %v1995_v14 }
 0x304   : > { %v2747_v7 = vrot.slane %v2746_v9, 4  ;;  %v2679_v50 = vrot.slane %v2678_v44, 1  ;;  %v9488_v46 = vsel %vm3651_vm0, %v3645_v42, %v2062_v47  ;;  %vm11576_vm7 = vcmask 257024   ;;  %vm11579_vm2 = vmmov %vm11575_vm12 }
 0x305   : > { %v4068_v58 = vsel %vm11575_vm12, %v11574_v36, %v11334_v24  ;;  %v2119_v53 = vsel %vm11576_vm7, %v9472_v33, -inf  ;;  %v4412_v22 = vrot.slane %v8611_v0, 4  ;;  %v2806_v29 = vmax.f32 %v2804_v39, %v2805_v8  ;;  %vm11580_vm14 = vmmov %vm11579_vm2  ;;  %v1234_v39 = vpop.f32.mrf.mxu2 }
 0x306   : > { %v9485_v45 = vmax.f32 %v9256_v18, %v4068_v58  ;;  %v2748_v4 = vmax.f32 %v2746_v9, %v2747_v7  ;;  %v2120_v38 = vmax.f32 %v2118_v49, %v2119_v53  ;;  %vm11577_vm6 = vcmask 1046528   ;;  %v7538_v9 = vld [vmem:[%s11302_s3 + $0x10] sm:$0xff]  ;;  %v7537_v49 = vld [vmem:[%s11302_s3 + $0x8] sm:$0xff] }
 0x307   : > { %v9496_v10 = vsel %vm11577_vm6, %v9402_v32, %v9384_v3  ;;  %v11578_v18 = vrot.slane %v9326_v5, 2  ;;  %v9504_v40 = vsel %vm11580_vm14, %v4027_v12, %v4029_v28  ;;  %v7676_v48 = vunpack.i.h.bf16 %v7674_v1  ;;  %v7544_v28 = vld [vmem:[%s11302_s3 + $0x40] sm:$0xff]  ;;  %5087 = vmatpush.bf16.msrb.mxu1 %v7538_v9 }
 0x308   : > { %v3719_v30 = vsel %vm3651_vm0, %v3711_v25, %v2610_v2  ;;  %vm11337_vm3 = vcmask 261120   ;;  %v2749_v57 = vrot.slane %v2748_v4, 2  ;;  %v2121_v37 = vrot.slane %v2120_v38, 4  ;;  %5138 = vmatpush.bf16.msrb.mxu2 %v7544_v28 }
 0x309   : > { %v9501_v35 = vsel %vm11579_vm2, %v11578_v18, %v4027_v12  ;;  %v2680_v27 = vmax.f32 %v2678_v44, %v2679_v50  ;;  %v7686_v14 = vunpack.i.h.bf16 %v9482_v43  ;;  %v7675_v3 = vunpack.i.l.bf16 %v7674_v1  ;;  %v1049_v12 = vpop.f32.mrf.mxu0  ;;  %v7679_v50 = vpop.permute.xlu0 %7678 }
 0x30a   : > { %v4409_v32 = vrot.slane %v8427_v16, 4  ;;  %vm11581_vm12 = vcmask 1043456   ;;  %v2807_v25 = vrot.slane %v2806_v29, 2  ;;  %v2122_v47 = vmax.f32 %v2120_v38, %v2121_v37 }
 0x30b   : > { %v4413_v2 = vsel %vm11581_vm12, %v4410_v31, %v4412_v22  ;;  %v1235_v44 = vadd.f32 %v9266_v19, %v1234_v39  ;;  %v7685_v8 = vunpack.i.l.bf16 %v9482_v43  ;;  %vm11582_vm7 = vmmov %vm11581_vm12  ;;  %v1050_v58 = vadd.f32 %v9266_v19, %v1049_v12  ;;  %v7689_v39 = vpop.permute.xlu1 %7688  ;;  %5088 = vmatpush.bf16.msrb.mxu1 %v7537_v49 }
 0x30c   : > { %v4815_v1 = vsel %vm11337_vm3, %v4413_v2, %v7676_v48  ;;  %v4411_v36 = vsel %vm11582_vm7, %v4409_v32, %v4410_v31  ;;  %v2750_v42 = vmax.f32 %v2748_v4, %v2749_v57  ;;  %v2123_v7 = vrot.slane %v2122_v47, 2 }
 0x30d   : > { %vm1408_vm6 = vcmp.gt.f32.partialorder %v1235_v44, 0.0  ;;  %v1544_v53 = vmul.f32 0.01, %v1235_v44  ;;  %v3727_v22 = vsel %vm3660_vm10, %v3719_v30, %v2680_v27  ;;  %v4814_v38 = vsel %vm11337_vm3, %v4411_v36, %v7675_v3  ;;  %v7536_v30 = vld [vmem:[%s11302_s3] sm:$0xff] }
 0x30e   : > { %v2872_v31 = vsel %vm2303_vm8, %v9463_v13, -inf  ;;  %v1470_v18 = vmul.f32 0.01, %v1050_v58  ;;  %v2808_v48 = vmax.f32 %v2806_v29, %v2807_v25  ;;  %v2124_v37 = vmax.f32 %v2122_v47, %v2123_v7 }
 0x30f   : > { %v1680_v32 = vsel %vm1408_vm6, %v1235_v44, %v1544_v53  ;;  %vm1334_vm2 = vcmp.gt.f32.partialorder %v1050_v58, 0.0  ;;  %vm11336_vm14 = vcmask 523264   ;;  %v7681_v9 = vunpack.i.h.bf16 %v7679_v50  ;;  %5089 = vmatpush.bf16.msrb.mxu1 %v7536_v30 }
 0x310   : > { %v2873_v4 = vsel %vm2305_vm9, %v1680_v32, -inf  ;;  %v2932_v57 = vsel %vm2377_vm13, %v1680_v32, -inf  ;;  %v2751_v27 = vrot.slane %v2750_v42, 1  ;;  %v2125_v3 = vrot.slane %v2124_v37, 1 }
 0x311   : > { %vm11583_vm12 = vcmask 261124   ;;  %v7680_v29 = vunpack.i.l.bf16 %v7679_v50  ;;  %v7691_v28 = vunpack.i.h.bf16 %v7689_v39  ;;  %v2874_v12 = vmax.f32 %v2872_v31, %v2873_v4 }
 0x312   : > { %v2192_v13 = vsel %vm11583_vm12, %v9472_v33, -inf  ;;  %v2933_v2 = vrot.slane %v2932_v57, 4  ;;  %v9535_v25 = vsel %vm1334_vm2, %v1050_v58, %v1470_v18  ;;  %v2809_v47 = vrot.slane %v2808_v48, 1  ;;  %v9544_v18 = vpop.f32.mrf.mxu0 }
 0x313   : > { %v2126_v44 = vmax.f32 %v2124_v37, %v2125_v3  ;;  %v7690_v36 = vunpack.i.l.bf16 %v7689_v39  ;;  %vm11584_vm7 = vcmask 253952   ;;  %v2875_v7 = vrot.slane %v2874_v12, 4 }
 0x314   : > { %v2193_v49 = vsel %vm11584_vm7, %v9535_v25, -inf  ;;  %v2934_v53 = vmax.f32 %v2932_v57, %v2933_v2  ;;  %vm11585_vm6 = vcmask 259073   ;;  %v2752_v33 = vmax.f32 %v2750_v42, %v2751_v27 }
 0x315   : > { %v2194_v32 = vmax.f32 %v2192_v13, %v2193_v49  ;;  %v2261_v24 = vsel %vm11585_vm6, %v9535_v25, -inf  ;;  %v3663_v50 = vsel %vm3660_vm10, %v9488_v46, %v2126_v44  ;;  %v4830_v58 = vsel %vm11336_vm14, %v4814_v38, %v7680_v29  ;;  %v7699_v29 = vpop.permute.xlu0 %7698 }
 0x316   : > { %v2262_v31 = vrot.slane %v2261_v24, 4  ;;  %v4831_v37 = vsel %vm11336_vm14, %v4815_v1, %v7681_v9  ;;  %v2876_v39 = vmax.f32 %v2874_v12, %v2875_v7  ;;  %v2935_v4 = vrot.slane %v2934_v53, 2 }
 0x317   : > { %v2195_v3 = vrot.slane %v2194_v32, 4  ;;  %v2810_v57 = vmax.f32 %v2808_v48, %v2809_v47  ;;  %v9549_v13 = vsel %vm11337_vm3, %v8605_v20, %v7691_v28  ;;  %vm11335_vm2 = vcmask 785408  }
 0x318   : > { %v2263_v30 = vmax.f32 %v2261_v24, %v2262_v31  ;;  %v2877_v42 = vrot.slane %v2876_v39, 2  ;;  %v2936_v27 = vmax.f32 %v2934_v53, %v2935_v4  ;;  %v4846_v38 = vsel %vm11335_vm2, %v4830_v58, %v7685_v8 }
 0x319   : > { %v2196_v46 = vmax.f32 %v2194_v32, %v2195_v3  ;;  %vm11586_vm12 = vcmask 1043456   ;;  %v4764_v1 = vsel %vm11337_vm3, %v8427_v16, %v7690_v36  ;;  %v4847_v48 = vsel %vm11335_vm2, %v4831_v37, %v7686_v14 }
 0x31a   : > { %v3735_v2 = vsel %vm11586_vm12, %v3727_v22, %v2752_v33  ;;  %v2264_v9 = vrot.slane %v2263_v30, 2  ;;  %v2878_v20 = vmax.f32 %v2876_v39, %v2877_v42  ;;  %v2937_v28 = vrot.slane %v2936_v27, 1  ;;  %v9577_v39 = vpop.f32.mrf.mxu0 }
 0x31b   : > { %v2197_v24 = vrot.slane %v2196_v46, 2  ;;  %v4871_v12 = vpack.c.bf16 %v4847_v48, %v4846_v38  ;;  %v9560_v47 = vmax.f32 %v9326_v5, %v9501_v35  ;;  %v9564_v8 = vmax.f32 %v9443_v54, %v9504_v40 }
 0x31c   : > { %v2265_v22 = vmax.f32 %v2263_v30, %v2264_v9  ;;  %v7701_v44 = vunpack.i.h.bf16 %v7699_v29  ;;  %vm11587_vm7 = vcmask 1044480   ;;  %v2879_v36 = vrot.slane %v2878_v20, 1 }
 0x31d   : > { %v3743_v16 = vsel %vm11587_vm7, %v3735_v2, %v2810_v57  ;;  %v2198_v43 = vmax.f32 %v2196_v46, %v2197_v24  ;;  %5139 = vmatmul.bf16.vlgmr.msrb.gmra.mxu2 %v4871_v12  ;;  %v7700_v14 = vunpack.i.l.bf16 %v7699_v29  ;;  %v2938_v49 = vmax.f32 %v2936_v27, %v2937_v28 }
 0x31e   : > { %v2266_v7 = vrot.slane %v2265_v22, 1  ;;  %v11588_v53 = vunpack.i.l.bf16 %v9371_v21  ;;  %v11589_v5 = vunpack.i.h.bf16 %v9371_v21  ;;  %v2880_v35 = vmax.f32 %v2878_v20, %v2879_v36 }
 0x31f   : > { %v2199_v40 = vrot.slane %v2198_v43, 1  ;;  %v3907_v31 = vrot.slane %v9496_v10, 1  ;;  %vm11590_vm6 = vcmask 1045504   ;;  %v4646_v57 = vrot.slane %v9345_v41, 7 }
 0x320   : > { %v4781_v32 = vsel %vm11336_vm14, %v4764_v1, %v11588_v53  ;;  %v4782_v54 = vsel %vm11336_vm14, %v9549_v13, %v11589_v5  ;;  %v3751_v4 = vsel %vm11590_vm6, %v3743_v16, %v2880_v35  ;;  %v4647_v21 = vrot.slane %v9560_v47, 7 }
 0x321   : > { %v4798_v33 = vsel %vm11335_vm2, %v4781_v32, %v7700_v14  ;;  %v4799_v58 = vsel %vm11335_vm2, %v4782_v54, %v7701_v44  ;;  %v2200_v3 = vmax.f32 %v2198_v43, %v2199_v40  ;;  %vm11591_vm12 = vcmask 1046528  }
 0x322   : > { %v4870_v37 = vpack.c.bf16 %v4799_v58, %v4798_v33  ;;  %v3759_v30 = vsel %vm11591_vm12, %v3751_v4, %v2938_v49  ;;  %v2267_v42 = vmax.f32 %v2265_v22, %v2266_v7  ;;  %v4649_v27 = vrot.slane %v9564_v8, 7  ;;  %vm11594_vm6 = vmmov %vm11591_vm12  ;;  %v1057_v7 = vpop.f32.mrf.mxu0 }
 0x323   : > { %v3908_v46 = vrot.slane %v3759_v30, 1  ;;  %vm11592_vm7 = vcmask 1043456   ;;  %v4648_v29 = vsel %vm3642_vm15, %v4646_v57, %v4647_v21  ;;  %vm11593_vm2 = vcmask 1044480   ;;  %vm11596_vm14 = vmmov %vm11594_vm6 }
 0x324   : > { %5090 = vmatmul.bf16.vlgmr.msrb.gmra.mxu1 %v4870_v37  ;;  %v3672_v38 = vsel %vm11592_vm7, %v3663_v50, %v2200_v3  ;;  %v4650_v1 = vsel %vm3642_vm15, %v4647_v21, %v4649_v27  ;;  %v11595_v48 = vrot.slane %v8598_v60, 1  ;;  %v4471_v24 = vrot.slane %v9560_v47, 5  ;;  %vm11602_vm7 = vmmov %vm11594_vm6 }
 0x325   : > { %v9587_v2 = vsel %vm11593_vm2, %v3672_v38, %v2267_v42  ;;  %v3909_v9 = vsel %vm11594_vm6, %v3907_v31, %v3908_v46  ;;  %v7717_v28 = vpack.i.bf16 %v4650_v1, %v4648_v29  ;;  %v4470_v50 = vrot.slane %v9345_v41, 5 }
 0x326   : > { %v3911_v20 = vsel %vm11596_vm14, %v3908_v46, %v11595_v48  ;;  %v3963_v12 = vmax.f32 %v9496_v10, %v3909_v9  ;;  %v4150_v44 = vrot.slane %v9345_v41, 1  ;;  %v4151_v16 = vrot.slane %v9560_v47, 1  ;;  %vm11597_vm14 = vmmov %vm11594_vm6 }
 0x327   : > { %v3964_v22 = vmax.f32 %v3759_v30, %v3911_v20  ;;  %7718 = vrot.lane.b32.xlu0 %v7717_v28, %s7962_s19  ;;  %v7965_v14 = vmov 0.0   ;;  %v4473_v49 = vrot.slane %v9564_v8, 5  ;;  %v4472_v53 = vsel %vm3660_vm10, %v4470_v50, %v4471_v24 }
 0x328   : > { %v4059_v36 = vrot.slane %v3963_v12, 2  ;;  %v9600_v60 = vrot.slane %v7965_v14, 1  ;;  %v4152_v10 = vsel %vm11597_vm14, %v4150_v44, %v4151_v16  ;;  %v1053_v32 = vadd.f32 %v9266_v19, %v9544_v18 }
 0x329   : > { %v4060_v43 = vrot.slane %v3964_v22, 2  ;;  %vm11598_vm2 = vcmask 1045504   ;;  %v11599_v54 = vrot.slane %v8691_v59, 2  ;;  %v2323_v40 = vsel %vm2303_vm8, %v9535_v25, -inf }
 0x32a   : > { %vm11600_vm12 = vmmov %vm11598_vm2  ;;  %v11601_v31 = vrot.slane %v8611_v0, 1  ;;  %v4474_v19 = vsel %vm3660_vm10, %v4471_v24, %v4473_v49  ;;  %vm1335_vm6 = vcmp.gt.f32.partialorder %v1053_v32, 0.0  ;;  %v1471_v59 = vmul.f32 0.01, %v1053_v32 }
 0x32b   : > { %v4061_v5 = vsel %vm11598_vm2, %v4059_v36, %v4060_v43  ;;  %v4063_v35 = vsel %vm11600_vm12, %v4060_v43, %v11599_v54  ;;  %v7707_v4 = vpack.i.bf16 %v4152_v10, %v4474_v19  ;;  %v4326_v3 = vrot.slane %v9345_v41, 3  ;;  %vm11605_vm12 = vmmov %vm11602_vm7  ;;  %v9643_v36 = vld [vmem:[%s11301_s2] ss:$0 sm:$0xff] }
 0x32c   : > { %v9613_v33 = vmax.f32 %v3963_v12, %v4061_v5  ;;  %v9615_v58 = vmax.f32 %v3964_v22, %v4063_v35  ;;  %v4731_v37 = vsel %vm11602_vm7, %v11601_v31, %v9600_v60  ;;  %v4327_v57 = vrot.slane %v9560_v47, 3  ;;  %v1059_v12 = vpop.f32.mrf.mxu0 }
 0x32d   : > { %v7702_v18 = vpack.i.bf16 %v4472_v53, %v4731_v37  ;;  %v4329_v25 = vrot.slane %v9564_v8, 3  ;;  %v4558_v21 = vrot.slane %v9345_v41, 6  ;;  %7708 = vrot.lane.b32.xlu1 %v7707_v4, %s7963_s20  ;;  %v1607_v30 = vsel %vm1335_vm6, %v1053_v32, %v1471_v59 }
 0x32e   : > { %v4559_v42 = vrot.slane %v9560_v47, 6  ;;  %v4561_v27 = vrot.slane %v9564_v8, 6  ;;  %v4153_v46 = vrot.slane %v9564_v8, 1  ;;  %v2324_v38 = vsel %vm2305_vm9, %v1607_v30, -inf }
 0x32f   : > { %7703 = vrot.lane.b32.xlu2 %v7702_v18, %s7963_s20  ;;  %v2392_v29 = vsel %vm2377_vm13, %v1607_v30, -inf  ;;  %vm11603_vm14 = vcmask 1044480   ;;  %v2325_v48 = vmax.f32 %v2323_v40, %v2324_v38  ;;  %v1055_v43 = vadd.f32 %v9643_v36, %v9577_v39 }
 0x330   : > { %v4328_v1 = vsel %vm11603_vm14, %v4326_v3, %v4327_v57  ;;  %vm11604_vm2 = vmmov %vm11603_vm14  ;;  %v2393_v20 = vrot.slane %v2392_v29, 4  ;;  %v4560_v24 = vsel %vm3651_vm0, %v4558_v21, %v4559_v42  ;;  %v4562_v22 = vsel %vm3651_vm0, %v4559_v42, %v4561_v27 }
 0x331   : > { %v4330_v9 = vsel %vm11604_vm2, %v4327_v57, %v4329_v25  ;;  %v4154_v50 = vsel %vm11605_vm12, %v4151_v16, %v4153_v46  ;;  %v4732_v44 = vsel %vm11602_vm7, %v4153_v46, %v9600_v60  ;;  %v2326_v14 = vrot.slane %v2325_v48, 4 }
 0x332   : > { %v7732_v28 = vpack.i.bf16 %v4330_v9, %v4328_v1  ;;  %v2394_v49 = vmax.f32 %v2392_v29, %v2393_v20  ;;  %v7712_v53 = vpack.i.bf16 %v4562_v22, %v4560_v24  ;;  %v7722_v10 = vpack.i.bf16 %v4732_v44, %v4154_v50 }
 0x333   : > { %vm1336_vm6 = vcmp.gt.f32.partialorder %v1055_v43, 0.0  ;;  %v1472_v32 = vmul.f32 0.01, %v1055_v43  ;;  %v4238_v16 = vrot.slane %v9345_v41, 2  ;;  %v4239_v5 = vrot.slane %v9560_v47, 2 }
 0x334   : > { %7733 = vrot.lane.b32.xlu0 %v7732_v28, %s7962_s19  ;;  %v2327_v54 = vmax.f32 %v2325_v48, %v2326_v14  ;;  %v2395_v35 = vrot.slane %v2394_v49, 2  ;;  %v4241_v40 = vrot.slane %v9564_v8, 2  ;;  %v1058_v31 = vadd.f32 %v9643_v36, %v1057_v7  ;;  %v1062_v27 = vpop.f32.mrf.mxu0 }
 0x335   : > { %v1608_v37 = vsel %vm1336_vm6, %v1055_v43, %v1472_v32  ;;  %vm11606_vm14 = vcmask 1045504   ;;  %v1060_v19 = vadd.f32 %v9643_v36, %v1059_v12  ;;  %7723 = vrot.lane.b32.xlu1 %v7722_v10, %s7963_s20  ;;  %vm11607_vm2 = vcmask 258048  }
 0x336   : > { %v4240_v39 = vsel %vm11606_vm14, %v4238_v16, %v4239_v5  ;;  %v2328_v18 = vrot.slane %v2327_v54, 2  ;;  %v2396_v4 = vmax.f32 %v2394_v49, %v2395_v35  ;;  %v2448_v59 = vsel %vm11607_vm2, %v1608_v37, -inf  ;;  %vm11609_vm7 = vmmov %vm11606_vm14  ;;  %v7555_v16 = vld [vmem:[%s11302_s3 + $0x98] sm:$0xff] }
 0x337   : > { %7713 = vrot.lane.b32.xlu2 %v7712_v53, %s7964_s21  ;;  %vm11608_vm12 = vcmask 261125   ;;  %v2449_v57 = vrot.slane %v2448_v59, 4  ;;  %v4242_v25 = vsel %vm11609_vm7, %v4239_v5, %v4241_v40  ;;  %vm1337_vm3 = vcmp.gt.f32.partialorder %v1058_v31, 0.0  ;;  %vm11611_vm2 = vmmov %vm11609_vm7  ;;  %5184 = vmatpush.bf16.msrb.mxu3 %v7555_v16 }
 0x338   : > { %v2508_v3 = vsel %vm11608_vm12, %v1608_v37, -inf  ;;  %v1473_v7 = vmul.f32 0.01, %v1058_v31  ;;  %v2329_v21 = vmax.f32 %v2327_v54, %v2328_v18  ;;  %v2397_v30 = vrot.slane %v2396_v4, 1 }
 0x339   : > { %v7727_v42 = vpack.i.bf16 %v4242_v25, %v4240_v39  ;;  %vm1338_vm6 = vcmp.gt.f32.partialorder %v1060_v19, 0.0  ;;  %v2450_v46 = vmax.f32 %v2448_v59, %v2449_v57  ;;  %v1474_v29 = vmul.f32 0.01, %v1060_v19 }
 0x33a   : > { %v1609_v38 = vsel %vm1337_vm3, %v1058_v31, %v1473_v7  ;;  %v1063_v1 = vadd.f32 %v9643_v36, %v1062_v27  ;;  %v2330_v9 = vrot.slane %v2329_v21, 1  ;;  %v2398_v48 = vmax.f32 %v2396_v4, %v2397_v30 }
 0x33b   : > { %v2509_v20 = vsel %vm1969_vm4, %v1609_v38, -inf  ;;  %v2576_v28 = vsel %vm2041_vm5, %v1609_v38, -inf  ;;  %v2451_v24 = vrot.slane %v2450_v46, 2  ;;  %v2636_v50 = vsel %vm2098_vm11, %v1609_v38, -inf }
 0x33c   : > { %v2510_v12 = vmax.f32 %v2508_v3, %v2509_v20  ;;  %v2577_v22 = vrot.slane %v2576_v28, 4  ;;  %v2331_v44 = vmax.f32 %v2329_v21, %v2330_v9  ;;  %v1610_v43 = vsel %vm1338_vm6, %v1060_v19, %v1474_v29  ;;  %v1064_v59 = vpop.f32.mrf.mxu0 }
 0x33d   : > { %vm1339_vm14 = vcmp.gt.f32.partialorder %v1063_v1, 0.0  ;;  %v1475_v14 = vmul.f32 0.01, %v1063_v1  ;;  %v2452_v49 = vmax.f32 %v2450_v46, %v2451_v24  ;;  %vm11610_vm3 = vcmask 257024  }
 0x33e   : > { %v2511_v53 = vrot.slane %v2510_v12, 4  ;;  %v2578_v10 = vmax.f32 %v2576_v28, %v2577_v22  ;;  %v2637_v32 = vsel %vm11610_vm3, %v1610_v43, -inf  ;;  %v3690_v5 = vsel %vm11611_vm2, %v9587_v2, %v2331_v44 }
 0x33f   : > { %7728 = vrot.lane.b32.xlu2 %v7727_v42, %s7964_s21  ;;  %v2638_v54 = vmax.f32 %v2636_v50, %v2637_v32  ;;  %v1611_v35 = vsel %vm1339_vm14, %v1063_v1, %v1475_v14  ;;  %vm11612_vm12 = vcmask 1046528   ;;  %vm11613_vm7 = vcmask 261124  }
 0x340   : > { %v9671_v40 = vsel %vm11612_vm12, %v3690_v5, %v2398_v48  ;;  %v2512_v31 = vmax.f32 %v2510_v12, %v2511_v53  ;;  %v2579_v37 = vrot.slane %v2578_v10, 2  ;;  %v2708_v19 = vsel %vm11613_vm7, %v1610_v43, -inf }
 0x341   : > { %v2639_v39 = vrot.slane %v2638_v54, 4  ;;  %vm11614_vm6 = vcmask 253952   ;;  %vm11615_vm3 = vcmask 259073   ;;  %v2453_v3 = vrot.slane %v2452_v49, 1 }
 0x342   : > { %v2709_v18 = vsel %vm11614_vm6, %v1611_v35, -inf  ;;  %v2776_v4 = vsel %vm11615_vm3, %v1611_v35, -inf  ;;  %v2513_v2 = vrot.slane %v2512_v31, 2  ;;  %v2580_v57 = vmax.f32 %v2578_v10, %v2579_v37 }
 0x343   : > { %v2710_v25 = vmax.f32 %v2708_v19, %v2709_v18  ;;  %v2640_v7 = vmax.f32 %v2638_v54, %v2639_v39  ;;  %v2777_v21 = vrot.slane %v2776_v4, 4  ;;  %v1065_v30 = vadd.f32 %v9643_v36, %v1064_v59 }
 0x344   : > { %v2514_v42 = vmax.f32 %v2512_v31, %v2513_v2  ;;  %v2581_v27 = vrot.slane %v2580_v57, 1  ;;  %v2454_v9 = vmax.f32 %v2452_v49, %v2453_v3  ;;  %v2836_v28 = vsel %vm2303_vm8, %v1611_v35, -inf  ;;  %v1067_v54 = vpop.f32.mrf.mxu0 }
 0x345   : > { %v2711_v46 = vrot.slane %v2710_v25, 4  ;;  %v2641_v38 = vrot.slane %v2640_v7, 2  ;;  %v2778_v29 = vmax.f32 %v2776_v4, %v2777_v21  ;;  %vm1340_vm14 = vcmp.gt.f32.partialorder %v1065_v30, 0.0 }
 0x346   : > { %v1476_v1 = vmul.f32 0.01, %v1065_v30  ;;  %v2515_v48 = vrot.slane %v2514_v42, 1  ;;  %v2582_v24 = vmax.f32 %v2580_v57, %v2581_v27  ;;  %v1068_v2 = vadd.f32 %v9643_v36, %v1067_v54 }
 0x347   : > { %v2712_v20 = vmax.f32 %v2710_v25, %v2711_v46  ;;  %v2642_v12 = vmax.f32 %v2640_v7, %v2641_v38  ;;  %v2779_v22 = vrot.slane %v2778_v29, 2  ;;  %vm11616_vm2 = vcmask 1043456  }
 0x348   : > { %v1612_v50 = vsel %vm1340_vm14, %v1065_v30, %v1476_v1  ;;  %v2516_v44 = vmax.f32 %v2514_v42, %v2515_v48  ;;  %vm11617_vm12 = vcmask 1044480   ;;  %v1477_v38 = vmul.f32 0.01, %v1068_v2 }
 0x349   : > { %v2713_v43 = vrot.slane %v2712_v20, 2  ;;  %v2837_v14 = vsel %vm2305_vm9, %v1612_v50, -inf  ;;  %v2904_v53 = vsel %vm2377_vm13, %v1612_v50, -inf  ;;  %v2643_v10 = vrot.slane %v2642_v12, 1 }
 0x34a   : > { %v2780_v32 = vmax.f32 %v2778_v29, %v2779_v22  ;;  %v2838_v16 = vmax.f32 %v2836_v28, %v2837_v14  ;;  %v2905_v5 = vrot.slane %v2904_v53, 4  ;;  %v3707_v49 = vsel %vm3642_vm15, %v2454_v9, %v2516_v44 }
 0x34b   : > { %v2714_v31 = vmax.f32 %v2712_v20, %v2713_v43  ;;  %v3715_v35 = vsel %vm3651_vm0, %v3707_v49, %v2582_v24  ;;  %v2644_v37 = vmax.f32 %v2642_v12, %v2643_v10  ;;  %vm1341_vm7 = vcmp.gt.f32.partialorder %v1068_v2, 0.0 }
 0x34c   : > { %v2781_v39 = vrot.slane %v2780_v32, 1  ;;  %v2839_v19 = vrot.slane %v2838_v16, 4  ;;  %v2906_v4 = vmax.f32 %v2904_v53, %v2905_v5  ;;  %v1069_v29 = vpop.f32.mrf.mxu0  ;;  %v1613_v24 = vsel %vm1341_vm7, %v1068_v2, %v1477_v38 }
 0x34d   : > { %v2715_v18 = vrot.slane %v2714_v31, 1  ;;  %v3723_v59 = vsel %vm3660_vm10, %v3715_v35, %v2644_v37  ;;  %v1070_v9 = vadd.f32 %v9643_v36, %v1069_v29  ;;  %vm11618_vm3 = vcmask 1045504  }
 0x34e   : > { %v2840_v3 = vmax.f32 %v2838_v16, %v2839_v19  ;;  %v2907_v25 = vrot.slane %v2906_v4, 2  ;;  %v2782_v7 = vmax.f32 %v2780_v32, %v2781_v39  ;;  %vm11619_vm14 = vcmask 1046528  }
 0x34f   : > { %v2716_v57 = vmax.f32 %v2714_v31, %v2715_v18  ;;  %vm1342_vm6 = vcmp.gt.f32.partialorder %v1070_v9, 0.0  ;;  %v1478_v20 = vmul.f32 0.01, %v1070_v9  ;;  %v3879_v53 = vrot.slane %v9671_v40, 1 }
 0x350   : > { %v2841_v21 = vrot.slane %v2840_v3, 2  ;;  %v2908_v42 = vmax.f32 %v2906_v4, %v2907_v25  ;;  %vm11622_vm7 = vcmask 258048  }
 0x351   : > { %v3731_v30 = vsel %vm11616_vm2, %v3723_v59, %v2716_v57  ;;  %v1614_v22 = vsel %vm1342_vm6, %v1070_v9, %v1478_v20  ;;  %vm11620_vm2 = vcmask 261125   ;;  %v2960_v49 = vsel %vm11622_vm7, %v1613_v24, -inf }
 0x352   : > { %v3739_v27 = vsel %vm11617_vm12, %v3731_v30, %v2782_v7  ;;  %v2842_v46 = vmax.f32 %v2840_v3, %v2841_v21  ;;  %v2909_v1 = vrot.slane %v2908_v42, 1  ;;  %v3021_v44 = vsel %vm1969_vm4, %v1614_v22, -inf  ;;  %vm11621_vm12 = vmmov %vm11619_vm14 }
 0x353   : > { %v3020_v14 = vsel %vm11620_vm2, %v1613_v24, -inf  ;;  %v2961_v39 = vrot.slane %v2960_v49, 4  ;;  %v3088_v19 = vsel %vm2041_vm5, %v1614_v22, -inf  ;;  %v3148_v4 = vsel %vm2098_vm11, %v1614_v22, -inf  ;;  %v7554_v24 = vld [vmem:[%s11302_s3 + $0x90] sm:$0xff] }
 0x354   : > { %v2843_v48 = vrot.slane %v2842_v46, 1  ;;  %v2910_v12 = vmax.f32 %v2908_v42, %v2909_v1  ;;  %v3022_v32 = vmax.f32 %v3020_v14, %v3021_v44  ;;  %v1072_v16 = vpop.f32.mrf.mxu0  ;;  %v3089_v7 = vrot.slane %v3088_v19, 4  ;;  %5185 = vmatpush.bf16.msrb.mxu3 %v7554_v24 }
 0x355   : > { %v1073_v5 = vadd.f32 %v9643_v36, %v1072_v16  ;;  %v2962_v25 = vmax.f32 %v2960_v49, %v2961_v39  ;;  %vm11624_vm2 = vcmask 261124   ;;  %vm11626_vm7 = vcmask 259073  }
 0x356   : > { %v2844_v28 = vmax.f32 %v2842_v46, %v2843_v48  ;;  %v3023_v35 = vrot.slane %v3022_v32, 4  ;;  %v3090_v38 = vmax.f32 %v3088_v19, %v3089_v7  ;;  %v2399_v39 = vsel %vm2377_vm13, %v8107_v63, -inf }
 0x357   : > { %vm1343_vm6 = vcmp.gt.f32.partialorder %v1073_v5, 0.0  ;;  %v1479_v37 = vmul.f32 0.01, %v1073_v5  ;;  %v2963_v46 = vrot.slane %v2962_v25, 2 }
 0x358   : > { %v3747_v50 = vsel %vm11618_vm3, %v3739_v27, %v2844_v28  ;;  %vm11623_vm3 = vcmask 257024   ;;  %v3024_v3 = vmax.f32 %v3022_v32, %v3023_v35 }
 0x359   : > { %v9690_v43 = vsel %vm11619_vm14, %v3747_v50, %v2910_v12  ;;  %v1615_v18 = vsel %vm1343_vm6, %v1073_v5, %v1479_v37  ;;  %vm11627_vm6 = vmmov %vm11626_vm7  ;;  %v2964_v14 = vmax.f32 %v2962_v25, %v2963_v46  ;;  %v7553_v5 = vld [vmem:[%s11302_s3 + $0x88] sm:$0xff] }
 0x35a   : > { %v3880_v10 = vrot.slane %v9690_v43, 1  ;;  %v3149_v59 = vsel %vm11623_vm3, %v1615_v18, -inf  ;;  %v3025_v42 = vrot.slane %v3024_v3, 2  ;;  %v3220_v1 = vsel %vm11624_vm2, %v1615_v18, -inf  ;;  %5186 = vmatpush.bf16.msrb.mxu3 %v7553_v5 }
 0x35b   : > { %v3150_v2 = vmax.f32 %v3148_v4, %v3149_v59  ;;  %v2268_v12 = vsel %vm11627_vm6, %v8100_v56, -inf  ;;  %v2965_v4 = vrot.slane %v2964_v14, 1  ;;  %vm11630_vm2 = vcmask 1044480  }
 0x35c   : > { %v3881_v54 = vsel %vm11621_vm12, %v3879_v53, %v3880_v10  ;;  %v1074_v57 = vpop.f32.mrf.mxu0  ;;  %vm11625_vm12 = vcmask 253952   ;;  %v3026_v22 = vmax.f32 %v3024_v3, %v3025_v42  ;;  %v3091_v53 = vrot.slane %v3090_v38, 2 }
 0x35d   : > { %v9701_v31 = vmax.f32 %v9671_v40, %v3881_v54  ;;  %v1075_v21 = vadd.f32 %v9643_v36, %v1074_v57  ;;  %v3151_v40 = vrot.slane %v3150_v2, 4  ;;  %v2269_v37 = vrot.slane %v2268_v12, 4  ;;  %v7552_v57 = vld [vmem:[%s11302_s3 + $0x80] sm:$0xff] }
 0x35e   : > { %v3027_v19 = vrot.slane %v3026_v22, 1  ;;  %v3092_v59 = vmax.f32 %v3090_v38, %v3091_v53  ;;  %5187 = vmatpush.bf16.msrb.mxu3 %v7552_v57  ;;  %v2335_v53 = vrot.slane %v8114_v11, 4  ;;  %vm11633_vm6 = vcmask 261125  }
 0x35f   : > { %vm1344_vm14 = vcmp.gt.f32.partialorder %v1075_v21, 0.0  ;;  %v1480_v30 = vmul.f32 0.01, %v1075_v21  ;;  %v3152_v27 = vmax.f32 %v3150_v2, %v3151_v40  ;;  %v2270_v24 = vmax.f32 %v2268_v12, %v2269_v37 }
 0x360   : > { %v3028_v46 = vmax.f32 %v3026_v22, %v3027_v19 }
 0x361   : > { %v1616_v29 = vsel %vm1344_vm14, %v1075_v21, %v1480_v30  ;;  %v3153_v50 = vrot.slane %v3152_v27, 2  ;;  %v2400_v30 = vrot.slane %v2399_v39, 4 }
 0x362   : > { %v3221_v9 = vsel %vm11625_vm12, %v1616_v29, -inf  ;;  %v3288_v48 = vsel %vm11626_vm7, %v1616_v29, -inf  ;;  %v3348_v7 = vsel %vm2303_vm8, %v1616_v29, -inf  ;;  %vm11631_vm12 = vcmask 1045504  }
 0x363   : > { %v3222_v20 = vmax.f32 %v3220_v1, %v3221_v9  ;;  %v3289_v28 = vrot.slane %v3288_v48, 4  ;;  %v3154_v18 = vmax.f32 %v3152_v27, %v3153_v50  ;;  %v3093_v9 = vrot.slane %v3092_v59, 1 }
 0x364   : > { %v1077_v44 = vpop.f32.mrf.mxu0  ;;  %v2966_v50 = vmax.f32 %v2964_v14, %v2965_v4  ;;  %vm11632_vm7 = vcmask 1046528  }
 0x365   : > { %v3223_v32 = vrot.slane %v3222_v20, 4  ;;  %v1078_v16 = vadd.f32 %v9643_v36, %v1077_v44  ;;  %v3290_v54 = vmax.f32 %v3288_v48, %v3289_v28  ;;  %v3155_v38 = vrot.slane %v3154_v18, 1 }
 0x366   : > { %v3763_v22 = vsel %vm3642_vm15, %v2966_v50, %v3028_v46 }
 0x367   : > { %v3224_v49 = vmax.f32 %v3222_v20, %v3223_v32  ;;  %vm1345_vm3 = vcmp.gt.f32.partialorder %v1078_v16, 0.0  ;;  %v1481_v35 = vmul.f32 0.01, %v1078_v16  ;;  %v3291_v25 = vrot.slane %v3290_v54, 2 }
 0x368   : > { %v2401_v32 = vmax.f32 %v2399_v39, %v2400_v30 }
 0x369   : > { %v3225_v3 = vrot.slane %v3224_v49, 2  ;;  %v1617_v2 = vsel %vm1345_vm3, %v1078_v16, %v1481_v35  ;;  %v3292_v44 = vmax.f32 %v3290_v54, %v3291_v25  ;;  %v3156_v35 = vmax.f32 %v3154_v18, %v3155_v38 }
 0x36a   : > { %v3349_v21 = vsel %vm2305_vm9, %v1617_v2, -inf  ;;  %v3416_v40 = vsel %vm2377_vm13, %v1617_v2, -inf  ;;  %v2271_v54 = vrot.slane %v2270_v24, 2  ;;  %vm11628_vm9 = vcmask 258048  }
 0x36b   : > { %v3226_v63 = vmax.f32 %v3224_v49, %v3225_v3  ;;  %v3350_v42 = vmax.f32 %v3348_v7, %v3349_v21  ;;  %v3417_v27 = vrot.slane %v3416_v40, 4  ;;  %v1292_v49 = vpop.f32.mrf.mxu3  ;;  %v3094_v3 = vmax.f32 %v3092_v59, %v3093_v9 }
 0x36c   : > { %v1079_v1 = vpop.f32.mrf.mxu0  ;;  %v3293_v12 = vrot.slane %v3292_v44, 1  ;;  %v2336_v25 = vmax.f32 %v8114_v11, %v2335_v53  ;;  %vm11629_vm13 = vcmask 1043456   ;;  %vm11634_vm3 = vcmask 253952  }
 0x36d   : > { %v3227_v48 = vrot.slane %v3226_v63, 1  ;;  %v3351_v20 = vrot.slane %v3350_v42, 4  ;;  %v3418_v28 = vmax.f32 %v3416_v40, %v3417_v27  ;;  %v1080_v29 = vadd.f32 %v9643_v36, %v1079_v1 }
 0x36e   : > { %v3771_v37 = vsel %vm3651_vm0, %v3763_v22, %v3094_v3  ;;  %v3294_v46 = vmax.f32 %v3292_v44, %v3293_v12 }
 0x36f   : > { %v3352_v16 = vmax.f32 %v3350_v42, %v3351_v20  ;;  %v3419_v5 = vrot.slane %v3418_v28, 2  ;;  %vm1346_vm8 = vcmp.gt.f32.partialorder %v1080_v29, 0.0  ;;  %v1482_v19 = vmul.f32 0.01, %v1080_v29 }
 0x370   : > { %v3228_v2 = vmax.f32 %v3226_v63, %v3227_v48  ;;  %v3779_v21 = vsel %vm3660_vm10, %v3771_v37, %v3156_v35  ;;  %v2402_v42 = vrot.slane %v2401_v32, 2  ;;  %v2272_v48 = vmax.f32 %v2270_v24, %v2271_v54 }
 0x371   : > { %v3353_v7 = vrot.slane %v3352_v16, 2  ;;  %v3420_v57 = vmax.f32 %v3418_v28, %v3419_v5  ;;  %v1618_v14 = vsel %vm1346_vm8, %v1080_v29, %v1482_v19  ;;  %v2337_v28 = vrot.slane %v2336_v25, 2  ;;  %vm11635_vm8 = vmmov %vm11632_vm7 }
 0x372   : > { %v3472_v39 = vsel %vm11628_vm9, %v1618_v14, -inf  ;;  %v3787_v59 = vsel %vm11629_vm13, %v3779_v21, %v3228_v2  ;;  %v2403_v50 = vmax.f32 %v2401_v32, %v2402_v42  ;;  %v3532_v44 = vsel %vm11633_vm6, %v1618_v14, -inf }
 0x373   : > { %v3354_v4 = vmax.f32 %v3352_v16, %v3353_v7  ;;  %v3421_v40 = vrot.slane %v3420_v57, 1  ;;  %v3473_v18 = vrot.slane %v3472_v39, 4  ;;  %v3795_v20 = vsel %vm11630_vm2, %v3787_v59, %v3294_v46  ;;  %v1294_v5 = vpop.f32.mrf.mxu3 }
 0x374   : > { %v1082_v30 = vpop.f32.mrf.mxu0  ;;  %v1293_v16 = vadd.f32 %v9643_v36, %v1292_v49  ;;  %v9750_v2 = vsel %vm11634_vm3, %v8100_v56, -inf  ;;  %v2273_v49 = vrot.slane %v2272_v48, 1  ;;  %v2338_v54 = vmax.f32 %v2336_v25, %v2337_v28 }
 0x375   : > { %v3355_v63 = vrot.slane %v3354_v4, 1  ;;  %v1083_v27 = vadd.f32 %v9643_v36, %v1082_v30  ;;  %v3474_v1 = vmax.f32 %v3472_v39, %v3473_v18  ;;  %v3422_v11 = vmax.f32 %v3420_v57, %v3421_v40 }
 0x376   : > { %v1295_v14 = vadd.f32 %v9643_v36, %v1294_v5  ;;  %v2404_v39 = vrot.slane %v2403_v50, 1  ;;  %v1567_v18 = vmul.f32 0.01, %v1293_v16  ;;  %v4031_v42 = vrot.slane %v9701_v31, 2 }
 0x377   : > { %v3356_v38 = vmax.f32 %v3354_v4, %v3355_v63  ;;  %vm1347_vm14 = vcmp.gt.f32.partialorder %v1083_v27, 0.0  ;;  %v1483_v9 = vmul.f32 0.01, %v1083_v27  ;;  %v3475_v19 = vrot.slane %v3474_v1, 2 }
 0x378   : > { %v2339_v46 = vrot.slane %v2338_v54, 1  ;;  %vm1431_vm13 = vcmp.gt.f32.partialorder %v1293_v16, 0.0  ;;  %vm11637_vm2 = vcmask 258048   ;;  %v9773_v5 = vmax.f32 %v2403_v50, %v2404_v39 }
 0x379   : > { %v3803_v29 = vsel %vm11631_vm12, %v3795_v20, %v3356_v38  ;;  %v1619_v53 = vsel %vm1347_vm14, %v1083_v27, %v1483_v9  ;;  %v3476_v30 = vmax.f32 %v3474_v1, %v3475_v19  ;;  %vm11636_vm14 = vmmov %vm11631_vm12  ;;  %vm1432_vm12 = vcmp.gt.f32.partialorder %v1295_v14, 0.0 }
 0x37a   : > { %v9740_v22 = vsel %vm11632_vm7, %v3803_v29, %v3422_v11  ;;  %v1824_v35 = vsel %vm1739_vm1, %v1619_v53, -inf  ;;  %v9771_v53 = vmax.f32 %v2272_v48, %v2273_v49  ;;  %vm11638_vm7 = vmmov %vm11637_vm2  ;;  %vm11639_vm3 = vcmask 261120  }
 0x37b   : > { %v3882_v24 = vrot.slane %v9740_v22, 1  ;;  %v3533_v3 = vsel %vm1969_vm4, %v1824_v35, -inf  ;;  %v3600_v32 = vsel %vm2041_vm5, %v1824_v35, -inf  ;;  %v3477_v28 = vrot.slane %v3476_v30, 1 }
 0x37c   : > { %v3534_v7 = vmax.f32 %v3532_v44, %v3533_v3  ;;  %v3601_v57 = vrot.slane %v3600_v32, 4  ;;  %v1084_v12 = vpop.f32.mrf.mxu0  ;;  %v1703_v44 = vsel %vm1431_vm13, %v1293_v16, %v1567_v18  ;;  %vm11641_vm13 = vmmov %vm11633_vm6 }
 0x37d   : > { %v3883_v37 = vsel %vm11635_vm8, %v3880_v10, %v3882_v24  ;;  %v1085_v4 = vadd.f32 %v9643_v36, %v1084_v12  ;;  %v1568_v10 = vmul.f32 0.01, %v1295_v14  ;;  %v9783_v50 = vsel %vm11633_vm6, %v1703_v44, -inf }
 0x37e   : > { %v9760_v21 = vmax.f32 %v9690_v43, %v3883_v37  ;;  %v3535_v56 = vrot.slane %v3534_v7, 4  ;;  %v3602_v40 = vmax.f32 %v3600_v32, %v3601_v57  ;;  %v9776_v37 = vmax.f32 %v2338_v54, %v2339_v46 }
 0x37f   : > { %vm1348_vm9 = vcmp.gt.f32.partialorder %v1085_v4, 0.0  ;;  %v1484_v25 = vmul.f32 0.01, %v1085_v4  ;;  %v3478_v16 = vmax.f32 %v3476_v30, %v3477_v28  ;;  %v4414_v30 = vrot.slane %v9345_v41, 4 }
 0x380   : > { %v4032_v59 = vrot.slane %v9760_v21, 2  ;;  %v3536_v63 = vmax.f32 %v3534_v7, %v3535_v56  ;;  %v3603_v27 = vrot.slane %v3602_v40, 2  ;;  %vm11647_vm6 = vcmask 261124  }
 0x381   : > { %v1620_v38 = vsel %vm1348_vm9, %v1085_v4, %v1484_v25  ;;  %v1704_v4 = vsel %vm1432_vm12, %v1295_v14, %v1568_v10  ;;  %v4415_v14 = vrot.slane %v9560_v47, 4  ;;  %vm11640_vm9 = vcmask 523264   ;;  %vm11645_vm12 = vmmov %vm11639_vm3 }
 0x382   : > { %v4033_v43 = vsel %vm11636_vm14, %v4031_v42, %v4032_v59  ;;  %v3537_v9 = vrot.slane %v3536_v63, 2  ;;  %v3604_v20 = vmax.f32 %v3602_v40, %v3603_v27  ;;  %v1932_v1 = vsel %vm11637_vm2, %v1620_v38, -inf }
 0x383   : > { %v9769_v11 = vmax.f32 %v9701_v31, %v4033_v43  ;;  %v1933_v29 = vrot.slane %v1932_v1, 4  ;;  %v9779_v31 = vsel %vm11638_vm7, %v1703_v44, -inf  ;;  %v9790_v18 = vsel %vm1739_vm1, %v1704_v4, -inf }
 0x384   : > { %v3538_v19 = vmax.f32 %v3536_v63, %v3537_v9  ;;  %v1087_v3 = vpop.f32.mrf.mxu0  ;;  %v3605_v7 = vrot.slane %v3604_v20, 1  ;;  %v4417_v42 = vrot.slane %v9564_v8, 4  ;;  %vm11642_vm1 = vcmask 1043456  }
 0x385   : > { %v1934_v57 = vmax.f32 %v1932_v1, %v1933_v29  ;;  %v1088_v12 = vadd.f32 %v9643_v36, %v1087_v3  ;;  %v9803_v29 = vsel %vm1969_vm4, %v9790_v18, -inf  ;;  %v4416_v44 = vsel %vm11642_vm1, %v4414_v30, %v4415_v14  ;;  %vm11643_vm14 = vmmov %vm11642_vm1 }
 0x386   : > { %v3539_v48 = vrot.slane %v3538_v19, 1  ;;  %v3606_v25 = vmax.f32 %v3604_v20, %v3605_v7  ;;  %vm11644_vm2 = vcmask 1046528   ;;  %vm11646_vm7 = vcmask 257024  }
 0x387   : > { %vm1349_vm8 = vcmp.gt.f32.partialorder %v1088_v12, 0.0  ;;  %v1935_v40 = vrot.slane %v1934_v57, 2  ;;  %v1485_v54 = vmul.f32 0.01, %v1088_v12 }
 0x388   : > { %v3540_v56 = vmax.f32 %v3538_v19, %v3539_v48 }
 0x389   : > { %v7704_v35 = vpop.permute.xlu2 %7703  ;;  %v1621_v63 = vsel %vm1349_vm8, %v1088_v12, %v1485_v54  ;;  %v1936_v9 = vmax.f32 %v1934_v57, %v1935_v40 }
 0x38a   : > { %v7705_v32 = vunpack.i.l.bf16 %v7704_v35  ;;  %v7706_v27 = vunpack.i.h.bf16 %v7704_v35  ;;  %v1997_v52 = vsel %vm1969_vm4, %v1621_v63, -inf  ;;  %v2063_v10 = vsel %vm2041_vm5, %v1621_v63, -inf }
 0x38b   : > { %v2064_v1 = vrot.slane %v2063_v10, 4 }
 0x38c   : > { %v4862_v49 = vsel %vm11639_vm3, %v8611_v0, %v7705_v32  ;;  %v3819_v0 = vsel %vm3642_vm15, %v3478_v16, %v3540_v56  ;;  %v1089_v28 = vpop.f32.mrf.mxu0  ;;  %v4816_v12 = vsel %vm11645_vm12, %v4416_v44, %v7706_v27  ;;  %vm11648_vm3 = vcmask 1045504  }
 0x38d   : > { %v4872_v39 = vpack.c.bf16 %v4862_v49, %v9549_v13  ;;  %v1996_v13 = vsel %vm11641_vm13, %v1620_v38, -inf  ;;  %v3827_v46 = vsel %vm3651_vm0, %v3819_v0, %v3606_v25  ;;  %v9807_v38 = vsel %vm11643_vm14, %v4415_v14, %v4417_v42  ;;  %vm11649_vm8 = vmmov %vm11648_vm3 }
 0x38e   : > { %v3884_v43 = vrot.slane %v3827_v46, 1  ;;  %v1998_v20 = vmax.f32 %v1996_v13, %v1997_v52  ;;  %v1090_v35 = vadd.f32 %v9643_v36, %v1089_v28  ;;  %v2065_v57 = vmax.f32 %v2063_v10, %v2064_v1  ;;  %vm11653_vm1 = vmmov %vm11648_vm3 }
 0x38f   : > { %7129 = vmatmul.msk.bf16.vlgmr.msrb.gmra.mxu3 %vm11640_vm9, %v4872_v39  ;;  %v1937_v49 = vrot.slane %v1936_v9, 1 }
 0x390   : > { %v3885_v19 = vsel %vm11644_vm2, %v3882_v24, %v3884_v43  ;;  %v3979_v3 = vmax.f32 %v3827_v46, %v3884_v43  ;;  %v1999_v7 = vrot.slane %v1998_v20, 4  ;;  %vm1350_vm4 = vcmp.gt.f32.partialorder %v1090_v35, 0.0 }
 0x391   : > { %v9813_v32 = vpop.permute.xlu2 %7713  ;;  %v3953_v4 = vmax.f32 %v9740_v22, %v3885_v19  ;;  %v1486_v48 = vmul.f32 0.01, %v1090_v35  ;;  %v2066_v56 = vrot.slane %v2065_v57, 2  ;;  %v2127_v24 = vsel %vm2098_vm11, %v1621_v63, -inf  ;;  %vm11650_vm11 = vmmov %vm11640_vm9 }
 0x392   : > { %v4036_v16 = vrot.slane %v3979_v3, 2  ;;  %v2000_v39 = vmax.f32 %v1998_v20, %v1999_v7  ;;  %v7715_v40 = vunpack.i.l.bf16 %v9813_v32  ;;  %v7716_v52 = vunpack.i.h.bf16 %v9813_v32  ;;  %vm11651_vm9 = vmmov %vm11645_vm12 }
 0x393   : > { %v4034_v36 = vrot.slane %v3953_v4, 2  ;;  %v1622_v54 = vsel %vm1350_vm4, %v1090_v35, %v1486_v48  ;;  %v2067_v25 = vmax.f32 %v2065_v57, %v2066_v56  ;;  %v1938_v20 = vmax.f32 %v1936_v9, %v1937_v49  ;;  %vm11652_vm13 = vmmov %vm11650_vm11 }
 0x394   : > { %v2001_v14 = vrot.slane %v2000_v39, 2  ;;  %v2128_v42 = vsel %vm11646_vm7, %v1622_v54, -inf  ;;  %v2201_v30 = vsel %vm11647_vm6, %v1622_v54, -inf  ;;  %v4832_v43 = vsel %vm11650_vm11, %v4816_v12, %v7715_v40  ;;  %vm11654_vm14 = vmmov %vm11651_vm9 }
 0x395   : > { %v4035_v22 = vsel %vm11648_vm3, %v4032_v59, %v4034_v36  ;;  %v4037_v0 = vsel %vm11649_vm8, %v4034_v36, %v4036_v16  ;;  %v2129_v13 = vmax.f32 %v2127_v24, %v2128_v42  ;;  %v2203_v27 = vmax.f32 %v2201_v30, %v9750_v2  ;;  %vm11658_vm7 = vmmov %vm11653_vm1 }
 0x396   : > { %v9827_v46 = vmax.f32 %v9760_v21, %v4035_v22  ;;  %v9829_v63 = vmax.f32 %v3953_v4, %v4037_v0  ;;  %v2002_v10 = vmax.f32 %v2000_v39, %v2001_v14  ;;  %v2068_v59 = vrot.slane %v2067_v25, 1  ;;  %vm11660_vm3 = vmmov %vm11653_vm1 }
 0x397   : > { %v2130_v1 = vrot.slane %v2129_v13, 4  ;;  %v2204_v28 = vrot.slane %v2203_v27, 4  ;;  %v4651_v19 = vrot.slane %v9769_v11, 7  ;;  %v4563_v2 = vrot.slane %v9769_v11, 6 }
 0x398   : > { %v2003_v44 = vrot.slane %v2002_v10, 1  ;;  %v4652_v7 = vrot.slane %v9827_v46, 7  ;;  %v4654_v57 = vrot.slane %v9829_v63, 7  ;;  %v4564_v4 = vrot.slane %v9827_v46, 6 }
 0x399   : > { %v7719_v35 = vpop.permute.xlu0 %7718  ;;  %v2131_v3 = vmax.f32 %v2129_v13, %v2130_v1  ;;  %v2205_v21 = vmax.f32 %v2203_v27, %v2204_v28  ;;  %v4566_v9 = vrot.slane %v9829_v63, 6  ;;  %v4475_v12 = vrot.slane %v9769_v11, 5 }
 0x39a   : > { %v2004_v32 = vmax.f32 %v2002_v10, %v2003_v44  ;;  %v4653_v49 = vsel %vm3642_vm15, %v4651_v19, %v4652_v7  ;;  %v4655_v39 = vsel %vm3642_vm15, %v4652_v7, %v4654_v57  ;;  %v2069_v56 = vmax.f32 %v2067_v25, %v2068_v59 }
 0x39b   : > { %v2132_v48 = vrot.slane %v2131_v3, 2  ;;  %v2206_v16 = vrot.slane %v2205_v21, 2  ;;  %v7747_v36 = vpack.i.bf16 %v4655_v39, %v4653_v49  ;;  %v4565_v40 = vsel %vm3651_vm0, %v4563_v2, %v4564_v4 }
 0x39c   : > { %v4567_v24 = vsel %vm3651_vm0, %v4564_v4, %v4566_v9  ;;  %v7720_v54 = vunpack.i.l.bf16 %v7719_v35  ;;  %v3646_v22 = vsel %vm3642_vm15, %v1938_v20, %v2004_v32  ;;  %v4476_v13 = vrot.slane %v9827_v46, 5 }
 0x39d   : > { %v2133_v14 = vmax.f32 %v2131_v3, %v2132_v48  ;;  %v2207_v42 = vmax.f32 %v2205_v21, %v2206_v16  ;;  %v7742_v30 = vpack.i.bf16 %v4567_v24, %v4565_v40  ;;  %7748 = vrot.lane.b32.xlu0 %v7747_v36, %s7962_s19  ;;  %v4478_v27 = vrot.slane %v9829_v63, 5  ;;  %v7729_v16 = vpop.permute.xlu2 %7728 }
 0x39e   : > { %v4243_v25 = vrot.slane %v9769_v11, 2  ;;  %v4477_v59 = vsel %vm3660_vm10, %v4475_v12, %v4476_v13  ;;  %v4244_v20 = vrot.slane %v9827_v46, 2  ;;  %v4246_v2 = vrot.slane %v9829_v63, 2 }
 0x39f   : > { %v7709_v0 = vpop.permute.xlu1 %7708  ;;  %v2134_v28 = vrot.slane %v2133_v14, 1  ;;  %v2208_v44 = vrot.slane %v2207_v42, 1  ;;  %7743 = vrot.lane.b32.xlu2 %v7742_v30, %s7964_s21  ;;  %v4479_v19 = vsel %vm3660_vm10, %v4476_v13, %v4478_v27  ;;  %v7721_v3 = vunpack.i.h.bf16 %v7719_v35 }
 0x3a0   : > { %v7711_v10 = vunpack.i.h.bf16 %v7709_v0  ;;  %v7710_v1 = vunpack.i.l.bf16 %v7709_v0  ;;  %v3655_v32 = vsel %vm3651_vm0, %v3646_v22, %v2069_v56  ;;  %v7737_v48 = vpack.i.bf16 %v4479_v19, %v4477_v59 }
 0x3a1   : > { %v2135_v7 = vmax.f32 %v2133_v14, %v2134_v28  ;;  %v2209_v57 = vmax.f32 %v2207_v42, %v2208_v44  ;;  %v4245_v12 = vsel %vm11653_vm1, %v4243_v25, %v4244_v20  ;;  %vm11655_vm2 = vcmask 785408   ;;  %vm11665_vm1 = vmmov %vm11654_vm14 }
 0x3a2   : > { %v4817_v21 = vsel %vm11651_vm9, %v9807_v38, %v7710_v1  ;;  %v4766_v49 = vsel %vm11654_vm14, %v9345_v41, %v7711_v10  ;;  %v4848_v35 = vsel %vm11655_vm2, %v4832_v43, %v7720_v54  ;;  %vm11656_vm12 = vmmov %vm11655_vm2  ;;  %vm11657_vm4 = vcmask 1043456   ;;  %7738 = vrot.lane.b32.xlu1 %v7737_v48, %s7963_s20 }
 0x3a3   : > { %v4833_v9 = vsel %vm11652_vm13, %v4817_v21, %v7716_v52  ;;  %v3664_v39 = vsel %vm3660_vm10, %v3655_v32, %v2135_v7  ;;  %v4247_v52 = vsel %vm11658_vm7, %v4244_v20, %v4246_v2  ;;  %vm11659_vm6 = vcmask 1044480   ;;  %vm11663_vm9 = vmmov %vm11652_vm13 }
 0x3a4   : > { %v4849_v38 = vsel %vm11656_vm12, %v4833_v9, %v7721_v3  ;;  %v3673_v36 = vsel %vm11657_vm4, %v3664_v39, %v2209_v57  ;;  %v7757_v14 = vpack.i.bf16 %v4247_v52, %v4245_v12  ;;  %v4155_v41 = vrot.slane %v9769_v11, 1  ;;  %vm11666_vm14 = vmmov %vm11665_vm1 }
 0x3a5   : > { %v4874_v56 = vpack.c.bf16 %v4849_v38, %v4848_v35  ;;  %v3682_v24 = vsel %vm11659_vm6, %v3673_v36, %v9771_v53  ;;  %v4156_v42 = vrot.slane %v9827_v46, 1  ;;  %v3579_v43 = vmax.f32 %v9783_v50, %v9803_v29  ;;  %vm11669_vm4 = vmmov %vm11663_vm9  ;;  %v11675_v36 = vld [vmem:[#allocation3_spill] sm:$0xff] }
 0x3a6   : > { %v7734_v4 = vpop.permute.xlu0 %7733  ;;  %v7730_v54 = vunpack.i.l.bf16 %v7729_v16  ;;  %v3691_v30 = vsel %vm11660_vm3, %v3682_v24, %v9776_v37  ;;  %v4158_v0 = vrot.slane %v9829_v63, 1  ;;  %vm11661_vm8 = vcmask 1046528   ;;  %7758 = vrot.lane.b32.xlu0 %v7757_v14, %s7964_s21  ;;  %vm11670_vm7 = vmmov %vm11655_vm2 }
 0x3a7   : > { %v7735_v40 = vunpack.i.l.bf16 %v7734_v4  ;;  %v7724_v22 = vpop.permute.xlu1 %7723  ;;  %5144 = vmatmul.bf16.gmra.mxu2 %v4874_v56  ;;  %v3700_v13 = vsel %vm11661_vm8, %v3691_v30, %v9773_v5  ;;  %vm11662_vm11 = vmmov %vm11661_vm8  ;;  %v7731_v10 = vunpack.i.h.bf16 %v7729_v16  ;;  %v7736_v37 = vunpack.i.h.bf16 %v7734_v4 }
 0x3a8   : > { %v7726_v53 = vunpack.i.h.bf16 %v7724_v22  ;;  %v7725_v27 = vunpack.i.l.bf16 %v7724_v22  ;;  %v4157_v25 = vsel %vm11662_vm11, %v4155_v41, %v4156_v42  ;;  %v3886_v1 = vrot.slane %v3700_v13, 1  ;;  %vm11664_vm13 = vmmov %vm11661_vm8 }
 0x3a9   : > { %v4783_v50 = vsel %vm11663_vm9, %v4766_v49, %v7730_v54  ;;  %v4159_v29 = vsel %vm11664_vm13, %v4156_v42, %v4158_v0  ;;  %v11667_v59 = vrot.slane %v8189_v62, 1  ;;  %vm11668_vm12 = vmmov %vm11661_vm8  ;;  %v4332_v57 = vrot.slane %v9827_v46, 3 }
 0x3aa   : > { %v4863_v28 = vsel %vm11665_vm1, %v9564_v8, %v7726_v53  ;;  %v4767_v44 = vsel %vm11666_vm14, %v9560_v47, %v7725_v27  ;;  %v4800_v5 = vsel %vm11655_vm2, %v4783_v50, %v7735_v40  ;;  %v7752_v3 = vpack.i.bf16 %v4159_v29, %v4157_v25  ;;  %vm11671_vm6 = vmmov %vm11669_vm4 }
 0x3ab   : > { %v3888_v19 = vsel %vm11668_vm12, %v3886_v1, %v11667_v59  ;;  %v4875_v20 = vpack.c.bf16 %v4863_v28, %v4767_v44  ;;  %v4784_v2 = vsel %vm11669_vm4, %v4767_v44, %v7731_v10  ;;  %v4334_v8 = vrot.slane %v9829_v63, 3  ;;  %vm11677_vm9 = vmmov %vm11660_vm3 }
 0x3ac   : > { %v3954_v21 = vmax.f32 %v3700_v13, %v3888_v19  ;;  %v4801_v7 = vsel %vm11670_vm7, %v4784_v2, %v7736_v37  ;;  %7753 = vrot.lane.b32.xlu1 %v7752_v3, %s7963_s20  ;;  %v3508_v62 = vrot.slane %v9779_v31, 4  ;;  %v4331_v4 = vrot.slane %v9769_v11, 3  ;;  %vm11680_vm14 = vmmov %vm11660_vm3 }
 0x3ad   : > { %7130 = vmatmul.msk.bf16.gmra.mxu3 %vm11671_vm6, %v4875_v20  ;;  %v4873_v47 = vpack.c.bf16 %v4801_v7, %v4800_v5  ;;  %v3580_v9 = vrot.slane %v3579_v43, 4  ;;  %v11672_v48 = vrot.slane %v8346_v51, 2  ;;  %vm11673_vm8 = vcmask 1044480   ;;  %vm11686_vm6 = vmmov %vm11660_vm3 }
 0x3ae   : > { %v4038_v32 = vrot.slane %v3954_v21, 2  ;;  %v4333_v16 = vsel %vm11673_vm8, %v4331_v4, %v4332_v57  ;;  %vm11674_vm11 = vmmov %vm11673_vm8  ;;  %v3635_v39 = vsel %vm2041_vm5, %v9790_v18, -inf  ;;  %v4569_v38 = vrot.slane %v8447_v15, 6 }
 0x3af   : > { %5095 = vmatmul.bf16.gmra.mxu1 %v4873_v47  ;;  %v4335_v49 = vsel %vm11674_vm11, %v4332_v57, %v4334_v8  ;;  %v4571_v40 = vrot.slane %v11675_v36, 6  ;;  %v3509_v56 = vmax.f32 %v9779_v31, %v3508_v62  ;;  %v4481_v52 = vrot.slane %v8447_v15, 5  ;;  %vm11676_vm5 = vmmov %vm11668_vm12 }
 0x3b0   : > { %v4040_v12 = vsel %vm11660_vm3, %v4038_v32, %v11672_v48  ;;  %v7762_v51 = vpack.i.bf16 %v4335_v49, %v4333_v16  ;;  %v3581_v42 = vmax.f32 %v3579_v43, %v3580_v9  ;;  %v3636_v54 = vrot.slane %v3635_v39, 4  ;;  %vm11678_vm13 = vmmov %vm11676_vm5 }
 0x3b1   : > { %v9905_v35 = vmax.f32 %v3954_v21, %v4040_v12  ;;  %v4657_v18 = vrot.slane %v8447_v15, 7  ;;  %v4659_v30 = vrot.slane %v11675_v36, 7  ;;  %v4572_v31 = vsel %vm3651_vm0, %v4569_v38, %v4571_v40  ;;  %vm11679_vm1 = vmmov %vm11676_vm5 }
 0x3b2   : > { %v4733_v53 = vsel %vm11676_vm5, %v4158_v0, %v9600_v60  ;;  %v4161_v1 = vrot.slane %v8447_v15, 1  ;;  %v4163_v50 = vrot.slane %v11675_v36, 1  ;;  %v3510_v29 = vrot.slane %v3509_v56, 2  ;;  %vm11681_vm2 = vmmov %vm11673_vm8 }
 0x3b3   : > { %v4568_v24 = vrot.slane %v9905_v35, 6  ;;  %v4480_v14 = vrot.slane %v9905_v35, 5  ;;  %v4656_v41 = vrot.slane %v9905_v35, 7  ;;  %v4248_v10 = vrot.slane %v9905_v35, 2  ;;  %vm11682_vm12 = vmmov %vm11681_vm2 }
 0x3b4   : > { %7763 = vrot.lane.b32.xlu1 %v7762_v51, %s7962_s19  ;;  %v3582_v37 = vrot.slane %v3581_v42, 2  ;;  %v3637_v28 = vmax.f32 %v3635_v39, %v3636_v54  ;;  %v4660_v44 = vsel %vm3642_vm15, %v4657_v18, %v4659_v30  ;;  %v4249_v5 = vrot.slane %v8447_v15, 2  ;;  %vm11683_vm4 = vmmov %vm11679_vm1 }
 0x3b5   : > { %v4570_v22 = vsel %vm3651_vm0, %v4568_v24, %v4569_v38  ;;  %v4482_v13 = vsel %vm3660_vm10, %v4480_v14, %v4481_v52  ;;  %v4658_v25 = vsel %vm3642_vm15, %v4656_v41, %v4657_v18  ;;  %v4251_v59 = vrot.slane %v11675_v36, 2  ;;  %vm11685_vm7 = vmmov %vm11679_vm1 }
 0x3b6   : > { %v7787_v27 = vpack.i.bf16 %v4572_v31, %v4570_v22  ;;  %v7767_v43 = vpack.i.bf16 %v4482_v13, %v4733_v53  ;;  %v7792_v0 = vpack.i.bf16 %v4660_v44, %v4658_v25  ;;  %v4250_v19 = vsel %vm11677_vm9, %v4248_v10, %v4249_v5  ;;  %vm11688_vm8 = vmmov %vm11679_vm1 }
 0x3b7   : > { %v4164_v20 = vsel %vm11678_vm13, %v4161_v1, %v4163_v50  ;;  %v4734_v2 = vsel %vm11679_vm1, %v4163_v50, %v9600_v60  ;;  %v3511_v3 = vmax.f32 %v3509_v56, %v3510_v29  ;;  %v3583_v21 = vmax.f32 %v3581_v42, %v3582_v37  ;;  %vm11689_vm11 = vmmov %vm11679_vm1 }
 0x3b8   : > { %7788 = vrot.lane.b32.xlu0 %v7787_v27, %s7964_s21  ;;  %7768 = vrot.lane.b32.xlu2 %v7767_v43, %s7963_s20  ;;  %v3638_v7 = vrot.slane %v3637_v28, 2  ;;  %v4336_v57 = vrot.slane %v9905_v35, 3  ;;  %v4252_v8 = vsel %vm11680_vm14, %v4249_v5, %v4251_v59  ;;  %v4573_v47 = vrot.slane %v9203_v55, 6  ;;  %vm11690_vm5 = vmmov %vm11679_vm1 }
 0x3b9   : > { %v4574_v62 = vrot.slane %v9205_v23, 6  ;;  %v4576_v32 = vrot.slane %v9207_v17, 6  ;;  %v7797_v4 = vpack.i.bf16 %v4252_v8, %v4250_v19  ;;  %v7772_v9 = vpack.i.bf16 %v4734_v2, %v4164_v20  ;;  %vm11691_vm9 = vmmov %vm11679_vm1 }
 0x3ba   : > { %v4337_v48 = vrot.slane %v8447_v15, 3  ;;  %v4339_v12 = vrot.slane %v11675_v36, 3  ;;  %v4160_v16 = vrot.slane %v9905_v35, 1  ;;  %v3512_v49 = vrot.slane %v3511_v3, 1  ;;  %vm11692_vm13 = vmmov %vm11681_vm2 }
 0x3bb   : > { %v3584_v38 = vrot.slane %v3583_v21, 1  ;;  %v3639_v40 = vmax.f32 %v3637_v28, %v3638_v7  ;;  %v4483_v56 = vrot.slane %v11675_v36, 5  ;;  %v4575_v24 = vsel %vm3651_vm0, %v4573_v47, %v4574_v62  ;;  %vm11693_vm1 = vmmov %vm11681_vm2 }
 0x3bc   : > { %7793 = vrot.lane.b32.xlu1 %v7792_v0, %s7962_s19  ;;  %v4338_v39 = vsel %vm11681_vm2, %v4336_v57, %v4337_v48  ;;  %v4340_v51 = vsel %vm11682_vm12, %v4337_v48, %v4339_v12  ;;  %v4577_v14 = vsel %vm3651_vm0, %v4574_v62, %v4576_v32  ;;  %v4162_v42 = vsel %vm11683_vm4, %v4160_v16, %v4161_v1  ;;  %v11684_v1 = vld [vmem:[#allocation5_spill] sm:$0xff]  ;;  %vm11694_vm14 = vmmov %vm11683_vm4 }
 0x3bd   : > { %v7807_v41 = vpack.i.bf16 %v4340_v51, %v4338_v39  ;;  %v3513_v54 = vmax.f32 %v3511_v3, %v3512_v49  ;;  %v4661_v18 = vrot.slane %v9203_v55, 7  ;;  %v4662_v30 = vrot.slane %v9205_v23, 7  ;;  %v11687_v49 = vld [vmem:[#allocation6_spill] sm:$0xff]  ;;  %vm11695_vm2 = vmmov %vm11683_vm4 }
 0x3be   : > { %v4664_v22 = vrot.slane %v9207_v17, 7  ;;  %v3585_v31 = vmax.f32 %v3583_v21, %v3584_v38  ;;  %v3640_v13 = vrot.slane %v3639_v40, 1  ;;  %v7802_v53 = vpack.i.bf16 %v4577_v14, %v4575_v24  ;;  %vm11697_vm12 = vmmov %vm11660_vm3 }
 0x3bf   : > { %v4484_v27 = vsel %vm3660_vm10, %v4481_v52, %v4483_v56  ;;  %v4168_v25 = vrot.slane %v9207_v17, 1  ;;  %v4490_v10 = vrot.slane %v9021_v61, 5  ;;  %v4491_v50 = vrot.slane %v11684_v1, 5  ;;  %vm11698_vm4 = vmmov %vm11660_vm3 }
 0x3c0   : > { %7798 = vrot.lane.b32.xlu0 %v7797_v4, %s7964_s21  ;;  %7773 = vrot.lane.b32.xlu2 %v7772_v9, %s7963_s20  ;;  %v7777_v43 = vpack.i.bf16 %v4162_v42, %v4484_v27  ;;  %v4485_v29 = vrot.slane %v9203_v55, 5  ;;  %v4486_v37 = vrot.slane %v9205_v23, 5  ;;  %v4488_v28 = vrot.slane %v9207_v17, 5 }
 0x3c1   : > { %v4663_v44 = vsel %vm3642_vm15, %v4661_v18, %v4662_v30  ;;  %v4665_v52 = vsel %vm3642_vm15, %v4662_v30, %v4664_v22  ;;  %v3641_v0 = vmax.f32 %v3639_v40, %v3640_v13  ;;  %v3824_v5 = vsel %vm3642_vm15, %v3513_v54, %v3585_v31  ;;  %v10007_v30 = vld [vmem:[%s11303_s4] ss:$0 sm:$0xff]  ;;  %v5091_v31 = vpop.f32.mrf.mxu1 }
 0x3c2   : > { %v4492_v59 = vsel %vm3660_vm10, %v4490_v10, %v4491_v50  ;;  %v4735_v19 = vsel %vm11685_vm7, %v4168_v25, %v9600_v60  ;;  %v4253_v20 = vrot.slane %v9203_v55, 2  ;;  %v4254_v2 = vrot.slane %v9205_v23, 2  ;;  %vm11700_vm7 = vmmov %vm11660_vm3 }
 0x3c3   : > { %v7812_v3 = vpack.i.bf16 %v4665_v52, %v4663_v44  ;;  %v4487_v21 = vsel %vm3660_vm10, %v4485_v29, %v4486_v37  ;;  %v4489_v7 = vsel %vm3660_vm10, %v4486_v37, %v4488_v28  ;;  %v4256_v57 = vrot.slane %v9207_v17, 2 }
 0x3c4   : > { %7808 = vrot.lane.b32.xlu1 %v7807_v41, %s7962_s19  ;;  %v9981_v8 = vsel %vm3651_vm0, %v3824_v5, %v3641_v0  ;;  %v7822_v47 = vpack.i.bf16 %v4492_v59, %v4735_v19  ;;  %v7782_v62 = vpack.i.bf16 %v4489_v7, %v4487_v21  ;;  %v4255_v32 = vsel %vm11686_vm6, %v4253_v20, %v4254_v2  ;;  %v5140_v5 = vpop.f32.mrf.mxu2  ;;  %vm11701_vm6 = vmmov %vm11693_vm1 }
 0x3c5   : > { %v4165_v4 = vrot.slane %v9203_v55, 1  ;;  %v4166_v9 = vrot.slane %v9205_v23, 1  ;;  %v4257_v48 = vsel %vm11660_vm3, %v4254_v2, %v4256_v57  ;;  %v4170_v12 = vrot.slane %v9021_v61, 1  ;;  %vm11702_vm3 = vmmov %vm11693_vm1 }
 0x3c6   : > { %v4171_v16 = vrot.slane %v11684_v1, 1  ;;  %v4493_v39 = vrot.slane %v11687_v49, 5  ;;  %v3919_v38 = vrot.slane %v9981_v8, 1  ;;  %v7827_v40 = vpack.i.bf16 %v4257_v48, %v4255_v32 }
 0x3c7   : > { %v4167_v24 = vsel %vm11689_vm11, %v4165_v4, %v4166_v9  ;;  %v4169_v14 = vsel %vm11690_vm5, %v4166_v9, %v4168_v25  ;;  %v4578_v41 = vrot.slane %v9021_v61, 6  ;;  %v4579_v42 = vrot.slane %v11684_v1, 6  ;;  %v11696_v4 = vld [vmem:[#allocation4_spill] sm:$0xff]  ;;  %vm11704_vm11 = vmmov %vm11695_vm2 }
 0x3c8   : > { %7803 = vrot.lane.b32.xlu0 %v7802_v53, %s7964_s21  ;;  %7778 = vrot.lane.b32.xlu2 %v7777_v43, %s7963_s20  ;;  %v4172_v56 = vsel %vm11688_vm8, %v4170_v12, %v4171_v16  ;;  %v4494_v51 = vsel %vm3660_vm10, %v4491_v50, %v4493_v39  ;;  %v4581_v54 = vrot.slane %v11687_v49, 6  ;;  %v3920_v18 = vsel %vm11691_vm9, %v3917_v26, %v3919_v38  ;;  %vm11703_vm8 = vmmov %vm11695_vm2 }
 0x3c9   : > { %v4341_v22 = vrot.slane %v9203_v55, 3  ;;  %v7837_v13 = vpack.i.bf16 %v4172_v56, %v4494_v51  ;;  %v7817_v53 = vpack.i.bf16 %v4169_v14, %v4167_v24  ;;  %v4342_v27 = vrot.slane %v9205_v23, 3  ;;  %vm11705_vm5 = vmmov %vm11698_vm4 }
 0x3ca   : > { %v4344_v43 = vrot.slane %v9207_v17, 3  ;;  %v4173_v25 = vrot.slane %v11687_v49, 1  ;;  %v4580_v26 = vsel %vm3651_vm0, %v4578_v41, %v4579_v42  ;;  %v4582_v10 = vsel %vm3651_vm0, %v4579_v42, %v4581_v54  ;;  %vm11706_vm9 = vmmov %vm11695_vm2 }
 0x3cb   : > { %v10019_v50 = vmax.f32 %v9449_v34, %v3920_v18  ;;  %v5092_v29 = vadd.f32 %v10007_v30, %v5091_v31  ;;  %v4343_v37 = vsel %vm11692_vm13, %v4341_v22, %v4342_v27  ;;  %v7842_v44 = vpack.i.bf16 %v4582_v10, %v4580_v26  ;;  %vm11707_vm13 = vmmov %vm11693_vm1 }
 0x3cc   : > { %7813 = vrot.lane.b32.xlu1 %v7812_v3, %s7962_s19  ;;  %v4345_v28 = vsel %vm11693_vm1, %v4342_v27, %v4344_v43  ;;  %v4174_v52 = vsel %vm11694_vm14, %v4171_v16, %v4173_v25  ;;  %v4736_v0 = vsel %vm11695_vm2, %v4173_v25, %v9600_v60  ;;  %v4258_v59 = vrot.slane %v9021_v61, 2  ;;  %vm11708_vm14 = vmmov %vm11695_vm2 }
 0x3cd   : > { %v4259_v19 = vrot.slane %v11684_v1, 2  ;;  %v4261_v34 = vrot.slane %v11687_v49, 2  ;;  %v4069_v20 = vrot.slane %v10019_v50, 2  ;;  %v7832_v2 = vpack.i.bf16 %v4345_v28, %v4343_v37  ;;  %vm11709_vm2 = vmmov %vm11698_vm4 }
 0x3ce   : > { %v10032_v3 = vadd.f32 %v5140_v5, %v5092_v29  ;;  %v7852_v21 = vpack.i.bf16 %v4736_v0, %v4174_v52  ;;  %v4666_v7 = vrot.slane %v9021_v61, 7  ;;  %v4667_v57 = vrot.slane %v11684_v1, 7 }
 0x3cf   : > { %v4496_v32 = vrot.slane %v9615_v58, 5  ;;  %v4498_v9 = vrot.slane %v11696_v4, 5  ;;  %v4260_v48 = vsel %vm11697_vm12, %v4258_v59, %v4259_v19  ;;  %v4262_v12 = vsel %vm11698_vm4, %v4259_v19, %v4261_v34  ;;  %vm11710_vm12 = vmmov %vm11709_vm2 }
 0x3d0   : > { %7823 = vrot.lane.b32.xlu0 %v7822_v47, %s7963_s20  ;;  %7783 = vrot.lane.b32.xlu2 %v7782_v62, %s7963_s20  ;;  %v4669_v47 = vrot.slane %v11687_v49, 7  ;;  %v4495_v62 = vrot.slane %v9613_v33, 5  ;;  %v11699_v16 = vrot.slane %v9461_v6, 2  ;;  %v3984_v51 = vmax.f32 %v9981_v8, %v3919_v38  ;;  %vm11712_vm4 = vmmov %vm11703_vm8 }
 0x3d1   : > { %v7857_v24 = vpack.i.bf16 %v4262_v12, %v4260_v48  ;;  %v4499_v41 = vsel %vm3660_vm10, %v4496_v32, %v4498_v9  ;;  %v4583_v54 = vrot.slane %v9613_v33, 6  ;;  %v4584_v18 = vrot.slane %v9615_v58, 6 }
 0x3d2   : > { %v4070_v39 = vsel %vm11700_vm7, %v11699_v16, %v4069_v20  ;;  %v4670_v56 = vsel %vm3642_vm15, %v4667_v57, %v4669_v47  ;;  %v4497_v14 = vsel %vm3660_vm10, %v4495_v62, %v4496_v32  ;;  %v4586_v22 = vrot.slane %v11696_v4, 6  ;;  %vm11714_vm7 = vmmov %vm11693_vm1 }
 0x3d3   : > { %v10053_v42 = vmax.f32 %v9461_v6, %v4070_v39  ;;  %v4347_v8 = vrot.slane %v11684_v1, 3  ;;  %v4349_v38 = vrot.slane %v11687_v49, 3  ;;  %v4175_v27 = vrot.slane %v9613_v33, 1 }
 0x3d4   : > { %7828 = vrot.lane.b32.xlu1 %v7827_v40, %s7964_s21  ;;  %v4668_v40 = vsel %vm3642_vm15, %v4666_v7, %v4667_v57  ;;  %v4176_v6 = vrot.slane %v9615_v58, 1  ;;  %v4178_v43 = vrot.slane %v11696_v4, 1  ;;  %v4585_v25 = vsel %vm3651_vm0, %v4583_v54, %v4584_v18 }
 0x3d5   : > { %v7847_v31 = vpack.i.bf16 %v4670_v56, %v4668_v40  ;;  %v4587_v26 = vsel %vm3651_vm0, %v4584_v18, %v4586_v22  ;;  %v4071_v10 = vrot.slane %v3984_v51, 2  ;;  %v4350_v37 = vsel %vm11702_vm3, %v4347_v8, %v4349_v38 }
 0x3d6   : > { %v4177_v28 = vsel %vm11703_vm8, %v4175_v27, %v4176_v6  ;;  %v4500_v52 = vrot.slane %v9485_v45, 5  ;;  %v4501_v0 = vrot.slane %v10053_v42, 5  ;;  %v7872_v5 = vpack.i.bf16 %v4587_v26, %v4585_v25 }
 0x3d7   : > { %v4072_v59 = vsel %vm11705_vm5, %v4069_v20, %v4071_v10  ;;  %v4351_v7 = vrot.slane %v9613_v33, 3  ;;  %v4352_v57 = vrot.slane %v9615_v58, 3  ;;  %v4354_v47 = vrot.slane %v11696_v4, 3 }
 0x3d8   : > { %7838 = vrot.lane.b32.xlu0 %v7837_v13, %s7963_s20  ;;  %7818 = vrot.lane.b32.xlu2 %v7817_v53, %s7963_s20  ;;  %v4346_v13 = vrot.slane %v9021_v61, 3  ;;  %v7867_v53 = vpack.i.bf16 %v4499_v41, %v4497_v14  ;;  %v4671_v62 = vrot.slane %v9613_v33, 7  ;;  %v4672_v32 = vrot.slane %v9615_v58, 7 }
 0x3d9   : > { %v4674_v20 = vrot.slane %v11696_v4, 7  ;;  %v10087_v9 = vmax.f32 %v10019_v50, %v4072_v59  ;;  %v4353_v12 = vsel %vm11707_vm13, %v4351_v7, %v4352_v57  ;;  %v4355_v16 = vsel %vm11693_vm1, %v4352_v57, %v4354_v47  ;;  %v5093_v47 = vpop.f32.mrf.mxu1 }
 0x3da   : > { %v4348_v29 = vsel %vm11701_vm6, %v4346_v13, %v4347_v8  ;;  %v4673_v39 = vsel %vm3642_vm15, %v4671_v62, %v4672_v32  ;;  %v4180_v56 = vrot.slane %v9485_v45, 1  ;;  %v4181_v51 = vrot.slane %v10053_v42, 1 }
 0x3db   : > { %v7862_v34 = vpack.i.bf16 %v4350_v37, %v4348_v29  ;;  %v4675_v40 = vsel %vm3642_vm15, %v4672_v32, %v4674_v20  ;;  %v4503_v50 = vrot.slane %v10087_v9, 5  ;;  %v4263_v41 = vrot.slane %v9613_v33, 2 }
 0x3dc   : > { %7843 = vrot.lane.b32.xlu1 %v7842_v44, %s7964_s21  ;;  %v4179_v44 = vsel %vm11704_vm11, %v4176_v6, %v4178_v43  ;;  %v7877_v14 = vpack.i.bf16 %v4675_v40, %v4673_v39  ;;  %v4264_v54 = vrot.slane %v9615_v58, 2  ;;  %v4266_v18 = vrot.slane %v11696_v4, 2 }
 0x3dd   : > { %v7882_v19 = vpack.i.bf16 %v4179_v44, %v4177_v28  ;;  %v4182_v22 = vsel %vm11708_vm14, %v4180_v56, %v4181_v51  ;;  %v4676_v38 = vrot.slane %v9485_v45, 7  ;;  %v4679_v6 = vrot.slane %v10087_v9, 7 }
 0x3de   : > { %v4265_v13 = vsel %vm11709_vm2, %v4263_v41, %v4264_v54  ;;  %v4267_v27 = vsel %vm11710_vm12, %v4264_v54, %v4266_v18  ;;  %v4588_v59 = vrot.slane %v9485_v45, 6  ;;  %v4268_v32 = vrot.slane %v9485_v45, 2 }
 0x3df   : > { %v7892_v10 = vpack.i.bf16 %v4267_v27, %v4265_v13  ;;  %v4269_v20 = vrot.slane %v10053_v42, 2  ;;  %vm11339_vm3 = vcmask 523265   ;;  %vm5407_vm11 = vcmask 523266  }
 0x3e0   : > { %7853 = vrot.lane.b32.xlu0 %v7852_v21, %s7963_s20  ;;  %7833 = vrot.lane.b32.xlu2 %v7832_v2, %s7962_s19  ;;  %v4502_v2 = vsel %vm3660_vm10, %v4500_v52, %v4501_v0  ;;  %v4737_v21 = vsel %vm11706_vm9, %v4178_v43, %v9600_v60  ;;  %v4183_v43 = vrot.slane %v10087_v9, 1  ;;  %v4356_v52 = vrot.slane %v9485_v45, 3 }
 0x3e1   : > { %v7887_v48 = vpack.i.bf16 %v4502_v2, %v4737_v21  ;;  %vm5409_vm5 = vcmask 517120   ;;  %vm11338_vm9 = vcmask 523267   ;;  %vm11342_vm14 = vcmask 523268  }
 0x3e2   : > { %v4738_v28 = vsel %vm11712_vm4, %v4183_v43, %v9600_v60  ;;  %vm5629_vm12 = vcmask 523269   ;;  %vm11341_vm4 = vcmask 523270  }
 0x3e4   : > { %7858 = vrot.lane.b32.xlu1 %v7857_v24, %s7964_s21  ;;  %v7897_v24 = vpack.i.bf16 %v4355_v16, %v4353_v12  ;;  %v5094_v12 = vadd.f32 %v10007_v30, %v5093_v47 }
 0x3e8   : > { %7868 = vrot.lane.b32.xlu0 %v7867_v53, %s7963_s20  ;;  %7848 = vrot.lane.b32.xlu2 %v7847_v31, %s7962_s19  ;;  %v4504_v31 = vsel %vm3660_vm10, %v4501_v0, %v4503_v50  ;;  %v4677_v53 = vrot.slane %v10053_v42, 7  ;;  %vm11711_vm10 = vmmov %vm11703_vm8  ;;  %v4357_v0 = vrot.slane %v10053_v42, 3  ;;  %v5142_v50 = vpop.f32.mrf.mxu2  ;;  %vm5335_vm8 = vcmask 516096  }
 0x3e9   : > { %v7902_v8 = vpack.i.bf16 %v4182_v22, %v4504_v31  ;;  %v4184_v37 = vsel %vm11711_vm10, %v4181_v51, %v4183_v43  ;;  %v5143_v41 = vadd.f32 %v5142_v50, %v5094_v12  ;;  %v4422_v22 = vrot.slane %v9829_v63, 4 }
 0x3ea   : > { %v4678_v25 = vsel %vm3642_vm15, %v4676_v38, %v4677_v53  ;;  %v4680_v26 = vsel %vm3642_vm15, %v4677_v53, %v4679_v6  ;;  %v7917_v44 = vpack.i.bf16 %v4738_v28, %v4184_v37  ;;  %vm11713_vm15 = vmmov %vm11693_vm1  ;;  %vm11340_vm1 = vcmask 518144  }
 0x3eb   : > { %v7912_v29 = vpack.i.bf16 %v4680_v26, %v4678_v25  ;;  %v4358_v2 = vsel %vm11713_vm15, %v4356_v52, %v4357_v0  ;;  %vm5705_vm15 = vcmask 521216   ;;  %v4419_v38 = vrot.slane %v9769_v11, 4 }
 0x3ec   : > { %7873 = vrot.lane.b32.xlu1 %v7872_v5, %s7964_s21  ;;  %v4359_v5 = vrot.slane %v10087_v9, 3 }
 0x3ee   : > { %v4360_v60 = vsel %vm11714_vm7, %v4357_v0, %v4359_v5  ;;  %vm5777_vm7 = vcmask 523271  }
 0x3ef   : > { %v7927_v21 = vpack.i.bf16 %v4360_v60, %v4358_v2 }
 0x3f0   : > { %7883 = vrot.lane.b32.xlu0 %v7882_v19, %s7963_s20  ;;  %7863 = vrot.lane.b32.xlu2 %v7862_v34, %s7962_s19  ;;  %v4589_v19 = vrot.slane %v10053_v42, 6  ;;  %v4591_v34 = vrot.slane %v10087_v9, 6 }
 0x3f2   : > { %v4590_v7 = vsel %vm3651_vm0, %v4588_v59, %v4589_v19  ;;  %v4592_v57 = vsel %vm3651_vm0, %v4589_v19, %v4591_v34  ;;  %vm11715_vm0 = vmmov %vm11709_vm2 }
 0x3f3   : > { %v7907_v62 = vpack.i.bf16 %v4592_v57, %v4590_v7  ;;  %v4270_v56 = vsel %vm11715_vm0, %v4268_v32, %v4269_v20  ;;  %vm11716_vm6 = vmmov %vm11715_vm0  ;;  %vm5779_vm0 = vcmask 522240  }
 0x3f4   : > { %7888 = vrot.lane.b32.xlu1 %v7887_v48, %s7963_s20  ;;  %v4271_v48 = vrot.slane %v10087_v9, 2 }
 0x3f6   : > { %v4272_v51 = vsel %vm11716_vm6, %v4269_v20, %v4271_v48  ;;  %vm11717_vm6 = vcmask 1043456  }
 0x3f7   : > { %v7922_v18 = vpack.i.bf16 %v4272_v51, %v4270_v56  ;;  %vm11718_vm10 = vmmov %vm11717_vm6 }
 0x3f8   : > { %7898 = vrot.lane.b32.xlu0 %v7897_v24, %s7962_s19  ;;  %7878 = vrot.lane.b32.xlu2 %v7877_v14, %s7962_s19 }
 0x3f9   : > { %v10137_v16 = vpop.permute.xlu2 %7743 }
 0x3fa   : > { %v7746_v24 = vunpack.i.h.bf16 %v10137_v16  ;;  %v7745_v14 = vunpack.i.l.bf16 %v10137_v16 }
 0x3fc   : > { %7903 = vrot.lane.b32.xlu1 %v7902_v8, %s7963_s20 }
 0x400   : > { %7893 = vrot.lane.b32.xlu2 %v7892_v10, %s7964_s21  ;;  %7913 = vrot.lane.b32.xlu0 %v7912_v29, %s7962_s19 }
 0x404   : > { %7918 = vrot.lane.b32.xlu1 %v7917_v44, %s7963_s20  ;;  %s334_s20 = scalar_lea.vmem %s11308_s9, %s6744_s15 }
 0x408   : > { %7928 = vrot.lane.b32.xlu0 %v7927_v21, %s7962_s19  ;;  %7908 = vrot.lane.b32.xlu2 %v7907_v62, %s7964_s21 }
 0x40f   : > { %v7749_v31 = vpop.permute.xlu0 %7748 }
 0x410   : > { %7923 = vrot.lane.b32.xlu2 %v7922_v18, %s7964_s21  ;;  %v7751_v26 = vunpack.i.h.bf16 %v7749_v31  ;;  %v7750_v28 = vunpack.i.l.bf16 %v7749_v31 }
 0x412   : > { %v5189_v39 = vpop.f32.mrf.mxu3  ;;  %v10148_v53 = vpop.permute.xlu2 %7768 }
 0x413   : > { %v5190_v40 = vadd.f32 %v5189_v39, %v10032_v3  ;;  %v4420_v3 = vrot.slane %v9827_v46, 4  ;;  %v7770_v44 = vunpack.i.l.bf16 %v10148_v53 }
 0x414   : > { %v7739_v13 = vpop.permute.xlu1 %7738 }
 0x415   : > { %v5245_v54 = vmul.f32 0.01, %v5190_v40  ;;  %vm5229_vm13 = vcmp.gt.f32.partialorder %v5190_v40, 0.0  ;;  %v7741_v43 = vunpack.i.h.bf16 %v7739_v13  ;;  %v7740_v25 = vunpack.i.l.bf16 %v7739_v13 }
 0x416   : > { %v4421_v10 = vsel %vm11717_vm6, %v4419_v38, %v4420_v3  ;;  %v4423_v29 = vsel %vm11718_vm10, %v4420_v3, %v4422_v22  ;;  %vm11721_vm6 = vcmask 519168  }
 0x417   : > { %v10151_v27 = vsel %vm5229_vm13, %v5190_v40, %v5245_v54  ;;  %vm11719_vm13 = vcmask 261120  }
 0x418   : > { %v5334_v52 = vsel %vm11339_vm3, %v10151_v27, -inf  ;;  %v5408_v0 = vsel %vm5407_vm11, %v10151_v27, -inf  ;;  %v5482_v5 = vsel %vm11338_vm9, %v10151_v27, -inf  ;;  %v5556_v59 = vsel %vm11342_vm14, %v10151_v27, -inf  ;;  %vm11720_vm10 = vmmov %vm11719_vm13 }
 0x419   : > { %v5630_v34 = vsel %vm5629_vm12, %v10151_v27, -inf  ;;  %v4819_v2 = vsel %vm11719_vm13, %v4423_v29, %v7741_v43  ;;  %v4818_v60 = vsel %vm11720_vm10, %v4421_v10, %v7740_v25  ;;  %v5704_v50 = vsel %vm11341_vm4, %v10151_v27, -inf  ;;  %v7759_v43 = vpop.permute.xlu0 %7758 }
 0x41a   : > { %v5191_v8 = vpop.f32.mrf.mxu3  ;;  %vm11723_vm13 = vcmask 523264   ;;  %vm11727_vm9 = vcmask 785408   ;;  %v7774_v16 = vpop.permute.xlu2 %7773  ;;  %v4424_v29 = vrot.slane %v9905_v35, 4  ;;  %vm11733_vm3 = vcmask 523264  }
 0x41b   : > { %v5192_v6 = vadd.f32 %v5191_v8, %v5143_v41  ;;  %v5778_v41 = vsel %vm5777_vm7, %v10151_v27, -inf  ;;  %v4834_v54 = vsel %vm11723_vm13, %v4818_v60, %v7745_v14  ;;  %vm11724_vm10 = vmmov %vm11723_vm13  ;;  %v7775_v60 = vunpack.i.l.bf16 %v7774_v16 }
 0x41c   : > { %v4835_v18 = vsel %vm11724_vm10, %v4819_v2, %v7746_v24  ;;  %vm11728_vm13 = vmmov %vm11727_vm9 }
 0x41d   : > { %vm5230_vm2 = vcmp.gt.f32.partialorder %v5192_v6, 0.0  ;;  %v5246_v37 = vmul.f32 0.01, %v5192_v6  ;;  %v4851_v14 = vsel %vm11728_vm13, %v4835_v18, %v7751_v26  ;;  %v7761_v26 = vunpack.i.h.bf16 %v7759_v43 }
 0x41e   : > { %v7754_v12 = vpop.permute.xlu1 %7753 }
 0x41f   : > { %v5262_v19 = vsel %vm5230_vm2, %v5192_v6, %v5246_v37  ;;  %vm11722_vm2 = vcmask 520192   ;;  %v7756_v51 = vunpack.i.h.bf16 %v7754_v12  ;;  %v4850_v6 = vsel %vm11727_vm9, %v4834_v54, %v7750_v28 }
 0x420   : > { %v5336_v21 = vsel %vm5335_vm8, %v5262_v19, -inf  ;;  %v5410_v7 = vsel %vm5409_vm5, %v5262_v19, -inf  ;;  %v5484_v57 = vsel %vm11340_vm1, %v5262_v19, -inf  ;;  %v5558_v47 = vsel %vm11721_vm6, %v5262_v19, -inf }
 0x421   : > { %v10172_v62 = vmax.f32 %v5334_v52, %v5336_v21  ;;  %v10174_v32 = vmax.f32 %v5408_v0, %v5410_v7  ;;  %v10176_v20 = vmax.f32 %v5482_v5, %v5484_v57  ;;  %v10178_v48 = vmax.f32 %v5556_v59, %v5558_v47 }
 0x422   : > { %v5632_v39 = vsel %vm11722_vm2, %v5262_v19, -inf  ;;  %v5706_v40 = vsel %vm5705_vm15, %v5262_v19, -inf  ;;  %v5780_v56 = vsel %vm5779_vm0, %v5262_v19, -inf  ;;  %vm11725_vm6 = vcmask 261120   ;;  %v7779_v57 = vpop.permute.xlu2 %7778 }
 0x423   : > { %v10191_v3 = vmax.f32 %v5630_v34, %v5632_v39  ;;  %v10193_v22 = vmax.f32 %v5704_v50, %v5706_v40  ;;  %v10195_v31 = vmax.f32 %v5778_v41, %v5780_v56  ;;  %v4769_v13 = vsel %vm11725_vm6, %v9827_v46, %v7756_v51  ;;  %vm11726_vm2 = vmmov %vm11725_vm6 }
 0x424   : > { %v4864_v8 = vsel %vm11726_vm2, %v9829_v63, %v7770_v44  ;;  %v7755_v24 = vunpack.i.l.bf16 %v7754_v12  ;;  %v4877_v25 = vpack.c.bf16 %v4851_v14, %v4850_v6  ;;  %v4425_v37 = vrot.slane %v8447_v15, 4  ;;  %vm11729_vm9 = vmmov %vm11726_vm2 }
 0x425   : > { %v4878_v38 = vpack.c.bf16 %v4864_v8, %v4769_v13  ;;  %v7771_v46 = vunpack.i.h.bf16 %v10148_v53  ;;  %v7760_v63 = vunpack.i.l.bf16 %v7759_v43  ;;  %v7776_v44 = vunpack.i.h.bf16 %v7774_v16  ;;  %vm11731_vm13 = vmmov %vm11726_vm2 }
 0x426   : > { %v7764_v10 = vpop.permute.xlu1 %7763  ;;  %5149 = vmatmul.bf16.gmra.mxu2 %v4877_v25  ;;  %v4427_v28 = vrot.slane %v11675_v36, 4  ;;  %v4768_v0 = vsel %vm11729_vm9, %v9769_v11, %v7755_v24  ;;  %vm11730_vm6 = vcmask 1043456   ;;  %v7780_v39 = vunpack.i.l.bf16 %v7779_v57  ;;  %vm11734_vm9 = vmmov %vm11733_vm3 }
 0x427   : > { %7131 = vmatmul.msk.bf16.gmra.mxu3 %vm11724_vm10, %v4878_v38  ;;  %v7765_v5 = vunpack.i.l.bf16 %v7764_v10  ;;  %v7766_v19 = vunpack.i.h.bf16 %v7764_v10  ;;  %v4426_v34 = vsel %vm11730_vm6, %v4424_v29, %v4425_v37  ;;  %v4865_v53 = vsel %vm11731_vm13, %v11675_v36, %v7776_v44  ;;  %vm11732_vm10 = vmmov %vm11730_vm6 }
 0x428   : > { %v4820_v21 = vsel %vm11726_vm2, %v4426_v34, %v7771_v46  ;;  %v4428_v7 = vsel %vm11732_vm10, %v4425_v37, %v4427_v28  ;;  %v4785_v47 = vsel %vm11733_vm3, %v4768_v0, %v7760_v63  ;;  %v4786_v40 = vsel %vm11734_vm9, %v4769_v13, %v7761_v26  ;;  %vm11737_vm13 = vmmov %vm11726_vm2 }
 0x429   : > { %vm11735_vm1 = vcmask 785408   ;;  %v4771_v38 = vsel %vm11726_vm2, %v8447_v15, %v7775_v60  ;;  %v4821_v6 = vsel %vm11737_vm13, %v4428_v7, %v7780_v39  ;;  %vm11738_vm10 = vmmov %vm11733_vm3  ;;  %v7781_v34 = vunpack.i.h.bf16 %v7779_v57 }
 0x42a   : > { %v5145_v52 = vpop.f32.mrf.mxu2  ;;  %v7789_v12 = vpop.permute.xlu0 %7788  ;;  %v4802_v56 = vsel %vm11735_vm1, %v4785_v47, %v7765_v5  ;;  %vm11736_vm6 = vmmov %vm11735_vm1  ;;  %v4881_v25 = vpack.c.bf16 %v4865_v53, %v4771_v38 }
 0x42b   : > { %v4803_v41 = vsel %vm11736_vm6, %v4786_v40, %v7766_v19  ;;  %v7791_v54 = vunpack.i.h.bf16 %v7789_v12  ;;  %v7790_v18 = vunpack.i.l.bf16 %v7789_v12  ;;  %vm11739_vm9 = vmmov %vm11735_vm1  ;;  %v7784_v15 = vpop.permute.xlu2 %7783 }
 0x42c   : > { %v5096_v59 = vpop.f32.mrf.mxu1  ;;  %v4876_v14 = vpack.c.bf16 %v4803_v41, %v4802_v56  ;;  %vm11740_vm6 = vmmov %vm11733_vm3 }
 0x42d   : > { %v5097_v2 = vadd.f32 %v10007_v30, %v5096_v59  ;;  %v4836_v16 = vsel %vm11733_vm3, %v4820_v21, %v7790_v18  ;;  %v4837_v13 = vsel %vm11738_vm10, %v4821_v6, %v7791_v54  ;;  %vm11741_vm3 = vcmask 519168  }
 0x42e   : > { %v7794_v51 = vpop.permute.xlu1 %7793  ;;  %5100 = vmatmul.bf16.gmra.mxu1 %v4876_v14  ;;  %vm11742_vm10 = vcmask 261120   ;;  %v4429_v14 = vrot.slane %v9203_v55, 4 }
 0x42f   : > { %v5146_v11 = vadd.f32 %v5145_v52, %v5097_v2  ;;  %v7796_v8 = vunpack.i.h.bf16 %v7794_v51  ;;  %v7795_v43 = vunpack.i.l.bf16 %v7794_v51 }
 0x430   : > { %v5194_v50 = vpop.f32.mrf.mxu3 }
 0x431   : > { %v5195_v36 = vadd.f32 %v5194_v50, %v5146_v11  ;;  %v4853_v24 = vsel %vm11735_vm1, %v4837_v13, %v7796_v8  ;;  %v4852_v29 = vsel %vm11739_vm9, %v4836_v16, %v7795_v43  ;;  %v4770_v50 = vsel %vm11742_vm10, %v9905_v35, %v7781_v34  ;;  %vm11743_vm1 = vmmov %vm11740_vm6 }
 0x432   : > { %v5147_v37 = vpop.f32.mrf.mxu2  ;;  %v4880_v63 = vpack.c.bf16 %v4853_v24, %v4852_v29  ;;  %v7799_v44 = vpop.permute.xlu0 %7798  ;;  %vm11744_vm9 = vmmov %vm11743_vm1  ;;  %v4430_v16 = vrot.slane %v9205_v23, 4  ;;  %v4432_v13 = vrot.slane %v9207_v17, 4  ;;  %v7786_v24 = vunpack.i.h.bf16 %v7784_v15 }
 0x433   : > { %v5247_v28 = vmul.f32 0.01, %v5195_v36  ;;  %vm5231_vm2 = vcmp.gt.f32.partialorder %v5195_v36, 0.0  ;;  %v7801_v60 = vunpack.i.h.bf16 %v7799_v44  ;;  %v7800_v21 = vunpack.i.l.bf16 %v7799_v44  ;;  %v7819_v11 = vpop.permute.xlu2 %7818 }
 0x434   : > { %v5098_v10 = vpop.f32.mrf.mxu1 }
 0x435   : > { %v5099_v46 = vadd.f32 %v10007_v30, %v5098_v10  ;;  %v10229_v59 = vsel %vm5231_vm2, %v5195_v36, %v5247_v28  ;;  %v4787_v8 = vsel %vm11743_vm1, %v4770_v50, %v7800_v21  ;;  %v4788_v36 = vsel %vm11744_vm9, %v4771_v38, %v7801_v60  ;;  %vm11749_vm1 = vmmov %vm11742_vm10 }
 0x436   : > { %v7809_v26 = vpop.permute.xlu1 %7808  ;;  %5154 = vmatmul.bf16.gmra.mxu2 %v4880_v63  ;;  %v5418_v53 = vsel %vm5407_vm11, %v10229_v59, -inf  ;;  %v5566_v47 = vsel %vm11342_vm14, %v10229_v59, -inf  ;;  %v5714_v18 = vsel %vm11341_vm4, %v10229_v59, -inf  ;;  %v4434_v21 = vrot.slane %v9021_v61, 4  ;;  %vm11760_vm4 = vmmov %vm11749_vm1 }
 0x437   : > { %7132 = vmatmul.msk.bf16.gmra.mxu3 %vm11740_vm6, %v4881_v25  ;;  %v5148_v52 = vadd.f32 %v5147_v37, %v5099_v46  ;;  %v7811_v41 = vunpack.i.h.bf16 %v7809_v26  ;;  %v7810_v54 = vunpack.i.l.bf16 %v7809_v26  ;;  %vm11745_vm6 = vcmask 785408  }
 0x438   : > { %v5196_v0 = vpop.f32.mrf.mxu3  ;;  %vm11746_vm2 = vmmov %vm11745_vm6  ;;  %v7785_v25 = vunpack.i.l.bf16 %v7784_v15 }
 0x439   : > { %v5197_v5 = vadd.f32 %v5196_v0, %v5148_v52  ;;  %v4804_v43 = vsel %vm11745_vm6, %v4787_v8, %v7810_v54  ;;  %v4805_v35 = vsel %vm11746_vm2, %v4788_v36, %v7811_v41  ;;  %v7821_v0 = vunpack.i.h.bf16 %v7819_v11  ;;  %vm11750_vm6 = vmmov %vm11744_vm9 }
 0x43a   : > { %v7804_v39 = vpop.permute.xlu0 %7803  ;;  %v4879_v37 = vpack.c.bf16 %v4805_v35, %v4804_v43  ;;  %v4435_v8 = vrot.slane %v11684_v1, 4 }
 0x43b   : > { %vm5232_vm13 = vcmp.gt.f32.partialorder %v5197_v5, 0.0  ;;  %v5248_v19 = vmul.f32 0.01, %v5197_v5  ;;  %v7834_v10 = vpop.permute.xlu2 %7833  ;;  %v7806_v46 = vunpack.i.h.bf16 %v7804_v39  ;;  %v7805_v28 = vunpack.i.l.bf16 %v7804_v39 }
 0x43c   : > { %v4437_v39 = vrot.slane %v11687_v49, 4  ;;  %v7835_v43 = vunpack.i.l.bf16 %v7834_v10 }
 0x43d   : > { %v10231_v2 = vsel %vm5232_vm13, %v5197_v5, %v5248_v19  ;;  %vm11747_vm13 = vcmask 1043456   ;;  %v7820_v19 = vunpack.i.l.bf16 %v7819_v11 }
 0x43e   : > { %v5419_v7 = vsel %vm5409_vm5, %v10231_v2, -inf  ;;  %v5567_v12 = vsel %vm11741_vm3, %v10231_v2, -inf  ;;  %v7814_v56 = vpop.permute.xlu1 %7813  ;;  %v5715_v51 = vsel %vm5705_vm15, %v10231_v2, -inf  ;;  %v4431_v38 = vsel %vm11747_vm13, %v4429_v14, %v4430_v16  ;;  %vm11748_vm3 = vmmov %vm11747_vm13  ;;  %5105 = vmatmul.bf16.gmra.mxu1 %v4879_v37 }
 0x43f   : > { %v10241_v40 = vmax.f32 %v5418_v53, %v5419_v7  ;;  %v10243_v57 = vmax.f32 %v5566_v47, %v5567_v12  ;;  %v10253_v6 = vmax.f32 %v5714_v18, %v5715_v51  ;;  %v4433_v44 = vsel %vm11748_vm3, %v4430_v16, %v4432_v13  ;;  %vm11751_vm13 = vmmov %vm11746_vm2 }
 0x440   : > { %v4823_v52 = vsel %vm11742_vm10, %v4433_v44, %v7786_v24  ;;  %v4822_v26 = vsel %vm11749_vm1, %v4431_v38, %v7785_v25  ;;  %v7816_v34 = vunpack.i.h.bf16 %v7814_v56  ;;  %v7815_v60 = vunpack.i.l.bf16 %v7814_v56  ;;  %vm11752_vm3 = vmmov %vm11749_vm1 }
 0x441   : > { %v4838_v5 = vsel %vm11744_vm9, %v4822_v26, %v7805_v28  ;;  %v4839_v15 = vsel %vm11750_vm6, %v4823_v52, %v7806_v46  ;;  %v4773_v51 = vsel %vm11752_vm3, %v9205_v23, %v7821_v0  ;;  %vm11753_vm10 = vmmov %vm11749_vm1  ;;  %v4772_v18 = vsel %vm11749_vm1, %v9203_v55, %v7820_v19 }
 0x442   : > { %v7824_v29 = vpop.permute.xlu0 %7823  ;;  %v4854_v7 = vsel %vm11746_vm2, %v4838_v5, %v7815_v60  ;;  %v4855_v47 = vsel %vm11751_vm13, %v4839_v15, %v7816_v34  ;;  %vm11754_vm9 = vmmov %vm11750_vm6  ;;  %v7836_v13 = vunpack.i.h.bf16 %v7834_v10  ;;  %vm11756_vm13 = vcmask 1043456  }
 0x443   : > { %v7825_v53 = vunpack.i.l.bf16 %v7824_v29  ;;  %v4883_v50 = vpack.c.bf16 %v4855_v47, %v4854_v7  ;;  %v7849_v11 = vpop.permute.xlu2 %7848  ;;  %v7826_v24 = vunpack.i.h.bf16 %v7824_v29  ;;  %vm11755_vm2 = vmmov %vm11750_vm6  ;;  %vm11757_vm3 = vcmask 785408  }
 0x444   : > { %vm11762_vm14 = vmmov %vm11755_vm2  ;;  %v7851_v0 = vunpack.i.h.bf16 %v7849_v11  ;;  %v7850_v5 = vunpack.i.l.bf16 %v7849_v11  ;;  %v4440_v11 = vrot.slane %v9615_v58, 4 }
 0x445   : > { %v4866_v41 = vsel %vm11753_vm10, %v9207_v17, %v7825_v53  ;;  %v4438_v17 = vsel %vm11756_vm13, %v4435_v8, %v4437_v39  ;;  %vm11758_vm10 = vmmov %vm11757_vm3 }
 0x446   : > { %v7829_v63 = vpop.permute.xlu1 %7828  ;;  %v4884_v36 = vpack.c.bf16 %v4866_v41, %v4773_v51  ;;  %5159 = vmatmul.bf16.gmra.mxu2 %v4883_v50  ;;  %v4439_v41 = vrot.slane %v9613_v33, 4 }
 0x447   : > { %v7831_v12 = vunpack.i.h.bf16 %v7829_v63  ;;  %v7830_v54 = vunpack.i.l.bf16 %v7829_v63 }
 0x448   : > { %7133 = vmatmul.msk.bf16.gmra.mxu3 %vm11755_vm2, %v4884_v36 }
 0x449   : > { %v4790_v14 = vsel %vm11754_vm9, %v4773_v51, %v7831_v12  ;;  %v4789_v23 = vsel %vm11750_vm6, %v4772_v18, %v7830_v54  ;;  %vm11759_vm9 = vmmov %vm11756_vm13  ;;  %v4442_v54 = vrot.slane %v11696_v4, 4 }
 0x44a   : > { %v7839_v56 = vpop.permute.xlu0 %7838  ;;  %v4806_v25 = vsel %vm11757_vm3, %v4789_v23, %v7835_v43  ;;  %v4807_v55 = vsel %vm11758_vm10, %v4790_v14, %v7836_v13  ;;  %v4436_v38 = vsel %vm11759_vm9, %v4434_v21, %v4435_v8  ;;  %vm11761_vm6 = vmmov %vm11755_vm2 }
 0x44b   : > { %v7840_v35 = vunpack.i.l.bf16 %v7839_v56  ;;  %v4824_v10 = vsel %vm11760_vm4, %v4436_v38, %v7826_v24  ;;  %v4882_v44 = vpack.c.bf16 %v4807_v55, %v4806_v25  ;;  %v7864_v28 = vpop.permute.xlu2 %7863  ;;  %vm11763_vm2 = vmmov %vm11757_vm3  ;;  %v7841_v21 = vunpack.i.h.bf16 %v7839_v56 }
 0x44c   : > { %vm11764_vm13 = vmmov %vm11763_vm2  ;;  %v7866_v13 = vunpack.i.h.bf16 %v7864_v28  ;;  %v7865_v43 = vunpack.i.l.bf16 %v7864_v28 }
 0x44d   : > { %v4825_v63 = vsel %vm11749_vm1, %v4438_v17, %v7840_v35  ;;  %vm11765_vm4 = vmmov %vm11749_vm1 }
 0x44e   : > { %v7844_v16 = vpop.permute.xlu1 %7843  ;;  %5110 = vmatmul.bf16.gmra.mxu1 %v4882_v44  ;;  %vm11766_vm3 = vmmov %vm11749_vm1 }
 0x44f   : > { %v7846_v37 = vunpack.i.h.bf16 %v7844_v16  ;;  %v7845_v46 = vunpack.i.l.bf16 %v7844_v16  ;;  %vm11768_vm10 = vmmov %vm11761_vm6 }
 0x451   : > { %v4841_v29 = vsel %vm11761_vm6, %v4825_v63, %v7846_v37  ;;  %v4840_v52 = vsel %vm11762_vm14, %v4824_v10, %v7845_v46  ;;  %vm11767_vm14 = vmmov %vm11749_vm1 }
 0x452   : > { %v7854_v26 = vpop.permute.xlu0 %7853  ;;  %v4856_v60 = vsel %vm11763_vm2, %v4840_v52, %v7850_v5  ;;  %v4857_v53 = vsel %vm11764_vm13, %v4841_v29, %v7851_v0  ;;  %v4774_v18 = vsel %vm11767_vm14, %v9021_v61, %v7841_v21  ;;  %vm11769_vm1 = vmmov %vm11761_vm6  ;;  %vm11771_vm6 = vcmask 1043456  }
 0x453   : > { %v7856_v15 = vunpack.i.h.bf16 %v7854_v26  ;;  %v7855_v19 = vunpack.i.l.bf16 %v7854_v26  ;;  %v4886_v51 = vpack.c.bf16 %v4857_v53, %v4856_v60  ;;  %v7879_v56 = vpop.permute.xlu2 %7878  ;;  %vm11770_vm9 = vmmov %vm11769_vm1  ;;  %v4441_v23 = vsel %vm11771_vm6, %v4439_v41, %v4440_v11 }
 0x454   : > { %vm11772_vm2 = vmmov %vm11771_vm6  ;;  %v7881_v28 = vunpack.i.h.bf16 %v7879_v56  ;;  %v7880_v29 = vunpack.i.l.bf16 %v7879_v56 }
 0x455   : > { %v4867_v7 = vsel %vm11765_vm4, %v11687_v49, %v7856_v15  ;;  %v4775_v47 = vsel %vm11766_vm3, %v11684_v1, %v7855_v19  ;;  %v4443_v35 = vsel %vm11772_vm2, %v4440_v11, %v4442_v54  ;;  %vm11773_vm4 = vmmov %vm11764_vm13  ;;  %v4444_v54 = vrot.slane %v9485_v45, 4 }
 0x456   : > { %v7859_v34 = vpop.permute.xlu1 %7858  ;;  %v4887_v50 = vpack.c.bf16 %v4867_v7, %v4775_v47  ;;  %5164 = vmatmul.bf16.gmra.mxu2 %v4886_v51  ;;  %vm11774_vm14 = vmmov %vm11766_vm3 }
 0x457   : > { %v7861_v12 = vunpack.i.h.bf16 %v7859_v34  ;;  %v7860_v39 = vunpack.i.l.bf16 %v7859_v34  ;;  %vm11777_vm6 = vmmov %vm11773_vm4 }
 0x458   : > { %7134 = vmatmul.msk.bf16.gmra.mxu3 %vm11770_vm9, %v4887_v50  ;;  %vm11776_vm9 = vmmov %vm11773_vm4 }
 0x459   : > { %v4792_v49 = vsel %vm11768_vm10, %v4775_v47, %v7861_v12  ;;  %v4791_v36 = vsel %vm11769_vm1, %v4774_v18, %v7860_v39  ;;  %vm11775_vm10 = vmmov %vm11769_vm1  ;;  %v4447_v18 = vrot.slane %v10087_v9, 4 }
 0x45a   : > { %v7869_v8 = vpop.permute.xlu0 %7868  ;;  %v4808_v17 = vsel %vm11764_vm13, %v4791_v36, %v7865_v43  ;;  %v4809_v25 = vsel %vm11773_vm4, %v4792_v49, %v7866_v13  ;;  %vm11778_vm2 = vmmov %vm11766_vm3 }
 0x45b   : > { %v7871_v1 = vunpack.i.h.bf16 %v7869_v8  ;;  %v7870_v14 = vunpack.i.l.bf16 %v7869_v8  ;;  %v4885_v46 = vpack.c.bf16 %v4809_v25, %v4808_v17  ;;  %v7894_v63 = vpop.permute.xlu2 %7893  ;;  %vm11779_vm13 = vmmov %vm11778_vm2 }
 0x45c   : > { %vm11780_vm4 = vmmov %vm11778_vm2  ;;  %v7896_v12 = vunpack.i.h.bf16 %v7894_v63  ;;  %v7895_v39 = vunpack.i.l.bf16 %v7894_v63 }
 0x45d   : > { %v4827_v55 = vsel %vm11766_vm3, %v4443_v35, %v7871_v1  ;;  %v4826_v37 = vsel %vm11774_vm14, %v4441_v23, %v7870_v14  ;;  %vm11781_vm3 = vmmov %vm11769_vm1 }
 0x45e   : > { %v7874_v16 = vpop.permute.xlu1 %7873  ;;  %5115 = vmatmul.bf16.gmra.mxu1 %v4885_v46  ;;  %vm11782_vm14 = vmmov %vm11769_vm1 }
 0x45f   : > { %v7876_v24 = vunpack.i.h.bf16 %v7874_v16  ;;  %v7875_v61 = vunpack.i.l.bf16 %v7874_v16 }
 0x461   : > { %v4843_v38 = vsel %vm11775_vm10, %v4827_v55, %v7876_v24  ;;  %v4842_v10 = vsel %vm11769_vm1, %v4826_v37, %v7875_v61  ;;  %vm11783_vm10 = vmmov %vm11769_vm1 }
 0x462   : > { %v7884_v44 = vpop.permute.xlu0 %7883  ;;  %v4858_v5 = vsel %vm11776_vm9, %v4842_v10, %v7880_v29  ;;  %v4859_v15 = vsel %vm11777_vm6, %v4843_v38, %v7881_v28  ;;  %vm11784_vm1 = vmmov %vm11777_vm6  ;;  %vm11786_vm6 = vcmask 1043456  }
 0x463   : > { %v7886_v52 = vunpack.i.h.bf16 %v7884_v44  ;;  %v7885_v34 = vunpack.i.l.bf16 %v7884_v44  ;;  %v4889_v53 = vpack.c.bf16 %v4859_v15, %v4858_v5  ;;  %v7909_v11 = vpop.permute.xlu2 %7908  ;;  %vm11785_vm9 = vmmov %vm11784_vm1 }
 0x464   : > { %v7910_v1 = vunpack.i.l.bf16 %v7909_v11  ;;  %v7911_v35 = vunpack.i.h.bf16 %v7909_v11 }
 0x465   : > { %v4777_v19 = vsel %vm11778_vm2, %v9615_v58, %v7886_v52  ;;  %v4776_v7 = vsel %vm11780_vm4, %v9613_v33, %v7885_v34  ;;  %v4445_v58 = vrot.slane %v10053_v42, 4  ;;  %vm11787_vm2 = vmmov %vm11786_vm6 }
 0x466   : > { %v7889_v26 = vpop.permute.xlu1 %7888  ;;  %5169 = vmatmul.bf16.gmra.mxu2 %v4889_v53  ;;  %v4793_v33 = vsel %vm11782_vm14, %v4776_v7, %v7895_v39  ;;  %v4794_v8 = vsel %vm11783_vm10, %v4777_v19, %v7896_v12  ;;  %vm11789_vm14 = vmmov %vm11781_vm3 }
 0x467   : > { %v7890_v0 = vunpack.i.l.bf16 %v7889_v26  ;;  %v4446_v14 = vsel %vm11786_vm6, %v4444_v54, %v4445_v58  ;;  %v4448_v16 = vsel %vm11787_vm2, %v4445_v58, %v4447_v18  ;;  %vm11790_vm10 = vmmov %vm11784_vm1 }
 0x468   : > { %vm11792_vm6 = vmmov %vm11780_vm4 }
 0x469   : > { %v4868_v60 = vsel %vm11779_vm13, %v11696_v4, %v7890_v0  ;;  %v7891_v4 = vunpack.i.h.bf16 %v7889_v26  ;;  %vm11788_vm13 = vmmov %vm11780_vm4 }
 0x46a   : > { %v4890_v21 = vpack.c.bf16 %v4868_v60, %v4777_v19  ;;  %v7899_v47 = vpop.permute.xlu0 %7898  ;;  %vm11793_vm2 = vmmov %vm11780_vm4 }
 0x46b   : > { %v7901_v51 = vunpack.i.h.bf16 %v7899_v47  ;;  %v7900_v50 = vunpack.i.l.bf16 %v7899_v47  ;;  %v4828_v13 = vsel %vm11788_vm13, %v4446_v14, %v7891_v4  ;;  %v7924_v44 = vpop.permute.xlu2 %7923  ;;  %vm11794_vm13 = vmmov %vm11781_vm3 }
 0x46c   : > { %7135 = vmatmul.msk.bf16.gmra.mxu3 %vm11781_vm3, %v4890_v21  ;;  %v4844_v46 = vsel %vm11781_vm3, %v4828_v13, %v7910_v1  ;;  %v7925_v0 = vunpack.i.l.bf16 %v7924_v44  ;;  %v7926_v19 = vunpack.i.h.bf16 %v7924_v44 }
 0x46d   : > { %v4810_v49 = vsel %vm11784_vm1, %v4793_v33, %v7900_v50  ;;  %v4811_v36 = vsel %vm11785_vm9, %v4794_v8, %v7901_v51  ;;  %vm11791_vm9 = vmmov %vm11780_vm4 }
 0x46e   : > { %v7904_v41 = vpop.permute.xlu1 %7903  ;;  %v4888_v23 = vpack.c.bf16 %v4811_v36, %v4810_v49 }
 0x46f   : > { %v7905_v56 = vunpack.i.l.bf16 %v7904_v41  ;;  %v7906_v28 = vunpack.i.h.bf16 %v7904_v41 }
 0x470   : > { %5120 = vmatmul.bf16.gmra.mxu1 %v4888_v23 }
 0x471   : > { %v4829_v43 = vsel %vm11780_vm4, %v4448_v16, %v7905_v56  ;;  %v4778_v15 = vsel %vm11793_vm2, %v9485_v45, %v7906_v28  ;;  %vm11795_vm4 = vmmov %vm11781_vm3  ;;  %v5412_v28 = vrot.slane %v10174_v32, 4  ;;  %vm11801_vm2 = vcmask 518144  }
 0x472   : > { %v7914_v24 = vpop.permute.xlu0 %7913  ;;  %v4845_v63 = vsel %vm11789_vm14, %v4829_v43, %v7911_v35  ;;  %v4795_v21 = vsel %vm11795_vm4, %v4778_v15, %v7925_v0  ;;  %vm11796_vm14 = vmmov %vm11784_vm1  ;;  %vm11803_vm4 = vcmask 523267  }
 0x473   : > { %v7916_v61 = vunpack.i.h.bf16 %v7914_v24  ;;  %v7915_v17 = vunpack.i.l.bf16 %v7914_v24 }
 0x475   : > { %v4860_v38 = vsel %vm11790_vm10, %v4844_v46, %v7915_v17  ;;  %v4861_v10 = vsel %vm11784_vm1, %v4845_v63, %v7916_v61  ;;  %vm11797_vm10 = vmmov %vm11784_vm1  ;;  %v5560_v61 = vrot.slane %v10178_v48, 4  ;;  %v5708_v17 = vrot.slane %v10193_v22, 4 }
 0x476   : > { %v7919_v25 = vpop.permute.xlu1 %7918  ;;  %v4892_v26 = vpack.c.bf16 %v4861_v10, %v4860_v38  ;;  %vm11798_vm1 = vmmov %vm11781_vm3  ;;  %v5345_v46 = vsel %vm5335_vm8, %v10231_v2, -inf  ;;  %v5569_v63 = vrot.slane %v10243_v57, 4  ;;  %v5788_v10 = vsel %vm5777_vm7, %v10229_v59, -inf }
 0x477   : > { %v7921_v55 = vunpack.i.h.bf16 %v7919_v25  ;;  %v7920_v37 = vunpack.i.l.bf16 %v7919_v25  ;;  %v5277_v1 = vsel %vm11798_vm1, %v10151_v27, -inf  ;;  %v5634_v27 = vrot.slane %v10191_v3, 4 }
 0x478   : > { %5174 = vmatmul.bf16.gmra.mxu2 %v4892_v26  ;;  %v5278_v23 = vrot.slane %v5277_v1, 4  ;;  %v5338_v26 = vrot.slane %v10172_v62, 4  ;;  %v5561_v0 = vmax.f32 %v10178_v48, %v5560_v61  ;;  %v5413_v48 = vmax.f32 %v10174_v32, %v5412_v28 }
 0x479   : > { %v4869_v29 = vsel %vm11791_vm9, %v10087_v9, %v7921_v55  ;;  %v4779_v52 = vsel %vm11792_vm6, %v10053_v42, %v7920_v37  ;;  %vm11799_vm9 = vmmov %vm11798_vm1  ;;  %vm11800_vm6 = vcmask 520192   ;;  %v5640_v55 = vsel %vm5629_vm12, %v10229_v59, -inf }
 0x47a   : > { %v4893_v5 = vpack.c.bf16 %v4869_v29, %v4779_v52  ;;  %v7929_v34 = vpop.permute.xlu0 %7928  ;;  %v4796_v9 = vsel %vm11781_vm3, %v4779_v52, %v7926_v19  ;;  %v5284_v13 = vsel %vm11799_vm9, %v10229_v59, -inf  ;;  %v5641_v35 = vsel %vm11800_vm6, %v10231_v2, -inf  ;;  %vm11804_vm1 = vmmov %vm11800_vm6 }
 0x47b   : > { %v7931_v60 = vunpack.i.h.bf16 %v7929_v34  ;;  %v7930_v53 = vunpack.i.l.bf16 %v7929_v34  ;;  %v5285_v25 = vrot.slane %v5284_v13, 4  ;;  %v5642_v38 = vmax.f32 %v5640_v55, %v5641_v35 }
 0x47c   : > { %7136 = vmatmul.msk.bf16.gmra.mxu3 %vm11794_vm13, %v4893_v5  ;;  %v5279_v44 = vmax.f32 %v5277_v1, %v5278_v23  ;;  %v5493_v29 = vsel %vm11801_vm2, %v10231_v2, -inf  ;;  %v5782_v5 = vrot.slane %v10195_v31, 4  ;;  %vm11802_vm13 = vcmask 523265  }
 0x47d   : > { %v4812_v7 = vsel %vm11796_vm14, %v4795_v21, %v7930_v53  ;;  %v4813_v42 = vsel %vm11797_vm10, %v4796_v9, %v7931_v60  ;;  %v5344_v15 = vsel %vm11802_vm13, %v10229_v59, -inf  ;;  %v5635_v19 = vmax.f32 %v10191_v3, %v5634_v27 }
 0x47e   : > { %v4891_v47 = vpack.c.bf16 %v4813_v42, %v4812_v7  ;;  %v5709_v34 = vmax.f32 %v10193_v22, %v5708_v17  ;;  %v5346_v60 = vmax.f32 %v5344_v15, %v5345_v46  ;;  %v5492_v53 = vsel %vm11803_vm4, %v10229_v59, -inf }
 0x47f   : > { %v5286_v21 = vmax.f32 %v5284_v13, %v5285_v25  ;;  %v5570_v9 = vmax.f32 %v10243_v57, %v5569_v63  ;;  %v5643_v7 = vrot.slane %v5642_v38, 4  ;;  %v5280_v22 = vrot.slane %v5279_v44, 2 }
 0x480   : > { %5125 = vmatmul.bf16.gmra.mxu1 %v4891_v47  ;;  %v5486_v47 = vrot.slane %v10176_v20, 4  ;;  %v5562_v59 = vrot.slane %v5561_v0, 2  ;;  %v5710_v57 = vrot.slane %v5709_v34, 2  ;;  %vm5859_vm14 = vcmask 1041409  }
 0x481   : > { %v5287_v32 = vrot.slane %v5286_v21, 2  ;;  %v5281_v13 = vmax.f32 %v5279_v44, %v5280_v22  ;;  %vm11805_vm4 = vcmask 523265  }
 0x482   : > { %v5711_v35 = vmax.f32 %v5709_v34, %v5710_v57 }
 0x483   : > { %v5288_v46 = vmax.f32 %v5286_v21, %v5287_v32 }
 0x4a9   : > { %v5150_v12 = vpop.f32.mrf.mxu2 }
 0x4aa   : > { %v5199_v39 = vpop.f32.mrf.mxu3 }
 0x4ab   : > { %v5101_v45 = vpop.f32.mrf.mxu1 }
 0x4ac   : > { %v5102_v51 = vadd.f32 %v10007_v30, %v5101_v45  ;;  %v5339_v45 = vmax.f32 %v10172_v62, %v5338_v26  ;;  %v5712_v26 = vrot.slane %v5711_v35, 1 }
 0x4ae   : > { %v5151_v50 = vadd.f32 %v5150_v12, %v5102_v51  ;;  %v5717_v12 = vrot.slane %v10253_v6, 4  ;;  %v5783_v51 = vmax.f32 %v10195_v31, %v5782_v5  ;;  %v5340_v62 = vrot.slane %v5339_v45, 2 }
 0x4af   : > { %v5713_v32 = vmax.f32 %v5711_v35, %v5712_v26 }
 0x4b0   : > { %v10346_v41 = vadd.f32 %v5199_v39, %v5151_v50  ;;  %v5636_v50 = vrot.slane %v5635_v19, 2  ;;  %v5784_v31 = vrot.slane %v5783_v51, 2 }
 0x4b1   : > { %v5152_v11 = vpop.f32.mrf.mxu2 }
 0x4b2   : > { %v5201_v54 = vpop.f32.mrf.mxu3  ;;  %v10405_v23 = vmax.f32 %v5635_v19, %v5636_v50  ;;  %v10413_v28 = vmax.f32 %v5783_v51, %v5784_v31  ;;  %vm5233_vm3 = vcmp.gt.f32.partialorder %v10346_v41, 0.0 }
 0x4b3   : > { %v5103_v58 = vpop.f32.mrf.mxu1 }
 0x4b4   : > { %v5104_v18 = vadd.f32 %v10007_v30, %v5103_v58 }
 0x4b6   : > { %v5153_v4 = vadd.f32 %v5152_v11, %v5104_v18  ;;  %v5347_v11 = vrot.slane %v5346_v60, 4 }
 0x4b8   : > { %v10349_v56 = vadd.f32 %v5201_v54, %v5153_v4  ;;  %v5421_v54 = vrot.slane %v10241_v40, 4  ;;  %v5571_v4 = vrot.slane %v5570_v9, 2  ;;  %v5348_v61 = vmax.f32 %v5346_v60, %v5347_v11 }
 0x4b9   : > { %v5155_v33 = vpop.f32.mrf.mxu2 }
 0x4ba   : > { %v5204_v8 = vpop.f32.mrf.mxu3  ;;  %v5572_v17 = vmax.f32 %v5570_v9, %v5571_v4  ;;  %v5249_v9 = vmul.f32 0.01, %v10346_v41  ;;  %vm5234_vm10 = vcmp.gt.f32.partialorder %v10349_v56, 0.0 }
 0x4bb   : > { %v5106_v49 = vpop.f32.mrf.mxu1 }
 0x4bc   : > { %v5107_v36 = vadd.f32 %v10007_v30, %v5106_v49  ;;  %v5789_v30 = vsel %vm5779_vm0, %v10231_v2, -inf  ;;  %v5494_v2 = vmax.f32 %v5492_v53, %v5493_v29  ;;  %v5487_v49 = vmax.f32 %v10176_v20, %v5486_v47  ;;  %v10425_v47 = vld [vmem:[%s11303_s4] ss:$0 sm:$0xff] }
 0x4bd   : > { %v5790_v52 = vmax.f32 %v5788_v10, %v5789_v30  ;;  %v5422_v30 = vmax.f32 %v10241_v40, %v5421_v54  ;;  %v5289_v29 = vrot.slane %v5288_v46, 1  ;;  %v5638_v40 = vrot.slane %v10405_v23, 1 }
 0x4be   : > { %v5156_v14 = vadd.f32 %v5155_v33, %v5107_v36  ;;  %v5495_v18 = vrot.slane %v5494_v2, 4  ;;  %v5644_v33 = vmax.f32 %v5642_v38, %v5643_v7  ;;  %v5718_v36 = vmax.f32 %v10253_v6, %v5717_v12 }
 0x4bf   : > { %v5791_v3 = vrot.slane %v5790_v52, 4  ;;  %v5488_v6 = vrot.slane %v5487_v49, 2  ;;  %v5423_v5 = vrot.slane %v5422_v30, 2  ;;  %v5573_v34 = vrot.slane %v5572_v17, 1 }
 0x4c0   : > { %v10358_v43 = vadd.f32 %v5204_v8, %v5156_v14  ;;  %v5414_v8 = vrot.slane %v5413_v48, 2  ;;  %v10403_v14 = vmax.f32 %v5561_v0, %v5562_v59  ;;  %v5496_v27 = vmax.f32 %v5494_v2, %v5495_v18 }
 0x4c1   : > { %v10354_v16 = vpop.f32.mrf.mxu2  ;;  %v5792_v1 = vmax.f32 %v5790_v52, %v5791_v3  ;;  %v5645_v25 = vrot.slane %v5644_v33, 2  ;;  %v5719_v63 = vrot.slane %v5718_v36, 2  ;;  %v5282_v52 = vrot.slane %v5281_v13, 1 }
 0x4c2   : > { %v10362_v24 = vpop.f32.mrf.mxu3  ;;  %v10408_v20 = vmax.f32 %v5413_v48, %v5414_v8  ;;  %v5564_v44 = vrot.slane %v10403_v14, 1  ;;  %v5349_v0 = vrot.slane %v5348_v61, 2  ;;  %v5497_v19 = vrot.slane %v5496_v27, 2 }
 0x4c3   : > { %v10371_v37 = vpop.f32.mrf.mxu1  ;;  %v5793_v38 = vrot.slane %v5792_v1, 2  ;;  %v5646_v60 = vmax.f32 %v5644_v33, %v5645_v25  ;;  %v5290_v53 = vmax.f32 %v5288_v46, %v5289_v29  ;;  %v5720_v21 = vmax.f32 %v5718_v36, %v5719_v63 }
 0x4c4   : > { %v5250_v7 = vmul.f32 0.01, %v10349_v56  ;;  %v5283_v48 = vmax.f32 %v5281_v13, %v5282_v52  ;;  %v5109_v12 = vadd.f32 %v10425_v47, %v10371_v37  ;;  %v5489_v22 = vmax.f32 %v5487_v49, %v5488_v6 }
 0x4c5   : > { %v10416_v2 = vmax.f32 %v5792_v1, %v5793_v38  ;;  %v5341_v59 = vmax.f32 %v5339_v45, %v5340_v62  ;;  %v5498_v57 = vmax.f32 %v5496_v27, %v5497_v19  ;;  %v5350_v11 = vmax.f32 %v5348_v61, %v5349_v0 }
 0x4c6   : > { %v10432_v54 = vsel %vm5859_vm14, %v5290_v53, %v5283_v48  ;;  %v5786_v18 = vrot.slane %v10413_v28, 1  ;;  %v5424_v4 = vmax.f32 %v5422_v30, %v5423_v5  ;;  %v5721_v33 = vrot.slane %v5720_v21, 1 }
 0x4c7   : > { %v10435_v36 = vmax.f32 %v5572_v17, %v5573_v34  ;;  %v10440_v37 = vsel %vm5234_vm10, %v10349_v56, %v5250_v7  ;;  %v5499_v45 = vrot.slane %v5498_v57, 1  ;;  %v10445_v49 = vsel %vm5233_vm3, %v10346_v41, %v5249_v9  ;;  %vm11807_vm10 = vmmov %vm11804_vm1 }
 0x4c8   : > { %v5158_v1 = vadd.f32 %v10354_v16, %v5109_v12  ;;  %v5490_v31 = vrot.slane %v5489_v22, 1  ;;  %v5342_v13 = vrot.slane %v5341_v59, 1  ;;  %v5647_v35 = vrot.slane %v5646_v60, 1 }
 0x4c9   : > { %v10391_v42 = vpop.f32.mrf.mxu2  ;;  %v5795_v61 = vrot.slane %v10416_v2, 1  ;;  %v5722_v56 = vmax.f32 %v5720_v21, %v5721_v33  ;;  %v5650_v17 = vsel %vm11804_vm1, %v10440_v37, -inf  ;;  %v5500_v25 = vmax.f32 %v5498_v57, %v5499_v45 }
 0x4ca   : > { %v5649_v41 = vsel %vm5629_vm12, %v10445_v49, -inf  ;;  %v5797_v16 = vsel %vm5777_vm7, %v10445_v49, -inf  ;;  %v5798_v6 = vsel %vm5779_vm0, %v10440_v37, -inf  ;;  %v5416_v63 = vrot.slane %v10408_v20, 1 }
 0x4cb   : > { %v10396_v39 = vpop.f32.mrf.mxu3  ;;  %v5111_v58 = vpop.f32.mrf.mxu1  ;;  %v5491_v38 = vmax.f32 %v5489_v22, %v5490_v31  ;;  %v5343_v29 = vmax.f32 %v5341_v59, %v5342_v13  ;;  %v10461_v52 = vmax.f32 %v5649_v41, %v5650_v17  ;;  %v5425_v21 = vrot.slane %v5424_v4, 1  ;;  %v7195_v41 = vld [vmem:[%s11304_s5 + $0x70] sm:$0xf] }
 0x4cc   : > { %v5112_v3 = vadd.f32 %v10425_v47, %v5111_v58  ;;  %v5351_v58 = vrot.slane %v5350_v11, 1  ;;  %vm5235_vm9 = vcmp.gt.f32.partialorder %v10358_v43, 0.0  ;;  %v5251_v9 = vmul.f32 0.01, %v10358_v43 }
 0x4cd   : > { %v10467_v34 = vsel %vm5859_vm14, %v5500_v25, %v5491_v38  ;;  %v5796_v48 = vmax.f32 %v10416_v2, %v5795_v61  ;;  %v5799_v2 = vmax.f32 %v5797_v16, %v5798_v6  ;;  %v5353_v57 = vsel %vm11805_vm4, %v10445_v49, -inf  ;;  %v7259_v38 = vld [vmem:[%s11304_s5 + $0xf0] sm:$0xf] }
 0x4ce   : > { %v5161_v30 = vadd.f32 %v10391_v42, %v5112_v3  ;;  %v5352_v46 = vmax.f32 %v5350_v11, %v5351_v58  ;;  %v5207_v42 = vadd.f32 %v10362_v24, %v5158_v1  ;;  %v5787_v24 = vmax.f32 %v10413_v28, %v5786_v18 }
 0x4cf   : > { %v5354_v58 = vsel %vm5335_vm8, %v10440_v37, -inf  ;;  %vm11806_vm3 = vcmask 518144   ;;  %v5652_v1 = vrot.slane %v10461_v52, 4  ;;  %v5800_v31 = vrot.slane %v5799_v2, 4 }
 0x4d0   : > { %v5210_v26 = vadd.f32 %v10396_v39, %v5161_v30  ;;  %v10470_v53 = vsel %vm5859_vm14, %v5352_v46, %v5343_v29  ;;  %v5648_v39 = vmax.f32 %v5646_v60, %v5647_v35  ;;  %vm5236_vm6 = vcmp.gt.f32.partialorder %v5207_v42, 0.0  ;;  %v7587_v29 = vld [vmem:[%s11304_s5 + $0xf4] sm:$0xf0]  ;;  %vm11812_vm4 = vmmov %vm11806_vm3 }
 0x4d1   : > { %v5162_v55 = vpop.f32.mrf.mxu2  ;;  %v5252_v7 = vmul.f32 0.01, %v5207_v42  ;;  %v10482_v59 = vsel %vm5859_vm14, %v5796_v48, %v5787_v24  ;;  %v5426_v60 = vmax.f32 %v5424_v4, %v5425_v21  ;;  %v10532_v16 = vmax.f32 %v5353_v57, %v5354_v58 }
 0x4d2   : > { %v5253_v12 = vmul.f32 0.01, %v5210_v26  ;;  %vm5237_vm13 = vcmp.gt.f32.partialorder %v5210_v26, 0.0 }
 0x4d3   : > { %v10410_v10 = vpop.f32.mrf.mxu3  ;;  %v5113_v15 = vpop.f32.mrf.mxu1  ;;  %v10493_v11 = vsel %vm5236_vm6, %v5207_v42, %v5252_v7  ;;  %v7260_v7 = vor.u32 %v7587_v29, %v7259_v38 }
 0x4d4   : > { %v5114_v51 = vadd.f32 %v10425_v47, %v5113_v15  ;;  %v5639_v15 = vmax.f32 %v10405_v23, %v5638_v40  ;;  %v5659_v13 = vsel %vm11807_vm10, %v10493_v11, -inf  ;;  %v5807_v17 = vsel %vm5779_vm0, %v10493_v11, -inf }
 0x4d5   : > { %6405 = vmatpush.bf16.msra.mxu1 %v7260_v7 }
 0x4d6   : > { %v5163_v27 = vadd.f32 %v5162_v55, %v5114_v51  ;;  %v10479_v28 = vsel %vm5859_vm14, %v5648_v39, %v5639_v15  ;;  %v5565_v51 = vmax.f32 %v10403_v14, %v5564_v44 }
 0x4d8   : > { %v5212_v0 = vadd.f32 %v10410_v10, %v5163_v27  ;;  %v5417_v10 = vmax.f32 %v10408_v20, %v5416_v63  ;;  %v10485_v20 = vsel %vm5859_vm14, %v5722_v56, %v5713_v32  ;;  %v10501_v32 = vsel %vm5235_vm9, %v10358_v43, %v5251_v9  ;;  %vm11809_vm9 = vmmov %vm11806_vm3 }
 0x4d9   : > { %v5165_v50 = vpop.f32.mrf.mxu2  ;;  %v10507_v45 = vsel %vm5859_vm14, %v10435_v36, %v5565_v51  ;;  %v5658_v61 = vsel %vm5629_vm12, %v10501_v32, -inf }
 0x4da   : > { %v5254_v3 = vmul.f32 0.01, %v5212_v0  ;;  %vm5238_vm2 = vcmp.gt.f32.partialorder %v5212_v0, 0.0  ;;  %v10496_v33 = vsel %vm5859_vm14, %v5426_v60, %v5417_v10  ;;  %vm11808_vm14 = vcmask 523267  }
 0x4db   : > { %v5214_v8 = vpop.f32.mrf.mxu3  ;;  %v5116_v62 = vpop.f32.mrf.mxu1  ;;  %v5501_v36 = vsel %vm11808_vm14, %v10445_v49, -inf  ;;  %vm11810_vm6 = vmmov %vm11808_vm14  ;;  %v10534_v63 = vmax.f32 %v5658_v61, %v5659_v13 }
 0x4dc   : > { %v5117_v55 = vadd.f32 %v10425_v47, %v5116_v62  ;;  %v10503_v4 = vsel %vm5238_vm2, %v5212_v0, %v5254_v3  ;;  %v10514_v62 = vsel %vm5237_vm13, %v5210_v26, %v5253_v12  ;;  %v10548_v26 = vmax.f32 %v10461_v52, %v5652_v1  ;;  %vm11811_vm13 = vmmov %vm11806_vm3 }
 0x4dd   : > { %v5520_v30 = vsel %vm11809_vm9, %v10503_v4, -inf  ;;  %v5519_v25 = vsel %vm11810_vm6, %v10514_v62, -inf  ;;  %v10550_v0 = vmax.f32 %v5799_v2, %v5800_v31  ;;  %v5511_v24 = vsel %vm11811_vm13, %v10493_v11, -inf }
 0x4de   : > { %v5166_v23 = vadd.f32 %v5165_v50, %v5117_v55  ;;  %v7571_v55 = vld [vmem:[%s11304_s5 + $0x74] sm:$0xf0]  ;;  %v5521_v15 = vmax.f32 %v5519_v25, %v5520_v30  ;;  %v5815_v57 = vsel %vm5777_vm7, %v10514_v62, -inf  ;;  %v5372_v13 = vsel %vm5335_vm8, %v10503_v4, -inf }
 0x4df   : > { %v7196_v10 = vor.u32 %v7571_v55, %v7195_v41  ;;  %vm11816_vm9 = vcmask 523265  }
 0x4e0   : > { %v5215_v18 = vadd.f32 %v5214_v8, %v5166_v23  ;;  %v5502_v8 = vsel %vm11806_vm3, %v10440_v37, -inf  ;;  %v5661_v23 = vrot.slane %v10534_v63, 4  ;;  %vm11813_vm3 = vmmov %vm11807_vm10  ;;  %v5522_v51 = vrot.slane %v5521_v15, 4 }
 0x4e1   : > { %v5167_v5 = vpop.f32.mrf.mxu2  ;;  %v5503_v6 = vmax.f32 %v5501_v36, %v5502_v8  ;;  %vm11814_vm10 = vmmov %vm11810_vm6  ;;  %6392 = vmatpush.bf16.msra.mxu3 %v7196_v10  ;;  %v5816_v8 = vsel %vm5779_vm0, %v10503_v4, -inf  ;;  %v5371_v55 = vsel %vm11816_vm9, %v10514_v62, -inf }
 0x4e2   : > { %v5255_v27 = vmul.f32 0.01, %v5215_v18  ;;  %vm5239_vm2 = vcmp.gt.f32.partialorder %v5215_v18, 0.0  ;;  %v5510_v12 = vsel %vm11814_vm10, %v10501_v32, -inf  ;;  %v5523_v31 = vmax.f32 %v5521_v15, %v5522_v51  ;;  %vm11819_vm10 = vmmov %vm11816_vm9 }
 0x4e3   : > { %v5216_v19 = vpop.f32.mrf.mxu3  ;;  %v5118_v40 = vpop.f32.mrf.mxu1  ;;  %v5504_v48 = vrot.slane %v5503_v6, 4  ;;  %v5512_v60 = vmax.f32 %v5510_v12, %v5511_v24  ;;  %v10585_v25 = vmax.f32 %v5815_v57, %v5816_v8 }
 0x4e4   : > { %v5119_v22 = vadd.f32 %v10425_v47, %v5118_v40  ;;  %v10561_v21 = vsel %vm5239_vm2, %v5215_v18, %v5255_v27  ;;  %v5668_v40 = vsel %vm11813_vm3, %v10503_v4, -inf  ;;  %vm11817_vm2 = vmmov %vm11813_vm3  ;;  %vm5861_vm3 = vcmask 1042434  }
 0x4e5   : > { %v5676_v12 = vsel %vm5629_vm12, %v10561_v21, -inf }
 0x4e6   : > { %v5168_v50 = vadd.f32 %v5167_v5, %v5119_v22  ;;  %v5806_v5 = vsel %vm5777_vm7, %v10501_v32, -inf }
 0x4e7   : > { %v10563_v39 = vmax.f32 %v5806_v5, %v5807_v17  ;;  %v5524_v17 = vrot.slane %v5523_v31, 2  ;;  %v5373_v5 = vmax.f32 %v5371_v55, %v5372_v13 }
 0x4e8   : > { %v5217_v14 = vadd.f32 %v5216_v19, %v5168_v50  ;;  %v10556_v19 = vsel %vm5335_vm8, %v10493_v11, -inf  ;;  %v5667_v50 = vsel %vm5629_vm12, %v10514_v62, -inf }
 0x4e9   : > { %v5170_v44 = vpop.f32.mrf.mxu2  ;;  %v5525_v24 = vmax.f32 %v5523_v31, %v5524_v17 }
 0x4ea   : > { %vm5240_vm1 = vcmp.gt.f32.partialorder %v5217_v14, 0.0  ;;  %v5256_v35 = vmul.f32 0.01, %v5217_v14 }
 0x4ec   : > { %v10536_v42 = vsel %vm5240_vm1, %v5217_v14, %v5256_v35  ;;  %vm11815_vm1 = vmmov %vm11810_vm6  ;;  %v10583_v35 = vmax.f32 %v5667_v50, %v5668_v40 }
 0x4ed   : > { %v5121_v56 = vpop.f32.mrf.mxu1  ;;  %v5529_v52 = vsel %vm11812_vm4, %v10536_v42, -inf  ;;  %v5528_v2 = vsel %vm11815_vm1, %v10561_v21, -inf  ;;  %vm11818_vm13 = vmmov %vm11815_vm1  ;;  %v5381_v13 = vsel %vm5335_vm8, %v10536_v42, -inf  ;;  %vm5863_vm1 = vcmask 1043459  }
 0x4ee   : > { %v5122_v46 = vadd.f32 %v10425_v47, %v5121_v56  ;;  %v5530_v58 = vmax.f32 %v5528_v2, %v5529_v52  ;;  %v5670_v40 = vrot.slane %v10583_v35, 4  ;;  %v5677_v2 = vsel %vm11817_vm2, %v10536_v42, -inf  ;;  %vm11821_vm2 = vmmov %vm11819_vm10 }
 0x4ef   : > { %v5219_v43 = vpop.f32.mrf.mxu3 }
 0x4f0   : > { %v5171_v9 = vadd.f32 %v5170_v44, %v5122_v46  ;;  %v5505_v44 = vmax.f32 %v5503_v6, %v5504_v48  ;;  %v5531_v61 = vrot.slane %v5530_v58, 4  ;;  %v5809_v6 = vrot.slane %v10563_v39, 4 }
 0x4f1   : > { %v5172_v22 = vpop.f32.mrf.mxu2  ;;  %v5818_v48 = vrot.slane %v10585_v25, 4 }
 0x4f2   : > { %v5220_v3 = vadd.f32 %v5219_v43, %v5171_v9  ;;  %v5513_v43 = vrot.slane %v5512_v60, 4  ;;  %v5506_v36 = vrot.slane %v5505_v44, 2  ;;  %v5532_v41 = vmax.f32 %v5530_v58, %v5531_v61 }
 0x4f4   : > { %v5257_v30 = vmul.f32 0.01, %v5220_v3  ;;  %v5514_v56 = vmax.f32 %v5512_v60, %v5513_v43  ;;  %vm5241_vm14 = vcmp.gt.f32.partialorder %v5220_v3, 0.0  ;;  %v5507_v46 = vmax.f32 %v5505_v44, %v5506_v36 }
 0x4f5   : > { %v5123_v14 = vpop.f32.mrf.mxu1  ;;  %v5533_v9 = vrot.slane %v5532_v41, 2  ;;  %v10611_v36 = vmax.f32 %v5676_v12, %v5677_v2 }
 0x4f6   : > { %v5124_v1 = vadd.f32 %v10425_v47, %v5123_v14  ;;  %v5515_v29 = vrot.slane %v5514_v56, 2  ;;  %v5508_v15 = vrot.slane %v5507_v46, 1  ;;  %v10590_v52 = vsel %vm5241_vm14, %v5220_v3, %v5257_v30  ;;  %vm11820_vm14 = vmmov %vm11816_vm9 }
 0x4f7   : > { %v5221_v18 = vpop.f32.mrf.mxu3  ;;  %v10600_v3 = vsel %vm5777_vm7, %v10561_v21, -inf  ;;  %v5526_v14 = vrot.slane %v5525_v24, 1  ;;  %v5534_v44 = vmax.f32 %v5532_v41, %v5533_v9  ;;  %v5537_v58 = vsel %vm11818_vm13, %v10590_v52, -inf }
 0x4f8   : > { %v5173_v27 = vadd.f32 %v5172_v22, %v5124_v1  ;;  %v5516_v7 = vmax.f32 %v5514_v56, %v5515_v29  ;;  %v5509_v51 = vmax.f32 %v5507_v46, %v5508_v15  ;;  %v5356_v30 = vrot.slane %v10532_v16, 4 }
 0x4f9   : > { %v5362_v46 = vsel %vm11819_vm10, %v10501_v32, -inf  ;;  %v5527_v15 = vmax.f32 %v5525_v24, %v5526_v14  ;;  %vm5867_vm13 = vcmask 1045509  }
 0x4fa   : > { %v5222_v38 = vadd.f32 %v5221_v18, %v5173_v27  ;;  %v5517_v43 = vrot.slane %v5516_v7, 1  ;;  %v5917_v61 = vsel %vm5861_vm3, %v5509_v51, %v10467_v34  ;;  %v10618_v27 = vsel %vm5779_vm0, %v10536_v42, -inf }
 0x4fb   : > { %v5175_v22 = vpop.f32.mrf.mxu2  ;;  %v5357_v41 = vmax.f32 %v10532_v16, %v5356_v30  ;;  %v5364_v55 = vmax.f32 %v5362_v46, %v10556_v19  ;;  %v5535_v34 = vrot.slane %v5534_v44, 1  ;;  %v5380_v51 = vsel %vm11820_vm14, %v10561_v21, -inf }
 0x4fc   : > { %vm5242_vm6 = vcmp.gt.f32.partialorder %v5222_v38, 0.0  ;;  %v5258_v10 = vmul.f32 0.01, %v5222_v38  ;;  %v5518_v29 = vmax.f32 %v5516_v7, %v5517_v43  ;;  %vm11822_vm14 = vcmask 523267  }
 0x4fd   : > { %v5126_v60 = vpop.f32.mrf.mxu1  ;;  %v5358_v12 = vrot.slane %v5357_v41, 2 }
 0x4fe   : > { %v10602_v50 = vsel %vm5242_vm6, %v5222_v38, %v5258_v10  ;;  %v5127_v57 = vadd.f32 %v10425_v47, %v5126_v60  ;;  %v5374_v38 = vrot.slane %v5373_v5, 4  ;;  %vm5865_vm6 = vcmask 1044484  }
 0x4ff   : > { %v5224_v18 = vpop.f32.mrf.mxu3  ;;  %v5538_v8 = vsel %vm11812_vm4, %v10602_v50, -inf  ;;  %v5359_v19 = vmax.f32 %v5357_v41, %v5358_v12  ;;  %vm5869_vm4 = vcmask 1046534  }
 0x500   : > { %v5176_v1 = vadd.f32 %v5175_v22, %v5127_v57  ;;  %v5539_v31 = vmax.f32 %v5537_v58, %v5538_v8  ;;  %v5365_v22 = vrot.slane %v5364_v55, 4  ;;  %v5375_v60 = vmax.f32 %v5373_v5, %v5374_v38 }
 0x501   : > { %v5382_v58 = vmax.f32 %v5380_v51, %v5381_v13  ;;  %v5389_v5 = vsel %vm11821_vm2, %v10590_v52, -inf  ;;  %v5536_v38 = vmax.f32 %v5534_v44, %v5535_v34  ;;  %v5918_v51 = vsel %vm5863_vm1, %v5518_v29, %v5917_v61 }
 0x502   : > { %v5225_v56 = vadd.f32 %v5224_v18, %v5176_v1  ;;  %v5540_v17 = vrot.slane %v5539_v31, 4  ;;  %v5366_v7 = vmax.f32 %v5364_v55, %v5365_v22  ;;  %v5376_v24 = vrot.slane %v5375_v60, 2 }
 0x503   : > { %v5177_v16 = vpop.f32.mrf.mxu2  ;;  %v5383_v1 = vrot.slane %v5382_v58, 4 }
 0x504   : > { %v5541_v9 = vmax.f32 %v5539_v31, %v5540_v17  ;;  %v5259_v2 = vmul.f32 0.01, %v5225_v56  ;;  %vm5243_vm9 = vcmp.gt.f32.partialorder %v5225_v56, 0.0  ;;  %v5360_v31 = vrot.slane %v5359_v19, 1 }
 0x505   : > { %v5128_v10 = vpop.f32.mrf.mxu1  ;;  %v5367_v30 = vrot.slane %v5366_v7, 2  ;;  %v5377_v17 = vmax.f32 %v5375_v60, %v5376_v24  ;;  %v5384_v41 = vmax.f32 %v5382_v58, %v5383_v1 }
 0x506   : > { %v5129_v57 = vadd.f32 %v10425_v47, %v5128_v10  ;;  %v5542_v18 = vrot.slane %v5541_v9, 2  ;;  %v5390_v47 = vsel %vm5335_vm8, %v10602_v50, -inf  ;;  %v10632_v13 = vsel %vm5243_vm9, %v5225_v56, %v5259_v2  ;;  %vm11823_vm9 = vmmov %vm11821_vm2 }
 0x507   : > { %v5226_v43 = vpop.f32.mrf.mxu3  ;;  %v5391_v55 = vmax.f32 %v5389_v5, %v5390_v47  ;;  %v5361_v10 = vmax.f32 %v5359_v19, %v5360_v31  ;;  %v5368_v12 = vmax.f32 %v5366_v7, %v5367_v30  ;;  %v5546_v60 = vsel %vm11822_vm14, %v10632_v13, -inf }
 0x508   : > { %v5178_v14 = vadd.f32 %v5177_v16, %v5129_v57  ;;  %v5543_v8 = vmax.f32 %v5541_v9, %v5542_v18  ;;  %v5385_v57 = vrot.slane %v5384_v41, 2  ;;  %v5378_v18 = vrot.slane %v5377_v17, 1 }
 0x509   : > { %v5392_v16 = vrot.slane %v5391_v55, 4  ;;  %v5883_v56 = vsel %vm5861_vm3, %v5361_v10, %v10470_v53  ;;  %v5369_v58 = vrot.slane %v5368_v12, 1  ;;  %v5398_v34 = vsel %vm11823_vm9, %v10632_v13, -inf }
 0x50a   : > { %v5227_v46 = vadd.f32 %v5226_v43, %v5178_v14  ;;  %v5544_v9 = vrot.slane %v5543_v8, 1  ;;  %v5386_v44 = vmax.f32 %v5384_v41, %v5385_v57  ;;  %vm11824_vm2 = vcmask 518144  }
 0x50b   : > { %v5393_v29 = vmax.f32 %v5391_v55, %v5392_v16  ;;  %v5919_v14 = vsel %vm5865_vm6, %v5527_v15, %v5918_v51  ;;  %v5654_v53 = vrot.slane %v10548_v26, 2  ;;  %v5662_v31 = vmax.f32 %v10534_v63, %v5661_v23 }
 0x50c   : > { %vm5244_vm10 = vcmp.gt.f32.partialorder %v5227_v46, 0.0  ;;  %v5260_v22 = vmul.f32 0.01, %v5227_v46  ;;  %v5545_v19 = vmax.f32 %v5543_v8, %v5544_v9  ;;  %v5387_v5 = vrot.slane %v5386_v44, 1 }
 0x50d   : > { %v5394_v43 = vrot.slane %v5393_v29, 2  ;;  %v5671_v8 = vmax.f32 %v10583_v35, %v5670_v40  ;;  %v5920_v47 = vsel %vm5867_vm13, %v5536_v38, %v5919_v14  ;;  %v10658_v15 = vmax.f32 %v10600_v3, %v10618_v27 }
 0x50e   : > { %v10639_v2 = vsel %vm5244_vm10, %v5227_v46, %v5260_v22  ;;  %v5370_v46 = vmax.f32 %v5368_v12, %v5369_v58  ;;  %v5921_v55 = vsel %vm5869_vm4, %v5545_v19, %v5920_v47  ;;  %v5379_v9 = vmax.f32 %v5377_v17, %v5378_v18 }
 0x50f   : > { %v5547_v61 = vsel %vm11824_vm2, %v10639_v2, -inf  ;;  %v5399_v7 = vsel %vm5335_vm8, %v10639_v2, -inf  ;;  %v5395_v10 = vmax.f32 %v5393_v29, %v5394_v43  ;;  %v5655_v63 = vmax.f32 %v10548_v26, %v5654_v53 }
 0x510   : > { %v5548_v24 = vmax.f32 %v5546_v60, %v5547_v61  ;;  %v5400_v1 = vmax.f32 %v5398_v34, %v5399_v7  ;;  %v5679_v23 = vrot.slane %v10611_v36, 4  ;;  %vm5871_vm8 = vcmask 1047559  }
 0x511   : > { %v5388_v35 = vmax.f32 %v5386_v44, %v5387_v5  ;;  %v5396_v40 = vrot.slane %v5395_v10, 1  ;;  %v5663_v38 = vrot.slane %v5662_v31, 2  ;;  %v5672_v12 = vrot.slane %v5671_v8, 2 }
 0x512   : > { %v5549_v30 = vrot.slane %v5548_v24, 4  ;;  %v5401_v41 = vrot.slane %v5400_v1, 4  ;;  %v5884_v3 = vsel %vm5863_vm1, %v5370_v46, %v5883_v56  ;;  %v5680_v27 = vmax.f32 %v10611_v36, %v5679_v23 }
 0x513   : > { %v5397_v16 = vmax.f32 %v5395_v10, %v5396_v40  ;;  %v5885_v17 = vsel %vm5865_vm6, %v5379_v9, %v5884_v3  ;;  %v5685_v18 = vsel %vm5629_vm12, %v10590_v52, -inf  ;;  %vm11825_vm10 = vcmask 520192  }
 0x514   : > { %v5550_v22 = vmax.f32 %v5548_v24, %v5549_v30  ;;  %v5402_v51 = vmax.f32 %v5400_v1, %v5401_v41  ;;  %v5686_v26 = vsel %vm11825_vm10, %v10602_v50, -inf  ;;  %v5656_v34 = vrot.slane %v5655_v63, 1  ;;  %vm11826_vm14 = vmmov %vm11825_vm10 }
 0x515   : > { %v5687_v19 = vmax.f32 %v5685_v18, %v5686_v26  ;;  %v5886_v61 = vsel %vm5867_vm13, %v5388_v35, %v5885_v17  ;;  %v10671_v29 = vmax.f32 %v5662_v31, %v5663_v38  ;;  %v10673_v56 = vmax.f32 %v5671_v8, %v5672_v12  ;;  %v7323_v26 = vld [vmem:[%s11304_s5 + $0x170] sm:$0xf] }
 0x516   : > { %v5551_v57 = vrot.slane %v5550_v22, 2  ;;  %v5403_v60 = vrot.slane %v5402_v51, 2  ;;  %v5681_v36 = vrot.slane %v5680_v27, 2  ;;  %v5887_v14 = vsel %vm5869_vm4, %v5397_v16, %v5886_v61 }
 0x517   : > { %v5688_v1 = vrot.slane %v5687_v19, 4  ;;  %v5695_v53 = vsel %vm11826_vm14, %v10639_v2, -inf  ;;  %v5802_v5 = vrot.slane %v10550_v0, 2  ;;  %v5810_v43 = vmax.f32 %v10563_v39, %v5809_v6 }
 0x518   : > { %v5552_v58 = vmax.f32 %v5550_v22, %v5551_v57  ;;  %v5404_v44 = vmax.f32 %v5402_v51, %v5403_v60  ;;  %v5819_v31 = vmax.f32 %v10585_v25, %v5818_v48  ;;  %v5694_v46 = vsel %vm5629_vm12, %v10632_v13, -inf }
 0x519   : > { %v5689_v47 = vmax.f32 %v5687_v19, %v5688_v1  ;;  %v5696_v41 = vmax.f32 %v5694_v46, %v5695_v53  ;;  %v5803_v9 = vmax.f32 %v10550_v0, %v5802_v5  ;;  %v5811_v10 = vrot.slane %v5810_v43, 2  ;;  %v7569_v1 = vld [vmem:[%s11304_s5 + $0x64] sm:$0xf0] }
 0x51a   : > { %v5553_v7 = vrot.slane %v5552_v58, 1  ;;  %v5405_v24 = vrot.slane %v5404_v44, 1  ;;  %v5820_v22 = vrot.slane %v5819_v31, 2  ;;  %v5682_v39 = vmax.f32 %v5680_v27, %v5681_v36 }
 0x51b   : > { %v5690_v6 = vrot.slane %v5689_v47, 2  ;;  %v5657_v25 = vmax.f32 %v5655_v63, %v5656_v34  ;;  %v5697_v48 = vrot.slane %v5696_v41, 4  ;;  %v5804_v35 = vrot.slane %v5803_v9, 1 }
 0x51c   : > { %v5554_v8 = vmax.f32 %v5552_v58, %v5553_v7  ;;  %v5406_v30 = vmax.f32 %v5404_v44, %v5405_v24  ;;  %v5812_v40 = vmax.f32 %v5810_v43, %v5811_v10  ;;  %v5665_v38 = vrot.slane %v10671_v29, 1  ;;  %v7603_v58 = vld [vmem:[%s11304_s5 + $0x174] sm:$0xf0] }
 0x51d   : > { %v5821_v12 = vmax.f32 %v5819_v31, %v5820_v22  ;;  %v5827_v0 = vrot.slane %v10658_v15, 4  ;;  %v5674_v57 = vrot.slane %v10673_v56, 1  ;;  %v5698_v60 = vmax.f32 %v5696_v41, %v5697_v48 }
 0x51e   : > { %v5922_v51 = vsel %vm5871_vm8, %v5554_v8, %v5921_v55  ;;  %v5888_v23 = vsel %vm5871_vm8, %v5406_v30, %v5887_v14  ;;  %v5834_v55 = vsel %vm5779_vm0, %v10602_v50, -inf  ;;  %v5805_v3 = vmax.f32 %v5803_v9, %v5804_v35  ;;  %v7251_v8 = vld [vmem:[%s11304_s5 + $0xe0] sm:$0xf]  ;;  %v7585_v30 = vld [vmem:[%s11304_s5 + $0xe4] sm:$0xf0] }
 0x51f   : > { %5923 = vrot.lane.b32.xlu2 %v5922_v51, %s7964_s21  ;;  %5889 = vrot.lane.b32.xlu1 %v5888_v23, %s7964_s21  ;;  %v5833_v27 = vsel %vm5777_vm7, %v10590_v52, -inf  ;;  %v5683_v16 = vrot.slane %v5682_v39, 1  ;;  %v5691_v63 = vmax.f32 %v5689_v47, %v5690_v6  ;;  %v5828_v17 = vmax.f32 %v10658_v15, %v5827_v0  ;;  %v7187_v15 = vld [vmem:[%s11304_s5 + $0x60] sm:$0xf]  ;;  %v7179_v23 = vld [vmem:[%s11304_s5 + $0x50] sm:$0xf] }
 0x520   : > { %v5835_v18 = vmax.f32 %v5833_v27, %v5834_v55  ;;  %v5699_v44 = vrot.slane %v5698_v60, 2  ;;  %v5813_v34 = vrot.slane %v5812_v40, 1  ;;  %v5842_v19 = vsel %vm5777_vm7, %v10632_v13, -inf  ;;  %v7567_v6 = vld [vmem:[%s11304_s5 + $0x54] sm:$0xf0] }
 0x521   : > { %v5843_v61 = vsel %vm5779_vm0, %v10639_v2, -inf  ;;  %v5822_v36 = vrot.slane %v5821_v12, 1  ;;  %v5829_v7 = vrot.slane %v5828_v17, 2  ;;  %v5951_v5 = vsel %vm5861_vm3, %v5657_v25, %v10479_v28  ;;  %v7315_v28 = vld [vmem:[%s11304_s5 + $0x160] sm:$0xf] }
 0x522   : > { %v5836_v24 = vrot.slane %v5835_v18, 4  ;;  %v5844_v14 = vmax.f32 %v5842_v19, %v5843_v61  ;;  %v5700_v53 = vmax.f32 %v5698_v60, %v5699_v44  ;;  %v5985_v43 = vsel %vm5861_vm3, %v5805_v3, %v10482_v59  ;;  %v7601_v59 = vld [vmem:[%s11304_s5 + $0x164] sm:$0xf0] }
 0x523   : > { %v7324_v31 = vor.u32 %v7603_v58, %v7323_v26  ;;  %v5692_v47 = vrot.slane %v5691_v63, 1  ;;  %v5830_v46 = vmax.f32 %v5828_v17, %v5829_v7  ;;  %v5666_v10 = vmax.f32 %v10671_v29, %v5665_v38  ;;  %v7243_v29 = vld [vmem:[%s11304_s5 + $0xd0] sm:$0xf]  ;;  %v7583_v38 = vld [vmem:[%s11304_s5 + $0xd4] sm:$0xf0] }
 0x524   : > { %v5837_v41 = vmax.f32 %v5835_v18, %v5836_v24  ;;  %v5845_v9 = vrot.slane %v5844_v14, 4  ;;  %v5701_v22 = vrot.slane %v5700_v53, 1  ;;  %v7188_v51 = vor.u32 %v7569_v1, %v7187_v15  ;;  %v7581_v7 = vld [vmem:[%s11304_s5 + $0xc4] sm:$0xf0]  ;;  %v7299_v1 = vld [vmem:[%s11304_s5 + $0x140] sm:$0xf] }
 0x525   : > { %6418 = vmatpush.bf16.msra.mxu2 %v7324_v31  ;;  %v5675_v25 = vmax.f32 %v10673_v56, %v5674_v57  ;;  %v5831_v48 = vrot.slane %v5830_v46, 1  ;;  %v5684_v55 = vmax.f32 %v5682_v39, %v5683_v16  ;;  %v5814_v60 = vmax.f32 %v5812_v40, %v5813_v34  ;;  %v7307_v56 = vld [vmem:[%s11304_s5 + $0x150] sm:$0xf]  ;;  %v7599_v57 = vld [vmem:[%s11304_s5 + $0x154] sm:$0xf0] }
 0x526   : > { %v5838_v35 = vrot.slane %v5837_v41, 2  ;;  %v5846_v0 = vmax.f32 %v5844_v14, %v5845_v9  ;;  %v5823_v3 = vmax.f32 %v5821_v12, %v5822_v36  ;;  %6393 = vmatpush.bf16.msra.mxu3 %v7188_v51  ;;  %v7252_v27 = vor.u32 %v7585_v30, %v7251_v8  ;;  %v7171_v39 = vld [vmem:[%s11304_s5 + $0x40] sm:$0xf]  ;;  %v7565_v40 = vld [vmem:[%s11304_s5 + $0x44] sm:$0xf0] }
 0x527   : > { %v5693_v17 = vmax.f32 %v5691_v63, %v5692_v47  ;;  %v7316_v58 = vor.u32 %v7601_v59, %v7315_v28  ;;  %v5702_v12 = vmax.f32 %v5700_v53, %v5701_v22  ;;  %v5952_v16 = vsel %vm5863_vm1, %v5666_v10, %v5951_v5  ;;  %v7235_v36 = vld [vmem:[%s11304_s5 + $0xc0] sm:$0xf]  ;;  %v7597_v53 = vld [vmem:[%s11304_s5 + $0x144] sm:$0xf0]  ;;  %v7163_v47 = vld [vmem:[%s11304_s5 + $0x30] sm:$0xf] }
 0x528   : > { %v5839_v18 = vmax.f32 %v5837_v41, %v5838_v35  ;;  %v5847_v26 = vrot.slane %v5846_v0, 2  ;;  %6406 = vmatpush.bf16.msra.mxu1 %v7252_v27  ;;  %v7180_v44 = vor.u32 %v7567_v6, %v7179_v23  ;;  %v7244_v34 = vor.u32 %v7583_v38, %v7243_v29  ;;  %v7227_v51 = vld [vmem:[%s11304_s5 + $0xb0] sm:$0xf]  ;;  %v7579_v23 = vld [vmem:[%s11304_s5 + $0xb4] sm:$0xf0] }
 0x529   : > { %v5832_v19 = vmax.f32 %v5830_v46, %v5831_v48  ;;  %6419 = vmatpush.bf16.msra.mxu2 %v7316_v58  ;;  %v7308_v15 = vor.u32 %v7599_v57, %v7307_v56  ;;  %v5953_v24 = vsel %vm5865_vm6, %v5675_v25, %v5952_v16  ;;  %v7172_v14 = vor.u32 %v7565_v40, %v7171_v39  ;;  %v7563_v46 = vld [vmem:[%s11304_s5 + $0x34] sm:$0xf0]  ;;  %v7291_v48 = vld [vmem:[%s11304_s5 + $0x130] sm:$0xf]  ;;  %v7155_v29 = vld [vmem:[%s11304_s5 + $0x20] sm:$0xf] }
 0x52a   : > { %v5840_v61 = vrot.slane %v5839_v18, 1  ;;  %v5848_v63 = vmax.f32 %v5846_v0, %v5847_v26  ;;  %6394 = vmatpush.bf16.msra.mxu3 %v7180_v44  ;;  %v5954_v8 = vsel %vm5867_vm13, %v5684_v55, %v5953_v24  ;;  %v5986_v30 = vsel %vm5863_vm1, %v5814_v60, %v5985_v43  ;;  %v7595_v35 = vld [vmem:[%s11304_s5 + $0x134] sm:$0xf0]  ;;  %v7561_v38 = vld [vmem:[%s11304_s5 + $0x24] sm:$0xf0] }
 0x52b   : > { %v5955_v41 = vsel %vm5869_vm4, %v5693_v17, %v5954_v8  ;;  %v5987_v9 = vsel %vm5865_vm6, %v5823_v3, %v5986_v30  ;;  %v7236_v28 = vor.u32 %v7581_v7, %v7235_v36  ;;  %v7300_v43 = vor.u32 %v7597_v53, %v7299_v1  ;;  %v7219_v3 = vld [vmem:[%s11304_s5 + $0xa0] sm:$0xf]  ;;  %v7577_v27 = vld [vmem:[%s11304_s5 + $0xa4] sm:$0xf0]  ;;  %v7147_v26 = vld [vmem:[%s11304_s5 + $0x10] sm:$0xf] }
 0x52c   : > { %v5841_v5 = vmax.f32 %v5839_v18, %v5840_v61  ;;  %v5849_v31 = vrot.slane %v5848_v63, 1  ;;  %6407 = vmatpush.bf16.msra.mxu1 %v7244_v34  ;;  %v5956_v10 = vsel %vm5871_vm8, %v5702_v12, %v5955_v41  ;;  %v5988_v22 = vsel %vm5867_vm13, %v5832_v19, %v5987_v9  ;;  %v7283_v17 = vld [vmem:[%s11304_s5 + $0x120] sm:$0xf]  ;;  %v7593_v18 = vld [vmem:[%s11304_s5 + $0x124] sm:$0xf0] }
 0x52d   : > { %6420 = vmatpush.bf16.msra.mxu2 %v7308_v15  ;;  %v7164_v25 = vor.u32 %v7563_v46, %v7163_v47  ;;  %v7228_v60 = vor.u32 %v7579_v23, %v7227_v51  ;;  %v7292_v56 = vor.u32 %v7595_v35, %v7291_v48  ;;  %v7156_v57 = vor.u32 %v7561_v38, %v7155_v29  ;;  %v7559_v58 = vld [vmem:[%s11304_s5 + $0x14] sm:$0xf0]  ;;  %v7211_v40 = vld [vmem:[%s11304_s5 + $0x90] sm:$0xf]  ;;  %v7139_v19 = vld [vmem:[%s11304_s5] sm:$0xf] }
 0x52e   : > { %v5850_v59 = vmax.f32 %v5848_v63, %v5849_v31  ;;  %v5989_v6 = vsel %vm5869_vm4, %v5841_v5, %v5988_v22  ;;  %6395 = vmatpush.bf16.msra.mxu3 %v7172_v14  ;;  %v7220_v39 = vor.u32 %v7577_v27, %v7219_v3  ;;  %v7575_v12 = vld [vmem:[%s11304_s5 + $0x94] sm:$0xf0]  ;;  %v7284_v16 = vor.u32 %v7593_v18, %v7283_v17  ;;  %v7557_v61 = vld [vmem:[%s11304_s5 + $0x4] sm:$0xf0]  ;;  %v7387_v36 = vld [vmem:[%s11304_s5 + $0x1f0] sm:$0xf] }
 0x52f   : > { %v7148_v44 = vor.u32 %v7559_v58, %v7147_v26  ;;  %v5428_v34 = vsel %vm5409_vm5, %v10440_v37, -inf  ;;  %v5437_v63 = vsel %vm5409_vm5, %v10493_v11, -inf  ;;  %v7212_v15 = vor.u32 %v7575_v12, %v7211_v40  ;;  %v7619_v7 = vld [vmem:[%s11304_s5 + $0x1f4] sm:$0xf0]  ;;  %v7203_v1 = vld [vmem:[%s11304_s5 + $0x80] sm:$0xf] }
 0x530   : > { %v5990_v0 = vsel %vm5871_vm8, %v5850_v59, %v5989_v6  ;;  %6408 = vmatpush.bf16.msra.mxu1 %v7236_v28  ;;  %v5427_v24 = vsel %vm5407_vm11, %v10445_v49, -inf  ;;  %v5446_v14 = vsel %vm5409_vm5, %v10503_v4, -inf  ;;  %v7573_v53 = vld [vmem:[%s11304_s5 + $0x84] sm:$0xf0]  ;;  %v5436_v31 = vsel %vm5407_vm11, %v10501_v32, -inf }
 0x531   : > { %v7932_v55 = vpack.i.bf16 %v5990_v0, %v5956_v10  ;;  %6421 = vmatpush.bf16.msra.mxu2 %v7300_v43  ;;  %v5429_v5 = vmax.f32 %v5427_v24, %v5428_v34  ;;  %v5455_v8 = vsel %vm5409_vm5, %v10536_v42, -inf  ;;  %v7570_v30 = vld [vmem:[%s11304_s5 + $0x74] sm:$0xf]  ;;  %v7197_v47 = vld [vmem:[%s11304_s5 + $0x78] sm:$0xf0]  ;;  %v7140_v46 = vor.u32 %v7557_v61, %v7139_v19 }
 0x532   : > { %6396 = vmatpush.bf16.msra.mxu3 %v7164_v25  ;;  %v5438_v41 = vmax.f32 %v5436_v31, %v5437_v63  ;;  %v5445_v9 = vsel %vm5407_vm11, %v10514_v62, -inf  ;;  %v7388_v28 = vor.u32 %v7619_v7, %v7387_v36  ;;  %v5454_v10 = vsel %vm5407_vm11, %v10561_v21, -inf  ;;  %v7568_v6 = vld [vmem:[%s11304_s5 + $0x64] sm:$0xf]  ;;  %v7189_v25 = vld [vmem:[%s11304_s5 + $0x68] sm:$0xf0] }
 0x533   : > { %7933 = vrot.lane.b32.xlu0 %v7932_v55, %s7964_s21  ;;  %v5447_v59 = vmax.f32 %v5445_v9, %v5446_v14  ;;  %v7204_v22 = vor.u32 %v7573_v53, %v7203_v1  ;;  %v5456_v43 = vmax.f32 %v5454_v10, %v5455_v8  ;;  %v7200_v51 = vor.u32 %v7570_v30, %v7197_v47  ;;  %v7566_v38 = vld [vmem:[%s11304_s5 + $0x54] sm:$0xf]  ;;  %v7181_v55 = vld [vmem:[%s11304_s5 + $0x58] sm:$0xf0]  ;;  %v7564_v17 = vld [vmem:[%s11304_s5 + $0x44] sm:$0xf] }
 0x534   : > { %6409 = vmatpush.bf16.msra.mxu1 %v7228_v60  ;;  %v5430_v23 = vrot.slane %v5429_v5, 4  ;;  %v5439_v48 = vrot.slane %v5438_v41, 4  ;;  %v7192_v0 = vor.u32 %v7568_v6, %v7189_v25  ;;  %v7173_v18 = vld [vmem:[%s11304_s5 + $0x48] sm:$0xf0]  ;;  %vm11827_vm12 = vcmask 519168  }
 0x535   : > { %6422 = vmatpush.bf16.msra.mxu2 %v7292_v56  ;;  %v5448_v35 = vrot.slane %v5447_v59, 4  ;;  %v5457_v29 = vrot.slane %v5456_v43, 4  ;;  %v7184_v56 = vor.u32 %v7566_v38, %v7181_v55  ;;  %v7176_v40 = vor.u32 %v7564_v17, %v7173_v18  ;;  %v7379_v38 = vld [vmem:[%s11304_s5 + $0x1e0] sm:$0xf]  ;;  %v7617_v55 = vld [vmem:[%s11304_s5 + $0x1e4] sm:$0xf0] }
 0x536   : > { %6397 = vmatpush.bf16.msra.mxu3 %v7156_v57  ;;  %v5431_v60 = vmax.f32 %v5429_v5, %v5430_v23  ;;  %v5440_v3 = vmax.f32 %v5438_v41, %v5439_v48  ;;  %v5576_v14 = vsel %vm11827_vm12, %v10440_v37, -inf  ;;  %v5724_v53 = vsel %vm5705_vm15, %v10440_v37, -inf  ;;  %v7558_v17 = vld [vmem:[%s11304_s5 + $0x14] sm:$0xf]  ;;  %v7149_v18 = vld [vmem:[%s11304_s5 + $0x18] sm:$0xf0] }
 0x537   : > { %v5449_v27 = vmax.f32 %v5447_v59, %v5448_v35  ;;  %v5458_v57 = vmax.f32 %v5456_v43, %v5457_v29  ;;  %v5464_v31 = vsel %vm5409_vm5, %v10602_v50, -inf  ;;  %v5473_v8 = vsel %vm5409_vm5, %v10639_v2, -inf }
 0x538   : > { %6410 = vmatpush.bf16.msra.mxu1 %v7220_v39  ;;  %v5432_v26 = vrot.slane %v5431_v60, 2  ;;  %v5441_v58 = vrot.slane %v5440_v3, 2  ;;  %vm11828_vm7 = vcmask 523268   ;;  %vm11829_vm0 = vcmask 523270  }
 0x539   : > { %6423 = vmatpush.bf16.msra.mxu2 %v7284_v16  ;;  %v5450_v39 = vrot.slane %v5449_v27, 2  ;;  %v5459_v12 = vrot.slane %v5458_v57, 2  ;;  %v7562_v16 = vld [vmem:[%s11304_s5 + $0x34] sm:$0xf]  ;;  %v5575_v30 = vsel %vm11828_vm7, %v10445_v49, -inf  ;;  %v5723_v47 = vsel %vm11829_vm0, %v10445_v49, -inf  ;;  %vm11832_vm9 = vmmov %vm11828_vm7 }
 0x53a   : > { %6398 = vmatpush.bf16.msra.mxu3 %v7148_v44  ;;  %v7165_v44 = vld [vmem:[%s11304_s5 + $0x38] sm:$0xf0]  ;;  %v5433_v34 = vmax.f32 %v5431_v60, %v5432_v26  ;;  %v5442_v19 = vmax.f32 %v5440_v3, %v5441_v58  ;;  %v5577_v41 = vmax.f32 %v5575_v30, %v5576_v14  ;;  %v5472_v37 = vsel %vm5407_vm11, %v10632_v13, -inf  ;;  %v7157_v3 = vld [vmem:[%s11304_s5 + $0x28] sm:$0xf0]  ;;  %vm11833_vm2 = vmmov %vm11828_vm7 }
 0x53b   : > { %v5451_v61 = vmax.f32 %v5449_v27, %v5450_v39  ;;  %v7168_v63 = vor.u32 %v7562_v16, %v7165_v44  ;;  %v5725_v59 = vmax.f32 %v5723_v47, %v5724_v53  ;;  %v5474_v43 = vmax.f32 %v5472_v37, %v5473_v8  ;;  %v7371_v27 = vld [vmem:[%s11304_s5 + $0x1d0] sm:$0xf]  ;;  %v7363_v44 = vld [vmem:[%s11304_s5 + $0x1c0] sm:$0xf]  ;;  %vm11834_vm10 = vmmov %vm11829_vm0 }
 0x53c   : > { %6411 = vmatpush.bf16.msra.mxu1 %v7212_v15  ;;  %v5460_v15 = vmax.f32 %v5458_v57, %v5459_v12  ;;  %v5434_v36 = vrot.slane %v5433_v34, 1  ;;  %v5443_v7 = vrot.slane %v5442_v19, 1  ;;  %v5578_v6 = vrot.slane %v5577_v41, 4  ;;  %v7275_v26 = vld [vmem:[%s11304_s5 + $0x110] sm:$0xf]  ;;  %vm11835_vm14 = vmmov %vm11829_vm0 }
 0x53d   : > { %v5452_v24 = vrot.slane %v5451_v61, 1  ;;  %v5726_v48 = vrot.slane %v5725_v59, 4  ;;  %v7380_v60 = vor.u32 %v7617_v55, %v7379_v38  ;;  %v7152_v12 = vor.u32 %v7558_v17, %v7149_v18  ;;  %vm11838_vm0 = vmmov %vm11833_vm2 }
 0x53e   : > { %6399 = vmatpush.bf16.msra.mxu3 %v7140_v46  ;;  %v5461_v1 = vrot.slane %v5460_v15, 1  ;;  %v5435_v5 = vmax.f32 %v5433_v34, %v5434_v36  ;;  %v5444_v46 = vmax.f32 %v5442_v19, %v5443_v7  ;;  %v7613_v34 = vld [vmem:[%s11304_s5 + $0x1c4] sm:$0xf0]  ;;  %v7556_v19 = vld [vmem:[%s11304_s5 + $0x4] sm:$0xf]  ;;  %v5733_v8 = vsel %vm5705_vm15, %v10493_v11, -inf }
 0x53f   : > { %v5453_v9 = vmax.f32 %v5451_v61, %v5452_v24  ;;  %v5579_v61 = vmax.f32 %v5577_v41, %v5578_v6  ;;  %v7267_v36 = vld [vmem:[%s11304_s5 + $0x100] sm:$0xf]  ;;  %v7589_v7 = vld [vmem:[%s11304_s5 + $0x104] sm:$0xf0]  ;;  %v5593_v30 = vsel %vm11833_vm2, %v10514_v62, -inf  ;;  %v7364_v47 = vor.u32 %v7613_v34, %v7363_v44 }
 0x540   : > { %6412 = vmatpush.bf16.msra.mxu1 %v7204_v22  ;;  %v5462_v10 = vmax.f32 %v5460_v15, %v5461_v1  ;;  %v7141_v15 = vld [vmem:[%s11304_s5 + $0x8] sm:$0xf0]  ;;  %v7268_v53 = vor.u32 %v7589_v7, %v7267_v36  ;;  %vm11837_vm7 = vcmask 523264   ;;  %v5602_v34 = vsel %vm11838_vm0, %v10561_v21, -inf }
 0x541   : > { %vm11842_vm2 = vmmov %vm11837_vm7 }
 0x542   : > { %6431 = vmatpush.bf16.msrb.mxu3 %v7388_v28  ;;  %v5463_v28 = vsel %vm5407_vm11, %v10590_v52, -inf  ;;  %vm11830_vm11 = vmmov %vm11827_vm12 }
 0x543   : > { %v5465_v22 = vmax.f32 %v5463_v28, %v5464_v31  ;;  %v5585_v58 = vsel %vm11830_vm11, %v10493_v11, -inf  ;;  %vm11831_vm5 = vmmov %vm11830_vm11  ;;  %v5584_v31 = vsel %vm11832_vm9, %v10501_v32, -inf  ;;  %v7355_v28 = vld [vmem:[%s11304_s5 + $0x1b0] sm:$0xf]  ;;  %v7611_v11 = vld [vmem:[%s11304_s5 + $0x1b4] sm:$0xf0] }
 0x544   : > { %6444 = vmatpush.bf16.msrb.mxu1 %v7200_v51  ;;  %v5901_v51 = vsel %vm5861_vm3, %v5435_v5, %v10496_v33  ;;  %v7560_v33 = vld [vmem:[%s11304_s5 + $0x24] sm:$0xf]  ;;  %v5594_v24 = vsel %vm11831_vm5, %v10503_v4, -inf  ;;  %v7586_v5 = vld [vmem:[%s11304_s5 + $0xf4] sm:$0xf]  ;;  %v5586_v41 = vmax.f32 %v5584_v31, %v5585_v58  ;;  %v7356_v38 = vor.u32 %v7611_v11, %v7355_v28  ;;  %vm11836_vm12 = vmmov %vm11831_vm5 }
 0x545   : > { %v5902_v23 = vsel %vm5863_vm1, %v5444_v46, %v5901_v51  ;;  %v5466_v35 = vrot.slane %v5465_v22, 4  ;;  %v7160_v57 = vor.u32 %v7560_v33, %v7157_v3  ;;  %v7261_v46 = vld [vmem:[%s11304_s5 + $0xf8] sm:$0xf0]  ;;  %v5742_v51 = vsel %vm5705_vm15, %v10503_v4, -inf  ;;  %v7347_v4 = vld [vmem:[%s11304_s5 + $0x1a0] sm:$0xf]  ;;  %vm11839_vm11 = vmmov %vm11837_vm7 }
 0x546   : > { %v5903_v25 = vsel %vm5865_vm6, %v5453_v9, %v5902_v23  ;;  %6432 = vmatpush.bf16.msrb.mxu3 %v7380_v60  ;;  %v7144_v9 = vor.u32 %v7556_v19, %v7141_v15  ;;  %v7264_v37 = vor.u32 %v7586_v5, %v7261_v46  ;;  %v7253_v23 = vld [vmem:[%s11304_s5 + $0xe8] sm:$0xf0]  ;;  %v5587_v33 = vrot.slane %v5586_v41, 4  ;;  %v7609_v3 = vld [vmem:[%s11304_s5 + $0x1a4] sm:$0xf0]  ;;  %vm11840_vm5 = vmmov %vm11834_vm10 }
 0x547   : > { %v10914_v29 = vsel %vm5867_vm13, %v5462_v10, %v5903_v25  ;;  %v5467_v14 = vmax.f32 %v5465_v22, %v5466_v35  ;;  %v5580_v10 = vrot.slane %v5579_v61, 2  ;;  %v5732_v22 = vsel %vm11834_vm10, %v10501_v32, -inf  ;;  %v7339_v19 = vld [vmem:[%s11304_s5 + $0x190] sm:$0xf]  ;;  %vm11841_vm9 = vmmov %vm11837_vm7 }
 0x548   : > { %6445 = vmatpush.bf16.msrb.mxu1 %v7192_v0  ;;  %v5475_v0 = vrot.slane %v5474_v43, 4  ;;  %v10996_v6 = vmax.f32 %v5732_v22, %v5733_v8  ;;  %v5603_v17 = vsel %vm11836_vm12, %v10536_v42, -inf  ;;  %v7348_v58 = vor.u32 %v7609_v3, %v7347_v4  ;;  %vm11843_vm10 = vmmov %vm11842_vm2 }
 0x549   : > { %v5468_v25 = vrot.slane %v5467_v14, 2  ;;  %v5604_v36 = vmax.f32 %v5602_v34, %v5603_v17  ;;  %v5312_v46 = vsel %vm11842_vm2, %v10561_v21, -inf  ;;  %vm11845_vm12 = vmmov %vm11842_vm2  ;;  %v7616_v34 = vld [vmem:[%s11304_s5 + $0x1e4] sm:$0xf] }
 0x54a   : > { %v5476_v1 = vmax.f32 %v5474_v43, %v5475_v0  ;;  %v5595_v43 = vmax.f32 %v5593_v30, %v5594_v24  ;;  %v5741_v0 = vsel %vm11835_vm14, %v10514_v62, -inf  ;;  %vm11844_vm14 = vmmov %vm11842_vm2 }
 0x54b   : > { %v5743_v60 = vmax.f32 %v5741_v0, %v5742_v51  ;;  %v5469_v18 = vmax.f32 %v5467_v14, %v5468_v25 }
 0x54c   : > { %6446 = vmatpush.bf16.msrb.mxu1 %v7184_v56  ;;  %v7615_v56 = vld [vmem:[%s11304_s5 + $0x1d4] sm:$0xf0] }
 0x54d   : > { %v7372_v39 = vor.u32 %v7615_v56, %v7371_v27  ;;  %v5596_v27 = vrot.slane %v5595_v43, 4  ;;  %v5581_v56 = vmax.f32 %v5579_v61, %v5580_v10  ;;  %v5744_v44 = vrot.slane %v5743_v60, 4  ;;  %v7607_v61 = vld [vmem:[%s11304_s5 + $0x194] sm:$0xf0] }
 0x54e   : > { %v5470_v24 = vrot.slane %v5469_v18, 1  ;;  %v7340_v5 = vor.u32 %v7607_v61, %v7339_v19  ;;  %v7381_v19 = vld [vmem:[%s11304_s5 + $0x1e8] sm:$0xf0] }
 0x54f   : > { %6433 = vmatpush.bf16.msrb.mxu3 %v7372_v39  ;;  %v5291_v39 = vsel %vm11837_vm7, %v10445_v49, -inf  ;;  %v11019_v15 = vmax.f32 %v5595_v43, %v5596_v27  ;;  %v5745_v30 = vmax.f32 %v5743_v60, %v5744_v44  ;;  %v5313_v43 = vrot.slane %v5312_v46, 4  ;;  %v7618_v60 = vld [vmem:[%s11304_s5 + $0x1f4] sm:$0xf] }
 0x550   : > { %6447 = vmatpush.bf16.msrb.mxu1 %v7176_v40  ;;  %v7591_v40 = vld [vmem:[%s11304_s5 + $0x114] sm:$0xf0]  ;;  %v5292_v14 = vrot.slane %v5291_v39, 4  ;;  %v5471_v11 = vmax.f32 %v5469_v18, %v5470_v24  ;;  %vm11846_vm7 = vcmask 519168  }
 0x551   : > { %v7276_v16 = vor.u32 %v7591_v40, %v7275_v26  ;;  %v5582_v40 = vrot.slane %v5581_v56, 1 }
 0x553   : > { %6424 = vmatpush.bf16.msra.mxu2 %v7276_v16  ;;  %6434 = vmatpush.bf16.msrb.mxu3 %v7364_v47  ;;  %v5588_v16 = vmax.f32 %v5586_v41, %v5587_v33  ;;  %v5583_v7 = vmax.f32 %v5581_v56, %v5582_v40  ;;  %v5750_v47 = vsel %vm11840_vm5, %v10561_v21, -inf  ;;  %v5605_v41 = vrot.slane %v5604_v36, 4  ;;  %vm11848_vm5 = vmmov %vm11846_vm7 }
 0x554   : > { %6448 = vmatpush.bf16.msrb.mxu1 %v7168_v63  ;;  %v5727_v63 = vmax.f32 %v5725_v59, %v5726_v48  ;;  %v7584_v59 = vld [vmem:[%s11304_s5 + $0xe4] sm:$0xf]  ;;  %v5477_v48 = vrot.slane %v5476_v1, 2  ;;  %v5905_v33 = vsel %vm5869_vm4, %v5471_v11, %v10914_v29  ;;  %v5314_v56 = vmax.f32 %v5312_v46, %v5313_v43  ;;  %v7614_v46 = vld [vmem:[%s11304_s5 + $0x1d4] sm:$0xf] }
 0x555   : > { %v7256_v55 = vor.u32 %v7584_v59, %v7253_v23  ;;  %v11027_v8 = vsel %vm5861_vm3, %v5583_v7, %v10507_v45  ;;  %v5293_v45 = vmax.f32 %v5291_v39, %v5292_v14  ;;  %v7582_v59 = vld [vmem:[%s11304_s5 + $0xd4] sm:$0xf]  ;;  %v5589_v21 = vrot.slane %v5588_v16, 2 }
 0x556   : > { %v5728_v35 = vrot.slane %v5727_v63, 2  ;;  %v5478_v26 = vmax.f32 %v5476_v1, %v5477_v48  ;;  %v5298_v1 = vsel %vm11839_vm11, %v10501_v32, -inf  ;;  %v5746_v23 = vrot.slane %v5745_v30, 2  ;;  %vm11847_vm11 = vmmov %vm11838_vm0 }
 0x557   : > { %6425 = vmatpush.bf16.msra.mxu2 %v7268_v53  ;;  %6435 = vmatpush.bf16.msrb.mxu3 %v7356_v38  ;;  %v5590_v25 = vmax.f32 %v5588_v16, %v5589_v21  ;;  %v5598_v48 = vrot.slane %v11019_v15, 2  ;;  %v5326_v38 = vsel %vm11844_vm14, %v10632_v13, -inf  ;;  %v5294_v4 = vrot.slane %v5293_v45, 2 }
 0x558   : > { %6449 = vmatpush.bf16.msrb.mxu1 %v7160_v57  ;;  %v5735_v57 = vrot.slane %v10996_v6, 4  ;;  %v5479_v53 = vrot.slane %v5478_v26, 1  ;;  %v5327_v18 = vrot.slane %v5326_v38, 4  ;;  %v5747_v39 = vmax.f32 %v5745_v30, %v5746_v23 }
 0x559   : > { %v5315_v24 = vrot.slane %v5314_v56, 2  ;;  %v7384_v30 = vor.u32 %v7616_v34, %v7381_v19  ;;  %v5769_v34 = vsel %vm5705_vm15, %v10639_v2, -inf  ;;  %vm6683_vm14 = vcmask 7168  }
 0x55a   : > { %v5480_v10 = vmax.f32 %v5478_v26, %v5479_v53  ;;  %v5736_v51 = vmax.f32 %v10996_v6, %v5735_v57  ;;  %v7389_v6 = vld [vmem:[%s11304_s5 + $0x1f8] sm:$0xf0]  ;;  %v5606_v57 = vmax.f32 %v5604_v36, %v5605_v41  ;;  %v5591_v26 = vrot.slane %v5590_v25, 1 }
 0x55b   : > { %6457 = vmatpush.bf16.msrb.mxu2 %v7264_v37  ;;  %6436 = vmatpush.bf16.msrb.mxu3 %v7348_v58  ;;  %v5319_v37 = vsel %vm11843_vm10, %v10590_v52, -inf  ;;  %v7392_v40 = vor.u32 %v7618_v60, %v7389_v6  ;;  %v5748_v36 = vrot.slane %v5747_v39, 1  ;;  %v7373_v41 = vld [vmem:[%s11304_s5 + $0x1d8] sm:$0xf0] }
 0x55c   : > { %6450 = vmatpush.bf16.msrb.mxu1 %v7152_v12  ;;  %v5729_v12 = vmax.f32 %v5727_v63, %v5728_v35  ;;  %v5751_v63 = vsel %vm5705_vm15, %v10536_v42, -inf  ;;  %v5305_v42 = vsel %vm11841_vm9, %v10514_v62, -inf  ;;  %v7245_v62 = vld [vmem:[%s11304_s5 + $0xd8] sm:$0xf0]  ;;  %v5320_v0 = vrot.slane %v5319_v37, 4 }
 0x55d   : > { %v5752_v32 = vmax.f32 %v5750_v47, %v5751_v63  ;;  %v5306_v22 = vrot.slane %v5305_v42, 4  ;;  %v5906_v3 = vsel %vm5871_vm8, %v5480_v10, %v5905_v33  ;;  %v5737_v58 = vrot.slane %v5736_v51, 2 }
 0x55e   : > { %v5730_v49 = vrot.slane %v5729_v12, 1  ;;  %v5321_v16 = vmax.f32 %v5319_v37, %v5320_v0  ;;  %v5607_v14 = vrot.slane %v5606_v57, 2  ;;  %v5592_v53 = vmax.f32 %v5590_v25, %v5591_v26 }
 0x55f   : > { %6458 = vmatpush.bf16.msrb.mxu2 %v7256_v55  ;;  %6437 = vmatpush.bf16.msrb.mxu3 %v7340_v5  ;;  %v5753_v55 = vrot.slane %v5752_v32, 4  ;;  %v5307_v27 = vmax.f32 %v5305_v42, %v5306_v22  ;;  %v5738_v61 = vmax.f32 %v5736_v51, %v5737_v58  ;;  %v5749_v11 = vmax.f32 %v5747_v39, %v5748_v36 }
 0x560   : > { %6451 = vmatpush.bf16.msrb.mxu1 %v7144_v9  ;;  %v5731_v31 = vmax.f32 %v5729_v12, %v5730_v49  ;;  %v5299_v9 = vrot.slane %v5298_v1, 4  ;;  %v5295_v49 = vmax.f32 %v5293_v45, %v5294_v4  ;;  %v5322_v42 = vrot.slane %v5321_v16, 2 }
 0x561   : > { %v5754_v7 = vmax.f32 %v5752_v32, %v5753_v55  ;;  %v5308_v63 = vrot.slane %v5307_v27, 2  ;;  %v5739_v5 = vrot.slane %v5738_v61, 1  ;;  %v5599_v32 = vmax.f32 %v11019_v15, %v5598_v48  ;;  %v7612_v15 = vld [vmem:[%s11304_s5 + $0x1c4] sm:$0xf]  ;;  %v7365_v48 = vld [vmem:[%s11304_s5 + $0x1c8] sm:$0xf0] }
 0x562   : > { %v11037_v28 = vsel %vm5861_vm3, %v5731_v31, %v10485_v20  ;;  %v7248_v20 = vor.u32 %v7582_v59, %v7245_v62  ;;  %v5300_v35 = vmax.f32 %v5298_v1, %v5299_v9  ;;  %v5328_v1 = vmax.f32 %v5326_v38, %v5327_v18 }
 0x563   : > { %v5755_v31 = vrot.slane %v5754_v7, 2  ;;  %v5740_v9 = vmax.f32 %v5738_v61, %v5739_v5  ;;  %v5296_v37 = vrot.slane %v5295_v49, 1  ;;  %v5309_v59 = vmax.f32 %v5307_v27, %v5308_v63 }
 0x564   : > { %6459 = vmatpush.bf16.msrb.mxu2 %v7248_v20  ;;  %v5301_v12 = vrot.slane %v5300_v35, 2  ;;  %v5316_v62 = vmax.f32 %v5314_v56, %v5315_v24  ;;  %v5608_v21 = vmax.f32 %v5606_v57, %v5607_v14  ;;  %v5329_v10 = vrot.slane %v5328_v1, 2 }
 0x565   : > { %v5756_v45 = vmax.f32 %v5754_v7, %v5755_v31  ;;  %v5970_v43 = vsel %vm5863_vm1, %v5740_v9, %v11037_v28  ;;  %v5936_v20 = vsel %vm5863_vm1, %v5592_v53, %v11027_v8  ;;  %v7376_v51 = vor.u32 %v7614_v46, %v7373_v41  ;;  %v7602_v41 = vld [vmem:[%s11304_s5 + $0x174] sm:$0xf]  ;;  %v7229_v9 = vld [vmem:[%s11304_s5 + $0xb8] sm:$0xf0] }
 0x566   : > { %v5302_v47 = vmax.f32 %v5300_v35, %v5301_v12  ;;  %v5323_v25 = vmax.f32 %v5321_v16, %v5322_v42  ;;  %v5600_v35 = vrot.slane %v5599_v32, 1  ;;  %v5971_v38 = vsel %vm5865_vm6, %v5749_v11, %v5970_v43  ;;  %v7578_v42 = vld [vmem:[%s11304_s5 + $0xb4] sm:$0xf] }
 0x567   : > { %v5757_v22 = vrot.slane %v5756_v45, 1  ;;  %v5297_v28 = vmax.f32 %v5295_v49, %v5296_v37  ;;  %v5310_v55 = vrot.slane %v5309_v59, 1  ;;  %v5609_v33 = vrot.slane %v5608_v21, 1  ;;  %v7605_v49 = vld [vmem:[%s11304_s5 + $0x184] sm:$0xf0] }
 0x568   : > { %v5303_v23 = vrot.slane %v5302_v47, 1  ;;  %v5317_v8 = vrot.slane %v5316_v62, 1  ;;  %v5330_v60 = vmax.f32 %v5328_v1, %v5329_v10  ;;  %v7368_v4 = vor.u32 %v7612_v15, %v7365_v48  ;;  %v7237_v1 = vld [vmem:[%s11304_s5 + $0xc8] sm:$0xf0] }
 0x569   : > { %v5758_v0 = vmax.f32 %v5756_v45, %v5757_v22  ;;  %v5324_v27 = vrot.slane %v5323_v25, 1  ;;  %v5601_v56 = vmax.f32 %v5599_v32, %v5600_v35  ;;  %v5311_v57 = vmax.f32 %v5309_v59, %v5310_v55  ;;  %v7325_v45 = vld [vmem:[%s11304_s5 + $0x178] sm:$0xf0]  ;;  %v7608_v59 = vld [vmem:[%s11304_s5 + $0x1a4] sm:$0xf] }
 0x56a   : > { %v5610_v18 = vmax.f32 %v5608_v21, %v5609_v33  ;;  %v5612_v26 = vsel %vm11846_vm7, %v10602_v50, -inf  ;;  %v5318_v58 = vmax.f32 %v5316_v62, %v5317_v8  ;;  %v5331_v39 = vrot.slane %v5330_v60, 1  ;;  %v7349_v62 = vld [vmem:[%s11304_s5 + $0x1a8] sm:$0xf0]  ;;  %v7606_v35 = vld [vmem:[%s11304_s5 + $0x194] sm:$0xf] }
 0x56b   : > { %v11089_v6 = vsel %vm5867_vm13, %v5758_v0, %v5971_v38  ;;  %v5620_v12 = vsel %vm11847_vm11, %v10632_v13, -inf  ;;  %v5621_v16 = vsel %vm11848_vm5, %v10639_v2, -inf  ;;  %v5325_v19 = vmax.f32 %v5323_v25, %v5324_v27  ;;  %v7341_v0 = vld [vmem:[%s11304_s5 + $0x198] sm:$0xf0]  ;;  %v7600_v33 = vld [vmem:[%s11304_s5 + $0x164] sm:$0xf] }
 0x56c   : > { %v5937_v7 = vsel %vm5865_vm6, %v5601_v56, %v5936_v20  ;;  %v5332_v53 = vmax.f32 %v5330_v60, %v5331_v39  ;;  %v5622_v5 = vmax.f32 %v5620_v12, %v5621_v16  ;;  %v7232_v37 = vor.u32 %v7578_v42, %v7229_v9  ;;  %v7576_v20 = vld [vmem:[%s11304_s5 + $0xa4] sm:$0xf]  ;;  %v7317_v8 = vld [vmem:[%s11304_s5 + $0x168] sm:$0xf0]  ;;  %v7574_v56 = vld [vmem:[%s11304_s5 + $0x94] sm:$0xf] }
 0x56d   : > { %v11121_v24 = vsel %vm5867_vm13, %v5610_v18, %v5937_v7  ;;  %v7352_v43 = vor.u32 %v7608_v59, %v7349_v62  ;;  %v7344_v27 = vor.u32 %v7606_v35, %v7341_v0  ;;  %v7320_v39 = vor.u32 %v7600_v33, %v7317_v8  ;;  %v7285_v9 = vld [vmem:[%s11304_s5 + $0x128] sm:$0xf0]  ;;  %v7627_v33 = vld [vmem:[%s11306_s7 + $0x38] sm:$0xff]  ;;  %v7626_v8 = vld [vmem:[%s11306_s7 + $0x30] sm:$0xff] }
 0x56e   : > { %v5623_v15 = vrot.slane %v5622_v5, 4 }
 0x579   : > { %v5924_v17 = vpop.permute.xlu2 %5923 }
 0x57a   : > { %v5995_v29 = vsel %vm11845_vm12, %v5906_v3, %v5924_v17  ;;  %v5304_v3 = vmax.f32 %v5302_v47, %v5303_v23  ;;  %v5862_v17 = vsel %vm5861_vm3, %v5297_v28, %v10432_v54  ;;  %vm11849_vm3 = vcmask 523270   ;;  %v7610_v47 = vld [vmem:[%s11304_s5 + $0x1b4] sm:$0xf] }
 0x57b   : > { %v11061_v44 = vpack.c.bf16 %v5995_v29, %v5995_v29  ;;  %v5611_v29 = vsel %vm11838_vm0, %v10590_v52, -inf  ;;  %v5759_v54 = vsel %vm11849_vm3, %v10590_v52, -inf  ;;  %v7580_v52 = vld [vmem:[%s11304_s5 + $0xc4] sm:$0xf]  ;;  %v7328_v28 = vor.u32 %v7602_v41, %v7325_v45 }
 0x57c   : > { %v5864_v61 = vsel %vm5863_vm1, %v5304_v3, %v5862_v17  ;;  %v5613_v36 = vmax.f32 %v5611_v29, %v5612_v26  ;;  %vm11851_vm1 = vmmov %vm11842_vm2  ;;  %v5624_v17 = vmax.f32 %v5622_v5, %v5623_v15  ;;  %v7604_v26 = vld [vmem:[%s11304_s5 + $0x184] sm:$0xf]  ;;  %v7598_v29 = vld [vmem:[%s11304_s5 + $0x154] sm:$0xf] }
 0x57d   : > { %6413 = vmatmul.bf16.vlgmr.msra.gmra.mxu1 %v11061_v44  ;;  %v5866_v46 = vsel %vm5865_vm6, %v5311_v57, %v5864_v61  ;;  %v7213_v57 = vld [vmem:[%s11304_s5 + $0x98] sm:$0xf0]  ;;  %v7205_v61 = vld [vmem:[%s11304_s5 + $0x88] sm:$0xf0]  ;;  %vm11852_vm6 = vmmov %vm11851_vm1 }
 0x57e   : > { %6483 = vmatpush.bf16.msra.mxu1 %v7392_v40  ;;  %v5760_v40 = vsel %vm5705_vm15, %v10602_v50, -inf  ;;  %v7331_v50 = vld [vmem:[%s11304_s5 + $0x180] sm:$0xf]  ;;  %vm11850_vm15 = vmmov %vm11849_vm3  ;;  %v5868_v11 = vsel %vm5867_vm13, %v5318_v58, %v5866_v46  ;;  %v5614_v10 = vrot.slane %v5613_v36, 4  ;;  %v7333_v58 = vld [vmem:[%s11304_s5 + $0x188] sm:$0xf0]  ;;  %v7216_v12 = vor.u32 %v7574_v56, %v7213_v57 }
 0x57f   : > { %v5761_v63 = vmax.f32 %v5759_v54, %v5760_v40  ;;  %v5768_v2 = vsel %vm11850_vm15, %v10632_v13, -inf  ;;  %v7332_v14 = vor.u32 %v7605_v49, %v7331_v50  ;;  %v7357_v13 = vld [vmem:[%s11304_s5 + $0x1b8] sm:$0xf0]  ;;  %v5870_v21 = vsel %vm5869_vm4, %v5325_v19, %v5868_v11  ;;  %v7572_v19 = vld [vmem:[%s11304_s5 + $0x84] sm:$0xf]  ;;  %vm11853_vm13 = vmmov %vm11851_vm1 }
 0x580   : > { %v5770_v31 = vmax.f32 %v5768_v2, %v5769_v34  ;;  %v7360_v32 = vor.u32 %v7610_v47, %v7357_v13  ;;  %v5872_v25 = vsel %vm5871_vm8, %v5332_v53, %v5870_v21  ;;  %v7309_v40 = vld [vmem:[%s11304_s5 + $0x158] sm:$0xf0]  ;;  %v7336_v34 = vor.u32 %v7604_v26, %v7333_v58  ;;  %v7596_v49 = vld [vmem:[%s11304_s5 + $0x144] sm:$0xf] }
 0x581   : > { %6438 = vmatpush.bf16.msrb.mxu3 %v7332_v14  ;;  %v5762_v22 = vrot.slane %v5761_v63, 4  ;;  %v7312_v50 = vor.u32 %v7598_v29, %v7309_v40  ;;  %v7623_v57 = vld [vmem:[%s11306_s7 + $0x18] sm:$0xff]  ;;  %v7622_v29 = vld [vmem:[%s11306_s7 + $0x10] sm:$0xff] }
 0x582   : > { %6484 = vmatpush.bf16.msra.mxu1 %v7384_v30  ;;  %v7240_v30 = vor.u32 %v7580_v52, %v7237_v1  ;;  %v5771_v48 = vrot.slane %v5770_v31, 4  ;;  %v7301_v52 = vld [vmem:[%s11304_s5 + $0x148] sm:$0xf0]  ;;  %v7634_v40 = vld [vmem:[%s11306_s7 + $0x70] sm:$0xff] }
 0x583   : > { %v5763_v3 = vmax.f32 %v5761_v63, %v5762_v22  ;;  %v7208_v63 = vor.u32 %v7572_v19, %v7205_v61  ;;  %v7304_v5 = vor.u32 %v7596_v49, %v7301_v52  ;;  %v7277_v22 = vld [vmem:[%s11304_s5 + $0x118] sm:$0xf0]  ;;  %v6066_v19 = vld [vmem:[%s11305_s6] sm:$0x3] }
 0x584   : > { %6460 = vmatpush.bf16.msrb.mxu2 %v7240_v30  ;;  %v5772_v18 = vmax.f32 %v5770_v31, %v5771_v48  ;;  %v7594_v31 = vld [vmem:[%s11304_s5 + $0x134] sm:$0xf]  ;;  %v7293_v30 = vld [vmem:[%s11304_s5 + $0x138] sm:$0xf0]  ;;  %v7632_v61 = vld [vmem:[%s11306_s7 + $0x60] sm:$0xff] }
 0x585   : > { %v5764_v54 = vrot.slane %v5763_v3, 2  ;;  %v7296_v41 = vor.u32 %v7594_v31, %v7293_v30  ;;  %v7628_v30 = vld [vmem:[%s11306_s7 + $0x40] sm:$0xff] }
 0x586   : > { %6485 = vmatpush.bf16.msra.mxu1 %v7376_v51  ;;  %v7221_v51 = vld [vmem:[%s11304_s5 + $0xa8] sm:$0xf0]  ;;  %v5773_v7 = vrot.slane %v5772_v18, 2 }
 0x587   : > { %v7224_v60 = vor.u32 %v7576_v20, %v7221_v51  ;;  %v5765_v14 = vmax.f32 %v5763_v3, %v5764_v54  ;;  %v7625_v3 = vld [vmem:[%s11306_s7 + $0x28] sm:$0xff] }
 0x588   : > { %6461 = vmatpush.bf16.msrb.mxu2 %v7232_v37  ;;  %v5774_v53 = vmax.f32 %v5772_v18, %v5773_v7  ;;  %v7635_v18 = vld [vmem:[%s11306_s7 + $0x78] sm:$0x10]  ;;  %v7633_v54 = vld [vmem:[%s11306_s7 + $0x68] sm:$0xff] }
 0x589   : > { %v5766_v13 = vrot.slane %v5765_v14, 1  ;;  %v7631_v7 = vld [vmem:[%s11306_s7 + $0x58] sm:$0xff] }
 0x58a   : > { %6486 = vmatpush.bf16.msra.mxu1 %v7368_v4  ;;  %v5615_v4 = vmax.f32 %v5613_v36, %v5614_v10  ;;  %v5625_v36 = vrot.slane %v5624_v17, 2  ;;  %v5775_v46 = vrot.slane %v5774_v53, 1  ;;  %v7590_v10 = vld [vmem:[%s11304_s5 + $0x114] sm:$0xf] }
 0x58b   : > { %v5767_v45 = vmax.f32 %v5765_v14, %v5766_v13  ;;  %v7280_v0 = vor.u32 %v7590_v10, %v7277_v22 }
 0x58c   : > { %6462 = vmatpush.bf16.msrb.mxu2 %v7224_v60  ;;  %v5616_v16 = vrot.slane %v5615_v4, 2  ;;  %v5626_v1 = vmax.f32 %v5624_v17, %v5625_v36  ;;  %v5776_v59 = vmax.f32 %v5774_v53, %v5775_v46  ;;  %v7455_v17 = vld [vmem:[%s11306_s7 + $0x78] sm:$0xf]  ;;  %v6068_v36 = vperm.slane %v6066_v19, 0 }
 0x58d   : > { %v7456_v26 = vor.u32 %v7635_v18, %v7455_v17  ;;  %v6069_v46 = vperm.slane %v6066_v19, 1 }
 0x58e   : > { %6487 = vmatpush.bf16.msra.mxu1 %v7360_v32  ;;  %v5617_v2 = vmax.f32 %v5615_v4, %v5616_v16  ;;  %v5627_v42 = vrot.slane %v5626_v1, 1  ;;  %v7592_v32 = vld [vmem:[%s11304_s5 + $0x124] sm:$0xf]  ;;  %v7621_v16 = vld [vmem:[%s11306_s7 + $0x8] sm:$0xff] }
 0x58f   : > { %v7288_v62 = vor.u32 %v7592_v32, %v7285_v9 }
 0x590   : > { %6463 = vmatpush.bf16.msrb.mxu2 %v7216_v12  ;;  %v5618_v47 = vrot.slane %v5617_v2, 1  ;;  %v5628_v37 = vmax.f32 %v5626_v1, %v5627_v42  ;;  %v7629_v1 = vld [vmem:[%s11306_s7 + $0x48] sm:$0xff] }
 0x591   : > { %v5890_v23 = vpop.permute.xlu1 %5889 }
 0x592   : > { %v5994_v38 = vsel %vm11851_vm1, %v5872_v25, %v5890_v23  ;;  %6488 = vmatpush.bf16.msra.mxu1 %v7352_v43  ;;  %v5619_v11 = vmax.f32 %v5617_v2, %v5618_v47  ;;  %v5973_v43 = vsel %vm5869_vm4, %v5767_v45, %v11089_v6  ;;  %v7588_v6 = vld [vmem:[%s11304_s5 + $0x104] sm:$0xf] }
 0x593   : > { %v5998_v55 = vpack.c.bf16 %v5994_v38, %v5994_v38  ;;  %v5974_v25 = vsel %vm5871_vm8, %v5776_v59, %v5973_v43 }
 0x594   : > { %6464 = vmatpush.bf16.msrb.mxu2 %v7208_v63  ;;  %v5939_v23 = vsel %vm5869_vm4, %v5619_v11, %v11121_v24  ;;  %v7269_v24 = vld [vmem:[%s11304_s5 + $0x108] sm:$0xf0]  ;;  %vm11854_vm4 = vcmask 1044480   ;;  %v7630_v63 = vld [vmem:[%s11306_s7 + $0x50] sm:$0xff] }
 0x595   : > { %6400 = vmatmul.bf16.vlgmr.msra.gmra.mxu3 %v5998_v55  ;;  %6452 = vmatmul.bf16.vlgmr.msrb.gmra.mxu1 %v5998_v55  ;;  %v5940_v15 = vsel %vm5871_vm8, %v5628_v37, %v5939_v23  ;;  %v7272_v55 = vor.u32 %v7588_v6, %v7269_v24  ;;  %vm6631_vm8 = vcmask 998400  }
 0x596   : > { %6470 = vmatpush.bf16.msra.mxu3 %v7328_v28  ;;  %6489 = vmatpush.bf16.msra.mxu1 %v7344_v27 }
 0x59a   : > { %6471 = vmatpush.bf16.msra.mxu3 %v7320_v39  ;;  %6490 = vmatpush.bf16.msra.mxu1 %v7336_v34  ;;  %v6636_v39 = vsel %vm11854_vm4, %v7456_v26, 0  ;;  %v7620_v34 = vld [vmem:[%s11306_s7] sm:$0xff] }
 0x59e   : > { %6472 = vmatpush.bf16.msra.mxu3 %v7312_v50 }
 0x5a2   : > { %6473 = vmatpush.bf16.msra.mxu3 %v7304_v5 }
 0x5a5   : > { %v7934_v21 = vpop.permute.xlu0 %7933 }
 0x5a6   : > { %6474 = vmatpush.bf16.msra.mxu3 %v7296_v41  ;;  %v7936_v20 = vunpack.i.h.bf16 %v7934_v21  ;;  %v7935_v51 = vunpack.i.l.bf16 %v7934_v21 }
 0x5a8   : > { %v5997_v48 = vsel %vm11852_vm6, %v5974_v25, %v7936_v20  ;;  %v5996_v35 = vsel %vm11853_vm13, %v5940_v15, %v7935_v51  ;;  %v7939_v51 = vld [vmem:[#allocation2] ss:$0 sm:$0xff] }
 0x5a9   : > { %v6001_v38 = vpack.c.bf16 %v5997_v48, %v5997_v48  ;;  %v6000_v28 = vpack.c.bf16 %v5996_v35, %v5996_v35 }
 0x5aa   : > { %6475 = vmatpush.bf16.msra.mxu3 %v7288_v62 }
 0x5ab   : > { %6426 = vmatmul.bf16.vlgmr.msra.gmra.mxu2 %v6000_v28  ;;  %6439 = vmatmul.bf16.vlgmr.msrb.gmra.mxu3 %v6001_v38 }
 0x5ac   : > { %6491 = vmatmul.bf16.vlgmr.msra.gmra.mxu1 %v6001_v38  ;;  %6638 = vmatpush.bf16.msra.mxu2 %v7627_v33 }
 0x5ae   : > { %6476 = vmatpush.bf16.msra.mxu3 %v7280_v0 }
 0x5b0   : > { %6639 = vmatpush.bf16.msra.mxu2 %v7626_v8 }
 0x5b2   : > { %6477 = vmatpush.bf16.msra.mxu3 %v7272_v55 }
 0x5b4   : > { %6640 = vmatpush.bf16.msra.mxu2 %v7625_v3 }
 0x5b6   : > { %6651 = vmatpush.bf16.msrb.mxu3 %v6636_v39 }
 0x5ba   : > { %6652 = vmatpush.bf16.msrb.mxu3 %v7634_v40 }
 0x5bb   : > { %6465 = vmatmul.bf16.vlgmr.msrb.gmra.mxu2 %v11061_v44  ;;  %6478 = vmatmul.bf16.vlgmr.msra.gmra.mxu3 %v6000_v28  ;;  %v7624_v44 = vld [vmem:[%s11306_s7 + $0x20] sm:$0xff] }
 0x5bc   : > { %6641 = vmatpush.bf16.msra.mxu2 %v7624_v44 }
 0x5be   : > { %6653 = vmatpush.bf16.msrb.mxu3 %v7633_v54 }
 0x5c0   : > { %6642 = vmatpush.bf16.msra.mxu2 %v7623_v57 }
 0x5c2   : > { %6654 = vmatpush.bf16.msrb.mxu3 %v7632_v61 }
 0x5c4   : > { %6643 = vmatpush.bf16.msra.mxu2 %v7622_v29 }
 0x5c6   : > { %6655 = vmatpush.bf16.msrb.mxu3 %v7631_v7 }
 0x5c8   : > { %6644 = vmatpush.bf16.msra.mxu2 %v7621_v16 }
 0x5ca   : > { %6656 = vmatpush.bf16.msrb.mxu3 %v7630_v63 }
 0x5cc   : > { %6645 = vmatpush.bf16.msra.mxu2 %v7620_v34 }
 0x5ce   : > { %6657 = vmatpush.bf16.msrb.mxu3 %v7629_v1 }
 0x5d2   : > { %6658 = vmatpush.bf16.msrb.mxu3 %v7628_v30 }
 0x5fa   : > { %v6414_v60 = vpop.f32.mrf.mxu1 }
 0x602   : > { %v6416_v4 = vpop.f32.mrf.mxu1 }
 0x612   : > { %v6453_v27 = vpop.f32.mrf.mxu1 }
 0x613   : > { %v6454_v32 = vadd.f32 %v6453_v27, %v6069_v46 }
 0x618   : > { %v6401_v56 = vpop.f32.mrf.mxu3 }
 0x619   : > { %v6402_v50 = vadd.f32 %v6401_v56, %v6068_v36 }
 0x61a   : > { %v6455_v58 = vpop.f32.mrf.mxu1 }
 0x61b   : > { %v6415_v52 = vadd.f32 %v6414_v60, %v6402_v50 }
 0x620   : > { %v6403_v12 = vpop.f32.mrf.mxu3 }
 0x629   : > { %v6492_v49 = vpop.f32.mrf.mxu1 }
 0x62e   : > { %v6427_v2 = vpop.f32.mrf.mxu2  ;;  %v6440_v14 = vpop.f32.mrf.mxu3 }
 0x62f   : > { %v6428_v53 = vadd.f32 %v6427_v2, %v6415_v52 }
 0x631   : > { %v6441_v5 = vadd.f32 %v6440_v14, %v6428_v53  ;;  %v6494_v31 = vpop.f32.mrf.mxu1 }
 0x633   : > { %7940 = vtanh.f32 %v6441_v5 }
 0x636   : > { %v6429_v47 = vpop.f32.mrf.mxu2  ;;  %v6442_v13 = vpop.f32.mrf.mxu3 }
 0x639   : > { %v7941_v42 = vpop.eup %7940 }
 0x63a   : > { %v6498_v41 = vpack.c.bf16 %v7941_v42, %v7941_v42 }
 0x63c   : > { %6646 = vmatmul.bf16.vlgmr.msra.gmra.mxu2 %v6498_v41 }
 0x63e   : > { %v6466_v9 = vpop.f32.mrf.mxu2  ;;  %v6479_v11 = vpop.f32.mrf.mxu3 }
 0x63f   : > { %v6467_v45 = vadd.f32 %v6466_v9, %v6454_v32 }
 0x641   : > { %v6480_v37 = vadd.f32 %v6479_v11, %v6467_v45 }
 0x643   : > { %v6493_v59 = vadd.f32 %v6492_v49, %v6480_v37 }
 0x645   : > { %7942 = vtanh.f32 %v6493_v59 }
 0x646   : > { %v6468_v62 = vpop.f32.mrf.mxu2  ;;  %v6481_v21 = vpop.f32.mrf.mxu3 }
 0x64b   : > { %v7943_v10 = vpop.eup %7942 }
 0x64c   : > { %v6499_v22 = vpack.c.bf16 %v7943_v10, %v7943_v10 }
 0x64e   : > { %7457 = vmatmul.msk.bf16.vlgmr.msrb.gmra.mxu3 %vm6631_vm8, %v6499_v22 }
 0x6bf   : > { %v6647_v43 = vpop.f32.mrf.mxu2 }
 0x6c0   : > { %v6648_v23 = vadd.f32 %v7939_v51, %v6647_v43 }
 0x6c7   : > { %v6649_v20 = vpop.f32.mrf.mxu2 }
 0x6d1   : > { %v6660_v25 = vpop.f32.mrf.mxu3 }
 0x6d2   : > { %v6661_v15 = vadd.f32 %v6660_v25, %v6648_v23 }
 0x6d4   : > { %v6664_v48 = vsub.f32 0.0, %v6661_v15 }
 0x6d6   : > { %v6665_v35 = vmul.f32 1.442695, %v6664_v48 }
 0x6d8   : > { %7944 = vpow2.f32 %v6665_v35 }
 0x6d9   : > { %v6662_v0 = vpop.f32.mrf.mxu3 }
 0x6de   : > { %v7945_v38 = vpop.eup %7944 }
 0x6df   : > { %v6667_v28 = vadd.f32 1.0, %v7945_v38 }
 0x6e1   : > { %7946 = vrcp.f32 %v6667_v28  ;;  %v6679_v33 = vand.u32 2147483648, %v6667_v28  ;;  %v6677_v60 = vand.u32 2147483647, %v6667_v28  ;;  %vm6673_vm2 = vweird.f32 %v6667_v28 }
 0x6e3   : > { %v6680_v3 = vor.u32 1.1754944e-38, %v6679_v33  ;;  %vm6678_vm12 = vcmp.eq.f32.partialorder %v6677_v60, 8.507059e+37 }
 0x6e7   : > { %v7947_v6 = vpop.eup %7946 }
 0x6e8   : > { %v6669_v24 = vmul.f32 %v7947_v6, %v6667_v28  ;;  %vm6674_vm9 = vweird.f32 %v7947_v6 }
 0x6e9   : > { %vm6675_vm10 = vmor %vm6673_vm2, %vm6674_vm9 }
 0x6ea   : > { %v6670_v55 = vsub.f32 1.0, %v6669_v24 }
 0x6ec   : > { %v6671_v8 = vmul.f32 %v7947_v6, %v6670_v55 }
 0x6ee   : > { %v6672_v4 = vadd.f32 %v7947_v6, %v6671_v8 }
 0x6f0   : > { %v6676_v27 = vsel %vm6675_vm10, %v7947_v6, %v6672_v4 }
 0x6f1   : > { %v6681_v44 = vsel %vm6678_vm12, %v6680_v3, %v6676_v27 }
 0x6f2   : > { %6684 = vst.msk [vmem:[%s334_s20] sm:$0xff] %vm6683_vm14, %v6681_v44 }
 0x6f3 PF: > { %s21_s11 = sadd.s32 1, %s7960_s11  }
 0x6f4   : > { %p18_p5 = scmp.ge.s32.totalorder %s21_s11, 4  }
 0x6f6   :  { %20 = sbr.rel (!%p18_p5) target bundleno = 3 (0x3), region = 86 }

</bundles_post_ra>
